<compile_context>
chip_gen: v6e
topology: v6e:2x2x1
jax: 0.10.0
libtpu: 0.0.40
codegen_flags: <defaults>
</compile_context>

<pallas_src>
import functools
import math

import jax
import jax.numpy as jnp
from jax.experimental import pallas as pl
from jax.experimental.pallas import tpu as pltpu

LANE = 128
BIG = 1e30
N_NEIGHBOURS = (16, 128, 16, 256)   # k per GravNetBlock (from the module)

D_SHAPE = 6                         # block feature width
SPACE = 3                           # spatial dimensions
PROP = 2 * D_SHAPE                  # propagate_dimensions = 12
OUT_CH = 2 * PROP                   # GravNetConv out_channels = 24
SW = 8                              # padded width of spatial coords
HW = 16                             # padded width of propagate features
FW = 8                              # padded width of block activations
CW = 32                             # padded width of conv linear output


def round_up(n, m):
    return ((n + m - 1) // m) * m


def pad2(a, rows, cols):
    return jnp.pad(a.astype(jnp.float32),
                   ((0, rows - a.shape[0]), (0, cols - a.shape[1])))


def fit_rows(a, rows):
    r = a.shape[0]
    if r == rows:
        return a
    if r > rows:
        return a[:rows]
    return jnp.pad(a, ((0, rows - r), (0, 0)))


def _elu(y):
    return jnp.where(y > 0.0, y, jnp.exp(jnp.minimum(y, 0.0)) - 1.0)


def _cparams(dims, vmem_limit=None):
    kw = dict(dimension_semantics=dims)
    if vmem_limit is not None:
        kw["vmem_limit_bytes"] = int(vmem_limit)
    return pltpu.CompilerParams(**kw)


def pick_tile(n, nc):
    """Row tile: big enough for pipelining, small enough that the O(tr*nc)
    temporaries fit scoped VMEM on v5e/v6e/v7x, and >=2 grid steps when
    possible (v7x megacore)."""
    budget = 512 * 1024                          # target tr*nc elements
    if nc <= 1024:
        tr = 512
    elif nc <= 8192:
        tr = max(32, (budget // nc) // 32 * 32)
    else:
        tr = max(8, (budget // nc) // 8 * 8)
    half = round_up(max(1, -(-n // 2)), 8)       # ceil(n/2) rounded to 8
    return max(8, min(tr, half))


# ---------------------------------------------------------------------------
# Kernel 1: packed lin_s / lin_h matmul -> narrow s (TR,8) and h (TR,16) slabs
# ---------------------------------------------------------------------------
def _sh_kernel(x_ref, ws_ref, bs_ref, wh_ref, bh_ref, s_ref, h_ref):
    x = x_ref[...]
    s_ref[...] = jnp.dot(x, ws_ref[...],
                         preferred_element_type=jnp.float32) + bs_ref[...]
    h_ref[...] = jnp.dot(x, wh_ref[...],
                         preferred_element_type=jnp.float32) + bh_ref[...]


def sh_forward(x_slab, ws, bs, wh, bh, tr):
    npad, xw = x_slab.shape
    wS = pad2(jnp.transpose(ws), xw, SW)
    bS = pad2(bs.reshape(1, -1), 1, SW)
    wH = pad2(jnp.transpose(wh), xw, HW)
    bH = pad2(bh.reshape(1, -1), 1, HW)
    return pl.pallas_call(
        _sh_kernel,
        out_shape=(jax.ShapeDtypeStruct((npad, SW), jnp.float32),
                   jax.ShapeDtypeStruct((npad, HW), jnp.float32)),
        grid=(npad // tr,),
        in_specs=[
            pl.BlockSpec((tr, xw), lambda i: (i, 0)),
            pl.BlockSpec((xw, SW), lambda i: (0, 0)),
            pl.BlockSpec((1, SW), lambda i: (0, 0)),
            pl.BlockSpec((xw, HW), lambda i: (0, 0)),
            pl.BlockSpec((1, HW), lambda i: (0, 0)),
        ],
        out_specs=[pl.BlockSpec((tr, SW), lambda i: (i, 0)),
                   pl.BlockSpec((tr, HW), lambda i: (i, 0))],
        compiler_params=_cparams(("parallel",)),
    )(x_slab, wS, bS, wH, bH)


# ---------------------------------------------------------------------------
# Kernel 2: GravNetConv (kNN + weighted mean/max aggregation) fused with the
#           conv output linear and post1/post2 (+ELU), row-tiled over queries.
# ---------------------------------------------------------------------------
def _gravnet_conv_kernel(kcap_ref, x_ref, s_ref, sT_ref, hm_ref, hT_ref,
                         bq_ref, bn_ref, wx_ref, wm_ref, wmx_ref, bc_ref,
                         w1c_ref, w1s_ref, b1_ref, w2_ref, b2_ref,
                         o_ref, work_scr, *, k, dyn_k, prop):
    f32 = jnp.float32
    tq = s_ref.shape[0]
    nc = sT_ref.shape[1]

    s = s_ref[...]                     # (tq, 8)  query spatial coords
    sT = sT_ref[...]                   # (8, nc)  candidate coords (transposed)
    bq = bq_ref[...]                   # (tq, 1)  query batch ids
    bn = bn_ref[...]                   # (1, nc)  candidate batch ids

    # pairwise squared distances; cross-graph / padding pairs -> BIG
    sq_col = jnp.sum(s * s, axis=1, keepdims=True)
    sq_row = jnp.sum(sT * sT, axis=0, keepdims=True)
    cross = jnp.dot(s, sT, preferred_element_type=f32)
    d2 = jnp.maximum(sq_col + sq_row - 2.0 * cross, 0.0)
    d2 = jnp.where((bq == bn) & (bq >= 0), d2, BIG)          # (tq, nc)

    iota = jax.lax.broadcasted_iota(jnp.int32, (1, nc), 1).astype(f32)

    # iterative kNN: `work` scratch is updated in place (selected -> 2*BIG),
    # neighbour count is a small (tq,1) loop carry.
    work_scr[...] = d2

    def body(_, cnt):
        work = work_scr[...]
        dmin = jnp.min(work, axis=1, keepdims=True)
        valid = dmin < (0.5 * BIG)
        sel = jnp.min(jnp.where(work <= dmin, iota, float(nc)),
                      axis=1, keepdims=True)                 # lowest-idx argmin
        upd = (iota == sel) & valid
        work_scr[...] = jnp.where(upd, 2.0 * BIG, work)
        return cnt + valid.astype(f32)

    cnt0 = jnp.zeros((tq, 1), f32)
    if dyn_k:
        cnt = jax.lax.fori_loop(0, kcap_ref[0], body, cnt0)
    else:
        cnt = jax.lax.fori_loop(0, k, body, cnt0)            # static trip count

    # selection mask / weights recovered from the in-place scratch
    S = work_scr[...] > (1.5 * BIG)
    W = jnp.where(S, jnp.exp(-10.0 * d2), 0.0)               # (tq, nc) f32
    inv_cnt = 1.0 / jnp.maximum(cnt, 1.0)
    has = cnt > 0.0

    # mean: one bf16 MXU matmul (f32 accumulate)
    mean_agg = jnp.dot(W.astype(jnp.bfloat16), hm_ref[...],
                       preferred_element_type=f32) * inv_cnt  # (tq, 16)

    # max: per real feature, fill mask hoisted out of the loop
    fill = jnp.where(S, 0.0, -BIG)
    lane = jax.lax.broadcasted_iota(jnp.int32, (tq, HW), 1)
    max_agg = jnp.zeros((tq, HW), f32)
    for p in range(prop):                                     # prop == 12
        mp = jnp.max(W * hT_ref[p:p + 1, :] + fill, axis=1, keepdims=True)
        mp = jnp.where(has, mp, 0.0)
        max_agg = jnp.where(lane == p, mp, max_agg)

    # fused: conv output linear on cat([x, mean, max]) + post1(+s_l) + post2
    y = (jnp.dot(x_ref[...], wx_ref[...], preferred_element_type=f32)
         + jnp.dot(mean_agg, wm_ref[...], preferred_element_type=f32)
         + jnp.dot(max_agg, wmx_ref[...], preferred_element_type=f32)
         + bc_ref[...])                                       # (tq, 32)
    y = _elu(jnp.dot(y, w1c_ref[...], preferred_element_type=f32)
             + jnp.dot(s, w1s_ref[...], preferred_element_type=f32)
             + b1_ref[...])                                   # post1 + ELU
    y = _elu(jnp.dot(y, w2_ref[...], preferred_element_type=f32)
             + b2_ref[...])                                   # post2 + ELU
    o_ref[...] = y                                            # (tq, 8)


def gravnet_conv_post(x_slab, s_slab, h_slab, bq_col, bn_row, kcap, k,
                      lin_w, lin_b, w1, b1, w2, b2, fold_w, nc, tr):
    npad, xw = x_slab.shape
    f32 = jnp.float32
    dyn_k = k > 32

    # candidate-side arrays at their real feature widths (narrow / lane-dense)
    sT = jnp.transpose(fit_rows(s_slab, nc))                  # (8, nc) f32
    h_nc = fit_rows(h_slab, nc)
    hm = h_nc.astype(jnp.bfloat16)                            # (nc, 16) bf16
    hT = jnp.transpose(h_nc)                                  # (16, nc) f32

    # split the conv linear over its concatenated input [x | mean | max]
    wt = jnp.transpose(lin_w)                                 # (30, 24)
    wxp = wt[:D_SHAPE]
    if fold_w is not None:                                    # fold input(9->6)
        wxp = jnp.transpose(fold_w) @ wxp
    wx = pad2(wxp, xw, CW)
    wm = pad2(wt[D_SHAPE:D_SHAPE + PROP], HW, CW)
    wmx = pad2(wt[D_SHAPE + PROP:], HW, CW)
    bc = pad2(lin_b.reshape(1, -1), 1, CW)

    # post1 split over [conv_out | s_l], post2 fused as well
    w1t = jnp.transpose(w1)                                   # (27, 6)
    w1c = pad2(w1t[:OUT_CH], CW, FW)
    w1s = pad2(w1t[OUT_CH:], SW, FW)
    b1p = pad2(b1.reshape(1, -1), 1, FW)
    w2p = pad2(jnp.transpose(w2), FW, FW)
    b2p = pad2(b2.reshape(1, -1), 1, FW)

    out = pl.pallas_call(
        functools.partial(_gravnet_conv_kernel, k=k, dyn_k=dyn_k, prop=PROP),
        out_shape=jax.ShapeDtypeStruct((npad, FW), f32),
        grid_spec=pltpu.PrefetchScalarGridSpec(
            num_scalar_prefetch=1,
            grid=(npad // tr,),
            in_specs=[
                pl.BlockSpec((tr, xw), lambda i, kc: (i, 0)),   # x
                pl.BlockSpec((tr, SW), lambda i, kc: (i, 0)),   # s (queries)
                pl.BlockSpec((SW, nc), lambda i, kc: (0, 0)),   # sT (resident)
                pl.BlockSpec((nc, HW), lambda i, kc: (0, 0)),   # h   (bf16)
                pl.BlockSpec((HW, nc), lambda i, kc: (0, 0)),   # hT
                pl.BlockSpec((tr, 1), lambda i, kc: (i, 0)),    # batch (query)
                pl.BlockSpec((1, nc), lambda i, kc: (0, 0)),    # batch (cand)
                pl.BlockSpec((xw, CW), lambda i, kc: (0, 0)),   # W_x
                pl.BlockSpec((HW, CW), lambda i, kc: (0, 0)),   # W_mean
                pl.BlockSpec((HW, CW), lambda i, kc: (0, 0)),   # W_max
                pl.BlockSpec((1, CW), lambda i, kc: (0, 0)),    # b_conv
                pl.BlockSpec((CW, FW), lambda i, kc: (0, 0)),   # W_post1(conv)
                pl.BlockSpec((SW, FW), lambda i, kc: (0, 0)),   # W_post1(s)
                pl.BlockSpec((1, FW), lambda i, kc: (0, 0)),    # b_post1
                pl.BlockSpec((FW, FW), lambda i, kc: (0, 0)),   # W_post2
                pl.BlockSpec((1, FW), lambda i, kc: (0, 0)),    # b_post2
            ],
            out_specs=pl.BlockSpec((tr, FW), lambda i, kc: (i, 0)),
            scratch_shapes=[pltpu.VMEM((tr, nc), f32)],
        ),
        compiler_params=_cparams(("parallel",), vmem_limit=48 * 1024 * 1024),
    )(kcap, x_slab, s_slab, sT, hm, hT, bq_col, bn_row,
      wx, wm, wmx, bc, w1c, w1s, b1p, w2p, b2p)
    # TODO(synk): for very large graphs the resident candidate arrays would
    # also need tiling (two-level kNN); not required at these sizes.
    return out


# ---------------------------------------------------------------------------
# Kernels 3+4: global_exchange as a tiled per-graph reduction + a tiled apply
#              pass fused with the block output Linear(24->6)+ELU.
# ---------------------------------------------------------------------------
def _gex_stats_kernel(x_ref, bq_ref, stats_ref, *, num_graphs, gp):
    f32 = jnp.float32

    @pl.when(pl.program_id(0) == 0)
    def _():
        stats_ref[0] = jnp.zeros((gp, FW), f32)
        stats_ref[1] = jnp.full((gp, FW), BIG, f32)
        stats_ref[2] = jnp.full((gp, FW), -BIG, f32)
        stats_ref[3] = jnp.zeros((gp, FW), f32)

    x = x_ref[...]
    bq = bq_ref[...]
    ones = jnp.ones_like(x)
    row = jax.lax.broadcasted_iota(jnp.int32, (gp, FW), 0)

    sum_t = jnp.zeros((gp, FW), f32)
    min_t = jnp.full((gp, FW), BIG, f32)
    max_t = jnp.full((gp, FW), -BIG, f32)
    cnt_t = jnp.zeros((gp, FW), f32)
    for g in range(num_graphs):
        m = bq == g
        mf = m.astype(f32)
        s_g = jnp.sum(mf * x, axis=0, keepdims=True)
        mn_g = jnp.min(jnp.where(m, x, BIG), axis=0, keepdims=True)
        mx_g = jnp.max(jnp.where(m, x, -BIG), axis=0, keepdims=True)
        c_g = jnp.sum(mf * ones, axis=0, keepdims=True)
        sel = row == g
        sum_t = jnp.where(sel, s_g, sum_t)
        min_t = jnp.where(sel, mn_g, min_t)
        max_t = jnp.where(sel, mx_g, max_t)
        cnt_t = jnp.where(sel, c_g, cnt_t)

    stats_ref[0] = stats_ref[0] + sum_t
    stats_ref[1] = jnp.minimum(stats_ref[1], min_t)
    stats_ref[2] = jnp.maximum(stats_ref[2], max_t)
    stats_ref[3] = stats_ref[3] + cnt_t


def _gex_apply_kernel(x_ref, bq_ref, stats_ref, w4_ref, b_ref, o_ref, *, gp):
    f32 = jnp.float32
    x = x_ref[...]
    onehot = (bq_ref[...] ==
              jax.lax.broadcasted_iota(jnp.int32, (1, gp), 1)).astype(f32)
    cnt = jnp.maximum(stats_ref[3], 1.0)
    mean_o = jnp.dot(onehot, stats_ref[0] / cnt, preferred_element_type=f32)
    min_o = jnp.dot(onehot, stats_ref[1], preferred_element_type=f32)
    max_o = jnp.dot(onehot, stats_ref[2], preferred_element_type=f32)
    # TODO(synk): global_exchange() source not given; concat order assumed
    # to be [mean, min, max, x] as in the common implementation.
    y = (jnp.dot(mean_o, w4_ref[0], preferred_element_type=f32)
         + jnp.dot(min_o, w4_ref[1], preferred_element_type=f32)
         + jnp.dot(max_o, w4_ref[2], preferred_element_type=f32)
         + jnp.dot(x, w4_ref[3], preferred_element_type=f32)
         + b_ref[...])
    o_ref[...] = _elu(y)


def global_exchange_out(x_slab, bq_col, num_graphs, w, b, tr):
    npad = x_slab.shape[0]
    gp = max(8, round_up(num_graphs, 8))
    f32 = jnp.float32

    stats = pl.pallas_call(
        functools.partial(_gex_stats_kernel, num_graphs=num_graphs, gp=gp),
        out_shape=jax.ShapeDtypeStruct((4, gp, FW), f32),
        grid=(npad // tr,),
        in_specs=[pl.BlockSpec((tr, FW), lambda i: (i, 0)),
                  pl.BlockSpec((tr, 1), lambda i: (i, 0))],
        out_specs=pl.BlockSpec((4, gp, FW), lambda i: (0, 0, 0)),
        compiler_params=_cparams(("arbitrary",)),
    )(x_slab, bq_col)

    wt = jnp.transpose(w)                                     # (24, 6)
    w4 = jnp.stack([pad2(wt[g * D_SHAPE:(g + 1) * D_SHAPE], FW, FW)
                    for g in range(4)])                       # (4, 8, 8)
    b4 = pad2(b.reshape(1, -1), 1, FW)

    return pl.pallas_call(
        functools.partial(_gex_apply_kernel, gp=gp),
        out_shape=jax.ShapeDtypeStruct((npad, FW), f32),
        grid=(npad // tr,),
        in_specs=[pl.BlockSpec((tr, FW), lambda i: (i, 0)),
                  pl.BlockSpec((tr, 1), lambda i: (i, 0)),
                  pl.BlockSpec((4, gp, FW), lambda i: (0, 0, 0)),
                  pl.BlockSpec((4, FW, FW), lambda i: (0, 0, 0)),
                  pl.BlockSpec((1, FW), lambda i: (0, 0))],
        out_specs=pl.BlockSpec((tr, FW), lambda i: (i, 0)),
        compiler_params=_cparams(("parallel",)),
    )(x_slab, bq_col, stats, w4, b4)


# ---------------------------------------------------------------------------
# Kernel 5: tail.  First postgn layer split over the 4 block-output slabs,
#           then the whole dense chain (postgn ELUs, output MLP, heads)
#           resident in VMEM.
# ---------------------------------------------------------------------------
def _tail_kernel(x1_ref, x2_ref, x3_ref, x4_ref, w0_ref, b0_ref, w_ref, b_ref,
                 o_ref, *, acts):
    f32 = jnp.float32
    y = (jnp.dot(x1_ref[...], w0_ref[0], preferred_element_type=f32)
         + jnp.dot(x2_ref[...], w0_ref[1], preferred_element_type=f32)
         + jnp.dot(x3_ref[...], w0_ref[2], preferred_element_type=f32)
         + jnp.dot(x4_ref[...], w0_ref[3], preferred_element_type=f32)
         + b0_ref[...])
    y = _elu(y)
    for l, act in enumerate(acts):
        y = jnp.dot(y, w_ref[l], preferred_element_type=f32) + b_ref[l]
        if act == "elu":
            y = _elu(y)
    o_ref[...] = y


def tail_forward(block_slabs, params, tr):
    npad = block_slabs[0].shape[0]
    f32 = jnp.float32

    w0, b0 = params["postgn"][0]                              # (6, 24)
    w0t = jnp.transpose(w0)                                   # (24, 6)
    w0s = jnp.stack([pad2(w0t[g * D_SHAPE:(g + 1) * D_SHAPE], FW, LANE)
                     for g in range(4)])                      # (4, 8, 128)
    b0p = pad2(b0.reshape(1, -1), 1, LANE)

    wcl, bcl = params["clustering"]
    wbe, bbe = params["beta"]
    head = (jnp.concatenate([wcl, wbe], axis=0),
            jnp.concatenate([bcl, bbe], axis=0))
    layers = list(params["postgn"][1:]) + [params["out1"], params["out2"],
                                           params["out3"], head]
    acts = ("elu", "elu", "elu", "elu", "elu", None, None)
    ws = jnp.stack([pad2(jnp.transpose(wl), LANE, LANE) for (wl, _) in layers])
    bs = jnp.stack([pad2(bl.reshape(1, -1), 1, LANE) for (_, bl) in layers])
    L = len(layers)

    return pl.pallas_call(
        functools.partial(_tail_kernel, acts=acts),
        out_shape=jax.ShapeDtypeStruct((npad, LANE), f32),
        grid=(npad // tr,),
        in_specs=[pl.BlockSpec((tr, FW), lambda i: (i, 0))] * 4 + [
            pl.BlockSpec((4, FW, LANE), lambda i: (0, 0, 0)),
            pl.BlockSpec((1, LANE), lambda i: (0, 0)),
            pl.BlockSpec((L, LANE, LANE), lambda i: (0, 0, 0)),
            pl.BlockSpec((L, 1, LANE), lambda i: (0, 0, 0)),
        ],
        out_specs=pl.BlockSpec((tr, LANE), lambda i: (i, 0)),
        compiler_params=_cparams(("parallel",)),
    )(*block_slabs, w0s, b0p, ws, bs)


# ---------------------------------------------------------------------------
# Parameter initialization (deterministic, torch-nn.Linear-style uniform init)
# ---------------------------------------------------------------------------
def _linear_params(key, fout, fin, bias=True):
    kw, kb = jax.random.split(key)
    bound = 1.0 / math.sqrt(fin)
    w = jax.random.uniform(kw, (fout, fin), jnp.float32, -bound, bound)
    b = jax.random.uniform(kb, (fout,), jnp.float32, -bound, bound) if bias else None
    return w, b


def init_params(key, input_dim=9, d_shape=6, output_dim=31, n_blocks=4, n_postgn=4):
    keys = jax.random.split(key, 64)
    ki = iter(keys)
    params = {}
    # self.input = Linear(9, 6, bias=False); weight copied from eye(6, 9)
    params["input_w"] = jnp.eye(d_shape, input_dim, dtype=jnp.float32)
    prop = 2 * d_shape
    out_ch = 2 * prop
    blocks = []
    for _ in range(n_blocks):
        blocks.append({
            "lin_s": _linear_params(next(ki), SPACE, d_shape),
            "lin_h": _linear_params(next(ki), prop, d_shape),
            "lin":   _linear_params(next(ki), out_ch, d_shape + 2 * prop),
            "post1": _linear_params(next(ki), d_shape, out_ch + SPACE),
            "post2": _linear_params(next(ki), d_shape, d_shape),
            "out":   _linear_params(next(ki), d_shape, 4 * d_shape),
        })
    params["blocks"] = blocks
    postgn = []
    for i in range(n_postgn):
        fin = 4 * d_shape if i == 0 else d_shape
        postgn.append(_linear_params(next(ki), d_shape, fin))
    params["postgn"] = postgn
    params["out1"] = _linear_params(next(ki), 64, d_shape)
    params["out2"] = _linear_params(next(ki), 64, 64)
    params["out3"] = _linear_params(next(ki), 64, 64)
    params["clustering"] = _linear_params(next(ki), output_dim - 1, 64)
    params["beta"] = _linear_params(next(ki), 1, 64)
    return params


# ---------------------------------------------------------------------------
# Forward pass (glue in plain JAX, compute in Pallas kernels)
# ---------------------------------------------------------------------------
def gravnet_block_forward(x_slab, bq_col, bn_row, kcap, k, num_graphs, p,
                          fold_w, nc, tr):
    ws, bs_ = p["lin_s"]
    wh, bh = p["lin_h"]
    if fold_w is not None:                    # fold the input Linear (no bias)
        ws = ws @ fold_w
        wh = wh @ fold_w
    s_slab, h_slab = sh_forward(x_slab, ws, bs_, wh, bh, tr)
    lin_w, lin_b = p["lin"]
    w1, b1 = p["post1"]
    w2, b2 = p["post2"]
    y = gravnet_conv_post(x_slab, s_slab, h_slab, bq_col, bn_row, kcap, k,
                          lin_w, lin_b, w1, b1, w2, b2, fold_w, nc, tr)
    wout, bout = p["out"]
    return global_exchange_out(y, bq_col, num_graphs, wout, bout, tr)


def gravnet_model_forward(x, batch, params, num_graphs):
    n = x.shape[0]
    f32 = jnp.float32
    nc = round_up(n, 128)                     # candidate axis (lane-dense)
    tr = pick_tile(n, nc)                     # shared row tile
    npad = round_up(n, tr)

    batch = batch.astype(jnp.int32)
    counts = jnp.zeros((num_graphs,), jnp.int32).at[batch].add(1)
    max_nodes = jnp.max(counts)

    bq_col = jnp.pad(batch, (0, npad - n), constant_values=-1).reshape(npad, 1)
    bn_row = jnp.pad(batch, (0, nc - n), constant_values=-1).reshape(1, nc)

    # raw input slab (9 real features, padded to 16 lanes); the input Linear
    # (eye(6,9), no bias) is folded into block 0's weights.
    x_slab = pad2(x.astype(f32), npad, 16)

    h = x_slab
    fold_w = params["input_w"]
    block_outs = []
    for i, k in enumerate(N_NEIGHBOURS):
        kcap = jnp.minimum(jnp.asarray(k, jnp.int32), max_nodes).reshape(1)
        h = gravnet_block_forward(h, bq_col, bn_row, kcap, k, num_graphs,
                                  params["blocks"][i], fold_w, nc, tr)
        fold_w = None
        block_outs.append(h)

    out = tail_forward(block_outs, params, tr)          # (npad, 128)
    out_dim = params["clustering"][0].shape[0] + 1
    return out[:n, :out_dim]


# TODO(synk): the DGL graph / edge-index object returned by GravNetConv is not
# materialized (only used for optional graph returns, not for the output tensor).

if __name__ == "__main__":
    key = jax.random.PRNGKey(0)
    kx, kp = jax.random.split(key)
    nodes_per_graph = (12, 12)            # two graphs in the batch
    num_graphs = len(nodes_per_graph)
    n = sum(nodes_per_graph)
    x = jax.random.normal(kx, (n, 9), jnp.float32)          # g.ndata['h']
    batch = jnp.concatenate(
        [jnp.full((c,), i, jnp.int32) for i, c in enumerate(nodes_per_graph)])
    params = init_params(kp)

    fwd = jax.jit(gravnet_model_forward, static_argnums=(3,))
    out = fwd(x, batch, params, num_graphs)
    out = jax.block_until_ready(out)
    assert out.shape == (n, 31), out.shape
    assert bool(jnp.all(jnp.isfinite(out)))
    print("KERNEL_OK")
</pallas_src>

<mosaic_0001>
module attributes {stable_mosaic.version = 11 : i64} {
  func.func private @main(%arg0: i32) attributes {dimension_semantics = [#tpu.dimension_semantics<core_parallel>], iteration_bounds = array<i64: 2>, tpu.core_type = #tpu.core_type<sc_scalar_subcore>, window_params = []} {
    return
  }
}

module attributes {stable_mosaic.version = 11 : i64} {
  func.func private @main(%arg0: i32) attributes {dimension_semantics = [#tpu.dimension_semantics<core_parallel>], iteration_bounds = array<i64: 2>, tpu.core_type = #tpu.core_type<sc_scalar_subcore>, window_params = []} {
    return
  }
}

module attributes {stable_mosaic.version = 11 : i64} {
  func.func @_sh_kernel(%arg0: i32, %arg1: memref<16x16xf32, #tpu.memory_space<vmem>>, %arg2: memref<16x8xf32, #tpu.memory_space<vmem>>, %arg3: memref<1x8xf32, #tpu.memory_space<vmem>>, %arg4: memref<16x16xf32, #tpu.memory_space<vmem>>, %arg5: memref<1x16xf32, #tpu.memory_space<vmem>>, %arg6: memref<16x8xf32, #tpu.memory_space<vmem>>, %arg7: memref<16x16xf32, #tpu.memory_space<vmem>>) attributes {dimension_semantics = [#tpu.dimension_semantics<parallel>], iteration_bounds = array<i64: 2>, scalar_prefetch = 0 : i64, scratch_operands = 0 : i64, tpu.core_type = #tpu.core_type<tc>, window_params = [{transform_indices = @transform_0, window_bounds = array<i64: 16, 16>}, {pipeline_mode = #tpu.pipeline_mode<synchronous>, transform_indices = @transform_1, window_bounds = array<i64: 16, 8>}, {pipeline_mode = #tpu.pipeline_mode<synchronous>, transform_indices = @transform_2, window_bounds = array<i64: 1, 8>}, {pipeline_mode = #tpu.pipeline_mode<synchronous>, transform_indices = @transform_3, window_bounds = array<i64: 16, 16>}, {pipeline_mode = #tpu.pipeline_mode<synchronous>, transform_indices = @transform_4, window_bounds = array<i64: 1, 16>}, {transform_indices = @transform_5, window_bounds = array<i64: 16, 8>}, {transform_indices = @transform_6, window_bounds = array<i64: 16, 16>}]} {
    %c0 = arith.constant 0 : index
    %c0_0 = arith.constant 0 : index
    %0 = vector.load %arg1[%c0, %c0_0] : memref<16x16xf32, #tpu.memory_space<vmem>>, vector<16x16xf32>
    %c0_1 = arith.constant 0 : index
    %c0_2 = arith.constant 0 : index
    %1 = vector.load %arg2[%c0_1, %c0_2] : memref<16x8xf32, #tpu.memory_space<vmem>>, vector<16x8xf32>
    %cst = arith.constant dense<0.000000e+00> : vector<16x8xf32>
    %2 = tpu.matmul %0, %1, %cst {dimension_numbers = #tpu.dot_dimension_numbers<[1], [0], [0], [1], [0, 0, 1, 1], [], []>} : vector<16x16xf32>, vector<16x8xf32>, vector<16x8xf32> -> vector<16x8xf32>
    %c0_3 = arith.constant 0 : index
    %c0_4 = arith.constant 0 : index
    %3 = vector.load %arg3[%c0_3, %c0_4] : memref<1x8xf32, #tpu.memory_space<vmem>>, vector<1x8xf32>
    %4 = vector.broadcast %3 : vector<1x8xf32> to vector<16x8xf32>
    %5 = arith.addf %2, %4 : vector<16x8xf32>
    %c0_5 = arith.constant 0 : index
    %c0_6 = arith.constant 0 : index
    %6 = vector.load %arg6[%c0_5, %c0_6] : memref<16x8xf32, #tpu.memory_space<vmem>>, vector<16x8xf32>
    tpu.vector_store %arg6[%c0_5, %c0_6], %5 {strides = array<i32>} : memref<16x8xf32, #tpu.memory_space<vmem>>, vector<16x8xf32>,
    %c0_7 = arith.constant 0 : index
    %c0_8 = arith.constant 0 : index
    %7 = vector.load %arg4[%c0_7, %c0_8] : memref<16x16xf32, #tpu.memory_space<vmem>>, vector<16x16xf32>
    %cst_9 = arith.constant dense<0.000000e+00> : vector<16x16xf32>
    %8 = tpu.matmul %0, %7, %cst_9 {dimension_numbers = #tpu.dot_dimension_numbers<[1], [0], [0], [1], [0, 0, 1, 1], [], []>} : vector<16x16xf32>, vector<16x16xf32>, vector<16x16xf32> -> vector<16x16xf32>
    %c0_10 = arith.constant 0 : index
    %c0_11 = arith.constant 0 : index
    %9 = vector.load %arg5[%c0_10, %c0_11] : memref<1x16xf32, #tpu.memory_space<vmem>>, vector<1x16xf32>
    %10 = vector.broadcast %9 : vector<1x16xf32> to vector<16x16xf32>
    %11 = arith.addf %8, %10 : vector<16x16xf32>
    %c0_12 = arith.constant 0 : index
    %c0_13 = arith.constant 0 : index
    %12 = vector.load %arg7[%c0_12, %c0_13] : memref<16x16xf32, #tpu.memory_space<vmem>>, vector<16x16xf32>
    tpu.vector_store %arg7[%c0_12, %c0_13], %11 {strides = array<i32>} : memref<16x16xf32, #tpu.memory_space<vmem>>, vector<16x16xf32>,
    return
  }
  func.func @transform_0(%arg0: i32) -> (i32, i32) {
    %c0_i32 = arith.constant 0 : i32
    %c0_i32_0 = arith.constant 0 : i32
    return %arg0, %c0_i32 : i32, i32
  }
  func.func @transform_1(%arg0: i32) -> (i32, i32) {
    %c0_i32 = arith.constant 0 : i32
    %c0_i32_0 = arith.constant 0 : i32
    %c0_i32_1 = arith.constant 0 : i32
    return %c0_i32, %c0_i32_0 : i32, i32
  }
  func.func @transform_2(%arg0: i32) -> (i32, i32) {
    %c0_i32 = arith.constant 0 : i32
    %c0_i32_0 = arith.constant 0 : i32
    %c0_i32_1 = arith.constant 0 : i32
    return %c0_i32, %c0_i32_0 : i32, i32
  }
  func.func @transform_3(%arg0: i32) -> (i32, i32) {
    %c0_i32 = arith.constant 0 : i32
    %c0_i32_0 = arith.constant 0 : i32
    %c0_i32_1 = arith.constant 0 : i32
    return %c0_i32, %c0_i32_0 : i32, i32
  }
  func.func @transform_4(%arg0: i32) -> (i32, i32) {
    %c0_i32 = arith.constant 0 : i32
    %c0_i32_0 = arith.constant 0 : i32
    %c0_i32_1 = arith.constant 0 : i32
    return %c0_i32, %c0_i32_0 : i32, i32
  }
  func.func @transform_5(%arg0: i32) -> (i32, i32) {
    %c0_i32 = arith.constant 0 : i32
    %c0_i32_0 = arith.constant 0 : i32
    return %arg0, %c0_i32 : i32, i32
  }
  func.func @transform_6(%arg0: i32) -> (i32, i32) {
    %c0_i32 = arith.constant 0 : i32
    %c0_i32_0 = arith.constant 0 : i32
    return %arg0, %c0_i32 : i32, i32
  }
}

module attributes {stable_mosaic.version = 11 : i64} {
  func.func @_gex_stats_kernel(%arg0: i32, %arg1: memref<16x8xf32, #tpu.memory_space<vmem>>, %arg2: memref<16x1xi32, #tpu.memory_space<vmem>>, %arg3: memref<4x8x8xf32, #tpu.memory_space<vmem>>) attributes {dimension_semantics = [#tpu.dimension_semantics<arbitrary>], iteration_bounds = array<i64: 2>, scalar_prefetch = 0 : i64, scratch_operands = 0 : i64, tpu.core_type = #tpu.core_type<tc>, window_params = [{transform_indices = @transform_0, window_bounds = array<i64: 16, 8>}, {transform_indices = @transform_1, window_bounds = array<i64: 16, 1>}, {pipeline_mode = #tpu.pipeline_mode<synchronous>, transform_indices = @transform_2, window_bounds = array<i64: 4, 8, 8>}]} {
    %c0_i32 = arith.constant 0 : i32
    %0 = arith.cmpi eq, %arg0, %c0_i32 : i32
    %1 = arith.extui %0 : i1 to i32
    %c0_i32_0 = arith.constant 0 : i32
    %2 = arith.cmpi ne, %1, %c0_i32_0 : i32
    scf.if %2 {
      %cst_44 = arith.constant 0.000000e+00 : f32
      %111 = vector.broadcast %cst_44 : f32 to vector<8x8xf32>
      %c0_45 = arith.constant 0 : index
      %c0_46 = arith.constant 0 : index
      %c0_47 = arith.constant 0 : index
      %112 = vector.load %arg3[%c0_45, %c0_46, %c0_47] : memref<4x8x8xf32, #tpu.memory_space<vmem>>, vector<1x8x8xf32>
      %113 = vector.shape_cast %112 : vector<1x8x8xf32> to vector<8x8xf32>
      %114 = vector.shape_cast %111 : vector<8x8xf32> to vector<1x8x8xf32>
      tpu.vector_store %arg3[%c0_45, %c0_46, %c0_47], %114 {strides = array<i32>} : memref<4x8x8xf32, #tpu.memory_space<vmem>>, vector<1x8x8xf32>,
      %cst_48 = arith.constant 1.000000e+30 : f32
      %115 = vector.broadcast %cst_48 : f32 to vector<8x8xf32>
      %c1_49 = arith.constant 1 : index
      %c0_50 = arith.constant 0 : index
      %c0_51 = arith.constant 0 : index
      %116 = vector.load %arg3[%c1_49, %c0_50, %c0_51] : memref<4x8x8xf32, #tpu.memory_space<vmem>>, vector<1x8x8xf32>
      %117 = vector.shape_cast %116 : vector<1x8x8xf32> to vector<8x8xf32>
      %118 = vector.shape_cast %115 : vector<8x8xf32> to vector<1x8x8xf32>
      tpu.vector_store %arg3[%c1_49, %c0_50, %c0_51], %118 {strides = array<i32>} : memref<4x8x8xf32, #tpu.memory_space<vmem>>, vector<1x8x8xf32>,
      %cst_52 = arith.constant -1.000000e+30 : f32
      %119 = vector.broadcast %cst_52 : f32 to vector<8x8xf32>
      %c2_53 = arith.constant 2 : index
      %c0_54 = arith.constant 0 : index
      %c0_55 = arith.constant 0 : index
      %120 = vector.load %arg3[%c2_53, %c0_54, %c0_55] : memref<4x8x8xf32, #tpu.memory_space<vmem>>, vector<1x8x8xf32>
      %121 = vector.shape_cast %120 : vector<1x8x8xf32> to vector<8x8xf32>
      %122 = vector.shape_cast %119 : vector<8x8xf32> to vector<1x8x8xf32>
      tpu.vector_store %arg3[%c2_53, %c0_54, %c0_55], %122 {strides = array<i32>} : memref<4x8x8xf32, #tpu.memory_space<vmem>>, vector<1x8x8xf32>,
      %cst_56 = arith.constant 0.000000e+00 : f32
      %123 = vector.broadcast %cst_56 : f32 to vector<8x8xf32>
      %c3_57 = arith.constant 3 : index
      %c0_58 = arith.constant 0 : index
      %c0_59 = arith.constant 0 : index
      %124 = vector.load %arg3[%c3_57, %c0_58, %c0_59] : memref<4x8x8xf32, #tpu.memory_space<vmem>>, vector<1x8x8xf32>
      %125 = vector.shape_cast %124 : vector<1x8x8xf32> to vector<8x8xf32>
      %126 = vector.shape_cast %123 : vector<8x8xf32> to vector<1x8x8xf32>
      tpu.vector_store %arg3[%c3_57, %c0_58, %c0_59], %126 {strides = array<i32>} : memref<4x8x8xf32, #tpu.memory_space<vmem>>, vector<1x8x8xf32>,
    } else {
    }
    %c0 = arith.constant 0 : index
    %c0_1 = arith.constant 0 : index
    %3 = vector.load %arg1[%c0, %c0_1] : memref<16x8xf32, #tpu.memory_space<vmem>>, vector<16x8xf32>
    %c0_2 = arith.constant 0 : index
    %c0_3 = arith.constant 0 : index
    %4 = vector.load %arg2[%c0_2, %c0_3] : memref<16x1xi32, #tpu.memory_space<vmem>>, vector<16x1xi32>
    %cst = arith.constant 1.000000e+00 : f32
    %5 = vector.broadcast %cst : f32 to vector<16x8xf32>
    %6 = tpu.iota {dimensions = array<i32: 0>} : vector<8x8xi32>
    %cst_4 = arith.constant 0.000000e+00 : f32
    %7 = vector.broadcast %cst_4 : f32 to vector<8x8xf32>
    %cst_5 = arith.constant 1.000000e+30 : f32
    %8 = vector.broadcast %cst_5 : f32 to vector<8x8xf32>
    %cst_6 = arith.constant -1.000000e+30 : f32
    %9 = vector.broadcast %cst_6 : f32 to vector<8x8xf32>
    %cst_7 = arith.constant 0.000000e+00 : f32
    %10 = vector.broadcast %cst_7 : f32 to vector<8x8xf32>
    %c0_i32_8 = arith.constant 0 : i32
    %11 = vector.broadcast %c0_i32_8 : i32 to vector<16x1xi32>
    %12 = arith.cmpi eq, %4, %11 : vector<16x1xi32>
    %13 = arith.extui %12 : vector<16x1xi1> to vector<16x1xi32>
    %14 = arith.sitofp %13 : vector<16x1xi32> to vector<16x1xf32>
    %15 = vector.broadcast %14 : vector<16x1xf32> to vector<16x8xf32>
    %16 = arith.mulf %15, %3 : vector<16x8xf32>
    %cst_9 = arith.constant dense<0.000000e+00> : vector<8xf32>
    %17 = vector.multi_reduction <add>, %16, %cst_9 [0] : vector<16x8xf32> to vector<8xf32>
    %18 = vector.shape_cast %17 : vector<8xf32> to vector<1x8xf32>
    %cst_10 = arith.constant 1.000000e+30 : f32
    %19 = vector.shape_cast %12 : vector<16x1xi1> to vector<16x1xi1>
    %20 = vector.broadcast %19 : vector<16x1xi1> to vector<16x8xi1>
    %21 = vector.broadcast %cst_10 : f32 to vector<16x8xf32>
    %22 = arith.select %20, %3, %21 : vector<16x8xi1>, vector<16x8xf32>
    %cst_11 = arith.constant dense<0x7F800000> : vector<8xf32>
    %23 = vector.multi_reduction <minimumf>, %22, %cst_11 [0] : vector<16x8xf32> to vector<8xf32>
    %24 = vector.shape_cast %23 : vector<8xf32> to vector<1x8xf32>
    %cst_12 = arith.constant -1.000000e+30 : f32
    %25 = vector.shape_cast %12 : vector<16x1xi1> to vector<16x1xi1>
    %26 = vector.broadcast %25 : vector<16x1xi1> to vector<16x8xi1>
    %27 = vector.broadcast %cst_12 : f32 to vector<16x8xf32>
    %28 = arith.select %26, %3, %27 : vector<16x8xi1>, vector<16x8xf32>
    %cst_13 = arith.constant dense<0xFF800000> : vector<8xf32>
    %29 = vector.multi_reduction <maximumf>, %28, %cst_13 [0] : vector<16x8xf32> to vector<8xf32>
    %30 = vector.shape_cast %29 : vector<8xf32> to vector<1x8xf32>
    %31 = vector.broadcast %14 : vector<16x1xf32> to vector<16x8xf32>
    %32 = arith.mulf %31, %5 : vector<16x8xf32>
    %cst_14 = arith.constant dense<0.000000e+00> : vector<8xf32>
    %33 = vector.multi_reduction <add>, %32, %cst_14 [0] : vector<16x8xf32> to vector<8xf32>
    %34 = vector.shape_cast %33 : vector<8xf32> to vector<1x8xf32>
    %c0_i32_15 = arith.constant 0 : i32
    %35 = vector.broadcast %c0_i32_15 : i32 to vector<8x8xi32>
    %36 = arith.cmpi eq, %6, %35 : vector<8x8xi32>
    %37 = vector.shape_cast %18 : vector<1x8xf32> to vector<1x8xf32>
    %38 = vector.broadcast %37 : vector<1x8xf32> to vector<8x8xf32>
    %39 = arith.select %36, %38, %7 : vector<8x8xi1>, vector<8x8xf32>
    %40 = vector.shape_cast %24 : vector<1x8xf32> to vector<1x8xf32>
    %41 = vector.broadcast %40 : vector<1x8xf32> to vector<8x8xf32>
    %42 = arith.select %36, %41, %8 : vector<8x8xi1>, vector<8x8xf32>
    %43 = vector.shape_cast %30 : vector<1x8xf32> to vector<1x8xf32>
    %44 = vector.broadcast %43 : vector<1x8xf32> to vector<8x8xf32>
    %45 = arith.select %36, %44, %9 : vector<8x8xi1>, vector<8x8xf32>
    %46 = vector.shape_cast %34 : vector<1x8xf32> to vector<1x8xf32>
    %47 = vector.broadcast %46 : vector<1x8xf32> to vector<8x8xf32>
    %48 = arith.select %36, %47, %10 : vector<8x8xi1>, vector<8x8xf32>
    %c1_i32 = arith.constant 1 : i32
    %49 = vector.broadcast %c1_i32 : i32 to vector<16x1xi32>
    %50 = arith.cmpi eq, %4, %49 : vector<16x1xi32>
    %51 = arith.extui %50 : vector<16x1xi1> to vector<16x1xi32>
    %52 = arith.sitofp %51 : vector<16x1xi32> to vector<16x1xf32>
    %53 = vector.broadcast %52 : vector<16x1xf32> to vector<16x8xf32>
    %54 = arith.mulf %53, %3 : vector<16x8xf32>
    %cst_16 = arith.constant dense<0.000000e+00> : vector<8xf32>
    %55 = vector.multi_reduction <add>, %54, %cst_16 [0] : vector<16x8xf32> to vector<8xf32>
    %56 = vector.shape_cast %55 : vector<8xf32> to vector<1x8xf32>
    %cst_17 = arith.constant 1.000000e+30 : f32
    %57 = vector.shape_cast %50 : vector<16x1xi1> to vector<16x1xi1>
    %58 = vector.broadcast %57 : vector<16x1xi1> to vector<16x8xi1>
    %59 = vector.broadcast %cst_17 : f32 to vector<16x8xf32>
    %60 = arith.select %58, %3, %59 : vector<16x8xi1>, vector<16x8xf32>
    %cst_18 = arith.constant dense<0x7F800000> : vector<8xf32>
    %61 = vector.multi_reduction <minimumf>, %60, %cst_18 [0] : vector<16x8xf32> to vector<8xf32>
    %62 = vector.shape_cast %61 : vector<8xf32> to vector<1x8xf32>
    %cst_19 = arith.constant -1.000000e+30 : f32
    %63 = vector.shape_cast %50 : vector<16x1xi1> to vector<16x1xi1>
    %64 = vector.broadcast %63 : vector<16x1xi1> to vector<16x8xi1>
    %65 = vector.broadcast %cst_19 : f32 to vector<16x8xf32>
    %66 = arith.select %64, %3, %65 : vector<16x8xi1>, vector<16x8xf32>
    %cst_20 = arith.constant dense<0xFF800000> : vector<8xf32>
    %67 = vector.multi_reduction <maximumf>, %66, %cst_20 [0] : vector<16x8xf32> to vector<8xf32>
    %68 = vector.shape_cast %67 : vector<8xf32> to vector<1x8xf32>
    %69 = vector.broadcast %52 : vector<16x1xf32> to vector<16x8xf32>
    %70 = arith.mulf %69, %5 : vector<16x8xf32>
    %cst_21 = arith.constant dense<0.000000e+00> : vector<8xf32>
    %71 = vector.multi_reduction <add>, %70, %cst_21 [0] : vector<16x8xf32> to vector<8xf32>
    %72 = vector.shape_cast %71 : vector<8xf32> to vector<1x8xf32>
    %c1_i32_22 = arith.constant 1 : i32
    %73 = vector.broadcast %c1_i32_22 : i32 to vector<8x8xi32>
    %74 = arith.cmpi eq, %6, %73 : vector<8x8xi32>
    %75 = vector.shape_cast %56 : vector<1x8xf32> to vector<1x8xf32>
    %76 = vector.broadcast %75 : vector<1x8xf32> to vector<8x8xf32>
    %77 = arith.select %74, %76, %39 : vector<8x8xi1>, vector<8x8xf32>
    %78 = vector.shape_cast %62 : vector<1x8xf32> to vector<1x8xf32>
    %79 = vector.broadcast %78 : vector<1x8xf32> to vector<8x8xf32>
    %80 = arith.select %74, %79, %42 : vector<8x8xi1>, vector<8x8xf32>
    %81 = vector.shape_cast %68 : vector<1x8xf32> to vector<1x8xf32>
    %82 = vector.broadcast %81 : vector<1x8xf32> to vector<8x8xf32>
    %83 = arith.select %74, %82, %45 : vector<8x8xi1>, vector<8x8xf32>
    %84 = vector.shape_cast %72 : vector<1x8xf32> to vector<1x8xf32>
    %85 = vector.broadcast %84 : vector<1x8xf32> to vector<8x8xf32>
    %86 = arith.select %74, %85, %48 : vector<8x8xi1>, vector<8x8xf32>
    %c0_23 = arith.constant 0 : index
    %c0_24 = arith.constant 0 : index
    %c0_25 = arith.constant 0 : index
    %87 = vector.load %arg3[%c0_23, %c0_24, %c0_25] : memref<4x8x8xf32, #tpu.memory_space<vmem>>, vector<1x8x8xf32>
    %88 = vector.shape_cast %87 : vector<1x8x8xf32> to vector<8x8xf32>
    %89 = arith.addf %88, %77 : vector<8x8xf32>
    %c0_26 = arith.constant 0 : index
    %c0_27 = arith.constant 0 : index
    %c0_28 = arith.constant 0 : index
    %90 = vector.load %arg3[%c0_26, %c0_27, %c0_28] : memref<4x8x8xf32, #tpu.memory_space<vmem>>, vector<1x8x8xf32>
    %91 = vector.shape_cast %90 : vector<1x8x8xf32> to vector<8x8xf32>
    %92 = vector.shape_cast %89 : vector<8x8xf32> to vector<1x8x8xf32>
    tpu.vector_store %arg3[%c0_26, %c0_27, %c0_28], %92 {strides = array<i32>} : memref<4x8x8xf32, #tpu.memory_space<vmem>>, vector<1x8x8xf32>,
    %c1 = arith.constant 1 : index
    %c0_29 = arith.constant 0 : index
    %c0_30 = arith.constant 0 : index
    %93 = vector.load %arg3[%c1, %c0_29, %c0_30] : memref<4x8x8xf32, #tpu.memory_space<vmem>>, vector<1x8x8xf32>
    %94 = vector.shape_cast %93 : vector<1x8x8xf32> to vector<8x8xf32>
    %95 = arith.minimumf %94, %80 : vector<8x8xf32>
    %c1_31 = arith.constant 1 : index
    %c0_32 = arith.constant 0 : index
    %c0_33 = arith.constant 0 : index
    %96 = vector.load %arg3[%c1_31, %c0_32, %c0_33] : memref<4x8x8xf32, #tpu.memory_space<vmem>>, vector<1x8x8xf32>
    %97 = vector.shape_cast %96 : vector<1x8x8xf32> to vector<8x8xf32>
    %98 = vector.shape_cast %95 : vector<8x8xf32> to vector<1x8x8xf32>
    tpu.vector_store %arg3[%c1_31, %c0_32, %c0_33], %98 {strides = array<i32>} : memref<4x8x8xf32, #tpu.memory_space<vmem>>, vector<1x8x8xf32>,
    %c2 = arith.constant 2 : index
    %c0_34 = arith.constant 0 : index
    %c0_35 = arith.constant 0 : index
    %99 = vector.load %arg3[%c2, %c0_34, %c0_35] : memref<4x8x8xf32, #tpu.memory_space<vmem>>, vector<1x8x8xf32>
    %100 = vector.shape_cast %99 : vector<1x8x8xf32> to vector<8x8xf32>
    %101 = arith.maximumf %100, %83 : vector<8x8xf32>
    %c2_36 = arith.constant 2 : index
    %c0_37 = arith.constant 0 : index
    %c0_38 = arith.constant 0 : index
    %102 = vector.load %arg3[%c2_36, %c0_37, %c0_38] : memref<4x8x8xf32, #tpu.memory_space<vmem>>, vector<1x8x8xf32>
    %103 = vector.shape_cast %102 : vector<1x8x8xf32> to vector<8x8xf32>
    %104 = vector.shape_cast %101 : vector<8x8xf32> to vector<1x8x8xf32>
    tpu.vector_store %arg3[%c2_36, %c0_37, %c0_38], %104 {strides = array<i32>} : memref<4x8x8xf32, #tpu.memory_space<vmem>>, vector<1x8x8xf32>,
    %c3 = arith.constant 3 : index
    %c0_39 = arith.constant 0 : index
    %c0_40 = arith.constant 0 : index
    %105 = vector.load %arg3[%c3, %c0_39, %c0_40] : memref<4x8x8xf32, #tpu.memory_space<vmem>>, vector<1x8x8xf32>
    %106 = vector.shape_cast %105 : vector<1x8x8xf32> to vector<8x8xf32>
    %107 = arith.addf %106, %86 : vector<8x8xf32>
    %c3_41 = arith.constant 3 : index
    %c0_42 = arith.constant 0 : index
    %c0_43 = arith.constant 0 : index
    %108 = vector.load %arg3[%c3_41, %c0_42, %c0_43] : memref<4x8x8xf32, #tpu.memory_space<vmem>>, vector<1x8x8xf32>
    %109 = vector.shape_cast %108 : vector<1x8x8xf32> to vector<8x8xf32>
    %110 = vector.shape_cast %107 : vector<8x8xf32> to vector<1x8x8xf32>
    tpu.vector_store %arg3[%c3_41, %c0_42, %c0_43], %110 {strides = array<i32>} : memref<4x8x8xf32, #tpu.memory_space<vmem>>, vector<1x8x8xf32>,
    return
  }
  func.func @transform_0(%arg0: i32) -> (i32, i32) {
    %c0_i32 = arith.constant 0 : i32
    %c0_i32_0 = arith.constant 0 : i32
    return %arg0, %c0_i32 : i32, i32
  }
  func.func @transform_1(%arg0: i32) -> (i32, i32) {
    %c0_i32 = arith.constant 0 : i32
    %c0_i32_0 = arith.constant 0 : i32
    return %arg0, %c0_i32 : i32, i32
  }
  func.func @transform_2(%arg0: i32) -> (i32, i32, i32) {
    %c0_i32 = arith.constant 0 : i32
    %c0_i32_0 = arith.constant 0 : i32
    %c0_i32_1 = arith.constant 0 : i32
    %c0_i32_2 = arith.constant 0 : i32
    return %c0_i32, %c0_i32_0, %c0_i32_1 : i32, i32, i32
  }
}

module attributes {stable_mosaic.version = 11 : i64} {
  func.func @_gex_apply_kernel(%arg0: i32, %arg1: memref<16x8xf32, #tpu.memory_space<vmem>>, %arg2: memref<16x1xi32, #tpu.memory_space<vmem>>, %arg3: memref<4x8x8xf32, #tpu.memory_space<vmem>>, %arg4: memref<4x8x8xf32, #tpu.memory_space<vmem>>, %arg5: memref<1x8xf32, #tpu.memory_space<vmem>>, %arg6: memref<16x8xf32, #tpu.memory_space<vmem>>) attributes {dimension_semantics = [#tpu.dimension_semantics<parallel>], iteration_bounds = array<i64: 2>, scalar_prefetch = 0 : i64, scratch_operands = 0 : i64, tpu.core_type = #tpu.core_type<tc>, window_params = [{transform_indices = @transform_0, window_bounds = array<i64: 16, 8>}, {transform_indices = @transform_1, window_bounds = array<i64: 16, 1>}, {pipeline_mode = #tpu.pipeline_mode<synchronous>, transform_indices = @transform_2, window_bounds = array<i64: 4, 8, 8>}, {pipeline_mode = #tpu.pipeline_mode<synchronous>, transform_indices = @transform_3, window_bounds = array<i64: 4, 8, 8>}, {pipeline_mode = #tpu.pipeline_mode<synchronous>, transform_indices = @transform_4, window_bounds = array<i64: 1, 8>}, {transform_indices = @transform_5, window_bounds = array<i64: 16, 8>}]} {
    %c0 = arith.constant 0 : index
    %c0_0 = arith.constant 0 : index
    %0 = vector.load %arg1[%c0, %c0_0] : memref<16x8xf32, #tpu.memory_space<vmem>>, vector<16x8xf32>
    %c0_1 = arith.constant 0 : index
    %c0_2 = arith.constant 0 : index
    %1 = vector.load %arg2[%c0_1, %c0_2] : memref<16x1xi32, #tpu.memory_space<vmem>>, vector<16x1xi32>
    %2 = tpu.iota {dimensions = array<i32: 1>} : vector<1x8xi32>
    %3 = vector.broadcast %1 : vector<16x1xi32> to vector<16x8xi32>
    %4 = vector.broadcast %2 : vector<1x8xi32> to vector<16x8xi32>
    %5 = arith.cmpi eq, %3, %4 : vector<16x8xi32>
    %6 = arith.extui %5 : vector<16x8xi1> to vector<16x8xi32>
    %7 = arith.sitofp %6 : vector<16x8xi32> to vector<16x8xf32>
    %c3 = arith.constant 3 : index
    %c0_3 = arith.constant 0 : index
    %c0_4 = arith.constant 0 : index
    %8 = vector.load %arg3[%c3, %c0_3, %c0_4] : memref<4x8x8xf32, #tpu.memory_space<vmem>>, vector<1x8x8xf32>
    %9 = vector.shape_cast %8 : vector<1x8x8xf32> to vector<8x8xf32>
    %cst = arith.constant 1.000000e+00 : f32
    %10 = vector.broadcast %cst : f32 to vector<8x8xf32>
    %11 = arith.maximumf %9, %10 : vector<8x8xf32>
    %c0_5 = arith.constant 0 : index
    %c0_6 = arith.constant 0 : index
    %c0_7 = arith.constant 0 : index
    %12 = vector.load %arg3[%c0_5, %c0_6, %c0_7] : memref<4x8x8xf32, #tpu.memory_space<vmem>>, vector<1x8x8xf32>
    %13 = vector.shape_cast %12 : vector<1x8x8xf32> to vector<8x8xf32>
    %14 = arith.divf %13, %11 : vector<8x8xf32>
    %cst_8 = arith.constant dense<0.000000e+00> : vector<16x8xf32>
    %15 = tpu.matmul %7, %14, %cst_8 {dimension_numbers = #tpu.dot_dimension_numbers<[1], [0], [0], [1], [0, 0, 1, 1], [], []>} : vector<16x8xf32>, vector<8x8xf32>, vector<16x8xf32> -> vector<16x8xf32>
    %c1 = arith.constant 1 : index
    %c0_9 = arith.constant 0 : index
    %c0_10 = arith.constant 0 : index
    %16 = vector.load %arg3[%c1, %c0_9, %c0_10] : memref<4x8x8xf32, #tpu.memory_space<vmem>>, vector<1x8x8xf32>
    %17 = vector.shape_cast %16 : vector<1x8x8xf32> to vector<8x8xf32>
    %cst_11 = arith.constant dense<0.000000e+00> : vector<16x8xf32>
    %18 = tpu.matmul %7, %17, %cst_11 {dimension_numbers = #tpu.dot_dimension_numbers<[1], [0], [0], [1], [0, 0, 1, 1], [], []>} : vector<16x8xf32>, vector<8x8xf32>, vector<16x8xf32> -> vector<16x8xf32>
    %c2 = arith.constant 2 : index
    %c0_12 = arith.constant 0 : index
    %c0_13 = arith.constant 0 : index
    %19 = vector.load %arg3[%c2, %c0_12, %c0_13] : memref<4x8x8xf32, #tpu.memory_space<vmem>>, vector<1x8x8xf32>
    %20 = vector.shape_cast %19 : vector<1x8x8xf32> to vector<8x8xf32>
    %cst_14 = arith.constant dense<0.000000e+00> : vector<16x8xf32>
    %21 = tpu.matmul %7, %20, %cst_14 {dimension_numbers = #tpu.dot_dimension_numbers<[1], [0], [0], [1], [0, 0, 1, 1], [], []>} : vector<16x8xf32>, vector<8x8xf32>, vector<16x8xf32> -> vector<16x8xf32>
    %c0_15 = arith.constant 0 : index
    %c0_16 = arith.constant 0 : index
    %c0_17 = arith.constant 0 : index
    %22 = vector.load %arg4[%c0_15, %c0_16, %c0_17] : memref<4x8x8xf32, #tpu.memory_space<vmem>>, vector<1x8x8xf32>
    %23 = vector.shape_cast %22 : vector<1x8x8xf32> to vector<8x8xf32>
    %cst_18 = arith.constant dense<0.000000e+00> : vector<16x8xf32>
    %24 = tpu.matmul %15, %23, %cst_18 {dimension_numbers = #tpu.dot_dimension_numbers<[1], [0], [0], [1], [0, 0, 1, 1], [], []>} : vector<16x8xf32>, vector<8x8xf32>, vector<16x8xf32> -> vector<16x8xf32>
    %c1_19 = arith.constant 1 : index
    %c0_20 = arith.constant 0 : index
    %c0_21 = arith.constant 0 : index
    %25 = vector.load %arg4[%c1_19, %c0_20, %c0_21] : memref<4x8x8xf32, #tpu.memory_space<vmem>>, vector<1x8x8xf32>
    %26 = vector.shape_cast %25 : vector<1x8x8xf32> to vector<8x8xf32>
    %cst_22 = arith.constant dense<0.000000e+00> : vector<16x8xf32>
    %27 = tpu.matmul %18, %26, %cst_22 {dimension_numbers = #tpu.dot_dimension_numbers<[1], [0], [0], [1], [0, 0, 1, 1], [], []>} : vector<16x8xf32>, vector<8x8xf32>, vector<16x8xf32> -> vector<16x8xf32>
    %28 = arith.addf %24, %27 : vector<16x8xf32>
    %c2_23 = arith.constant 2 : index
    %c0_24 = arith.constant 0 : index
    %c0_25 = arith.constant 0 : index
    %29 = vector.load %arg4[%c2_23, %c0_24, %c0_25] : memref<4x8x8xf32, #tpu.memory_space<vmem>>, vector<1x8x8xf32>
    %30 = vector.shape_cast %29 : vector<1x8x8xf32> to vector<8x8xf32>
    %cst_26 = arith.constant dense<0.000000e+00> : vector<16x8xf32>
    %31 = tpu.matmul %21, %30, %cst_26 {dimension_numbers = #tpu.dot_dimension_numbers<[1], [0], [0], [1], [0, 0, 1, 1], [], []>} : vector<16x8xf32>, vector<8x8xf32>, vector<16x8xf32> -> vector<16x8xf32>
    %32 = arith.addf %28, %31 : vector<16x8xf32>
    %c3_27 = arith.constant 3 : index
    %c0_28 = arith.constant 0 : index
    %c0_29 = arith.constant 0 : index
    %33 = vector.load %arg4[%c3_27, %c0_28, %c0_29] : memref<4x8x8xf32, #tpu.memory_space<vmem>>, vector<1x8x8xf32>
    %34 = vector.shape_cast %33 : vector<1x8x8xf32> to vector<8x8xf32>
    %cst_30 = arith.constant dense<0.000000e+00> : vector<16x8xf32>
    %35 = tpu.matmul %0, %34, %cst_30 {dimension_numbers = #tpu.dot_dimension_numbers<[1], [0], [0], [1], [0, 0, 1, 1], [], []>} : vector<16x8xf32>, vector<8x8xf32>, vector<16x8xf32> -> vector<16x8xf32>
    %36 = arith.addf %32, %35 : vector<16x8xf32>
    %c0_31 = arith.constant 0 : index
    %c0_32 = arith.constant 0 : index
    %37 = vector.load %arg5[%c0_31, %c0_32] : memref<1x8xf32, #tpu.memory_space<vmem>>, vector<1x8xf32>
    %38 = vector.broadcast %37 : vector<1x8xf32> to vector<16x8xf32>
    %39 = arith.addf %36, %38 : vector<16x8xf32>
    %cst_33 = arith.constant 0.000000e+00 : f32
    %40 = vector.broadcast %cst_33 : f32 to vector<16x8xf32>
    %41 = arith.cmpf ogt, %39, %40 : vector<16x8xf32>
    %cst_34 = arith.constant 0.000000e+00 : f32
    %42 = vector.broadcast %cst_34 : f32 to vector<16x8xf32>
    %43 = arith.minimumf %39, %42 : vector<16x8xf32>
    %44 = math.exp %43 : vector<16x8xf32>
    %cst_35 = arith.constant 1.000000e+00 : f32
    %45 = vector.broadcast %cst_35 : f32 to vector<16x8xf32>
    %46 = arith.subf %44, %45 : vector<16x8xf32>
    %47 = arith.select %41, %39, %46 : vector<16x8xi1>, vector<16x8xf32>
    %c0_36 = arith.constant 0 : index
    %c0_37 = arith.constant 0 : index
    %48 = vector.load %arg6[%c0_36, %c0_37] : memref<16x8xf32, #tpu.memory_space<vmem>>, vector<16x8xf32>
    tpu.vector_store %arg6[%c0_36, %c0_37], %47 {strides = array<i32>} : memref<16x8xf32, #tpu.memory_space<vmem>>, vector<16x8xf32>,
    return
  }
  func.func @transform_0(%arg0: i32) -> (i32, i32) {
    %c0_i32 = arith.constant 0 : i32
    %c0_i32_0 = arith.constant 0 : i32
    return %arg0, %c0_i32 : i32, i32
  }
  func.func @transform_1(%arg0: i32) -> (i32, i32) {
    %c0_i32 = arith.constant 0 : i32
    %c0_i32_0 = arith.constant 0 : i32
    return %arg0, %c0_i32 : i32, i32
  }
  func.func @transform_2(%arg0: i32) -> (i32, i32, i32) {
    %c0_i32 = arith.constant 0 : i32
    %c0_i32_0 = arith.constant 0 : i32
    %c0_i32_1 = arith.constant 0 : i32
    %c0_i32_2 = arith.constant 0 : i32
    return %c0_i32, %c0_i32_0, %c0_i32_1 : i32, i32, i32
  }
  func.func @transform_3(%arg0: i32) -> (i32, i32, i32) {
    %c0_i32 = arith.constant 0 : i32
    %c0_i32_0 = arith.constant 0 : i32
    %c0_i32_1 = arith.constant 0 : i32
    %c0_i32_2 = arith.constant 0 : i32
    return %c0_i32, %c0_i32_0, %c0_i32_1 : i32, i32, i32
  }
  func.func @transform_4(%arg0: i32) -> (i32, i32) {
    %c0_i32 = arith.constant 0 : i32
    %c0_i32_0 = arith.constant 0 : i32
    %c0_i32_1 = arith.constant 0 : i32
    return %c0_i32, %c0_i32_0 : i32, i32
  }
  func.func @transform_5(%arg0: i32) -> (i32, i32) {
    %c0_i32 = arith.constant 0 : i32
    %c0_i32_0 = arith.constant 0 : i32
    return %arg0, %c0_i32 : i32, i32
  }
}

module attributes {stable_mosaic.version = 11 : i64} {
  func.func @_sh_kernel(%arg0: i32, %arg1: memref<16x8xf32, #tpu.memory_space<vmem>>, %arg2: memref<8x8xf32, #tpu.memory_space<vmem>>, %arg3: memref<1x8xf32, #tpu.memory_space<vmem>>, %arg4: memref<8x16xf32, #tpu.memory_space<vmem>>, %arg5: memref<1x16xf32, #tpu.memory_space<vmem>>, %arg6: memref<16x8xf32, #tpu.memory_space<vmem>>, %arg7: memref<16x16xf32, #tpu.memory_space<vmem>>) attributes {dimension_semantics = [#tpu.dimension_semantics<parallel>], iteration_bounds = array<i64: 2>, scalar_prefetch = 0 : i64, scratch_operands = 0 : i64, tpu.core_type = #tpu.core_type<tc>, window_params = [{transform_indices = @transform_0, window_bounds = array<i64: 16, 8>}, {pipeline_mode = #tpu.pipeline_mode<synchronous>, transform_indices = @transform_1, window_bounds = array<i64: 8, 8>}, {pipeline_mode = #tpu.pipeline_mode<synchronous>, transform_indices = @transform_2, window_bounds = array<i64: 1, 8>}, {pipeline_mode = #tpu.pipeline_mode<synchronous>, transform_indices = @transform_3, window_bounds = array<i64: 8, 16>}, {pipeline_mode = #tpu.pipeline_mode<synchronous>, transform_indices = @transform_4, window_bounds = array<i64: 1, 16>}, {transform_indices = @transform_5, window_bounds = array<i64: 16, 8>}, {transform_indices = @transform_6, window_bounds = array<i64: 16, 16>}]} {
    %c0 = arith.constant 0 : index
    %c0_0 = arith.constant 0 : index
    %0 = vector.load %arg1[%c0, %c0_0] : memref<16x8xf32, #tpu.memory_space<vmem>>, vector<16x8xf32>
    %c0_1 = arith.constant 0 : index
    %c0_2 = arith.constant 0 : index
    %1 = vector.load %arg2[%c0_1, %c0_2] : memref<8x8xf32, #tpu.memory_space<vmem>>, vector<8x8xf32>
    %cst = arith.constant dense<0.000000e+00> : vector<16x8xf32>
    %2 = tpu.matmul %0, %1, %cst {dimension_numbers = #tpu.dot_dimension_numbers<[1], [0], [0], [1], [0, 0, 1, 1], [], []>} : vector<16x8xf32>, vector<8x8xf32>, vector<16x8xf32> -> vector<16x8xf32>
    %c0_3 = arith.constant 0 : index
    %c0_4 = arith.constant 0 : index
    %3 = vector.load %arg3[%c0_3, %c0_4] : memref<1x8xf32, #tpu.memory_space<vmem>>, vector<1x8xf32>
    %4 = vector.broadcast %3 : vector<1x8xf32> to vector<16x8xf32>
    %5 = arith.addf %2, %4 : vector<16x8xf32>
    %c0_5 = arith.constant 0 : index
    %c0_6 = arith.constant 0 : index
    %6 = vector.load %arg6[%c0_5, %c0_6] : memref<16x8xf32, #tpu.memory_space<vmem>>, vector<16x8xf32>
    tpu.vector_store %arg6[%c0_5, %c0_6], %5 {strides = array<i32>} : memref<16x8xf32, #tpu.memory_space<vmem>>, vector<16x8xf32>,
    %c0_7 = arith.constant 0 : index
    %c0_8 = arith.constant 0 : index
    %7 = vector.load %arg4[%c0_7, %c0_8] : memref<8x16xf32, #tpu.memory_space<vmem>>, vector<8x16xf32>
    %cst_9 = arith.constant dense<0.000000e+00> : vector<16x16xf32>
    %8 = tpu.matmul %0, %7, %cst_9 {dimension_numbers = #tpu.dot_dimension_numbers<[1], [0], [0], [1], [0, 0, 1, 1], [], []>} : vector<16x8xf32>, vector<8x16xf32>, vector<16x16xf32> -> vector<16x16xf32>
    %c0_10 = arith.constant 0 : index
    %c0_11 = arith.constant 0 : index
    %9 = vector.load %arg5[%c0_10, %c0_11] : memref<1x16xf32, #tpu.memory_space<vmem>>, vector<1x16xf32>
    %10 = vector.broadcast %9 : vector<1x16xf32> to vector<16x16xf32>
    %11 = arith.addf %8, %10 : vector<16x16xf32>
    %c0_12 = arith.constant 0 : index
    %c0_13 = arith.constant 0 : index
    %12 = vector.load %arg7[%c0_12, %c0_13] : memref<16x16xf32, #tpu.memory_space<vmem>>, vector<16x16xf32>
    tpu.vector_store %arg7[%c0_12, %c0_13], %11 {strides = array<i32>} : memref<16x16xf32, #tpu.memory_space<vmem>>, vector<16x16xf32>,
    return
  }
  func.func @transform_0(%arg0: i32) -> (i32, i32) {
    %c0_i32 = arith.constant 0 : i32
    %c0_i32_0 = arith.constant 0 : i32
    return %arg0, %c0_i32 : i32, i32
  }
  func.func @transform_1(%arg0: i32) -> (i32, i32) {
    %c0_i32 = arith.constant 0 : i32
    %c0_i32_0 = arith.constant 0 : i32
    %c0_i32_1 = arith.constant 0 : i32
    return %c0_i32, %c0_i32_0 : i32, i32
  }
  func.func @transform_2(%arg0: i32) -> (i32, i32) {
    %c0_i32 = arith.constant 0 : i32
    %c0_i32_0 = arith.constant 0 : i32
    %c0_i32_1 = arith.constant 0 : i32
    return %c0_i32, %c0_i32_0 : i32, i32
  }
  func.func @transform_3(%arg0: i32) -> (i32, i32) {
    %c0_i32 = arith.constant 0 : i32
    %c0_i32_0 = arith.constant 0 : i32
    %c0_i32_1 = arith.constant 0 : i32
    return %c0_i32, %c0_i32_0 : i32, i32
  }
  func.func @transform_4(%arg0: i32) -> (i32, i32) {
    %c0_i32 = arith.constant 0 : i32
    %c0_i32_0 = arith.constant 0 : i32
    %c0_i32_1 = arith.constant 0 : i32
    return %c0_i32, %c0_i32_0 : i32, i32
  }
  func.func @transform_5(%arg0: i32) -> (i32, i32) {
    %c0_i32 = arith.constant 0 : i32
    %c0_i32_0 = arith.constant 0 : i32
    return %arg0, %c0_i32 : i32, i32
  }
  func.func @transform_6(%arg0: i32) -> (i32, i32) {
    %c0_i32 = arith.constant 0 : i32
    %c0_i32_0 = arith.constant 0 : i32
    return %arg0, %c0_i32 : i32, i32
  }
}

module attributes {stable_mosaic.version = 11 : i64} {
  func.func @_gravnet_conv_kernel(%arg0: i32, %arg1: memref<1xi32, #tpu.memory_space<smem>>, %arg2: memref<16x16xf32, #tpu.memory_space<vmem>>, %arg3: memref<16x8xf32, #tpu.memory_space<vmem>>, %arg4: memref<8x128xf32, #tpu.memory_space<vmem>>, %arg5: memref<128x16xbf16, #tpu.memory_space<vmem>>, %arg6: memref<16x128xf32, #tpu.memory_space<vmem>>, %arg7: memref<16x1xi32, #tpu.memory_space<vmem>>, %arg8: memref<1x128xi32, #tpu.memory_space<vmem>>, %arg9: memref<16x32xf32, #tpu.memory_space<vmem>>, %arg10: memref<16x32xf32, #tpu.memory_space<vmem>>, %arg11: memref<16x32xf32, #tpu.memory_space<vmem>>, %arg12: memref<1x32xf32, #tpu.memory_space<vmem>>, %arg13: memref<32x8xf32, #tpu.memory_space<vmem>>, %arg14: memref<8x8xf32, #tpu.memory_space<vmem>>, %arg15: memref<1x8xf32, #tpu.memory_space<vmem>>, %arg16: memref<8x8xf32, #tpu.memory_space<vmem>>, %arg17: memref<1x8xf32, #tpu.memory_space<vmem>>, %arg18: memref<16x8xf32, #tpu.memory_space<vmem>>, %arg19: memref<16x128xf32, #tpu.memory_space<vmem>>) attributes {dimension_semantics = [#tpu.dimension_semantics<parallel>], iteration_bounds = array<i64: 2>, scalar_prefetch = 1 : i64, scratch_operands = 1 : i64, tpu.core_type = #tpu.core_type<tc>, window_params = [{transform_indices = @transform_0, window_bounds = array<i64: 16, 16>}, {transform_indices = @transform_1, window_bounds = array<i64: 16, 8>}, {pipeline_mode = #tpu.pipeline_mode<synchronous>, transform_indices = @transform_2, window_bounds = array<i64: 8, 128>}, {pipeline_mode = #tpu.pipeline_mode<synchronous>, transform_indices = @transform_3, window_bounds = array<i64: 128, 16>}, {pipeline_mode = #tpu.pipeline_mode<synchronous>, transform_indices = @transform_4, window_bounds = array<i64: 16, 128>}, {transform_indices = @transform_5, window_bounds = array<i64: 16, 1>}, {pipeline_mode = #tpu.pipeline_mode<synchronous>, transform_indices = @transform_6, window_bounds = array<i64: 1, 128>}, {pipeline_mode = #tpu.pipeline_mode<synchronous>, transform_indices = @transform_7, window_bounds = array<i64: 16, 32>}, {pipeline_mode = #tpu.pipeline_mode<synchronous>, transform_indices = @transform_8, window_bounds = array<i64: 16, 32>}, {pipeline_mode = #tpu.pipeline_mode<synchronous>, transform_indices = @transform_9, window_bounds = array<i64: 16, 32>}, {pipeline_mode = #tpu.pipeline_mode<synchronous>, transform_indices = @transform_10, window_bounds = array<i64: 1, 32>}, {pipeline_mode = #tpu.pipeline_mode<synchronous>, transform_indices = @transform_11, window_bounds = array<i64: 32, 8>}, {pipeline_mode = #tpu.pipeline_mode<synchronous>, transform_indices = @transform_12, window_bounds = array<i64: 8, 8>}, {pipeline_mode = #tpu.pipeline_mode<synchronous>, transform_indices = @transform_13, window_bounds = array<i64: 1, 8>}, {pipeline_mode = #tpu.pipeline_mode<synchronous>, transform_indices = @transform_14, window_bounds = array<i64: 8, 8>}, {pipeline_mode = #tpu.pipeline_mode<synchronous>, transform_indices = @transform_15, window_bounds = array<i64: 1, 8>}, {transform_indices = @transform_16, window_bounds = array<i64: 16, 8>}]} {
    %c0 = arith.constant 0 : index
    %c0_0 = arith.constant 0 : index
    %0 = vector.load %arg3[%c0, %c0_0] : memref<16x8xf32, #tpu.memory_space<vmem>>, vector<16x8xf32>
    %c0_1 = arith.constant 0 : index
    %c0_2 = arith.constant 0 : index
    %1 = vector.load %arg4[%c0_1, %c0_2] : memref<8x128xf32, #tpu.memory_space<vmem>>, vector<8x128xf32>
    %c0_3 = arith.constant 0 : index
    %c0_4 = arith.constant 0 : index
    %2 = vector.load %arg7[%c0_3, %c0_4] : memref<16x1xi32, #tpu.memory_space<vmem>>, vector<16x1xi32>
    %c0_5 = arith.constant 0 : index
    %c0_6 = arith.constant 0 : index
    %3 = vector.load %arg8[%c0_5, %c0_6] : memref<1x128xi32, #tpu.memory_space<vmem>>, vector<1x128xi32>
    %4 = arith.mulf %0, %0 : vector<16x8xf32>
    %cst = arith.constant dense<0.000000e+00> : vector<16xf32>
    %5 = vector.multi_reduction <add>, %4, %cst [1] : vector<16x8xf32> to vector<16xf32>
    %6 = vector.shape_cast %5 : vector<16xf32> to vector<16x1xf32>
    %7 = arith.mulf %1, %1 : vector<8x128xf32>
    %cst_7 = arith.constant dense<0.000000e+00> : vector<128xf32>
    %8 = vector.multi_reduction <add>, %7, %cst_7 [0] : vector<8x128xf32> to vector<128xf32>
    %9 = vector.shape_cast %8 : vector<128xf32> to vector<1x128xf32>
    %cst_8 = arith.constant dense<0.000000e+00> : vector<16x128xf32>
    %10 = tpu.matmul %0, %1, %cst_8 {dimension_numbers = #tpu.dot_dimension_numbers<[1], [0], [0], [1], [0, 0, 1, 1], [], []>} : vector<16x8xf32>, vector<8x128xf32>, vector<16x128xf32> -> vector<16x128xf32>
    %11 = vector.broadcast %6 : vector<16x1xf32> to vector<16x128xf32>
    %12 = vector.broadcast %9 : vector<1x128xf32> to vector<16x128xf32>
    %13 = arith.addf %11, %12 : vector<16x128xf32>
    %cst_9 = arith.constant 2.000000e+00 : f32
    %14 = vector.broadcast %cst_9 : f32 to vector<16x128xf32>
    %15 = arith.mulf %14, %10 : vector<16x128xf32>
    %16 = arith.subf %13, %15 : vector<16x128xf32>
    %cst_10 = arith.constant 0.000000e+00 : f32
    %17 = vector.broadcast %cst_10 : f32 to vector<16x128xf32>
    %18 = arith.maximumf %16, %17 : vector<16x128xf32>
    %19 = vector.broadcast %2 : vector<16x1xi32> to vector<16x128xi32>
    %20 = vector.broadcast %3 : vector<1x128xi32> to vector<16x128xi32>
    %21 = arith.cmpi eq, %19, %20 : vector<16x128xi32>
    %c0_i32 = arith.constant 0 : i32
    %22 = vector.broadcast %c0_i32 : i32 to vector<16x1xi32>
    %23 = arith.cmpi sge, %2, %22 : vector<16x1xi32>
    %24 = vector.broadcast %23 : vector<16x1xi1> to vector<16x128xi1>
    %25 = arith.andi %21, %24 : vector<16x128xi1>
    %cst_11 = arith.constant 1.000000e+30 : f32
    %26 = vector.broadcast %cst_11 : f32 to vector<16x128xf32>
    %27 = arith.select %25, %18, %26 : vector<16x128xi1>, vector<16x128xf32>
    %28 = tpu.iota {dimensions = array<i32: 1>} : vector<1x128xi32>
    %29 = arith.sitofp %28 : vector<1x128xi32> to vector<1x128xf32>
    %c0_12 = arith.constant 0 : index
    %c0_13 = arith.constant 0 : index
    %30 = vector.load %arg19[%c0_12, %c0_13] : memref<16x128xf32, #tpu.memory_space<vmem>>, vector<16x128xf32>
    tpu.vector_store %arg19[%c0_12, %c0_13], %27 {strides = array<i32>} : memref<16x128xf32, #tpu.memory_space<vmem>>, vector<16x128xf32>,
    %cst_14 = arith.constant 0.000000e+00 : f32
    %31 = vector.broadcast %cst_14 : f32 to vector<16x1xf32>
    %c0_i32_15 = arith.constant 0 : i32
    %c16_i32 = arith.constant 16 : i32
    %32 = arith.addi %c0_i32_15, %c16_i32 : i32
    %c1_i32 = arith.constant 1 : i32
    %33 = scf.for %arg20 = %c0_i32_15 to %32 step %c1_i32 iter_args(%arg21 = %31) -> (vector<16x1xf32>)  : i32 {
      %c0_103 = arith.constant 0 : index
      %c0_104 = arith.constant 0 : index
      %256 = vector.load %arg19[%c0_103, %c0_104] : memref<16x128xf32, #tpu.memory_space<vmem>>, vector<16x128xf32>
      %cst_105 = arith.constant dense<0x7F800000> : vector<16xf32>
      %257 = vector.multi_reduction <minimumf>, %256, %cst_105 [1] : vector<16x128xf32> to vector<16xf32>
      %258 = vector.shape_cast %257 : vector<16xf32> to vector<16x1xf32>
      %cst_106 = arith.constant 5.000000e+29 : f32
      %259 = vector.broadcast %cst_106 : f32 to vector<16x1xf32>
      %260 = arith.cmpf olt, %258, %259 : vector<16x1xf32>
      %261 = vector.broadcast %258 : vector<16x1xf32> to vector<16x128xf32>
      %262 = arith.cmpf ole, %256, %261 : vector<16x128xf32>
      %cst_107 = arith.constant 1.280000e+02 : f32
      %263 = vector.shape_cast %29 : vector<1x128xf32> to vector<1x128xf32>
      %264 = vector.broadcast %263 : vector<1x128xf32> to vector<16x128xf32>
      %265 = vector.broadcast %cst_107 : f32 to vector<16x128xf32>
      %266 = arith.select %262, %264, %265 : vector<16x128xi1>, vector<16x128xf32>
      %cst_108 = arith.constant dense<0x7F800000> : vector<16xf32>
      %267 = vector.multi_reduction <minimumf>, %266, %cst_108 [1] : vector<16x128xf32> to vector<16xf32>
      %268 = vector.shape_cast %267 : vector<16xf32> to vector<16x1xf32>
      %269 = vector.broadcast %29 : vector<1x128xf32> to vector<16x128xf32>
      %270 = vector.broadcast %268 : vector<16x1xf32> to vector<16x128xf32>
      %271 = arith.cmpf oeq, %269, %270 : vector<16x128xf32>
      %272 = vector.broadcast %260 : vector<16x1xi1> to vector<16x128xi1>
      %273 = arith.andi %271, %272 : vector<16x128xi1>
      %cst_109 = arith.constant 2.000000e+30 : f32
      %274 = vector.broadcast %cst_109 : f32 to vector<16x128xf32>
      %275 = arith.select %273, %274, %256 : vector<16x128xi1>, vector<16x128xf32>
      %c0_110 = arith.constant 0 : index
      %c0_111 = arith.constant 0 : index
      %276 = vector.load %arg19[%c0_110, %c0_111] : memref<16x128xf32, #tpu.memory_space<vmem>>, vector<16x128xf32>
      tpu.vector_store %arg19[%c0_110, %c0_111], %275 {strides = array<i32>} : memref<16x128xf32, #tpu.memory_space<vmem>>, vector<16x128xf32>,
      %277 = arith.extui %260 : vector<16x1xi1> to vector<16x1xi32>
      %278 = arith.sitofp %277 : vector<16x1xi32> to vector<16x1xf32>
      %279 = arith.addf %arg21, %278 : vector<16x1xf32>
      scf.yield %279 : vector<16x1xf32>
    }
    %c0_16 = arith.constant 0 : index
    %c0_17 = arith.constant 0 : index
    %34 = vector.load %arg19[%c0_16, %c0_17] : memref<16x128xf32, #tpu.memory_space<vmem>>, vector<16x128xf32>
    %cst_18 = arith.constant 1.500000e+30 : f32
    %35 = vector.broadcast %cst_18 : f32 to vector<16x128xf32>
    %36 = arith.cmpf ogt, %34, %35 : vector<16x128xf32>
    %cst_19 = arith.constant -1.000000e+01 : f32
    %37 = vector.broadcast %cst_19 : f32 to vector<16x128xf32>
    %38 = arith.mulf %37, %27 : vector<16x128xf32>
    %39 = math.exp %38 : vector<16x128xf32>
    %cst_20 = arith.constant 0.000000e+00 : f32
    %40 = vector.broadcast %cst_20 : f32 to vector<16x128xf32>
    %41 = arith.select %36, %39, %40 : vector<16x128xi1>, vector<16x128xf32>
    %cst_21 = arith.constant 1.000000e+00 : f32
    %42 = vector.broadcast %cst_21 : f32 to vector<16x1xf32>
    %43 = arith.maximumf %33, %42 : vector<16x1xf32>
    %cst_22 = arith.constant 1.000000e+00 : f32
    %44 = vector.broadcast %cst_22 : f32 to vector<16x1xf32>
    %45 = arith.divf %44, %43 : vector<16x1xf32>
    %cst_23 = arith.constant 0.000000e+00 : f32
    %46 = vector.broadcast %cst_23 : f32 to vector<16x1xf32>
    %47 = arith.cmpf ogt, %33, %46 : vector<16x1xf32>
    %48 = arith.truncf %41 : vector<16x128xf32> to vector<16x128xbf16>
    %c0_24 = arith.constant 0 : index
    %c0_25 = arith.constant 0 : index
    %49 = vector.load %arg5[%c0_24, %c0_25] : memref<128x16xbf16, #tpu.memory_space<vmem>>, vector<128x16xbf16>
    %cst_26 = arith.constant dense<0.000000e+00> : vector<16x16xf32>
    %50 = tpu.matmul %48, %49, %cst_26 {dimension_numbers = #tpu.dot_dimension_numbers<[1], [0], [0], [1], [0, 0, 1, 1], [], []>} : vector<16x128xbf16>, vector<128x16xbf16>, vector<16x16xf32> -> vector<16x16xf32>
    %51 = vector.broadcast %45 : vector<16x1xf32> to vector<16x16xf32>
    %52 = arith.mulf %50, %51 : vector<16x16xf32>
    %cst_27 = arith.constant 0.000000e+00 : f32
    %cst_28 = arith.constant -1.000000e+30 : f32
    %53 = vector.broadcast %cst_27 : f32 to vector<16x128xf32>
    %54 = vector.broadcast %cst_28 : f32 to vector<16x128xf32>
    %55 = arith.select %36, %53, %54 : vector<16x128xi1>, vector<16x128xf32>
    %56 = tpu.iota {dimensions = array<i32: 1>} : vector<16x16xi32>
    %cst_29 = arith.constant 0.000000e+00 : f32
    %57 = vector.broadcast %cst_29 : f32 to vector<16x16xf32>
    %c0_30 = arith.constant 0 : index
    %c0_31 = arith.constant 0 : index
    %58 = vector.load %arg6[%c0_30, %c0_31] : memref<16x128xf32, #tpu.memory_space<vmem>>, vector<1x128xf32>
    %59 = vector.broadcast %58 : vector<1x128xf32> to vector<16x128xf32>
    %60 = arith.mulf %41, %59 : vector<16x128xf32>
    %61 = arith.addf %60, %55 : vector<16x128xf32>
    %cst_32 = arith.constant dense<0xFF800000> : vector<16xf32>
    %62 = vector.multi_reduction <maximumf>, %61, %cst_32 [1] : vector<16x128xf32> to vector<16xf32>
    %63 = vector.shape_cast %62 : vector<16xf32> to vector<16x1xf32>
    %cst_33 = arith.constant 0.000000e+00 : f32
    %64 = vector.broadcast %cst_33 : f32 to vector<16x1xf32>
    %65 = arith.select %47, %63, %64 : vector<16x1xi1>, vector<16x1xf32>
    %c0_i32_34 = arith.constant 0 : i32
    %66 = vector.broadcast %c0_i32_34 : i32 to vector<16x16xi32>
    %67 = arith.cmpi eq, %56, %66 : vector<16x16xi32>
    %68 = vector.shape_cast %65 : vector<16x1xf32> to vector<16x1xf32>
    %69 = vector.broadcast %68 : vector<16x1xf32> to vector<16x16xf32>
    %70 = arith.select %67, %69, %57 : vector<16x16xi1>, vector<16x16xf32>
    %c1 = arith.constant 1 : index
    %c0_35 = arith.constant 0 : index
    %71 = vector.load %arg6[%c1, %c0_35] : memref<16x128xf32, #tpu.memory_space<vmem>>, vector<1x128xf32>
    %72 = vector.broadcast %71 : vector<1x128xf32> to vector<16x128xf32>
    %73 = arith.mulf %41, %72 : vector<16x128xf32>
    %74 = arith.addf %73, %55 : vector<16x128xf32>
    %cst_36 = arith.constant dense<0xFF800000> : vector<16xf32>
    %75 = vector.multi_reduction <maximumf>, %74, %cst_36 [1] : vector<16x128xf32> to vector<16xf32>
    %76 = vector.shape_cast %75 : vector<16xf32> to vector<16x1xf32>
    %cst_37 = arith.constant 0.000000e+00 : f32
    %77 = vector.broadcast %cst_37 : f32 to vector<16x1xf32>
    %78 = arith.select %47, %76, %77 : vector<16x1xi1>, vector<16x1xf32>
    %c1_i32_38 = arith.constant 1 : i32
    %79 = vector.broadcast %c1_i32_38 : i32 to vector<16x16xi32>
    %80 = arith.cmpi eq, %56, %79 : vector<16x16xi32>
    %81 = vector.shape_cast %78 : vector<16x1xf32> to vector<16x1xf32>
    %82 = vector.broadcast %81 : vector<16x1xf32> to vector<16x16xf32>
    %83 = arith.select %80, %82, %70 : vector<16x16xi1>, vector<16x16xf32>
    %c2 = arith.constant 2 : index
    %c0_39 = arith.constant 0 : index
    %84 = vector.load %arg6[%c2, %c0_39] : memref<16x128xf32, #tpu.memory_space<vmem>>, vector<1x128xf32>
    %85 = vector.broadcast %84 : vector<1x128xf32> to vector<16x128xf32>
    %86 = arith.mulf %41, %85 : vector<16x128xf32>
    %87 = arith.addf %86, %55 : vector<16x128xf32>
    %cst_40 = arith.constant dense<0xFF800000> : vector<16xf32>
    %88 = vector.multi_reduction <maximumf>, %87, %cst_40 [1] : vector<16x128xf32> to vector<16xf32>
    %89 = vector.shape_cast %88 : vector<16xf32> to vector<16x1xf32>
    %cst_41 = arith.constant 0.000000e+00 : f32
    %90 = vector.broadcast %cst_41 : f32 to vector<16x1xf32>
    %91 = arith.select %47, %89, %90 : vector<16x1xi1>, vector<16x1xf32>
    %c2_i32 = arith.constant 2 : i32
    %92 = vector.broadcast %c2_i32 : i32 to vector<16x16xi32>
    %93 = arith.cmpi eq, %56, %92 : vector<16x16xi32>
    %94 = vector.shape_cast %91 : vector<16x1xf32> to vector<16x1xf32>
    %95 = vector.broadcast %94 : vector<16x1xf32> to vector<16x16xf32>
    %96 = arith.select %93, %95, %83 : vector<16x16xi1>, vector<16x16xf32>
    %c3 = arith.constant 3 : index
    %c0_42 = arith.constant 0 : index
    %97 = vector.load %arg6[%c3, %c0_42] : memref<16x128xf32, #tpu.memory_space<vmem>>, vector<1x128xf32>
    %98 = vector.broadcast %97 : vector<1x128xf32> to vector<16x128xf32>
    %99 = arith.mulf %41, %98 : vector<16x128xf32>
    %100 = arith.addf %99, %55 : vector<16x128xf32>
    %cst_43 = arith.constant dense<0xFF800000> : vector<16xf32>
    %101 = vector.multi_reduction <maximumf>, %100, %cst_43 [1] : vector<16x128xf32> to vector<16xf32>
    %102 = vector.shape_cast %101 : vector<16xf32> to vector<16x1xf32>
    %cst_44 = arith.constant 0.000000e+00 : f32
    %103 = vector.broadcast %cst_44 : f32 to vector<16x1xf32>
    %104 = arith.select %47, %102, %103 : vector<16x1xi1>, vector<16x1xf32>
    %c3_i32 = arith.constant 3 : i32
    %105 = vector.broadcast %c3_i32 : i32 to vector<16x16xi32>
    %106 = arith.cmpi eq, %56, %105 : vector<16x16xi32>
    %107 = vector.shape_cast %104 : vector<16x1xf32> to vector<16x1xf32>
    %108 = vector.broadcast %107 : vector<16x1xf32> to vector<16x16xf32>
    %109 = arith.select %106, %108, %96 : vector<16x16xi1>, vector<16x16xf32>
    %c4 = arith.constant 4 : index
    %c0_45 = arith.constant 0 : index
    %110 = vector.load %arg6[%c4, %c0_45] : memref<16x128xf32, #tpu.memory_space<vmem>>, vector<1x128xf32>
    %111 = vector.broadcast %110 : vector<1x128xf32> to vector<16x128xf32>
    %112 = arith.mulf %41, %111 : vector<16x128xf32>
    %113 = arith.addf %112, %55 : vector<16x128xf32>
    %cst_46 = arith.constant dense<0xFF800000> : vector<16xf32>
    %114 = vector.multi_reduction <maximumf>, %113, %cst_46 [1] : vector<16x128xf32> to vector<16xf32>
    %115 = vector.shape_cast %114 : vector<16xf32> to vector<16x1xf32>
    %cst_47 = arith.constant 0.000000e+00 : f32
    %116 = vector.broadcast %cst_47 : f32 to vector<16x1xf32>
    %117 = arith.select %47, %115, %116 : vector<16x1xi1>, vector<16x1xf32>
    %c4_i32 = arith.constant 4 : i32
    %118 = vector.broadcast %c4_i32 : i32 to vector<16x16xi32>
    %119 = arith.cmpi eq, %56, %118 : vector<16x16xi32>
    %120 = vector.shape_cast %117 : vector<16x1xf32> to vector<16x1xf32>
    %121 = vector.broadcast %120 : vector<16x1xf32> to vector<16x16xf32>
    %122 = arith.select %119, %121, %109 : vector<16x16xi1>, vector<16x16xf32>
    %c5 = arith.constant 5 : index
    %c0_48 = arith.constant 0 : index
    %123 = vector.load %arg6[%c5, %c0_48] : memref<16x128xf32, #tpu.memory_space<vmem>>, vector<1x128xf32>
    %124 = vector.broadcast %123 : vector<1x128xf32> to vector<16x128xf32>
    %125 = arith.mulf %41, %124 : vector<16x128xf32>
    %126 = arith.addf %125, %55 : vector<16x128xf32>
    %cst_49 = arith.constant dense<0xFF800000> : vector<16xf32>
    %127 = vector.multi_reduction <maximumf>, %126, %cst_49 [1] : vector<16x128xf32> to vector<16xf32>
    %128 = vector.shape_cast %127 : vector<16xf32> to vector<16x1xf32>
    %cst_50 = arith.constant 0.000000e+00 : f32
    %129 = vector.broadcast %cst_50 : f32 to vector<16x1xf32>
    %130 = arith.select %47, %128, %129 : vector<16x1xi1>, vector<16x1xf32>
    %c5_i32 = arith.constant 5 : i32
    %131 = vector.broadcast %c5_i32 : i32 to vector<16x16xi32>
    %132 = arith.cmpi eq, %56, %131 : vector<16x16xi32>
    %133 = vector.shape_cast %130 : vector<16x1xf32> to vector<16x1xf32>
    %134 = vector.broadcast %133 : vector<16x1xf32> to vector<16x16xf32>
    %135 = arith.select %132, %134, %122 : vector<16x16xi1>, vector<16x16xf32>
    %c6 = arith.constant 6 : index
    %c0_51 = arith.constant 0 : index
    %136 = vector.load %arg6[%c6, %c0_51] : memref<16x128xf32, #tpu.memory_space<vmem>>, vector<1x128xf32>
    %137 = vector.broadcast %136 : vector<1x128xf32> to vector<16x128xf32>
    %138 = arith.mulf %41, %137 : vector<16x128xf32>
    %139 = arith.addf %138, %55 : vector<16x128xf32>
    %cst_52 = arith.constant dense<0xFF800000> : vector<16xf32>
    %140 = vector.multi_reduction <maximumf>, %139, %cst_52 [1] : vector<16x128xf32> to vector<16xf32>
    %141 = vector.shape_cast %140 : vector<16xf32> to vector<16x1xf32>
    %cst_53 = arith.constant 0.000000e+00 : f32
    %142 = vector.broadcast %cst_53 : f32 to vector<16x1xf32>
    %143 = arith.select %47, %141, %142 : vector<16x1xi1>, vector<16x1xf32>
    %c6_i32 = arith.constant 6 : i32
    %144 = vector.broadcast %c6_i32 : i32 to vector<16x16xi32>
    %145 = arith.cmpi eq, %56, %144 : vector<16x16xi32>
    %146 = vector.shape_cast %143 : vector<16x1xf32> to vector<16x1xf32>
    %147 = vector.broadcast %146 : vector<16x1xf32> to vector<16x16xf32>
    %148 = arith.select %145, %147, %135 : vector<16x16xi1>, vector<16x16xf32>
    %c7 = arith.constant 7 : index
    %c0_54 = arith.constant 0 : index
    %149 = vector.load %arg6[%c7, %c0_54] : memref<16x128xf32, #tpu.memory_space<vmem>>, vector<1x128xf32>
    %150 = vector.broadcast %149 : vector<1x128xf32> to vector<16x128xf32>
    %151 = arith.mulf %41, %150 : vector<16x128xf32>
    %152 = arith.addf %151, %55 : vector<16x128xf32>
    %cst_55 = arith.constant dense<0xFF800000> : vector<16xf32>
    %153 = vector.multi_reduction <maximumf>, %152, %cst_55 [1] : vector<16x128xf32> to vector<16xf32>
    %154 = vector.shape_cast %153 : vector<16xf32> to vector<16x1xf32>
    %cst_56 = arith.constant 0.000000e+00 : f32
    %155 = vector.broadcast %cst_56 : f32 to vector<16x1xf32>
    %156 = arith.select %47, %154, %155 : vector<16x1xi1>, vector<16x1xf32>
    %c7_i32 = arith.constant 7 : i32
    %157 = vector.broadcast %c7_i32 : i32 to vector<16x16xi32>
    %158 = arith.cmpi eq, %56, %157 : vector<16x16xi32>
    %159 = vector.shape_cast %156 : vector<16x1xf32> to vector<16x1xf32>
    %160 = vector.broadcast %159 : vector<16x1xf32> to vector<16x16xf32>
    %161 = arith.select %158, %160, %148 : vector<16x16xi1>, vector<16x16xf32>
    %c8 = arith.constant 8 : index
    %c0_57 = arith.constant 0 : index
    %162 = vector.load %arg6[%c8, %c0_57] : memref<16x128xf32, #tpu.memory_space<vmem>>, vector<1x128xf32>
    %163 = vector.broadcast %162 : vector<1x128xf32> to vector<16x128xf32>
    %164 = arith.mulf %41, %163 : vector<16x128xf32>
    %165 = arith.addf %164, %55 : vector<16x128xf32>
    %cst_58 = arith.constant dense<0xFF800000> : vector<16xf32>
    %166 = vector.multi_reduction <maximumf>, %165, %cst_58 [1] : vector<16x128xf32> to vector<16xf32>
    %167 = vector.shape_cast %166 : vector<16xf32> to vector<16x1xf32>
    %cst_59 = arith.constant 0.000000e+00 : f32
    %168 = vector.broadcast %cst_59 : f32 to vector<16x1xf32>
    %169 = arith.select %47, %167, %168 : vector<16x1xi1>, vector<16x1xf32>
    %c8_i32 = arith.constant 8 : i32
    %170 = vector.broadcast %c8_i32 : i32 to vector<16x16xi32>
    %171 = arith.cmpi eq, %56, %170 : vector<16x16xi32>
    %172 = vector.shape_cast %169 : vector<16x1xf32> to vector<16x1xf32>
    %173 = vector.broadcast %172 : vector<16x1xf32> to vector<16x16xf32>
    %174 = arith.select %171, %173, %161 : vector<16x16xi1>, vector<16x16xf32>
    %c9 = arith.constant 9 : index
    %c0_60 = arith.constant 0 : index
    %175 = vector.load %arg6[%c9, %c0_60] : memref<16x128xf32, #tpu.memory_space<vmem>>, vector<1x128xf32>
    %176 = vector.broadcast %175 : vector<1x128xf32> to vector<16x128xf32>
    %177 = arith.mulf %41, %176 : vector<16x128xf32>
    %178 = arith.addf %177, %55 : vector<16x128xf32>
    %cst_61 = arith.constant dense<0xFF800000> : vector<16xf32>
    %179 = vector.multi_reduction <maximumf>, %178, %cst_61 [1] : vector<16x128xf32> to vector<16xf32>
    %180 = vector.shape_cast %179 : vector<16xf32> to vector<16x1xf32>
    %cst_62 = arith.constant 0.000000e+00 : f32
    %181 = vector.broadcast %cst_62 : f32 to vector<16x1xf32>
    %182 = arith.select %47, %180, %181 : vector<16x1xi1>, vector<16x1xf32>
    %c9_i32 = arith.constant 9 : i32
    %183 = vector.broadcast %c9_i32 : i32 to vector<16x16xi32>
    %184 = arith.cmpi eq, %56, %183 : vector<16x16xi32>
    %185 = vector.shape_cast %182 : vector<16x1xf32> to vector<16x1xf32>
    %186 = vector.broadcast %185 : vector<16x1xf32> to vector<16x16xf32>
    %187 = arith.select %184, %186, %174 : vector<16x16xi1>, vector<16x16xf32>
    %c10 = arith.constant 10 : index
    %c0_63 = arith.constant 0 : index
    %188 = vector.load %arg6[%c10, %c0_63] : memref<16x128xf32, #tpu.memory_space<vmem>>, vector<1x128xf32>
    %189 = vector.broadcast %188 : vector<1x128xf32> to vector<16x128xf32>
    %190 = arith.mulf %41, %189 : vector<16x128xf32>
    %191 = arith.addf %190, %55 : vector<16x128xf32>
    %cst_64 = arith.constant dense<0xFF800000> : vector<16xf32>
    %192 = vector.multi_reduction <maximumf>, %191, %cst_64 [1] : vector<16x128xf32> to vector<16xf32>
    %193 = vector.shape_cast %192 : vector<16xf32> to vector<16x1xf32>
    %cst_65 = arith.constant 0.000000e+00 : f32
    %194 = vector.broadcast %cst_65 : f32 to vector<16x1xf32>
    %195 = arith.select %47, %193, %194 : vector<16x1xi1>, vector<16x1xf32>
    %c10_i32 = arith.constant 10 : i32
    %196 = vector.broadcast %c10_i32 : i32 to vector<16x16xi32>
    %197 = arith.cmpi eq, %56, %196 : vector<16x16xi32>
    %198 = vector.shape_cast %195 : vector<16x1xf32> to vector<16x1xf32>
    %199 = vector.broadcast %198 : vector<16x1xf32> to vector<16x16xf32>
    %200 = arith.select %197, %199, %187 : vector<16x16xi1>, vector<16x16xf32>
    %c11 = arith.constant 11 : index
    %c0_66 = arith.constant 0 : index
    %201 = vector.load %arg6[%c11, %c0_66] : memref<16x128xf32, #tpu.memory_space<vmem>>, vector<1x128xf32>
    %202 = vector.broadcast %201 : vector<1x128xf32> to vector<16x128xf32>
    %203 = arith.mulf %41, %202 : vector<16x128xf32>
    %204 = arith.addf %203, %55 : vector<16x128xf32>
    %cst_67 = arith.constant dense<0xFF800000> : vector<16xf32>
    %205 = vector.multi_reduction <maximumf>, %204, %cst_67 [1] : vector<16x128xf32> to vector<16xf32>
    %206 = vector.shape_cast %205 : vector<16xf32> to vector<16x1xf32>
    %cst_68 = arith.constant 0.000000e+00 : f32
    %207 = vector.broadcast %cst_68 : f32 to vector<16x1xf32>
    %208 = arith.select %47, %206, %207 : vector<16x1xi1>, vector<16x1xf32>
    %c11_i32 = arith.constant 11 : i32
    %209 = vector.broadcast %c11_i32 : i32 to vector<16x16xi32>
    %210 = arith.cmpi eq, %56, %209 : vector<16x16xi32>
    %211 = vector.shape_cast %208 : vector<16x1xf32> to vector<16x1xf32>
    %212 = vector.broadcast %211 : vector<16x1xf32> to vector<16x16xf32>
    %213 = arith.select %210, %212, %200 : vector<16x16xi1>, vector<16x16xf32>
    %c0_69 = arith.constant 0 : index
    %c0_70 = arith.constant 0 : index
    %214 = vector.load %arg2[%c0_69, %c0_70] : memref<16x16xf32, #tpu.memory_space<vmem>>, vector<16x16xf32>
    %c0_71 = arith.constant 0 : index
    %c0_72 = arith.constant 0 : index
    %215 = vector.load %arg9[%c0_71, %c0_72] : memref<16x32xf32, #tpu.memory_space<vmem>>, vector<16x32xf32>
    %cst_73 = arith.constant dense<0.000000e+00> : vector<16x32xf32>
    %216 = tpu.matmul %214, %215, %cst_73 {dimension_numbers = #tpu.dot_dimension_numbers<[1], [0], [0], [1], [0, 0, 1, 1], [], []>} : vector<16x16xf32>, vector<16x32xf32>, vector<16x32xf32> -> vector<16x32xf32>
    %c0_74 = arith.constant 0 : index
    %c0_75 = arith.constant 0 : index
    %217 = vector.load %arg10[%c0_74, %c0_75] : memref<16x32xf32, #tpu.memory_space<vmem>>, vector<16x32xf32>
    %cst_76 = arith.constant dense<0.000000e+00> : vector<16x32xf32>
    %218 = tpu.matmul %52, %217, %cst_76 {dimension_numbers = #tpu.dot_dimension_numbers<[1], [0], [0], [1], [0, 0, 1, 1], [], []>} : vector<16x16xf32>, vector<16x32xf32>, vector<16x32xf32> -> vector<16x32xf32>
    %219 = arith.addf %216, %218 : vector<16x32xf32>
    %c0_77 = arith.constant 0 : index
    %c0_78 = arith.constant 0 : index
    %220 = vector.load %arg11[%c0_77, %c0_78] : memref<16x32xf32, #tpu.memory_space<vmem>>, vector<16x32xf32>
    %cst_79 = arith.constant dense<0.000000e+00> : vector<16x32xf32>
    %221 = tpu.matmul %213, %220, %cst_79 {dimension_numbers = #tpu.dot_dimension_numbers<[1], [0], [0], [1], [0, 0, 1, 1], [], []>} : vector<16x16xf32>, vector<16x32xf32>, vector<16x32xf32> -> vector<16x32xf32>
    %222 = arith.addf %219, %221 : vector<16x32xf32>
    %c0_80 = arith.constant 0 : index
    %c0_81 = arith.constant 0 : index
    %223 = vector.load %arg12[%c0_80, %c0_81] : memref<1x32xf32, #tpu.memory_space<vmem>>, vector<1x32xf32>
    %224 = vector.broadcast %223 : vector<1x32xf32> to vector<16x32xf32>
    %225 = arith.addf %222, %224 : vector<16x32xf32>
    %c0_82 = arith.constant 0 : index
    %c0_83 = arith.constant 0 : index
    %226 = vector.load %arg13[%c0_82, %c0_83] : memref<32x8xf32, #tpu.memory_space<vmem>>, vector<32x8xf32>
    %cst_84 = arith.constant dense<0.000000e+00> : vector<16x8xf32>
    %227 = tpu.matmul %225, %226, %cst_84 {dimension_numbers = #tpu.dot_dimension_numbers<[1], [0], [0], [1], [0, 0, 1, 1], [], []>} : vector<16x32xf32>, vector<32x8xf32>, vector<16x8xf32> -> vector<16x8xf32>
    %c0_85 = arith.constant 0 : index
    %c0_86 = arith.constant 0 : index
    %228 = vector.load %arg14[%c0_85, %c0_86] : memref<8x8xf32, #tpu.memory_space<vmem>>, vector<8x8xf32>
    %cst_87 = arith.constant dense<0.000000e+00> : vector<16x8xf32>
    %229 = tpu.matmul %0, %228, %cst_87 {dimension_numbers = #tpu.dot_dimension_numbers<[1], [0], [0], [1], [0, 0, 1, 1], [], []>} : vector<16x8xf32>, vector<8x8xf32>, vector<16x8xf32> -> vector<16x8xf32>
    %230 = arith.addf %227, %229 : vector<16x8xf32>
    %c0_88 = arith.constant 0 : index
    %c0_89 = arith.constant 0 : index
    %231 = vector.load %arg15[%c0_88, %c0_89] : memref<1x8xf32, #tpu.memory_space<vmem>>, vector<1x8xf32>
    %232 = vector.broadcast %231 : vector<1x8xf32> to vector<16x8xf32>
    %233 = arith.addf %230, %232 : vector<16x8xf32>
    %cst_90 = arith.constant 0.000000e+00 : f32
    %234 = vector.broadcast %cst_90 : f32 to vector<16x8xf32>
    %235 = arith.cmpf ogt, %233, %234 : vector<16x8xf32>
    %cst_91 = arith.constant 0.000000e+00 : f32
    %236 = vector.broadcast %cst_91 : f32 to vector<16x8xf32>
    %237 = arith.minimumf %233, %236 : vector<16x8xf32>
    %238 = math.exp %237 : vector<16x8xf32>
    %cst_92 = arith.constant 1.000000e+00 : f32
    %239 = vector.broadcast %cst_92 : f32 to vector<16x8xf32>
    %240 = arith.subf %238, %239 : vector<16x8xf32>
    %241 = arith.select %235, %233, %240 : vector<16x8xi1>, vector<16x8xf32>
    %c0_93 = arith.constant 0 : index
    %c0_94 = arith.constant 0 : index
    %242 = vector.load %arg16[%c0_93, %c0_94] : memref<8x8xf32, #tpu.memory_space<vmem>>, vector<8x8xf32>
    %cst_95 = arith.constant dense<0.000000e+00> : vector<16x8xf32>
    %243 = tpu.matmul %241, %242, %cst_95 {dimension_numbers = #tpu.dot_dimension_numbers<[1], [0], [0], [1], [0, 0, 1, 1], [], []>} : vector<16x8xf32>, vector<8x8xf32>, vector<16x8xf32> -> vector<16x8xf32>
    %c0_96 = arith.constant 0 : index
    %c0_97 = arith.constant 0 : index
    %244 = vector.load %arg17[%c0_96, %c0_97] : memref<1x8xf32, #tpu.memory_space<vmem>>, vector<1x8xf32>
    %245 = vector.broadcast %244 : vector<1x8xf32> to vector<16x8xf32>
    %246 = arith.addf %243, %245 : vector<16x8xf32>
    %cst_98 = arith.constant 0.000000e+00 : f32
    %247 = vector.broadcast %cst_98 : f32 to vector<16x8xf32>
    %248 = arith.cmpf ogt, %246, %247 : vector<16x8xf32>
    %cst_99 = arith.constant 0.000000e+00 : f32
    %249 = vector.broadcast %cst_99 : f32 to vector<16x8xf32>
    %250 = arith.minimumf %246, %249 : vector<16x8xf32>
    %251 = math.exp %250 : vector<16x8xf32>
    %cst_100 = arith.constant 1.000000e+00 : f32
    %252 = vector.broadcast %cst_100 : f32 to vector<16x8xf32>
    %253 = arith.subf %251, %252 : vector<16x8xf32>
    %254 = arith.select %248, %246, %253 : vector<16x8xi1>, vector<16x8xf32>
    %c0_101 = arith.constant 0 : index
    %c0_102 = arith.constant 0 : index
    %255 = vector.load %arg18[%c0_101, %c0_102] : memref<16x8xf32, #tpu.memory_space<vmem>>, vector<16x8xf32>
    tpu.vector_store %arg18[%c0_101, %c0_102], %254 {strides = array<i32>} : memref<16x8xf32, #tpu.memory_space<vmem>>, vector<16x8xf32>,
    return
  }
  func.func @transform_0(%arg0: i32, %arg1: memref<1xi32, #tpu.memory_space<smem>>) -> (i32, i32) {
    %c0_i32 = arith.constant 0 : i32
    %c0_i32_0 = arith.constant 0 : i32
    return %arg0, %c0_i32 : i32, i32
  }
  func.func @transform_1(%arg0: i32, %arg1: memref<1xi32, #tpu.memory_space<smem>>) -> (i32, i32) {
    %c0_i32 = arith.constant 0 : i32
    %c0_i32_0 = arith.constant 0 : i32
    return %arg0, %c0_i32 : i32, i32
  }
  func.func @transform_2(%arg0: i32, %arg1: memref<1xi32, #tpu.memory_space<smem>>) -> (i32, i32) {
    %c0_i32 = arith.constant 0 : i32
    %c0_i32_0 = arith.constant 0 : i32
    %c0_i32_1 = arith.constant 0 : i32
    return %c0_i32, %c0_i32_0 : i32, i32
  }
  func.func @transform_3(%arg0: i32, %arg1: memref<1xi32, #tpu.memory_space<smem>>) -> (i32, i32) {
    %c0_i32 = arith.constant 0 : i32
    %c0_i32_0 = arith.constant 0 : i32
    %c0_i32_1 = arith.constant 0 : i32
    return %c0_i32, %c0_i32_0 : i32, i32
  }
  func.func @transform_4(%arg0: i32, %arg1: memref<1xi32, #tpu.memory_space<smem>>) -> (i32, i32) {
    %c0_i32 = arith.constant 0 : i32
    %c0_i32_0 = arith.constant 0 : i32
    %c0_i32_1 = arith.constant 0 : i32
    return %c0_i32, %c0_i32_0 : i32, i32
  }
  func.func @transform_5(%arg0: i32, %arg1: memref<1xi32, #tpu.memory_space<smem>>) -> (i32, i32) {
    %c0_i32 = arith.constant 0 : i32
    %c0_i32_0 = arith.constant 0 : i32
    return %arg0, %c0_i32 : i32, i32
  }
  func.func @transform_6(%arg0: i32, %arg1: memref<1xi32, #tpu.memory_space<smem>>) -> (i32, i32) {
    %c0_i32 = arith.constant 0 : i32
    %c0_i32_0 = arith.constant 0 : i32
    %c0_i32_1 = arith.constant 0 : i32
    return %c0_i32, %c0_i32_0 : i32, i32
  }
  func.func @transform_7(%arg0: i32, %arg1: memref<1xi32, #tpu.memory_space<smem>>) -> (i32, i32) {
    %c0_i32 = arith.constant 0 : i32
    %c0_i32_0 = arith.constant 0 : i32
    %c0_i32_1 = arith.constant 0 : i32
    return %c0_i32, %c0_i32_0 : i32, i32
  }
  func.func @transform_8(%arg0: i32, %arg1: memref<1xi32, #tpu.memory_space<smem>>) -> (i32, i32) {
    %c0_i32 = arith.constant 0 : i32
    %c0_i32_0 = arith.constant 0 : i32
    %c0_i32_1 = arith.constant 0 : i32
    return %c0_i32, %c0_i32_0 : i32, i32
  }
  func.func @transform_9(%arg0: i32, %arg1: memref<1xi32, #tpu.memory_space<smem>>) -> (i32, i32) {
    %c0_i32 = arith.constant 0 : i32
    %c0_i32_0 = arith.constant 0 : i32
    %c0_i32_1 = arith.constant 0 : i32
    return %c0_i32, %c0_i32_0 : i32, i32
  }
  func.func @transform_10(%arg0: i32, %arg1: memref<1xi32, #tpu.memory_space<smem>>) -> (i32, i32) {
    %c0_i32 = arith.constant 0 : i32
    %c0_i32_0 = arith.constant 0 : i32
    %c0_i32_1 = arith.constant 0 : i32
    return %c0_i32, %c0_i32_0 : i32, i32
  }
  func.func @transform_11(%arg0: i32, %arg1: memref<1xi32, #tpu.memory_space<smem>>) -> (i32, i32) {
    %c0_i32 = arith.constant 0 : i32
    %c0_i32_0 = arith.constant 0 : i32
    %c0_i32_1 = arith.constant 0 : i32
    return %c0_i32, %c0_i32_0 : i32, i32
  }
  func.func @transform_12(%arg0: i32, %arg1: memref<1xi32, #tpu.memory_space<smem>>) -> (i32, i32) {
    %c0_i32 = arith.constant 0 : i32
    %c0_i32_0 = arith.constant 0 : i32
    %c0_i32_1 = arith.constant 0 : i32
    return %c0_i32, %c0_i32_0 : i32, i32
  }
  func.func @transform_13(%arg0: i32, %arg1: memref<1xi32, #tpu.memory_space<smem>>) -> (i32, i32) {
    %c0_i32 = arith.constant 0 : i32
    %c0_i32_0 = arith.constant 0 : i32
    %c0_i32_1 = arith.constant 0 : i32
    return %c0_i32, %c0_i32_0 : i32, i32
  }
  func.func @transform_14(%arg0: i32, %arg1: memref<1xi32, #tpu.memory_space<smem>>) -> (i32, i32) {
    %c0_i32 = arith.constant 0 : i32
    %c0_i32_0 = arith.constant 0 : i32
    %c0_i32_1 = arith.constant 0 : i32
    return %c0_i32, %c0_i32_0 : i32, i32
  }
  func.func @transform_15(%arg0: i32, %arg1: memref<1xi32, #tpu.memory_space<smem>>) -> (i32, i32) {
    %c0_i32 = arith.constant 0 : i32
    %c0_i32_0 = arith.constant 0 : i32
    %c0_i32_1 = arith.constant 0 : i32
    return %c0_i32, %c0_i32_0 : i32, i32
  }
  func.func @transform_16(%arg0: i32, %arg1: memref<1xi32, #tpu.memory_space<smem>>) -> (i32, i32) {
    %c0_i32 = arith.constant 0 : i32
    %c0_i32_0 = arith.constant 0 : i32
    return %arg0, %c0_i32 : i32, i32
  }
}

module attributes {stable_mosaic.version = 11 : i64} {
  func.func @_gravnet_conv_kernel(%arg0: i32, %arg1: memref<1xi32, #tpu.memory_space<smem>>, %arg2: memref<16x8xf32, #tpu.memory_space<vmem>>, %arg3: memref<16x8xf32, #tpu.memory_space<vmem>>, %arg4: memref<8x128xf32, #tpu.memory_space<vmem>>, %arg5: memref<128x16xbf16, #tpu.memory_space<vmem>>, %arg6: memref<16x128xf32, #tpu.memory_space<vmem>>, %arg7: memref<16x1xi32, #tpu.memory_space<vmem>>, %arg8: memref<1x128xi32, #tpu.memory_space<vmem>>, %arg9: memref<8x32xf32, #tpu.memory_space<vmem>>, %arg10: memref<16x32xf32, #tpu.memory_space<vmem>>, %arg11: memref<16x32xf32, #tpu.memory_space<vmem>>, %arg12: memref<1x32xf32, #tpu.memory_space<vmem>>, %arg13: memref<32x8xf32, #tpu.memory_space<vmem>>, %arg14: memref<8x8xf32, #tpu.memory_space<vmem>>, %arg15: memref<1x8xf32, #tpu.memory_space<vmem>>, %arg16: memref<8x8xf32, #tpu.memory_space<vmem>>, %arg17: memref<1x8xf32, #tpu.memory_space<vmem>>, %arg18: memref<16x8xf32, #tpu.memory_space<vmem>>, %arg19: memref<16x128xf32, #tpu.memory_space<vmem>>) attributes {dimension_semantics = [#tpu.dimension_semantics<parallel>], iteration_bounds = array<i64: 2>, scalar_prefetch = 1 : i64, scratch_operands = 1 : i64, tpu.core_type = #tpu.core_type<tc>, window_params = [{transform_indices = @transform_0, window_bounds = array<i64: 16, 8>}, {transform_indices = @transform_1, window_bounds = array<i64: 16, 8>}, {pipeline_mode = #tpu.pipeline_mode<synchronous>, transform_indices = @transform_2, window_bounds = array<i64: 8, 128>}, {pipeline_mode = #tpu.pipeline_mode<synchronous>, transform_indices = @transform_3, window_bounds = array<i64: 128, 16>}, {pipeline_mode = #tpu.pipeline_mode<synchronous>, transform_indices = @transform_4, window_bounds = array<i64: 16, 128>}, {transform_indices = @transform_5, window_bounds = array<i64: 16, 1>}, {pipeline_mode = #tpu.pipeline_mode<synchronous>, transform_indices = @transform_6, window_bounds = array<i64: 1, 128>}, {pipeline_mode = #tpu.pipeline_mode<synchronous>, transform_indices = @transform_7, window_bounds = array<i64: 8, 32>}, {pipeline_mode = #tpu.pipeline_mode<synchronous>, transform_indices = @transform_8, window_bounds = array<i64: 16, 32>}, {pipeline_mode = #tpu.pipeline_mode<synchronous>, transform_indices = @transform_9, window_bounds = array<i64: 16, 32>}, {pipeline_mode = #tpu.pipeline_mode<synchronous>, transform_indices = @transform_10, window_bounds = array<i64: 1, 32>}, {pipeline_mode = #tpu.pipeline_mode<synchronous>, transform_indices = @transform_11, window_bounds = array<i64: 32, 8>}, {pipeline_mode = #tpu.pipeline_mode<synchronous>, transform_indices = @transform_12, window_bounds = array<i64: 8, 8>}, {pipeline_mode = #tpu.pipeline_mode<synchronous>, transform_indices = @transform_13, window_bounds = array<i64: 1, 8>}, {pipeline_mode = #tpu.pipeline_mode<synchronous>, transform_indices = @transform_14, window_bounds = array<i64: 8, 8>}, {pipeline_mode = #tpu.pipeline_mode<synchronous>, transform_indices = @transform_15, window_bounds = array<i64: 1, 8>}, {transform_indices = @transform_16, window_bounds = array<i64: 16, 8>}]} {
    %c0 = arith.constant 0 : index
    %c0_0 = arith.constant 0 : index
    %0 = vector.load %arg3[%c0, %c0_0] : memref<16x8xf32, #tpu.memory_space<vmem>>, vector<16x8xf32>
    %c0_1 = arith.constant 0 : index
    %c0_2 = arith.constant 0 : index
    %1 = vector.load %arg4[%c0_1, %c0_2] : memref<8x128xf32, #tpu.memory_space<vmem>>, vector<8x128xf32>
    %c0_3 = arith.constant 0 : index
    %c0_4 = arith.constant 0 : index
    %2 = vector.load %arg7[%c0_3, %c0_4] : memref<16x1xi32, #tpu.memory_space<vmem>>, vector<16x1xi32>
    %c0_5 = arith.constant 0 : index
    %c0_6 = arith.constant 0 : index
    %3 = vector.load %arg8[%c0_5, %c0_6] : memref<1x128xi32, #tpu.memory_space<vmem>>, vector<1x128xi32>
    %4 = arith.mulf %0, %0 : vector<16x8xf32>
    %cst = arith.constant dense<0.000000e+00> : vector<16xf32>
    %5 = vector.multi_reduction <add>, %4, %cst [1] : vector<16x8xf32> to vector<16xf32>
    %6 = vector.shape_cast %5 : vector<16xf32> to vector<16x1xf32>
    %7 = arith.mulf %1, %1 : vector<8x128xf32>
    %cst_7 = arith.constant dense<0.000000e+00> : vector<128xf32>
    %8 = vector.multi_reduction <add>, %7, %cst_7 [0] : vector<8x128xf32> to vector<128xf32>
    %9 = vector.shape_cast %8 : vector<128xf32> to vector<1x128xf32>
    %cst_8 = arith.constant dense<0.000000e+00> : vector<16x128xf32>
    %10 = tpu.matmul %0, %1, %cst_8 {dimension_numbers = #tpu.dot_dimension_numbers<[1], [0], [0], [1], [0, 0, 1, 1], [], []>} : vector<16x8xf32>, vector<8x128xf32>, vector<16x128xf32> -> vector<16x128xf32>
    %11 = vector.broadcast %6 : vector<16x1xf32> to vector<16x128xf32>
    %12 = vector.broadcast %9 : vector<1x128xf32> to vector<16x128xf32>
    %13 = arith.addf %11, %12 : vector<16x128xf32>
    %cst_9 = arith.constant 2.000000e+00 : f32
    %14 = vector.broadcast %cst_9 : f32 to vector<16x128xf32>
    %15 = arith.mulf %14, %10 : vector<16x128xf32>
    %16 = arith.subf %13, %15 : vector<16x128xf32>
    %cst_10 = arith.constant 0.000000e+00 : f32
    %17 = vector.broadcast %cst_10 : f32 to vector<16x128xf32>
    %18 = arith.maximumf %16, %17 : vector<16x128xf32>
    %19 = vector.broadcast %2 : vector<16x1xi32> to vector<16x128xi32>
    %20 = vector.broadcast %3 : vector<1x128xi32> to vector<16x128xi32>
    %21 = arith.cmpi eq, %19, %20 : vector<16x128xi32>
    %c0_i32 = arith.constant 0 : i32
    %22 = vector.broadcast %c0_i32 : i32 to vector<16x1xi32>
    %23 = arith.cmpi sge, %2, %22 : vector<16x1xi32>
    %24 = vector.broadcast %23 : vector<16x1xi1> to vector<16x128xi1>
    %25 = arith.andi %21, %24 : vector<16x128xi1>
    %cst_11 = arith.constant 1.000000e+30 : f32
    %26 = vector.broadcast %cst_11 : f32 to vector<16x128xf32>
    %27 = arith.select %25, %18, %26 : vector<16x128xi1>, vector<16x128xf32>
    %28 = tpu.iota {dimensions = array<i32: 1>} : vector<1x128xi32>
    %29 = arith.sitofp %28 : vector<1x128xi32> to vector<1x128xf32>
    %c0_12 = arith.constant 0 : index
    %c0_13 = arith.constant 0 : index
    %30 = vector.load %arg19[%c0_12, %c0_13] : memref<16x128xf32, #tpu.memory_space<vmem>>, vector<16x128xf32>
    tpu.vector_store %arg19[%c0_12, %c0_13], %27 {strides = array<i32>} : memref<16x128xf32, #tpu.memory_space<vmem>>, vector<16x128xf32>,
    %cst_14 = arith.constant 0.000000e+00 : f32
    %31 = vector.broadcast %cst_14 : f32 to vector<16x1xf32>
    %c0_15 = arith.constant 0 : index
    %32 = memref.load %arg1[%c0_15] : memref<1xi32, #tpu.memory_space<smem>>
    %c0_i32_16 = arith.constant 0 : i32
    %33 = arith.subi %32, %c0_i32_16 : i32
    %34 = arith.addi %c0_i32_16, %33 : i32
    %c1_i32 = arith.constant 1 : i32
    %35 = scf.for %arg20 = %c0_i32_16 to %34 step %c1_i32 iter_args(%arg21 = %31) -> (vector<16x1xf32>)  : i32 {
      %c0_104 = arith.constant 0 : index
      %c0_105 = arith.constant 0 : index
      %258 = vector.load %arg19[%c0_104, %c0_105] : memref<16x128xf32, #tpu.memory_space<vmem>>, vector<16x128xf32>
      %cst_106 = arith.constant dense<0x7F800000> : vector<16xf32>
      %259 = vector.multi_reduction <minimumf>, %258, %cst_106 [1] : vector<16x128xf32> to vector<16xf32>
      %260 = vector.shape_cast %259 : vector<16xf32> to vector<16x1xf32>
      %cst_107 = arith.constant 5.000000e+29 : f32
      %261 = vector.broadcast %cst_107 : f32 to vector<16x1xf32>
      %262 = arith.cmpf olt, %260, %261 : vector<16x1xf32>
      %263 = vector.broadcast %260 : vector<16x1xf32> to vector<16x128xf32>
      %264 = arith.cmpf ole, %258, %263 : vector<16x128xf32>
      %cst_108 = arith.constant 1.280000e+02 : f32
      %265 = vector.shape_cast %29 : vector<1x128xf32> to vector<1x128xf32>
      %266 = vector.broadcast %265 : vector<1x128xf32> to vector<16x128xf32>
      %267 = vector.broadcast %cst_108 : f32 to vector<16x128xf32>
      %268 = arith.select %264, %266, %267 : vector<16x128xi1>, vector<16x128xf32>
      %cst_109 = arith.constant dense<0x7F800000> : vector<16xf32>
      %269 = vector.multi_reduction <minimumf>, %268, %cst_109 [1] : vector<16x128xf32> to vector<16xf32>
      %270 = vector.shape_cast %269 : vector<16xf32> to vector<16x1xf32>
      %271 = vector.broadcast %29 : vector<1x128xf32> to vector<16x128xf32>
      %272 = vector.broadcast %270 : vector<16x1xf32> to vector<16x128xf32>
      %273 = arith.cmpf oeq, %271, %272 : vector<16x128xf32>
      %274 = vector.broadcast %262 : vector<16x1xi1> to vector<16x128xi1>
      %275 = arith.andi %273, %274 : vector<16x128xi1>
      %cst_110 = arith.constant 2.000000e+30 : f32
      %276 = vector.broadcast %cst_110 : f32 to vector<16x128xf32>
      %277 = arith.select %275, %276, %258 : vector<16x128xi1>, vector<16x128xf32>
      %c0_111 = arith.constant 0 : index
      %c0_112 = arith.constant 0 : index
      %278 = vector.load %arg19[%c0_111, %c0_112] : memref<16x128xf32, #tpu.memory_space<vmem>>, vector<16x128xf32>
      tpu.vector_store %arg19[%c0_111, %c0_112], %277 {strides = array<i32>} : memref<16x128xf32, #tpu.memory_space<vmem>>, vector<16x128xf32>,
      %279 = arith.extui %262 : vector<16x1xi1> to vector<16x1xi32>
      %280 = arith.sitofp %279 : vector<16x1xi32> to vector<16x1xf32>
      %281 = arith.addf %arg21, %280 : vector<16x1xf32>
      scf.yield %281 : vector<16x1xf32>
    }
    %c0_17 = arith.constant 0 : index
    %c0_18 = arith.constant 0 : index
    %36 = vector.load %arg19[%c0_17, %c0_18] : memref<16x128xf32, #tpu.memory_space<vmem>>, vector<16x128xf32>
    %cst_19 = arith.constant 1.500000e+30 : f32
    %37 = vector.broadcast %cst_19 : f32 to vector<16x128xf32>
    %38 = arith.cmpf ogt, %36, %37 : vector<16x128xf32>
    %cst_20 = arith.constant -1.000000e+01 : f32
    %39 = vector.broadcast %cst_20 : f32 to vector<16x128xf32>
    %40 = arith.mulf %39, %27 : vector<16x128xf32>
    %41 = math.exp %40 : vector<16x128xf32>
    %cst_21 = arith.constant 0.000000e+00 : f32
    %42 = vector.broadcast %cst_21 : f32 to vector<16x128xf32>
    %43 = arith.select %38, %41, %42 : vector<16x128xi1>, vector<16x128xf32>
    %cst_22 = arith.constant 1.000000e+00 : f32
    %44 = vector.broadcast %cst_22 : f32 to vector<16x1xf32>
    %45 = arith.maximumf %35, %44 : vector<16x1xf32>
    %cst_23 = arith.constant 1.000000e+00 : f32
    %46 = vector.broadcast %cst_23 : f32 to vector<16x1xf32>
    %47 = arith.divf %46, %45 : vector<16x1xf32>
    %cst_24 = arith.constant 0.000000e+00 : f32
    %48 = vector.broadcast %cst_24 : f32 to vector<16x1xf32>
    %49 = arith.cmpf ogt, %35, %48 : vector<16x1xf32>
    %50 = arith.truncf %43 : vector<16x128xf32> to vector<16x128xbf16>
    %c0_25 = arith.constant 0 : index
    %c0_26 = arith.constant 0 : index
    %51 = vector.load %arg5[%c0_25, %c0_26] : memref<128x16xbf16, #tpu.memory_space<vmem>>, vector<128x16xbf16>
    %cst_27 = arith.constant dense<0.000000e+00> : vector<16x16xf32>
    %52 = tpu.matmul %50, %51, %cst_27 {dimension_numbers = #tpu.dot_dimension_numbers<[1], [0], [0], [1], [0, 0, 1, 1], [], []>} : vector<16x128xbf16>, vector<128x16xbf16>, vector<16x16xf32> -> vector<16x16xf32>
    %53 = vector.broadcast %47 : vector<16x1xf32> to vector<16x16xf32>
    %54 = arith.mulf %52, %53 : vector<16x16xf32>
    %cst_28 = arith.constant 0.000000e+00 : f32
    %cst_29 = arith.constant -1.000000e+30 : f32
    %55 = vector.broadcast %cst_28 : f32 to vector<16x128xf32>
    %56 = vector.broadcast %cst_29 : f32 to vector<16x128xf32>
    %57 = arith.select %38, %55, %56 : vector<16x128xi1>, vector<16x128xf32>
    %58 = tpu.iota {dimensions = array<i32: 1>} : vector<16x16xi32>
    %cst_30 = arith.constant 0.000000e+00 : f32
    %59 = vector.broadcast %cst_30 : f32 to vector<16x16xf32>
    %c0_31 = arith.constant 0 : index
    %c0_32 = arith.constant 0 : index
    %60 = vector.load %arg6[%c0_31, %c0_32] : memref<16x128xf32, #tpu.memory_space<vmem>>, vector<1x128xf32>
    %61 = vector.broadcast %60 : vector<1x128xf32> to vector<16x128xf32>
    %62 = arith.mulf %43, %61 : vector<16x128xf32>
    %63 = arith.addf %62, %57 : vector<16x128xf32>
    %cst_33 = arith.constant dense<0xFF800000> : vector<16xf32>
    %64 = vector.multi_reduction <maximumf>, %63, %cst_33 [1] : vector<16x128xf32> to vector<16xf32>
    %65 = vector.shape_cast %64 : vector<16xf32> to vector<16x1xf32>
    %cst_34 = arith.constant 0.000000e+00 : f32
    %66 = vector.broadcast %cst_34 : f32 to vector<16x1xf32>
    %67 = arith.select %49, %65, %66 : vector<16x1xi1>, vector<16x1xf32>
    %c0_i32_35 = arith.constant 0 : i32
    %68 = vector.broadcast %c0_i32_35 : i32 to vector<16x16xi32>
    %69 = arith.cmpi eq, %58, %68 : vector<16x16xi32>
    %70 = vector.shape_cast %67 : vector<16x1xf32> to vector<16x1xf32>
    %71 = vector.broadcast %70 : vector<16x1xf32> to vector<16x16xf32>
    %72 = arith.select %69, %71, %59 : vector<16x16xi1>, vector<16x16xf32>
    %c1 = arith.constant 1 : index
    %c0_36 = arith.constant 0 : index
    %73 = vector.load %arg6[%c1, %c0_36] : memref<16x128xf32, #tpu.memory_space<vmem>>, vector<1x128xf32>
    %74 = vector.broadcast %73 : vector<1x128xf32> to vector<16x128xf32>
    %75 = arith.mulf %43, %74 : vector<16x128xf32>
    %76 = arith.addf %75, %57 : vector<16x128xf32>
    %cst_37 = arith.constant dense<0xFF800000> : vector<16xf32>
    %77 = vector.multi_reduction <maximumf>, %76, %cst_37 [1] : vector<16x128xf32> to vector<16xf32>
    %78 = vector.shape_cast %77 : vector<16xf32> to vector<16x1xf32>
    %cst_38 = arith.constant 0.000000e+00 : f32
    %79 = vector.broadcast %cst_38 : f32 to vector<16x1xf32>
    %80 = arith.select %49, %78, %79 : vector<16x1xi1>, vector<16x1xf32>
    %c1_i32_39 = arith.constant 1 : i32
    %81 = vector.broadcast %c1_i32_39 : i32 to vector<16x16xi32>
    %82 = arith.cmpi eq, %58, %81 : vector<16x16xi32>
    %83 = vector.shape_cast %80 : vector<16x1xf32> to vector<16x1xf32>
    %84 = vector.broadcast %83 : vector<16x1xf32> to vector<16x16xf32>
    %85 = arith.select %82, %84, %72 : vector<16x16xi1>, vector<16x16xf32>
    %c2 = arith.constant 2 : index
    %c0_40 = arith.constant 0 : index
    %86 = vector.load %arg6[%c2, %c0_40] : memref<16x128xf32, #tpu.memory_space<vmem>>, vector<1x128xf32>
    %87 = vector.broadcast %86 : vector<1x128xf32> to vector<16x128xf32>
    %88 = arith.mulf %43, %87 : vector<16x128xf32>
    %89 = arith.addf %88, %57 : vector<16x128xf32>
    %cst_41 = arith.constant dense<0xFF800000> : vector<16xf32>
    %90 = vector.multi_reduction <maximumf>, %89, %cst_41 [1] : vector<16x128xf32> to vector<16xf32>
    %91 = vector.shape_cast %90 : vector<16xf32> to vector<16x1xf32>
    %cst_42 = arith.constant 0.000000e+00 : f32
    %92 = vector.broadcast %cst_42 : f32 to vector<16x1xf32>
    %93 = arith.select %49, %91, %92 : vector<16x1xi1>, vector<16x1xf32>
    %c2_i32 = arith.constant 2 : i32
    %94 = vector.broadcast %c2_i32 : i32 to vector<16x16xi32>
    %95 = arith.cmpi eq, %58, %94 : vector<16x16xi32>
    %96 = vector.shape_cast %93 : vector<16x1xf32> to vector<16x1xf32>
    %97 = vector.broadcast %96 : vector<16x1xf32> to vector<16x16xf32>
    %98 = arith.select %95, %97, %85 : vector<16x16xi1>, vector<16x16xf32>
    %c3 = arith.constant 3 : index
    %c0_43 = arith.constant 0 : index
    %99 = vector.load %arg6[%c3, %c0_43] : memref<16x128xf32, #tpu.memory_space<vmem>>, vector<1x128xf32>
    %100 = vector.broadcast %99 : vector<1x128xf32> to vector<16x128xf32>
    %101 = arith.mulf %43, %100 : vector<16x128xf32>
    %102 = arith.addf %101, %57 : vector<16x128xf32>
    %cst_44 = arith.constant dense<0xFF800000> : vector<16xf32>
    %103 = vector.multi_reduction <maximumf>, %102, %cst_44 [1] : vector<16x128xf32> to vector<16xf32>
    %104 = vector.shape_cast %103 : vector<16xf32> to vector<16x1xf32>
    %cst_45 = arith.constant 0.000000e+00 : f32
    %105 = vector.broadcast %cst_45 : f32 to vector<16x1xf32>
    %106 = arith.select %49, %104, %105 : vector<16x1xi1>, vector<16x1xf32>
    %c3_i32 = arith.constant 3 : i32
    %107 = vector.broadcast %c3_i32 : i32 to vector<16x16xi32>
    %108 = arith.cmpi eq, %58, %107 : vector<16x16xi32>
    %109 = vector.shape_cast %106 : vector<16x1xf32> to vector<16x1xf32>
    %110 = vector.broadcast %109 : vector<16x1xf32> to vector<16x16xf32>
    %111 = arith.select %108, %110, %98 : vector<16x16xi1>, vector<16x16xf32>
    %c4 = arith.constant 4 : index
    %c0_46 = arith.constant 0 : index
    %112 = vector.load %arg6[%c4, %c0_46] : memref<16x128xf32, #tpu.memory_space<vmem>>, vector<1x128xf32>
    %113 = vector.broadcast %112 : vector<1x128xf32> to vector<16x128xf32>
    %114 = arith.mulf %43, %113 : vector<16x128xf32>
    %115 = arith.addf %114, %57 : vector<16x128xf32>
    %cst_47 = arith.constant dense<0xFF800000> : vector<16xf32>
    %116 = vector.multi_reduction <maximumf>, %115, %cst_47 [1] : vector<16x128xf32> to vector<16xf32>
    %117 = vector.shape_cast %116 : vector<16xf32> to vector<16x1xf32>
    %cst_48 = arith.constant 0.000000e+00 : f32
    %118 = vector.broadcast %cst_48 : f32 to vector<16x1xf32>
    %119 = arith.select %49, %117, %118 : vector<16x1xi1>, vector<16x1xf32>
    %c4_i32 = arith.constant 4 : i32
    %120 = vector.broadcast %c4_i32 : i32 to vector<16x16xi32>
    %121 = arith.cmpi eq, %58, %120 : vector<16x16xi32>
    %122 = vector.shape_cast %119 : vector<16x1xf32> to vector<16x1xf32>
    %123 = vector.broadcast %122 : vector<16x1xf32> to vector<16x16xf32>
    %124 = arith.select %121, %123, %111 : vector<16x16xi1>, vector<16x16xf32>
    %c5 = arith.constant 5 : index
    %c0_49 = arith.constant 0 : index
    %125 = vector.load %arg6[%c5, %c0_49] : memref<16x128xf32, #tpu.memory_space<vmem>>, vector<1x128xf32>
    %126 = vector.broadcast %125 : vector<1x128xf32> to vector<16x128xf32>
    %127 = arith.mulf %43, %126 : vector<16x128xf32>
    %128 = arith.addf %127, %57 : vector<16x128xf32>
    %cst_50 = arith.constant dense<0xFF800000> : vector<16xf32>
    %129 = vector.multi_reduction <maximumf>, %128, %cst_50 [1] : vector<16x128xf32> to vector<16xf32>
    %130 = vector.shape_cast %129 : vector<16xf32> to vector<16x1xf32>
    %cst_51 = arith.constant 0.000000e+00 : f32
    %131 = vector.broadcast %cst_51 : f32 to vector<16x1xf32>
    %132 = arith.select %49, %130, %131 : vector<16x1xi1>, vector<16x1xf32>
    %c5_i32 = arith.constant 5 : i32
    %133 = vector.broadcast %c5_i32 : i32 to vector<16x16xi32>
    %134 = arith.cmpi eq, %58, %133 : vector<16x16xi32>
    %135 = vector.shape_cast %132 : vector<16x1xf32> to vector<16x1xf32>
    %136 = vector.broadcast %135 : vector<16x1xf32> to vector<16x16xf32>
    %137 = arith.select %134, %136, %124 : vector<16x16xi1>, vector<16x16xf32>
    %c6 = arith.constant 6 : index
    %c0_52 = arith.constant 0 : index
    %138 = vector.load %arg6[%c6, %c0_52] : memref<16x128xf32, #tpu.memory_space<vmem>>, vector<1x128xf32>
    %139 = vector.broadcast %138 : vector<1x128xf32> to vector<16x128xf32>
    %140 = arith.mulf %43, %139 : vector<16x128xf32>
    %141 = arith.addf %140, %57 : vector<16x128xf32>
    %cst_53 = arith.constant dense<0xFF800000> : vector<16xf32>
    %142 = vector.multi_reduction <maximumf>, %141, %cst_53 [1] : vector<16x128xf32> to vector<16xf32>
    %143 = vector.shape_cast %142 : vector<16xf32> to vector<16x1xf32>
    %cst_54 = arith.constant 0.000000e+00 : f32
    %144 = vector.broadcast %cst_54 : f32 to vector<16x1xf32>
    %145 = arith.select %49, %143, %144 : vector<16x1xi1>, vector<16x1xf32>
    %c6_i32 = arith.constant 6 : i32
    %146 = vector.broadcast %c6_i32 : i32 to vector<16x16xi32>
    %147 = arith.cmpi eq, %58, %146 : vector<16x16xi32>
    %148 = vector.shape_cast %145 : vector<16x1xf32> to vector<16x1xf32>
    %149 = vector.broadcast %148 : vector<16x1xf32> to vector<16x16xf32>
    %150 = arith.select %147, %149, %137 : vector<16x16xi1>, vector<16x16xf32>
    %c7 = arith.constant 7 : index
    %c0_55 = arith.constant 0 : index
    %151 = vector.load %arg6[%c7, %c0_55] : memref<16x128xf32, #tpu.memory_space<vmem>>, vector<1x128xf32>
    %152 = vector.broadcast %151 : vector<1x128xf32> to vector<16x128xf32>
    %153 = arith.mulf %43, %152 : vector<16x128xf32>
    %154 = arith.addf %153, %57 : vector<16x128xf32>
    %cst_56 = arith.constant dense<0xFF800000> : vector<16xf32>
    %155 = vector.multi_reduction <maximumf>, %154, %cst_56 [1] : vector<16x128xf32> to vector<16xf32>
    %156 = vector.shape_cast %155 : vector<16xf32> to vector<16x1xf32>
    %cst_57 = arith.constant 0.000000e+00 : f32
    %157 = vector.broadcast %cst_57 : f32 to vector<16x1xf32>
    %158 = arith.select %49, %156, %157 : vector<16x1xi1>, vector<16x1xf32>
    %c7_i32 = arith.constant 7 : i32
    %159 = vector.broadcast %c7_i32 : i32 to vector<16x16xi32>
    %160 = arith.cmpi eq, %58, %159 : vector<16x16xi32>
    %161 = vector.shape_cast %158 : vector<16x1xf32> to vector<16x1xf32>
    %162 = vector.broadcast %161 : vector<16x1xf32> to vector<16x16xf32>
    %163 = arith.select %160, %162, %150 : vector<16x16xi1>, vector<16x16xf32>
    %c8 = arith.constant 8 : index
    %c0_58 = arith.constant 0 : index
    %164 = vector.load %arg6[%c8, %c0_58] : memref<16x128xf32, #tpu.memory_space<vmem>>, vector<1x128xf32>
    %165 = vector.broadcast %164 : vector<1x128xf32> to vector<16x128xf32>
    %166 = arith.mulf %43, %165 : vector<16x128xf32>
    %167 = arith.addf %166, %57 : vector<16x128xf32>
    %cst_59 = arith.constant dense<0xFF800000> : vector<16xf32>
    %168 = vector.multi_reduction <maximumf>, %167, %cst_59 [1] : vector<16x128xf32> to vector<16xf32>
    %169 = vector.shape_cast %168 : vector<16xf32> to vector<16x1xf32>
    %cst_60 = arith.constant 0.000000e+00 : f32
    %170 = vector.broadcast %cst_60 : f32 to vector<16x1xf32>
    %171 = arith.select %49, %169, %170 : vector<16x1xi1>, vector<16x1xf32>
    %c8_i32 = arith.constant 8 : i32
    %172 = vector.broadcast %c8_i32 : i32 to vector<16x16xi32>
    %173 = arith.cmpi eq, %58, %172 : vector<16x16xi32>
    %174 = vector.shape_cast %171 : vector<16x1xf32> to vector<16x1xf32>
    %175 = vector.broadcast %174 : vector<16x1xf32> to vector<16x16xf32>
    %176 = arith.select %173, %175, %163 : vector<16x16xi1>, vector<16x16xf32>
    %c9 = arith.constant 9 : index
    %c0_61 = arith.constant 0 : index
    %177 = vector.load %arg6[%c9, %c0_61] : memref<16x128xf32, #tpu.memory_space<vmem>>, vector<1x128xf32>
    %178 = vector.broadcast %177 : vector<1x128xf32> to vector<16x128xf32>
    %179 = arith.mulf %43, %178 : vector<16x128xf32>
    %180 = arith.addf %179, %57 : vector<16x128xf32>
    %cst_62 = arith.constant dense<0xFF800000> : vector<16xf32>
    %181 = vector.multi_reduction <maximumf>, %180, %cst_62 [1] : vector<16x128xf32> to vector<16xf32>
    %182 = vector.shape_cast %181 : vector<16xf32> to vector<16x1xf32>
    %cst_63 = arith.constant 0.000000e+00 : f32
    %183 = vector.broadcast %cst_63 : f32 to vector<16x1xf32>
    %184 = arith.select %49, %182, %183 : vector<16x1xi1>, vector<16x1xf32>
    %c9_i32 = arith.constant 9 : i32
    %185 = vector.broadcast %c9_i32 : i32 to vector<16x16xi32>
    %186 = arith.cmpi eq, %58, %185 : vector<16x16xi32>
    %187 = vector.shape_cast %184 : vector<16x1xf32> to vector<16x1xf32>
    %188 = vector.broadcast %187 : vector<16x1xf32> to vector<16x16xf32>
    %189 = arith.select %186, %188, %176 : vector<16x16xi1>, vector<16x16xf32>
    %c10 = arith.constant 10 : index
    %c0_64 = arith.constant 0 : index
    %190 = vector.load %arg6[%c10, %c0_64] : memref<16x128xf32, #tpu.memory_space<vmem>>, vector<1x128xf32>
    %191 = vector.broadcast %190 : vector<1x128xf32> to vector<16x128xf32>
    %192 = arith.mulf %43, %191 : vector<16x128xf32>
    %193 = arith.addf %192, %57 : vector<16x128xf32>
    %cst_65 = arith.constant dense<0xFF800000> : vector<16xf32>
    %194 = vector.multi_reduction <maximumf>, %193, %cst_65 [1] : vector<16x128xf32> to vector<16xf32>
    %195 = vector.shape_cast %194 : vector<16xf32> to vector<16x1xf32>
    %cst_66 = arith.constant 0.000000e+00 : f32
    %196 = vector.broadcast %cst_66 : f32 to vector<16x1xf32>
    %197 = arith.select %49, %195, %196 : vector<16x1xi1>, vector<16x1xf32>
    %c10_i32 = arith.constant 10 : i32
    %198 = vector.broadcast %c10_i32 : i32 to vector<16x16xi32>
    %199 = arith.cmpi eq, %58, %198 : vector<16x16xi32>
    %200 = vector.shape_cast %197 : vector<16x1xf32> to vector<16x1xf32>
    %201 = vector.broadcast %200 : vector<16x1xf32> to vector<16x16xf32>
    %202 = arith.select %199, %201, %189 : vector<16x16xi1>, vector<16x16xf32>
    %c11 = arith.constant 11 : index
    %c0_67 = arith.constant 0 : index
    %203 = vector.load %arg6[%c11, %c0_67] : memref<16x128xf32, #tpu.memory_space<vmem>>, vector<1x128xf32>
    %204 = vector.broadcast %203 : vector<1x128xf32> to vector<16x128xf32>
    %205 = arith.mulf %43, %204 : vector<16x128xf32>
    %206 = arith.addf %205, %57 : vector<16x128xf32>
    %cst_68 = arith.constant dense<0xFF800000> : vector<16xf32>
    %207 = vector.multi_reduction <maximumf>, %206, %cst_68 [1] : vector<16x128xf32> to vector<16xf32>
    %208 = vector.shape_cast %207 : vector<16xf32> to vector<16x1xf32>
    %cst_69 = arith.constant 0.000000e+00 : f32
    %209 = vector.broadcast %cst_69 : f32 to vector<16x1xf32>
    %210 = arith.select %49, %208, %209 : vector<16x1xi1>, vector<16x1xf32>
    %c11_i32 = arith.constant 11 : i32
    %211 = vector.broadcast %c11_i32 : i32 to vector<16x16xi32>
    %212 = arith.cmpi eq, %58, %211 : vector<16x16xi32>
    %213 = vector.shape_cast %210 : vector<16x1xf32> to vector<16x1xf32>
    %214 = vector.broadcast %213 : vector<16x1xf32> to vector<16x16xf32>
    %215 = arith.select %212, %214, %202 : vector<16x16xi1>, vector<16x16xf32>
    %c0_70 = arith.constant 0 : index
    %c0_71 = arith.constant 0 : index
    %216 = vector.load %arg2[%c0_70, %c0_71] : memref<16x8xf32, #tpu.memory_space<vmem>>, vector<16x8xf32>
    %c0_72 = arith.constant 0 : index
    %c0_73 = arith.constant 0 : index
    %217 = vector.load %arg9[%c0_72, %c0_73] : memref<8x32xf32, #tpu.memory_space<vmem>>, vector<8x32xf32>
    %cst_74 = arith.constant dense<0.000000e+00> : vector<16x32xf32>
    %218 = tpu.matmul %216, %217, %cst_74 {dimension_numbers = #tpu.dot_dimension_numbers<[1], [0], [0], [1], [0, 0, 1, 1], [], []>} : vector<16x8xf32>, vector<8x32xf32>, vector<16x32xf32> -> vector<16x32xf32>
    %c0_75 = arith.constant 0 : index
    %c0_76 = arith.constant 0 : index
    %219 = vector.load %arg10[%c0_75, %c0_76] : memref<16x32xf32, #tpu.memory_space<vmem>>, vector<16x32xf32>
    %cst_77 = arith.constant dense<0.000000e+00> : vector<16x32xf32>
    %220 = tpu.matmul %54, %219, %cst_77 {dimension_numbers = #tpu.dot_dimension_numbers<[1], [0], [0], [1], [0, 0, 1, 1], [], []>} : vector<16x16xf32>, vector<16x32xf32>, vector<16x32xf32> -> vector<16x32xf32>
    %221 = arith.addf %218, %220 : vector<16x32xf32>
    %c0_78 = arith.constant 0 : index
    %c0_79 = arith.constant 0 : index
    %222 = vector.load %arg11[%c0_78, %c0_79] : memref<16x32xf32, #tpu.memory_space<vmem>>, vector<16x32xf32>
    %cst_80 = arith.constant dense<0.000000e+00> : vector<16x32xf32>
    %223 = tpu.matmul %215, %222, %cst_80 {dimension_numbers = #tpu.dot_dimension_numbers<[1], [0], [0], [1], [0, 0, 1, 1], [], []>} : vector<16x16xf32>, vector<16x32xf32>, vector<16x32xf32> -> vector<16x32xf32>
    %224 = arith.addf %221, %223 : vector<16x32xf32>
    %c0_81 = arith.constant 0 : index
    %c0_82 = arith.constant 0 : index
    %225 = vector.load %arg12[%c0_81, %c0_82] : memref<1x32xf32, #tpu.memory_space<vmem>>, vector<1x32xf32>
    %226 = vector.broadcast %225 : vector<1x32xf32> to vector<16x32xf32>
    %227 = arith.addf %224, %226 : vector<16x32xf32>
    %c0_83 = arith.constant 0 : index
    %c0_84 = arith.constant 0 : index
    %228 = vector.load %arg13[%c0_83, %c0_84] : memref<32x8xf32, #tpu.memory_space<vmem>>, vector<32x8xf32>
    %cst_85 = arith.constant dense<0.000000e+00> : vector<16x8xf32>
    %229 = tpu.matmul %227, %228, %cst_85 {dimension_numbers = #tpu.dot_dimension_numbers<[1], [0], [0], [1], [0, 0, 1, 1], [], []>} : vector<16x32xf32>, vector<32x8xf32>, vector<16x8xf32> -> vector<16x8xf32>
    %c0_86 = arith.constant 0 : index
    %c0_87 = arith.constant 0 : index
    %230 = vector.load %arg14[%c0_86, %c0_87] : memref<8x8xf32, #tpu.memory_space<vmem>>, vector<8x8xf32>
    %cst_88 = arith.constant dense<0.000000e+00> : vector<16x8xf32>
    %231 = tpu.matmul %0, %230, %cst_88 {dimension_numbers = #tpu.dot_dimension_numbers<[1], [0], [0], [1], [0, 0, 1, 1], [], []>} : vector<16x8xf32>, vector<8x8xf32>, vector<16x8xf32> -> vector<16x8xf32>
    %232 = arith.addf %229, %231 : vector<16x8xf32>
    %c0_89 = arith.constant 0 : index
    %c0_90 = arith.constant 0 : index
    %233 = vector.load %arg15[%c0_89, %c0_90] : memref<1x8xf32, #tpu.memory_space<vmem>>, vector<1x8xf32>
    %234 = vector.broadcast %233 : vector<1x8xf32> to vector<16x8xf32>
    %235 = arith.addf %232, %234 : vector<16x8xf32>
    %cst_91 = arith.constant 0.000000e+00 : f32
    %236 = vector.broadcast %cst_91 : f32 to vector<16x8xf32>
    %237 = arith.cmpf ogt, %235, %236 : vector<16x8xf32>
    %cst_92 = arith.constant 0.000000e+00 : f32
    %238 = vector.broadcast %cst_92 : f32 to vector<16x8xf32>
    %239 = arith.minimumf %235, %238 : vector<16x8xf32>
    %240 = math.exp %239 : vector<16x8xf32>
    %cst_93 = arith.constant 1.000000e+00 : f32
    %241 = vector.broadcast %cst_93 : f32 to vector<16x8xf32>
    %242 = arith.subf %240, %241 : vector<16x8xf32>
    %243 = arith.select %237, %235, %242 : vector<16x8xi1>, vector<16x8xf32>
    %c0_94 = arith.constant 0 : index
    %c0_95 = arith.constant 0 : index
    %244 = vector.load %arg16[%c0_94, %c0_95] : memref<8x8xf32, #tpu.memory_space<vmem>>, vector<8x8xf32>
    %cst_96 = arith.constant dense<0.000000e+00> : vector<16x8xf32>
    %245 = tpu.matmul %243, %244, %cst_96 {dimension_numbers = #tpu.dot_dimension_numbers<[1], [0], [0], [1], [0, 0, 1, 1], [], []>} : vector<16x8xf32>, vector<8x8xf32>, vector<16x8xf32> -> vector<16x8xf32>
    %c0_97 = arith.constant 0 : index
    %c0_98 = arith.constant 0 : index
    %246 = vector.load %arg17[%c0_97, %c0_98] : memref<1x8xf32, #tpu.memory_space<vmem>>, vector<1x8xf32>
    %247 = vector.broadcast %246 : vector<1x8xf32> to vector<16x8xf32>
    %248 = arith.addf %245, %247 : vector<16x8xf32>
    %cst_99 = arith.constant 0.000000e+00 : f32
    %249 = vector.broadcast %cst_99 : f32 to vector<16x8xf32>
    %250 = arith.cmpf ogt, %248, %249 : vector<16x8xf32>
    %cst_100 = arith.constant 0.000000e+00 : f32
    %251 = vector.broadcast %cst_100 : f32 to vector<16x8xf32>
    %252 = arith.minimumf %248, %251 : vector<16x8xf32>
    %253 = math.exp %252 : vector<16x8xf32>
    %cst_101 = arith.constant 1.000000e+00 : f32
    %254 = vector.broadcast %cst_101 : f32 to vector<16x8xf32>
    %255 = arith.subf %253, %254 : vector<16x8xf32>
    %256 = arith.select %250, %248, %255 : vector<16x8xi1>, vector<16x8xf32>
    %c0_102 = arith.constant 0 : index
    %c0_103 = arith.constant 0 : index
    %257 = vector.load %arg18[%c0_102, %c0_103] : memref<16x8xf32, #tpu.memory_space<vmem>>, vector<16x8xf32>
    tpu.vector_store %arg18[%c0_102, %c0_103], %256 {strides = array<i32>} : memref<16x8xf32, #tpu.memory_space<vmem>>, vector<16x8xf32>,
    return
  }
  func.func @transform_0(%arg0: i32, %arg1: memref<1xi32, #tpu.memory_space<smem>>) -> (i32, i32) {
    %c0_i32 = arith.constant 0 : i32
    %c0_i32_0 = arith.constant 0 : i32
    return %arg0, %c0_i32 : i32, i32
  }
  func.func @transform_1(%arg0: i32, %arg1: memref<1xi32, #tpu.memory_space<smem>>) -> (i32, i32) {
    %c0_i32 = arith.constant 0 : i32
    %c0_i32_0 = arith.constant 0 : i32
    return %arg0, %c0_i32 : i32, i32
  }
  func.func @transform_2(%arg0: i32, %arg1: memref<1xi32, #tpu.memory_space<smem>>) -> (i32, i32) {
    %c0_i32 = arith.constant 0 : i32
    %c0_i32_0 = arith.constant 0 : i32
    %c0_i32_1 = arith.constant 0 : i32
    return %c0_i32, %c0_i32_0 : i32, i32
  }
  func.func @transform_3(%arg0: i32, %arg1: memref<1xi32, #tpu.memory_space<smem>>) -> (i32, i32) {
    %c0_i32 = arith.constant 0 : i32
    %c0_i32_0 = arith.constant 0 : i32
    %c0_i32_1 = arith.constant 0 : i32
    return %c0_i32, %c0_i32_0 : i32, i32
  }
  func.func @transform_4(%arg0: i32, %arg1: memref<1xi32, #tpu.memory_space<smem>>) -> (i32, i32) {
    %c0_i32 = arith.constant 0 : i32
    %c0_i32_0 = arith.constant 0 : i32
    %c0_i32_1 = arith.constant 0 : i32
    return %c0_i32, %c0_i32_0 : i32, i32
  }
  func.func @transform_5(%arg0: i32, %arg1: memref<1xi32, #tpu.memory_space<smem>>) -> (i32, i32) {
    %c0_i32 = arith.constant 0 : i32
    %c0_i32_0 = arith.constant 0 : i32
    return %arg0, %c0_i32 : i32, i32
  }
  func.func @transform_6(%arg0: i32, %arg1: memref<1xi32, #tpu.memory_space<smem>>) -> (i32, i32) {
    %c0_i32 = arith.constant 0 : i32
    %c0_i32_0 = arith.constant 0 : i32
    %c0_i32_1 = arith.constant 0 : i32
    return %c0_i32, %c0_i32_0 : i32, i32
  }
  func.func @transform_7(%arg0: i32, %arg1: memref<1xi32, #tpu.memory_space<smem>>) -> (i32, i32) {
    %c0_i32 = arith.constant 0 : i32
    %c0_i32_0 = arith.constant 0 : i32
    %c0_i32_1 = arith.constant 0 : i32
    return %c0_i32, %c0_i32_0 : i32, i32
  }
  func.func @transform_8(%arg0: i32, %arg1: memref<1xi32, #tpu.memory_space<smem>>) -> (i32, i32) {
    %c0_i32 = arith.constant 0 : i32
    %c0_i32_0 = arith.constant 0 : i32
    %c0_i32_1 = arith.constant 0 : i32
    return %c0_i32, %c0_i32_0 : i32, i32
  }
  func.func @transform_9(%arg0: i32, %arg1: memref<1xi32, #tpu.memory_space<smem>>) -> (i32, i32) {
    %c0_i32 = arith.constant 0 : i32
    %c0_i32_0 = arith.constant 0 : i32
    %c0_i32_1 = arith.constant 0 : i32
    return %c0_i32, %c0_i32_0 : i32, i32
  }
  func.func @transform_10(%arg0: i32, %arg1: memref<1xi32, #tpu.memory_space<smem>>) -> (i32, i32) {
    %c0_i32 = arith.constant 0 : i32
    %c0_i32_0 = arith.constant 0 : i32
    %c0_i32_1 = arith.constant 0 : i32
    return %c0_i32, %c0_i32_0 : i32, i32
  }
  func.func @transform_11(%arg0: i32, %arg1: memref<1xi32, #tpu.memory_space<smem>>) -> (i32, i32) {
    %c0_i32 = arith.constant 0 : i32
    %c0_i32_0 = arith.constant 0 : i32
    %c0_i32_1 = arith.constant 0 : i32
    return %c0_i32, %c0_i32_0 : i32, i32
  }
  func.func @transform_12(%arg0: i32, %arg1: memref<1xi32, #tpu.memory_space<smem>>) -> (i32, i32) {
    %c0_i32 = arith.constant 0 : i32
    %c0_i32_0 = arith.constant 0 : i32
    %c0_i32_1 = arith.constant 0 : i32
    return %c0_i32, %c0_i32_0 : i32, i32
  }
  func.func @transform_13(%arg0: i32, %arg1: memref<1xi32, #tpu.memory_space<smem>>) -> (i32, i32) {
    %c0_i32 = arith.constant 0 : i32
    %c0_i32_0 = arith.constant 0 : i32
    %c0_i32_1 = arith.constant 0 : i32
    return %c0_i32, %c0_i32_0 : i32, i32
  }
  func.func @transform_14(%arg0: i32, %arg1: memref<1xi32, #tpu.memory_space<smem>>) -> (i32, i32) {
    %c0_i32 = arith.constant 0 : i32
    %c0_i32_0 = arith.constant 0 : i32
    %c0_i32_1 = arith.constant 0 : i32
    return %c0_i32, %c0_i32_0 : i32, i32
  }
  func.func @transform_15(%arg0: i32, %arg1: memref<1xi32, #tpu.memory_space<smem>>) -> (i32, i32) {
    %c0_i32 = arith.constant 0 : i32
    %c0_i32_0 = arith.constant 0 : i32
    %c0_i32_1 = arith.constant 0 : i32
    return %c0_i32, %c0_i32_0 : i32, i32
  }
  func.func @transform_16(%arg0: i32, %arg1: memref<1xi32, #tpu.memory_space<smem>>) -> (i32, i32) {
    %c0_i32 = arith.constant 0 : i32
    %c0_i32_0 = arith.constant 0 : i32
    return %arg0, %c0_i32 : i32, i32
  }
}

module attributes {stable_mosaic.version = 11 : i64} {
  func.func @_tail_kernel(%arg0: i32, %arg1: memref<16x8xf32, #tpu.memory_space<vmem>>, %arg2: memref<16x8xf32, #tpu.memory_space<vmem>>, %arg3: memref<16x8xf32, #tpu.memory_space<vmem>>, %arg4: memref<16x8xf32, #tpu.memory_space<vmem>>, %arg5: memref<4x8x128xf32, #tpu.memory_space<vmem>>, %arg6: memref<1x128xf32, #tpu.memory_space<vmem>>, %arg7: memref<7x128x128xf32, #tpu.memory_space<vmem>>, %arg8: memref<7x1x128xf32, #tpu.memory_space<vmem>>, %arg9: memref<16x128xf32, #tpu.memory_space<vmem>>) attributes {dimension_semantics = [#tpu.dimension_semantics<parallel>], iteration_bounds = array<i64: 2>, scalar_prefetch = 0 : i64, scratch_operands = 0 : i64, tpu.core_type = #tpu.core_type<tc>, window_params = [{transform_indices = @transform_0, window_bounds = array<i64: 16, 8>}, {transform_indices = @transform_1, window_bounds = array<i64: 16, 8>}, {transform_indices = @transform_2, window_bounds = array<i64: 16, 8>}, {transform_indices = @transform_3, window_bounds = array<i64: 16, 8>}, {pipeline_mode = #tpu.pipeline_mode<synchronous>, transform_indices = @transform_4, window_bounds = array<i64: 4, 8, 128>}, {pipeline_mode = #tpu.pipeline_mode<synchronous>, transform_indices = @transform_5, window_bounds = array<i64: 1, 128>}, {pipeline_mode = #tpu.pipeline_mode<synchronous>, transform_indices = @transform_6, window_bounds = array<i64: 7, 128, 128>}, {pipeline_mode = #tpu.pipeline_mode<synchronous>, transform_indices = @transform_7, window_bounds = array<i64: 7, 1, 128>}, {transform_indices = @transform_8, window_bounds = array<i64: 16, 128>}]} {
    %c0 = arith.constant 0 : index
    %c0_0 = arith.constant 0 : index
    %0 = vector.load %arg1[%c0, %c0_0] : memref<16x8xf32, #tpu.memory_space<vmem>>, vector<16x8xf32>
    %c0_1 = arith.constant 0 : index
    %c0_2 = arith.constant 0 : index
    %c0_3 = arith.constant 0 : index
    %1 = vector.load %arg5[%c0_1, %c0_2, %c0_3] : memref<4x8x128xf32, #tpu.memory_space<vmem>>, vector<1x8x128xf32>
    %2 = vector.shape_cast %1 : vector<1x8x128xf32> to vector<8x128xf32>
    %cst = arith.constant dense<0.000000e+00> : vector<16x128xf32>
    %3 = tpu.matmul %0, %2, %cst {dimension_numbers = #tpu.dot_dimension_numbers<[1], [0], [0], [1], [0, 0, 1, 1], [], []>} : vector<16x8xf32>, vector<8x128xf32>, vector<16x128xf32> -> vector<16x128xf32>
    %c0_4 = arith.constant 0 : index
    %c0_5 = arith.constant 0 : index
    %4 = vector.load %arg2[%c0_4, %c0_5] : memref<16x8xf32, #tpu.memory_space<vmem>>, vector<16x8xf32>
    %c1 = arith.constant 1 : index
    %c0_6 = arith.constant 0 : index
    %c0_7 = arith.constant 0 : index
    %5 = vector.load %arg5[%c1, %c0_6, %c0_7] : memref<4x8x128xf32, #tpu.memory_space<vmem>>, vector<1x8x128xf32>
    %6 = vector.shape_cast %5 : vector<1x8x128xf32> to vector<8x128xf32>
    %cst_8 = arith.constant dense<0.000000e+00> : vector<16x128xf32>
    %7 = tpu.matmul %4, %6, %cst_8 {dimension_numbers = #tpu.dot_dimension_numbers<[1], [0], [0], [1], [0, 0, 1, 1], [], []>} : vector<16x8xf32>, vector<8x128xf32>, vector<16x128xf32> -> vector<16x128xf32>
    %8 = arith.addf %3, %7 : vector<16x128xf32>
    %c0_9 = arith.constant 0 : index
    %c0_10 = arith.constant 0 : index
    %9 = vector.load %arg3[%c0_9, %c0_10] : memref<16x8xf32, #tpu.memory_space<vmem>>, vector<16x8xf32>
    %c2 = arith.constant 2 : index
    %c0_11 = arith.constant 0 : index
    %c0_12 = arith.constant 0 : index
    %10 = vector.load %arg5[%c2, %c0_11, %c0_12] : memref<4x8x128xf32, #tpu.memory_space<vmem>>, vector<1x8x128xf32>
    %11 = vector.shape_cast %10 : vector<1x8x128xf32> to vector<8x128xf32>
    %cst_13 = arith.constant dense<0.000000e+00> : vector<16x128xf32>
    %12 = tpu.matmul %9, %11, %cst_13 {dimension_numbers = #tpu.dot_dimension_numbers<[1], [0], [0], [1], [0, 0, 1, 1], [], []>} : vector<16x8xf32>, vector<8x128xf32>, vector<16x128xf32> -> vector<16x128xf32>
    %13 = arith.addf %8, %12 : vector<16x128xf32>
    %c0_14 = arith.constant 0 : index
    %c0_15 = arith.constant 0 : index
    %14 = vector.load %arg4[%c0_14, %c0_15] : memref<16x8xf32, #tpu.memory_space<vmem>>, vector<16x8xf32>
    %c3 = arith.constant 3 : index
    %c0_16 = arith.constant 0 : index
    %c0_17 = arith.constant 0 : index
    %15 = vector.load %arg5[%c3, %c0_16, %c0_17] : memref<4x8x128xf32, #tpu.memory_space<vmem>>, vector<1x8x128xf32>
    %16 = vector.shape_cast %15 : vector<1x8x128xf32> to vector<8x128xf32>
    %cst_18 = arith.constant dense<0.000000e+00> : vector<16x128xf32>
    %17 = tpu.matmul %14, %16, %cst_18 {dimension_numbers = #tpu.dot_dimension_numbers<[1], [0], [0], [1], [0, 0, 1, 1], [], []>} : vector<16x8xf32>, vector<8x128xf32>, vector<16x128xf32> -> vector<16x128xf32>
    %18 = arith.addf %13, %17 : vector<16x128xf32>
    %c0_19 = arith.constant 0 : index
    %c0_20 = arith.constant 0 : index
    %19 = vector.load %arg6[%c0_19, %c0_20] : memref<1x128xf32, #tpu.memory_space<vmem>>, vector<1x128xf32>
    %20 = vector.broadcast %19 : vector<1x128xf32> to vector<16x128xf32>
    %21 = arith.addf %18, %20 : vector<16x128xf32>
    %cst_21 = arith.constant 0.000000e+00 : f32
    %22 = vector.broadcast %cst_21 : f32 to vector<16x128xf32>
    %23 = arith.cmpf ogt, %21, %22 : vector<16x128xf32>
    %cst_22 = arith.constant 0.000000e+00 : f32
    %24 = vector.broadcast %cst_22 : f32 to vector<16x128xf32>
    %25 = arith.minimumf %21, %24 : vector<16x128xf32>
    %26 = math.exp %25 : vector<16x128xf32>
    %cst_23 = arith.constant 1.000000e+00 : f32
    %27 = vector.broadcast %cst_23 : f32 to vector<16x128xf32>
    %28 = arith.subf %26, %27 : vector<16x128xf32>
    %29 = arith.select %23, %21, %28 : vector<16x128xi1>, vector<16x128xf32>
    %c0_24 = arith.constant 0 : index
    %c0_25 = arith.constant 0 : index
    %c0_26 = arith.constant 0 : index
    %30 = vector.load %arg7[%c0_24, %c0_25, %c0_26] : memref<7x128x128xf32, #tpu.memory_space<vmem>>, vector<1x128x128xf32>
    %31 = vector.shape_cast %30 : vector<1x128x128xf32> to vector<128x128xf32>
    %cst_27 = arith.constant dense<0.000000e+00> : vector<16x128xf32>
    %32 = tpu.matmul %29, %31, %cst_27 {dimension_numbers = #tpu.dot_dimension_numbers<[1], [0], [0], [1], [0, 0, 1, 1], [], []>} : vector<16x128xf32>, vector<128x128xf32>, vector<16x128xf32> -> vector<16x128xf32>
    %c0_28 = arith.constant 0 : index
    %c0_29 = arith.constant 0 : index
    %c0_30 = arith.constant 0 : index
    %33 = vector.load %arg8[%c0_28, %c0_29, %c0_30] : memref<7x1x128xf32, #tpu.memory_space<vmem>>, vector<1x1x128xf32>
    %34 = vector.shape_cast %33 : vector<1x1x128xf32> to vector<1x128xf32>
    %35 = vector.broadcast %34 : vector<1x128xf32> to vector<16x128xf32>
    %36 = arith.addf %32, %35 : vector<16x128xf32>
    %cst_31 = arith.constant 0.000000e+00 : f32
    %37 = vector.broadcast %cst_31 : f32 to vector<16x128xf32>
    %38 = arith.cmpf ogt, %36, %37 : vector<16x128xf32>
    %cst_32 = arith.constant 0.000000e+00 : f32
    %39 = vector.broadcast %cst_32 : f32 to vector<16x128xf32>
    %40 = arith.minimumf %36, %39 : vector<16x128xf32>
    %41 = math.exp %40 : vector<16x128xf32>
    %cst_33 = arith.constant 1.000000e+00 : f32
    %42 = vector.broadcast %cst_33 : f32 to vector<16x128xf32>
    %43 = arith.subf %41, %42 : vector<16x128xf32>
    %44 = arith.select %38, %36, %43 : vector<16x128xi1>, vector<16x128xf32>
    %c1_34 = arith.constant 1 : index
    %c0_35 = arith.constant 0 : index
    %c0_36 = arith.constant 0 : index
    %45 = vector.load %arg7[%c1_34, %c0_35, %c0_36] : memref<7x128x128xf32, #tpu.memory_space<vmem>>, vector<1x128x128xf32>
    %46 = vector.shape_cast %45 : vector<1x128x128xf32> to vector<128x128xf32>
    %cst_37 = arith.constant dense<0.000000e+00> : vector<16x128xf32>
    %47 = tpu.matmul %44, %46, %cst_37 {dimension_numbers = #tpu.dot_dimension_numbers<[1], [0], [0], [1], [0, 0, 1, 1], [], []>} : vector<16x128xf32>, vector<128x128xf32>, vector<16x128xf32> -> vector<16x128xf32>
    %c1_38 = arith.constant 1 : index
    %c0_39 = arith.constant 0 : index
    %c0_40 = arith.constant 0 : index
    %48 = vector.load %arg8[%c1_38, %c0_39, %c0_40] : memref<7x1x128xf32, #tpu.memory_space<vmem>>, vector<1x1x128xf32>
    %49 = vector.shape_cast %48 : vector<1x1x128xf32> to vector<1x128xf32>
    %50 = vector.broadcast %49 : vector<1x128xf32> to vector<16x128xf32>
    %51 = arith.addf %47, %50 : vector<16x128xf32>
    %cst_41 = arith.constant 0.000000e+00 : f32
    %52 = vector.broadcast %cst_41 : f32 to vector<16x128xf32>
    %53 = arith.cmpf ogt, %51, %52 : vector<16x128xf32>
    %cst_42 = arith.constant 0.000000e+00 : f32
    %54 = vector.broadcast %cst_42 : f32 to vector<16x128xf32>
    %55 = arith.minimumf %51, %54 : vector<16x128xf32>
    %56 = math.exp %55 : vector<16x128xf32>
    %cst_43 = arith.constant 1.000000e+00 : f32
    %57 = vector.broadcast %cst_43 : f32 to vector<16x128xf32>
    %58 = arith.subf %56, %57 : vector<16x128xf32>
    %59 = arith.select %53, %51, %58 : vector<16x128xi1>, vector<16x128xf32>
    %c2_44 = arith.constant 2 : index
    %c0_45 = arith.constant 0 : index
    %c0_46 = arith.constant 0 : index
    %60 = vector.load %arg7[%c2_44, %c0_45, %c0_46] : memref<7x128x128xf32, #tpu.memory_space<vmem>>, vector<1x128x128xf32>
    %61 = vector.shape_cast %60 : vector<1x128x128xf32> to vector<128x128xf32>
    %cst_47 = arith.constant dense<0.000000e+00> : vector<16x128xf32>
    %62 = tpu.matmul %59, %61, %cst_47 {dimension_numbers = #tpu.dot_dimension_numbers<[1], [0], [0], [1], [0, 0, 1, 1], [], []>} : vector<16x128xf32>, vector<128x128xf32>, vector<16x128xf32> -> vector<16x128xf32>
    %c2_48 = arith.constant 2 : index
    %c0_49 = arith.constant 0 : index
    %c0_50 = arith.constant 0 : index
    %63 = vector.load %arg8[%c2_48, %c0_49, %c0_50] : memref<7x1x128xf32, #tpu.memory_space<vmem>>, vector<1x1x128xf32>
    %64 = vector.shape_cast %63 : vector<1x1x128xf32> to vector<1x128xf32>
    %65 = vector.broadcast %64 : vector<1x128xf32> to vector<16x128xf32>
    %66 = arith.addf %62, %65 : vector<16x128xf32>
    %cst_51 = arith.constant 0.000000e+00 : f32
    %67 = vector.broadcast %cst_51 : f32 to vector<16x128xf32>
    %68 = arith.cmpf ogt, %66, %67 : vector<16x128xf32>
    %cst_52 = arith.constant 0.000000e+00 : f32
    %69 = vector.broadcast %cst_52 : f32 to vector<16x128xf32>
    %70 = arith.minimumf %66, %69 : vector<16x128xf32>
    %71 = math.exp %70 : vector<16x128xf32>
    %cst_53 = arith.constant 1.000000e+00 : f32
    %72 = vector.broadcast %cst_53 : f32 to vector<16x128xf32>
    %73 = arith.subf %71, %72 : vector<16x128xf32>
    %74 = arith.select %68, %66, %73 : vector<16x128xi1>, vector<16x128xf32>
    %c3_54 = arith.constant 3 : index
    %c0_55 = arith.constant 0 : index
    %c0_56 = arith.constant 0 : index
    %75 = vector.load %arg7[%c3_54, %c0_55, %c0_56] : memref<7x128x128xf32, #tpu.memory_space<vmem>>, vector<1x128x128xf32>
    %76 = vector.shape_cast %75 : vector<1x128x128xf32> to vector<128x128xf32>
    %cst_57 = arith.constant dense<0.000000e+00> : vector<16x128xf32>
    %77 = tpu.matmul %74, %76, %cst_57 {dimension_numbers = #tpu.dot_dimension_numbers<[1], [0], [0], [1], [0, 0, 1, 1], [], []>} : vector<16x128xf32>, vector<128x128xf32>, vector<16x128xf32> -> vector<16x128xf32>
    %c3_58 = arith.constant 3 : index
    %c0_59 = arith.constant 0 : index
    %c0_60 = arith.constant 0 : index
    %78 = vector.load %arg8[%c3_58, %c0_59, %c0_60] : memref<7x1x128xf32, #tpu.memory_space<vmem>>, vector<1x1x128xf32>
    %79 = vector.shape_cast %78 : vector<1x1x128xf32> to vector<1x128xf32>
    %80 = vector.broadcast %79 : vector<1x128xf32> to vector<16x128xf32>
    %81 = arith.addf %77, %80 : vector<16x128xf32>
    %cst_61 = arith.constant 0.000000e+00 : f32
    %82 = vector.broadcast %cst_61 : f32 to vector<16x128xf32>
    %83 = arith.cmpf ogt, %81, %82 : vector<16x128xf32>
    %cst_62 = arith.constant 0.000000e+00 : f32
    %84 = vector.broadcast %cst_62 : f32 to vector<16x128xf32>
    %85 = arith.minimumf %81, %84 : vector<16x128xf32>
    %86 = math.exp %85 : vector<16x128xf32>
    %cst_63 = arith.constant 1.000000e+00 : f32
    %87 = vector.broadcast %cst_63 : f32 to vector<16x128xf32>
    %88 = arith.subf %86, %87 : vector<16x128xf32>
    %89 = arith.select %83, %81, %88 : vector<16x128xi1>, vector<16x128xf32>
    %c4 = arith.constant 4 : index
    %c0_64 = arith.constant 0 : index
    %c0_65 = arith.constant 0 : index
    %90 = vector.load %arg7[%c4, %c0_64, %c0_65] : memref<7x128x128xf32, #tpu.memory_space<vmem>>, vector<1x128x128xf32>
    %91 = vector.shape_cast %90 : vector<1x128x128xf32> to vector<128x128xf32>
    %cst_66 = arith.constant dense<0.000000e+00> : vector<16x128xf32>
    %92 = tpu.matmul %89, %91, %cst_66 {dimension_numbers = #tpu.dot_dimension_numbers<[1], [0], [0], [1], [0, 0, 1, 1], [], []>} : vector<16x128xf32>, vector<128x128xf32>, vector<16x128xf32> -> vector<16x128xf32>
    %c4_67 = arith.constant 4 : index
    %c0_68 = arith.constant 0 : index
    %c0_69 = arith.constant 0 : index
    %93 = vector.load %arg8[%c4_67, %c0_68, %c0_69] : memref<7x1x128xf32, #tpu.memory_space<vmem>>, vector<1x1x128xf32>
    %94 = vector.shape_cast %93 : vector<1x1x128xf32> to vector<1x128xf32>
    %95 = vector.broadcast %94 : vector<1x128xf32> to vector<16x128xf32>
    %96 = arith.addf %92, %95 : vector<16x128xf32>
    %cst_70 = arith.constant 0.000000e+00 : f32
    %97 = vector.broadcast %cst_70 : f32 to vector<16x128xf32>
    %98 = arith.cmpf ogt, %96, %97 : vector<16x128xf32>
    %cst_71 = arith.constant 0.000000e+00 : f32
    %99 = vector.broadcast %cst_71 : f32 to vector<16x128xf32>
    %100 = arith.minimumf %96, %99 : vector<16x128xf32>
    %101 = math.exp %100 : vector<16x128xf32>
    %cst_72 = arith.constant 1.000000e+00 : f32
    %102 = vector.broadcast %cst_72 : f32 to vector<16x128xf32>
    %103 = arith.subf %101, %102 : vector<16x128xf32>
    %104 = arith.select %98, %96, %103 : vector<16x128xi1>, vector<16x128xf32>
    %c5 = arith.constant 5 : index
    %c0_73 = arith.constant 0 : index
    %c0_74 = arith.constant 0 : index
    %105 = vector.load %arg7[%c5, %c0_73, %c0_74] : memref<7x128x128xf32, #tpu.memory_space<vmem>>, vector<1x128x128xf32>
    %106 = vector.shape_cast %105 : vector<1x128x128xf32> to vector<128x128xf32>
    %cst_75 = arith.constant dense<0.000000e+00> : vector<16x128xf32>
    %107 = tpu.matmul %104, %106, %cst_75 {dimension_numbers = #tpu.dot_dimension_numbers<[1], [0], [0], [1], [0, 0, 1, 1], [], []>} : vector<16x128xf32>, vector<128x128xf32>, vector<16x128xf32> -> vector<16x128xf32>
    %c5_76 = arith.constant 5 : index
    %c0_77 = arith.constant 0 : index
    %c0_78 = arith.constant 0 : index
    %108 = vector.load %arg8[%c5_76, %c0_77, %c0_78] : memref<7x1x128xf32, #tpu.memory_space<vmem>>, vector<1x1x128xf32>
    %109 = vector.shape_cast %108 : vector<1x1x128xf32> to vector<1x128xf32>
    %110 = vector.broadcast %109 : vector<1x128xf32> to vector<16x128xf32>
    %111 = arith.addf %107, %110 : vector<16x128xf32>
    %c6 = arith.constant 6 : index
    %c0_79 = arith.constant 0 : index
    %c0_80 = arith.constant 0 : index
    %112 = vector.load %arg7[%c6, %c0_79, %c0_80] : memref<7x128x128xf32, #tpu.memory_space<vmem>>, vector<1x128x128xf32>
    %113 = vector.shape_cast %112 : vector<1x128x128xf32> to vector<128x128xf32>
    %cst_81 = arith.constant dense<0.000000e+00> : vector<16x128xf32>
    %114 = tpu.matmul %111, %113, %cst_81 {dimension_numbers = #tpu.dot_dimension_numbers<[1], [0], [0], [1], [0, 0, 1, 1], [], []>} : vector<16x128xf32>, vector<128x128xf32>, vector<16x128xf32> -> vector<16x128xf32>
    %c6_82 = arith.constant 6 : index
    %c0_83 = arith.constant 0 : index
    %c0_84 = arith.constant 0 : index
    %115 = vector.load %arg8[%c6_82, %c0_83, %c0_84] : memref<7x1x128xf32, #tpu.memory_space<vmem>>, vector<1x1x128xf32>
    %116 = vector.shape_cast %115 : vector<1x1x128xf32> to vector<1x128xf32>
    %117 = vector.broadcast %116 : vector<1x128xf32> to vector<16x128xf32>
    %118 = arith.addf %114, %117 : vector<16x128xf32>
    %c0_85 = arith.constant 0 : index
    %c0_86 = arith.constant 0 : index
    %119 = vector.load %arg9[%c0_85, %c0_86] : memref<16x128xf32, #tpu.memory_space<vmem>>, vector<16x128xf32>
    tpu.vector_store %arg9[%c0_85, %c0_86], %118 {strides = array<i32>} : memref<16x128xf32, #tpu.memory_space<vmem>>, vector<16x128xf32>,
    return
  }
  func.func @transform_0(%arg0: i32) -> (i32, i32) {
    %c0_i32 = arith.constant 0 : i32
    %c0_i32_0 = arith.constant 0 : i32
    return %arg0, %c0_i32 : i32, i32
  }
  func.func @transform_1(%arg0: i32) -> (i32, i32) {
    %c0_i32 = arith.constant 0 : i32
    %c0_i32_0 = arith.constant 0 : i32
    return %arg0, %c0_i32 : i32, i32
  }
  func.func @transform_2(%arg0: i32) -> (i32, i32) {
    %c0_i32 = arith.constant 0 : i32
    %c0_i32_0 = arith.constant 0 : i32
    return %arg0, %c0_i32 : i32, i32
  }
  func.func @transform_3(%arg0: i32) -> (i32, i32) {
    %c0_i32 = arith.constant 0 : i32
    %c0_i32_0 = arith.constant 0 : i32
    return %arg0, %c0_i32 : i32, i32
  }
  func.func @transform_4(%arg0: i32) -> (i32, i32, i32) {
    %c0_i32 = arith.constant 0 : i32
    %c0_i32_0 = arith.constant 0 : i32
    %c0_i32_1 = arith.constant 0 : i32
    %c0_i32_2 = arith.constant 0 : i32
    return %c0_i32, %c0_i32_0, %c0_i32_1 : i32, i32, i32
  }
  func.func @transform_5(%arg0: i32) -> (i32, i32) {
    %c0_i32 = arith.constant 0 : i32
    %c0_i32_0 = arith.constant 0 : i32
    %c0_i32_1 = arith.constant 0 : i32
    return %c0_i32, %c0_i32_0 : i32, i32
  }
  func.func @transform_6(%arg0: i32) -> (i32, i32, i32) {
    %c0_i32 = arith.constant 0 : i32
    %c0_i32_0 = arith.constant 0 : i32
    %c0_i32_1 = arith.constant 0 : i32
    %c0_i32_2 = arith.constant 0 : i32
    return %c0_i32, %c0_i32_0, %c0_i32_1 : i32, i32, i32
  }
  func.func @transform_7(%arg0: i32) -> (i32, i32, i32) {
    %c0_i32 = arith.constant 0 : i32
    %c0_i32_0 = arith.constant 0 : i32
    %c0_i32_1 = arith.constant 0 : i32
    %c0_i32_2 = arith.constant 0 : i32
    return %c0_i32, %c0_i32_0, %c0_i32_1 : i32, i32, i32
  }
  func.func @transform_8(%arg0: i32) -> (i32, i32) {
    %c0_i32 = arith.constant 0 : i32
    %c0_i32_0 = arith.constant 0 : i32
    return %arg0, %c0_i32 : i32, i32
  }
}

module attributes {stable_mosaic.version = 11 : i64} {
  func.func @_gravnet_conv_kernel(%arg0: i32, %arg1: memref<1xi32, #tpu.memory_space<smem>>, %arg2: memref<16x8xf32, #tpu.memory_space<vmem>>, %arg3: memref<16x8xf32, #tpu.memory_space<vmem>>, %arg4: memref<8x128xf32, #tpu.memory_space<vmem>>, %arg5: memref<128x16xbf16, #tpu.memory_space<vmem>>, %arg6: memref<16x128xf32, #tpu.memory_space<vmem>>, %arg7: memref<16x1xi32, #tpu.memory_space<vmem>>, %arg8: memref<1x128xi32, #tpu.memory_space<vmem>>, %arg9: memref<8x32xf32, #tpu.memory_space<vmem>>, %arg10: memref<16x32xf32, #tpu.memory_space<vmem>>, %arg11: memref<16x32xf32, #tpu.memory_space<vmem>>, %arg12: memref<1x32xf32, #tpu.memory_space<vmem>>, %arg13: memref<32x8xf32, #tpu.memory_space<vmem>>, %arg14: memref<8x8xf32, #tpu.memory_space<vmem>>, %arg15: memref<1x8xf32, #tpu.memory_space<vmem>>, %arg16: memref<8x8xf32, #tpu.memory_space<vmem>>, %arg17: memref<1x8xf32, #tpu.memory_space<vmem>>, %arg18: memref<16x8xf32, #tpu.memory_space<vmem>>, %arg19: memref<16x128xf32, #tpu.memory_space<vmem>>) attributes {dimension_semantics = [#tpu.dimension_semantics<parallel>], iteration_bounds = array<i64: 2>, scalar_prefetch = 1 : i64, scratch_operands = 1 : i64, tpu.core_type = #tpu.core_type<tc>, window_params = [{transform_indices = @transform_0, window_bounds = array<i64: 16, 8>}, {transform_indices = @transform_1, window_bounds = array<i64: 16, 8>}, {pipeline_mode = #tpu.pipeline_mode<synchronous>, transform_indices = @transform_2, window_bounds = array<i64: 8, 128>}, {pipeline_mode = #tpu.pipeline_mode<synchronous>, transform_indices = @transform_3, window_bounds = array<i64: 128, 16>}, {pipeline_mode = #tpu.pipeline_mode<synchronous>, transform_indices = @transform_4, window_bounds = array<i64: 16, 128>}, {transform_indices = @transform_5, window_bounds = array<i64: 16, 1>}, {pipeline_mode = #tpu.pipeline_mode<synchronous>, transform_indices = @transform_6, window_bounds = array<i64: 1, 128>}, {pipeline_mode = #tpu.pipeline_mode<synchronous>, transform_indices = @transform_7, window_bounds = array<i64: 8, 32>}, {pipeline_mode = #tpu.pipeline_mode<synchronous>, transform_indices = @transform_8, window_bounds = array<i64: 16, 32>}, {pipeline_mode = #tpu.pipeline_mode<synchronous>, transform_indices = @transform_9, window_bounds = array<i64: 16, 32>}, {pipeline_mode = #tpu.pipeline_mode<synchronous>, transform_indices = @transform_10, window_bounds = array<i64: 1, 32>}, {pipeline_mode = #tpu.pipeline_mode<synchronous>, transform_indices = @transform_11, window_bounds = array<i64: 32, 8>}, {pipeline_mode = #tpu.pipeline_mode<synchronous>, transform_indices = @transform_12, window_bounds = array<i64: 8, 8>}, {pipeline_mode = #tpu.pipeline_mode<synchronous>, transform_indices = @transform_13, window_bounds = array<i64: 1, 8>}, {pipeline_mode = #tpu.pipeline_mode<synchronous>, transform_indices = @transform_14, window_bounds = array<i64: 8, 8>}, {pipeline_mode = #tpu.pipeline_mode<synchronous>, transform_indices = @transform_15, window_bounds = array<i64: 1, 8>}, {transform_indices = @transform_16, window_bounds = array<i64: 16, 8>}]} {
    %c0 = arith.constant 0 : index
    %c0_0 = arith.constant 0 : index
    %0 = vector.load %arg3[%c0, %c0_0] : memref<16x8xf32, #tpu.memory_space<vmem>>, vector<16x8xf32>
    %c0_1 = arith.constant 0 : index
    %c0_2 = arith.constant 0 : index
    %1 = vector.load %arg4[%c0_1, %c0_2] : memref<8x128xf32, #tpu.memory_space<vmem>>, vector<8x128xf32>
    %c0_3 = arith.constant 0 : index
    %c0_4 = arith.constant 0 : index
    %2 = vector.load %arg7[%c0_3, %c0_4] : memref<16x1xi32, #tpu.memory_space<vmem>>, vector<16x1xi32>
    %c0_5 = arith.constant 0 : index
    %c0_6 = arith.constant 0 : index
    %3 = vector.load %arg8[%c0_5, %c0_6] : memref<1x128xi32, #tpu.memory_space<vmem>>, vector<1x128xi32>
    %4 = arith.mulf %0, %0 : vector<16x8xf32>
    %cst = arith.constant dense<0.000000e+00> : vector<16xf32>
    %5 = vector.multi_reduction <add>, %4, %cst [1] : vector<16x8xf32> to vector<16xf32>
    %6 = vector.shape_cast %5 : vector<16xf32> to vector<16x1xf32>
    %7 = arith.mulf %1, %1 : vector<8x128xf32>
    %cst_7 = arith.constant dense<0.000000e+00> : vector<128xf32>
    %8 = vector.multi_reduction <add>, %7, %cst_7 [0] : vector<8x128xf32> to vector<128xf32>
    %9 = vector.shape_cast %8 : vector<128xf32> to vector<1x128xf32>
    %cst_8 = arith.constant dense<0.000000e+00> : vector<16x128xf32>
    %10 = tpu.matmul %0, %1, %cst_8 {dimension_numbers = #tpu.dot_dimension_numbers<[1], [0], [0], [1], [0, 0, 1, 1], [], []>} : vector<16x8xf32>, vector<8x128xf32>, vector<16x128xf32> -> vector<16x128xf32>
    %11 = vector.broadcast %6 : vector<16x1xf32> to vector<16x128xf32>
    %12 = vector.broadcast %9 : vector<1x128xf32> to vector<16x128xf32>
    %13 = arith.addf %11, %12 : vector<16x128xf32>
    %cst_9 = arith.constant 2.000000e+00 : f32
    %14 = vector.broadcast %cst_9 : f32 to vector<16x128xf32>
    %15 = arith.mulf %14, %10 : vector<16x128xf32>
    %16 = arith.subf %13, %15 : vector<16x128xf32>
    %cst_10 = arith.constant 0.000000e+00 : f32
    %17 = vector.broadcast %cst_10 : f32 to vector<16x128xf32>
    %18 = arith.maximumf %16, %17 : vector<16x128xf32>
    %19 = vector.broadcast %2 : vector<16x1xi32> to vector<16x128xi32>
    %20 = vector.broadcast %3 : vector<1x128xi32> to vector<16x128xi32>
    %21 = arith.cmpi eq, %19, %20 : vector<16x128xi32>
    %c0_i32 = arith.constant 0 : i32
    %22 = vector.broadcast %c0_i32 : i32 to vector<16x1xi32>
    %23 = arith.cmpi sge, %2, %22 : vector<16x1xi32>
    %24 = vector.broadcast %23 : vector<16x1xi1> to vector<16x128xi1>
    %25 = arith.andi %21, %24 : vector<16x128xi1>
    %cst_11 = arith.constant 1.000000e+30 : f32
    %26 = vector.broadcast %cst_11 : f32 to vector<16x128xf32>
    %27 = arith.select %25, %18, %26 : vector<16x128xi1>, vector<16x128xf32>
    %28 = tpu.iota {dimensions = array<i32: 1>} : vector<1x128xi32>
    %29 = arith.sitofp %28 : vector<1x128xi32> to vector<1x128xf32>
    %c0_12 = arith.constant 0 : index
    %c0_13 = arith.constant 0 : index
    %30 = vector.load %arg19[%c0_12, %c0_13] : memref<16x128xf32, #tpu.memory_space<vmem>>, vector<16x128xf32>
    tpu.vector_store %arg19[%c0_12, %c0_13], %27 {strides = array<i32>} : memref<16x128xf32, #tpu.memory_space<vmem>>, vector<16x128xf32>,
    %cst_14 = arith.constant 0.000000e+00 : f32
    %31 = vector.broadcast %cst_14 : f32 to vector<16x1xf32>
    %c0_i32_15 = arith.constant 0 : i32
    %c16_i32 = arith.constant 16 : i32
    %32 = arith.addi %c0_i32_15, %c16_i32 : i32
    %c1_i32 = arith.constant 1 : i32
    %33 = scf.for %arg20 = %c0_i32_15 to %32 step %c1_i32 iter_args(%arg21 = %31) -> (vector<16x1xf32>)  : i32 {
      %c0_103 = arith.constant 0 : index
      %c0_104 = arith.constant 0 : index
      %256 = vector.load %arg19[%c0_103, %c0_104] : memref<16x128xf32, #tpu.memory_space<vmem>>, vector<16x128xf32>
      %cst_105 = arith.constant dense<0x7F800000> : vector<16xf32>
      %257 = vector.multi_reduction <minimumf>, %256, %cst_105 [1] : vector<16x128xf32> to vector<16xf32>
      %258 = vector.shape_cast %257 : vector<16xf32> to vector<16x1xf32>
      %cst_106 = arith.constant 5.000000e+29 : f32
      %259 = vector.broadcast %cst_106 : f32 to vector<16x1xf32>
      %260 = arith.cmpf olt, %258, %259 : vector<16x1xf32>
      %261 = vector.broadcast %258 : vector<16x1xf32> to vector<16x128xf32>
      %262 = arith.cmpf ole, %256, %261 : vector<16x128xf32>
      %cst_107 = arith.constant 1.280000e+02 : f32
      %263 = vector.shape_cast %29 : vector<1x128xf32> to vector<1x128xf32>
      %264 = vector.broadcast %263 : vector<1x128xf32> to vector<16x128xf32>
      %265 = vector.broadcast %cst_107 : f32 to vector<16x128xf32>
      %266 = arith.select %262, %264, %265 : vector<16x128xi1>, vector<16x128xf32>
      %cst_108 = arith.constant dense<0x7F800000> : vector<16xf32>
      %267 = vector.multi_reduction <minimumf>, %266, %cst_108 [1] : vector<16x128xf32> to vector<16xf32>
      %268 = vector.shape_cast %267 : vector<16xf32> to vector<16x1xf32>
      %269 = vector.broadcast %29 : vector<1x128xf32> to vector<16x128xf32>
      %270 = vector.broadcast %268 : vector<16x1xf32> to vector<16x128xf32>
      %271 = arith.cmpf oeq, %269, %270 : vector<16x128xf32>
      %272 = vector.broadcast %260 : vector<16x1xi1> to vector<16x128xi1>
      %273 = arith.andi %271, %272 : vector<16x128xi1>
      %cst_109 = arith.constant 2.000000e+30 : f32
      %274 = vector.broadcast %cst_109 : f32 to vector<16x128xf32>
      %275 = arith.select %273, %274, %256 : vector<16x128xi1>, vector<16x128xf32>
      %c0_110 = arith.constant 0 : index
      %c0_111 = arith.constant 0 : index
      %276 = vector.load %arg19[%c0_110, %c0_111] : memref<16x128xf32, #tpu.memory_space<vmem>>, vector<16x128xf32>
      tpu.vector_store %arg19[%c0_110, %c0_111], %275 {strides = array<i32>} : memref<16x128xf32, #tpu.memory_space<vmem>>, vector<16x128xf32>,
      %277 = arith.extui %260 : vector<16x1xi1> to vector<16x1xi32>
      %278 = arith.sitofp %277 : vector<16x1xi32> to vector<16x1xf32>
      %279 = arith.addf %arg21, %278 : vector<16x1xf32>
      scf.yield %279 : vector<16x1xf32>
    }
    %c0_16 = arith.constant 0 : index
    %c0_17 = arith.constant 0 : index
    %34 = vector.load %arg19[%c0_16, %c0_17] : memref<16x128xf32, #tpu.memory_space<vmem>>, vector<16x128xf32>
    %cst_18 = arith.constant 1.500000e+30 : f32
    %35 = vector.broadcast %cst_18 : f32 to vector<16x128xf32>
    %36 = arith.cmpf ogt, %34, %35 : vector<16x128xf32>
    %cst_19 = arith.constant -1.000000e+01 : f32
    %37 = vector.broadcast %cst_19 : f32 to vector<16x128xf32>
    %38 = arith.mulf %37, %27 : vector<16x128xf32>
    %39 = math.exp %38 : vector<16x128xf32>
    %cst_20 = arith.constant 0.000000e+00 : f32
    %40 = vector.broadcast %cst_20 : f32 to vector<16x128xf32>
    %41 = arith.select %36, %39, %40 : vector<16x128xi1>, vector<16x128xf32>
    %cst_21 = arith.constant 1.000000e+00 : f32
    %42 = vector.broadcast %cst_21 : f32 to vector<16x1xf32>
    %43 = arith.maximumf %33, %42 : vector<16x1xf32>
    %cst_22 = arith.constant 1.000000e+00 : f32
    %44 = vector.broadcast %cst_22 : f32 to vector<16x1xf32>
    %45 = arith.divf %44, %43 : vector<16x1xf32>
    %cst_23 = arith.constant 0.000000e+00 : f32
    %46 = vector.broadcast %cst_23 : f32 to vector<16x1xf32>
    %47 = arith.cmpf ogt, %33, %46 : vector<16x1xf32>
    %48 = arith.truncf %41 : vector<16x128xf32> to vector<16x128xbf16>
    %c0_24 = arith.constant 0 : index
    %c0_25 = arith.constant 0 : index
    %49 = vector.load %arg5[%c0_24, %c0_25] : memref<128x16xbf16, #tpu.memory_space<vmem>>, vector<128x16xbf16>
    %cst_26 = arith.constant dense<0.000000e+00> : vector<16x16xf32>
    %50 = tpu.matmul %48, %49, %cst_26 {dimension_numbers = #tpu.dot_dimension_numbers<[1], [0], [0], [1], [0, 0, 1, 1], [], []>} : vector<16x128xbf16>, vector<128x16xbf16>, vector<16x16xf32> -> vector<16x16xf32>
    %51 = vector.broadcast %45 : vector<16x1xf32> to vector<16x16xf32>
    %52 = arith.mulf %50, %51 : vector<16x16xf32>
    %cst_27 = arith.constant 0.000000e+00 : f32
    %cst_28 = arith.constant -1.000000e+30 : f32
    %53 = vector.broadcast %cst_27 : f32 to vector<16x128xf32>
    %54 = vector.broadcast %cst_28 : f32 to vector<16x128xf32>
    %55 = arith.select %36, %53, %54 : vector<16x128xi1>, vector<16x128xf32>
    %56 = tpu.iota {dimensions = array<i32: 1>} : vector<16x16xi32>
    %cst_29 = arith.constant 0.000000e+00 : f32
    %57 = vector.broadcast %cst_29 : f32 to vector<16x16xf32>
    %c0_30 = arith.constant 0 : index
    %c0_31 = arith.constant 0 : index
    %58 = vector.load %arg6[%c0_30, %c0_31] : memref<16x128xf32, #tpu.memory_space<vmem>>, vector<1x128xf32>
    %59 = vector.broadcast %58 : vector<1x128xf32> to vector<16x128xf32>
    %60 = arith.mulf %41, %59 : vector<16x128xf32>
    %61 = arith.addf %60, %55 : vector<16x128xf32>
    %cst_32 = arith.constant dense<0xFF800000> : vector<16xf32>
    %62 = vector.multi_reduction <maximumf>, %61, %cst_32 [1] : vector<16x128xf32> to vector<16xf32>
    %63 = vector.shape_cast %62 : vector<16xf32> to vector<16x1xf32>
    %cst_33 = arith.constant 0.000000e+00 : f32
    %64 = vector.broadcast %cst_33 : f32 to vector<16x1xf32>
    %65 = arith.select %47, %63, %64 : vector<16x1xi1>, vector<16x1xf32>
    %c0_i32_34 = arith.constant 0 : i32
    %66 = vector.broadcast %c0_i32_34 : i32 to vector<16x16xi32>
    %67 = arith.cmpi eq, %56, %66 : vector<16x16xi32>
    %68 = vector.shape_cast %65 : vector<16x1xf32> to vector<16x1xf32>
    %69 = vector.broadcast %68 : vector<16x1xf32> to vector<16x16xf32>
    %70 = arith.select %67, %69, %57 : vector<16x16xi1>, vector<16x16xf32>
    %c1 = arith.constant 1 : index
    %c0_35 = arith.constant 0 : index
    %71 = vector.load %arg6[%c1, %c0_35] : memref<16x128xf32, #tpu.memory_space<vmem>>, vector<1x128xf32>
    %72 = vector.broadcast %71 : vector<1x128xf32> to vector<16x128xf32>
    %73 = arith.mulf %41, %72 : vector<16x128xf32>
    %74 = arith.addf %73, %55 : vector<16x128xf32>
    %cst_36 = arith.constant dense<0xFF800000> : vector<16xf32>
    %75 = vector.multi_reduction <maximumf>, %74, %cst_36 [1] : vector<16x128xf32> to vector<16xf32>
    %76 = vector.shape_cast %75 : vector<16xf32> to vector<16x1xf32>
    %cst_37 = arith.constant 0.000000e+00 : f32
    %77 = vector.broadcast %cst_37 : f32 to vector<16x1xf32>
    %78 = arith.select %47, %76, %77 : vector<16x1xi1>, vector<16x1xf32>
    %c1_i32_38 = arith.constant 1 : i32
    %79 = vector.broadcast %c1_i32_38 : i32 to vector<16x16xi32>
    %80 = arith.cmpi eq, %56, %79 : vector<16x16xi32>
    %81 = vector.shape_cast %78 : vector<16x1xf32> to vector<16x1xf32>
    %82 = vector.broadcast %81 : vector<16x1xf32> to vector<16x16xf32>
    %83 = arith.select %80, %82, %70 : vector<16x16xi1>, vector<16x16xf32>
    %c2 = arith.constant 2 : index
    %c0_39 = arith.constant 0 : index
    %84 = vector.load %arg6[%c2, %c0_39] : memref<16x128xf32, #tpu.memory_space<vmem>>, vector<1x128xf32>
    %85 = vector.broadcast %84 : vector<1x128xf32> to vector<16x128xf32>
    %86 = arith.mulf %41, %85 : vector<16x128xf32>
    %87 = arith.addf %86, %55 : vector<16x128xf32>
    %cst_40 = arith.constant dense<0xFF800000> : vector<16xf32>
    %88 = vector.multi_reduction <maximumf>, %87, %cst_40 [1] : vector<16x128xf32> to vector<16xf32>
    %89 = vector.shape_cast %88 : vector<16xf32> to vector<16x1xf32>
    %cst_41 = arith.constant 0.000000e+00 : f32
    %90 = vector.broadcast %cst_41 : f32 to vector<16x1xf32>
    %91 = arith.select %47, %89, %90 : vector<16x1xi1>, vector<16x1xf32>
    %c2_i32 = arith.constant 2 : i32
    %92 = vector.broadcast %c2_i32 : i32 to vector<16x16xi32>
    %93 = arith.cmpi eq, %56, %92 : vector<16x16xi32>
    %94 = vector.shape_cast %91 : vector<16x1xf32> to vector<16x1xf32>
    %95 = vector.broadcast %94 : vector<16x1xf32> to vector<16x16xf32>
    %96 = arith.select %93, %95, %83 : vector<16x16xi1>, vector<16x16xf32>
    %c3 = arith.constant 3 : index
    %c0_42 = arith.constant 0 : index
    %97 = vector.load %arg6[%c3, %c0_42] : memref<16x128xf32, #tpu.memory_space<vmem>>, vector<1x128xf32>
    %98 = vector.broadcast %97 : vector<1x128xf32> to vector<16x128xf32>
    %99 = arith.mulf %41, %98 : vector<16x128xf32>
    %100 = arith.addf %99, %55 : vector<16x128xf32>
    %cst_43 = arith.constant dense<0xFF800000> : vector<16xf32>
    %101 = vector.multi_reduction <maximumf>, %100, %cst_43 [1] : vector<16x128xf32> to vector<16xf32>
    %102 = vector.shape_cast %101 : vector<16xf32> to vector<16x1xf32>
    %cst_44 = arith.constant 0.000000e+00 : f32
    %103 = vector.broadcast %cst_44 : f32 to vector<16x1xf32>
    %104 = arith.select %47, %102, %103 : vector<16x1xi1>, vector<16x1xf32>
    %c3_i32 = arith.constant 3 : i32
    %105 = vector.broadcast %c3_i32 : i32 to vector<16x16xi32>
    %106 = arith.cmpi eq, %56, %105 : vector<16x16xi32>
    %107 = vector.shape_cast %104 : vector<16x1xf32> to vector<16x1xf32>
    %108 = vector.broadcast %107 : vector<16x1xf32> to vector<16x16xf32>
    %109 = arith.select %106, %108, %96 : vector<16x16xi1>, vector<16x16xf32>
    %c4 = arith.constant 4 : index
    %c0_45 = arith.constant 0 : index
    %110 = vector.load %arg6[%c4, %c0_45] : memref<16x128xf32, #tpu.memory_space<vmem>>, vector<1x128xf32>
    %111 = vector.broadcast %110 : vector<1x128xf32> to vector<16x128xf32>
    %112 = arith.mulf %41, %111 : vector<16x128xf32>
    %113 = arith.addf %112, %55 : vector<16x128xf32>
    %cst_46 = arith.constant dense<0xFF800000> : vector<16xf32>
    %114 = vector.multi_reduction <maximumf>, %113, %cst_46 [1] : vector<16x128xf32> to vector<16xf32>
    %115 = vector.shape_cast %114 : vector<16xf32> to vector<16x1xf32>
    %cst_47 = arith.constant 0.000000e+00 : f32
    %116 = vector.broadcast %cst_47 : f32 to vector<16x1xf32>
    %117 = arith.select %47, %115, %116 : vector<16x1xi1>, vector<16x1xf32>
    %c4_i32 = arith.constant 4 : i32
    %118 = vector.broadcast %c4_i32 : i32 to vector<16x16xi32>
    %119 = arith.cmpi eq, %56, %118 : vector<16x16xi32>
    %120 = vector.shape_cast %117 : vector<16x1xf32> to vector<16x1xf32>
    %121 = vector.broadcast %120 : vector<16x1xf32> to vector<16x16xf32>
    %122 = arith.select %119, %121, %109 : vector<16x16xi1>, vector<16x16xf32>
    %c5 = arith.constant 5 : index
    %c0_48 = arith.constant 0 : index
    %123 = vector.load %arg6[%c5, %c0_48] : memref<16x128xf32, #tpu.memory_space<vmem>>, vector<1x128xf32>
    %124 = vector.broadcast %123 : vector<1x128xf32> to vector<16x128xf32>
    %125 = arith.mulf %41, %124 : vector<16x128xf32>
    %126 = arith.addf %125, %55 : vector<16x128xf32>
    %cst_49 = arith.constant dense<0xFF800000> : vector<16xf32>
    %127 = vector.multi_reduction <maximumf>, %126, %cst_49 [1] : vector<16x128xf32> to vector<16xf32>
    %128 = vector.shape_cast %127 : vector<16xf32> to vector<16x1xf32>
    %cst_50 = arith.constant 0.000000e+00 : f32
    %129 = vector.broadcast %cst_50 : f32 to vector<16x1xf32>
    %130 = arith.select %47, %128, %129 : vector<16x1xi1>, vector<16x1xf32>
    %c5_i32 = arith.constant 5 : i32
    %131 = vector.broadcast %c5_i32 : i32 to vector<16x16xi32>
    %132 = arith.cmpi eq, %56, %131 : vector<16x16xi32>
    %133 = vector.shape_cast %130 : vector<16x1xf32> to vector<16x1xf32>
    %134 = vector.broadcast %133 : vector<16x1xf32> to vector<16x16xf32>
    %135 = arith.select %132, %134, %122 : vector<16x16xi1>, vector<16x16xf32>
    %c6 = arith.constant 6 : index
    %c0_51 = arith.constant 0 : index
    %136 = vector.load %arg6[%c6, %c0_51] : memref<16x128xf32, #tpu.memory_space<vmem>>, vector<1x128xf32>
    %137 = vector.broadcast %136 : vector<1x128xf32> to vector<16x128xf32>
    %138 = arith.mulf %41, %137 : vector<16x128xf32>
    %139 = arith.addf %138, %55 : vector<16x128xf32>
    %cst_52 = arith.constant dense<0xFF800000> : vector<16xf32>
    %140 = vector.multi_reduction <maximumf>, %139, %cst_52 [1] : vector<16x128xf32> to vector<16xf32>
    %141 = vector.shape_cast %140 : vector<16xf32> to vector<16x1xf32>
    %cst_53 = arith.constant 0.000000e+00 : f32
    %142 = vector.broadcast %cst_53 : f32 to vector<16x1xf32>
    %143 = arith.select %47, %141, %142 : vector<16x1xi1>, vector<16x1xf32>
    %c6_i32 = arith.constant 6 : i32
    %144 = vector.broadcast %c6_i32 : i32 to vector<16x16xi32>
    %145 = arith.cmpi eq, %56, %144 : vector<16x16xi32>
    %146 = vector.shape_cast %143 : vector<16x1xf32> to vector<16x1xf32>
    %147 = vector.broadcast %146 : vector<16x1xf32> to vector<16x16xf32>
    %148 = arith.select %145, %147, %135 : vector<16x16xi1>, vector<16x16xf32>
    %c7 = arith.constant 7 : index
    %c0_54 = arith.constant 0 : index
    %149 = vector.load %arg6[%c7, %c0_54] : memref<16x128xf32, #tpu.memory_space<vmem>>, vector<1x128xf32>
    %150 = vector.broadcast %149 : vector<1x128xf32> to vector<16x128xf32>
    %151 = arith.mulf %41, %150 : vector<16x128xf32>
    %152 = arith.addf %151, %55 : vector<16x128xf32>
    %cst_55 = arith.constant dense<0xFF800000> : vector<16xf32>
    %153 = vector.multi_reduction <maximumf>, %152, %cst_55 [1] : vector<16x128xf32> to vector<16xf32>
    %154 = vector.shape_cast %153 : vector<16xf32> to vector<16x1xf32>
    %cst_56 = arith.constant 0.000000e+00 : f32
    %155 = vector.broadcast %cst_56 : f32 to vector<16x1xf32>
    %156 = arith.select %47, %154, %155 : vector<16x1xi1>, vector<16x1xf32>
    %c7_i32 = arith.constant 7 : i32
    %157 = vector.broadcast %c7_i32 : i32 to vector<16x16xi32>
    %158 = arith.cmpi eq, %56, %157 : vector<16x16xi32>
    %159 = vector.shape_cast %156 : vector<16x1xf32> to vector<16x1xf32>
    %160 = vector.broadcast %159 : vector<16x1xf32> to vector<16x16xf32>
    %161 = arith.select %158, %160, %148 : vector<16x16xi1>, vector<16x16xf32>
    %c8 = arith.constant 8 : index
    %c0_57 = arith.constant 0 : index
    %162 = vector.load %arg6[%c8, %c0_57] : memref<16x128xf32, #tpu.memory_space<vmem>>, vector<1x128xf32>
    %163 = vector.broadcast %162 : vector<1x128xf32> to vector<16x128xf32>
    %164 = arith.mulf %41, %163 : vector<16x128xf32>
    %165 = arith.addf %164, %55 : vector<16x128xf32>
    %cst_58 = arith.constant dense<0xFF800000> : vector<16xf32>
    %166 = vector.multi_reduction <maximumf>, %165, %cst_58 [1] : vector<16x128xf32> to vector<16xf32>
    %167 = vector.shape_cast %166 : vector<16xf32> to vector<16x1xf32>
    %cst_59 = arith.constant 0.000000e+00 : f32
    %168 = vector.broadcast %cst_59 : f32 to vector<16x1xf32>
    %169 = arith.select %47, %167, %168 : vector<16x1xi1>, vector<16x1xf32>
    %c8_i32 = arith.constant 8 : i32
    %170 = vector.broadcast %c8_i32 : i32 to vector<16x16xi32>
    %171 = arith.cmpi eq, %56, %170 : vector<16x16xi32>
    %172 = vector.shape_cast %169 : vector<16x1xf32> to vector<16x1xf32>
    %173 = vector.broadcast %172 : vector<16x1xf32> to vector<16x16xf32>
    %174 = arith.select %171, %173, %161 : vector<16x16xi1>, vector<16x16xf32>
    %c9 = arith.constant 9 : index
    %c0_60 = arith.constant 0 : index
    %175 = vector.load %arg6[%c9, %c0_60] : memref<16x128xf32, #tpu.memory_space<vmem>>, vector<1x128xf32>
    %176 = vector.broadcast %175 : vector<1x128xf32> to vector<16x128xf32>
    %177 = arith.mulf %41, %176 : vector<16x128xf32>
    %178 = arith.addf %177, %55 : vector<16x128xf32>
    %cst_61 = arith.constant dense<0xFF800000> : vector<16xf32>
    %179 = vector.multi_reduction <maximumf>, %178, %cst_61 [1] : vector<16x128xf32> to vector<16xf32>
    %180 = vector.shape_cast %179 : vector<16xf32> to vector<16x1xf32>
    %cst_62 = arith.constant 0.000000e+00 : f32
    %181 = vector.broadcast %cst_62 : f32 to vector<16x1xf32>
    %182 = arith.select %47, %180, %181 : vector<16x1xi1>, vector<16x1xf32>
    %c9_i32 = arith.constant 9 : i32
    %183 = vector.broadcast %c9_i32 : i32 to vector<16x16xi32>
    %184 = arith.cmpi eq, %56, %183 : vector<16x16xi32>
    %185 = vector.shape_cast %182 : vector<16x1xf32> to vector<16x1xf32>
    %186 = vector.broadcast %185 : vector<16x1xf32> to vector<16x16xf32>
    %187 = arith.select %184, %186, %174 : vector<16x16xi1>, vector<16x16xf32>
    %c10 = arith.constant 10 : index
    %c0_63 = arith.constant 0 : index
    %188 = vector.load %arg6[%c10, %c0_63] : memref<16x128xf32, #tpu.memory_space<vmem>>, vector<1x128xf32>
    %189 = vector.broadcast %188 : vector<1x128xf32> to vector<16x128xf32>
    %190 = arith.mulf %41, %189 : vector<16x128xf32>
    %191 = arith.addf %190, %55 : vector<16x128xf32>
    %cst_64 = arith.constant dense<0xFF800000> : vector<16xf32>
    %192 = vector.multi_reduction <maximumf>, %191, %cst_64 [1] : vector<16x128xf32> to vector<16xf32>
    %193 = vector.shape_cast %192 : vector<16xf32> to vector<16x1xf32>
    %cst_65 = arith.constant 0.000000e+00 : f32
    %194 = vector.broadcast %cst_65 : f32 to vector<16x1xf32>
    %195 = arith.select %47, %193, %194 : vector<16x1xi1>, vector<16x1xf32>
    %c10_i32 = arith.constant 10 : i32
    %196 = vector.broadcast %c10_i32 : i32 to vector<16x16xi32>
    %197 = arith.cmpi eq, %56, %196 : vector<16x16xi32>
    %198 = vector.shape_cast %195 : vector<16x1xf32> to vector<16x1xf32>
    %199 = vector.broadcast %198 : vector<16x1xf32> to vector<16x16xf32>
    %200 = arith.select %197, %199, %187 : vector<16x16xi1>, vector<16x16xf32>
    %c11 = arith.constant 11 : index
    %c0_66 = arith.constant 0 : index
    %201 = vector.load %arg6[%c11, %c0_66] : memref<16x128xf32, #tpu.memory_space<vmem>>, vector<1x128xf32>
    %202 = vector.broadcast %201 : vector<1x128xf32> to vector<16x128xf32>
    %203 = arith.mulf %41, %202 : vector<16x128xf32>
    %204 = arith.addf %203, %55 : vector<16x128xf32>
    %cst_67 = arith.constant dense<0xFF800000> : vector<16xf32>
    %205 = vector.multi_reduction <maximumf>, %204, %cst_67 [1] : vector<16x128xf32> to vector<16xf32>
    %206 = vector.shape_cast %205 : vector<16xf32> to vector<16x1xf32>
    %cst_68 = arith.constant 0.000000e+00 : f32
    %207 = vector.broadcast %cst_68 : f32 to vector<16x1xf32>
    %208 = arith.select %47, %206, %207 : vector<16x1xi1>, vector<16x1xf32>
    %c11_i32 = arith.constant 11 : i32
    %209 = vector.broadcast %c11_i32 : i32 to vector<16x16xi32>
    %210 = arith.cmpi eq, %56, %209 : vector<16x16xi32>
    %211 = vector.shape_cast %208 : vector<16x1xf32> to vector<16x1xf32>
    %212 = vector.broadcast %211 : vector<16x1xf32> to vector<16x16xf32>
    %213 = arith.select %210, %212, %200 : vector<16x16xi1>, vector<16x16xf32>
    %c0_69 = arith.constant 0 : index
    %c0_70 = arith.constant 0 : index
    %214 = vector.load %arg2[%c0_69, %c0_70] : memref<16x8xf32, #tpu.memory_space<vmem>>, vector<16x8xf32>
    %c0_71 = arith.constant 0 : index
    %c0_72 = arith.constant 0 : index
    %215 = vector.load %arg9[%c0_71, %c0_72] : memref<8x32xf32, #tpu.memory_space<vmem>>, vector<8x32xf32>
    %cst_73 = arith.constant dense<0.000000e+00> : vector<16x32xf32>
    %216 = tpu.matmul %214, %215, %cst_73 {dimension_numbers = #tpu.dot_dimension_numbers<[1], [0], [0], [1], [0, 0, 1, 1], [], []>} : vector<16x8xf32>, vector<8x32xf32>, vector<16x32xf32> -> vector<16x32xf32>
    %c0_74 = arith.constant 0 : index
    %c0_75 = arith.constant 0 : index
    %217 = vector.load %arg10[%c0_74, %c0_75] : memref<16x32xf32, #tpu.memory_space<vmem>>, vector<16x32xf32>
    %cst_76 = arith.constant dense<0.000000e+00> : vector<16x32xf32>
    %218 = tpu.matmul %52, %217, %cst_76 {dimension_numbers = #tpu.dot_dimension_numbers<[1], [0], [0], [1], [0, 0, 1, 1], [], []>} : vector<16x16xf32>, vector<16x32xf32>, vector<16x32xf32> -> vector<16x32xf32>
    %219 = arith.addf %216, %218 : vector<16x32xf32>
    %c0_77 = arith.constant 0 : index
    %c0_78 = arith.constant 0 : index
    %220 = vector.load %arg11[%c0_77, %c0_78] : memref<16x32xf32, #tpu.memory_space<vmem>>, vector<16x32xf32>
    %cst_79 = arith.constant dense<0.000000e+00> : vector<16x32xf32>
    %221 = tpu.matmul %213, %220, %cst_79 {dimension_numbers = #tpu.dot_dimension_numbers<[1], [0], [0], [1], [0, 0, 1, 1], [], []>} : vector<16x16xf32>, vector<16x32xf32>, vector<16x32xf32> -> vector<16x32xf32>
    %222 = arith.addf %219, %221 : vector<16x32xf32>
    %c0_80 = arith.constant 0 : index
    %c0_81 = arith.constant 0 : index
    %223 = vector.load %arg12[%c0_80, %c0_81] : memref<1x32xf32, #tpu.memory_space<vmem>>, vector<1x32xf32>
    %224 = vector.broadcast %223 : vector<1x32xf32> to vector<16x32xf32>
    %225 = arith.addf %222, %224 : vector<16x32xf32>
    %c0_82 = arith.constant 0 : index
    %c0_83 = arith.constant 0 : index
    %226 = vector.load %arg13[%c0_82, %c0_83] : memref<32x8xf32, #tpu.memory_space<vmem>>, vector<32x8xf32>
    %cst_84 = arith.constant dense<0.000000e+00> : vector<16x8xf32>
    %227 = tpu.matmul %225, %226, %cst_84 {dimension_numbers = #tpu.dot_dimension_numbers<[1], [0], [0], [1], [0, 0, 1, 1], [], []>} : vector<16x32xf32>, vector<32x8xf32>, vector<16x8xf32> -> vector<16x8xf32>
    %c0_85 = arith.constant 0 : index
    %c0_86 = arith.constant 0 : index
    %228 = vector.load %arg14[%c0_85, %c0_86] : memref<8x8xf32, #tpu.memory_space<vmem>>, vector<8x8xf32>
    %cst_87 = arith.constant dense<0.000000e+00> : vector<16x8xf32>
    %229 = tpu.matmul %0, %228, %cst_87 {dimension_numbers = #tpu.dot_dimension_numbers<[1], [0], [0], [1], [0, 0, 1, 1], [], []>} : vector<16x8xf32>, vector<8x8xf32>, vector<16x8xf32> -> vector<16x8xf32>
    %230 = arith.addf %227, %229 : vector<16x8xf32>
    %c0_88 = arith.constant 0 : index
    %c0_89 = arith.constant 0 : index
    %231 = vector.load %arg15[%c0_88, %c0_89] : memref<1x8xf32, #tpu.memory_space<vmem>>, vector<1x8xf32>
    %232 = vector.broadcast %231 : vector<1x8xf32> to vector<16x8xf32>
    %233 = arith.addf %230, %232 : vector<16x8xf32>
    %cst_90 = arith.constant 0.000000e+00 : f32
    %234 = vector.broadcast %cst_90 : f32 to vector<16x8xf32>
    %235 = arith.cmpf ogt, %233, %234 : vector<16x8xf32>
    %cst_91 = arith.constant 0.000000e+00 : f32
    %236 = vector.broadcast %cst_91 : f32 to vector<16x8xf32>
    %237 = arith.minimumf %233, %236 : vector<16x8xf32>
    %238 = math.exp %237 : vector<16x8xf32>
    %cst_92 = arith.constant 1.000000e+00 : f32
    %239 = vector.broadcast %cst_92 : f32 to vector<16x8xf32>
    %240 = arith.subf %238, %239 : vector<16x8xf32>
    %241 = arith.select %235, %233, %240 : vector<16x8xi1>, vector<16x8xf32>
    %c0_93 = arith.constant 0 : index
    %c0_94 = arith.constant 0 : index
    %242 = vector.load %arg16[%c0_93, %c0_94] : memref<8x8xf32, #tpu.memory_space<vmem>>, vector<8x8xf32>
    %cst_95 = arith.constant dense<0.000000e+00> : vector<16x8xf32>
    %243 = tpu.matmul %241, %242, %cst_95 {dimension_numbers = #tpu.dot_dimension_numbers<[1], [0], [0], [1], [0, 0, 1, 1], [], []>} : vector<16x8xf32>, vector<8x8xf32>, vector<16x8xf32> -> vector<16x8xf32>
    %c0_96 = arith.constant 0 : index
    %c0_97 = arith.constant 0 : index
    %244 = vector.load %arg17[%c0_96, %c0_97] : memref<1x8xf32, #tpu.memory_space<vmem>>, vector<1x8xf32>
    %245 = vector.broadcast %244 : vector<1x8xf32> to vector<16x8xf32>
    %246 = arith.addf %243, %245 : vector<16x8xf32>
    %cst_98 = arith.constant 0.000000e+00 : f32
    %247 = vector.broadcast %cst_98 : f32 to vector<16x8xf32>
    %248 = arith.cmpf ogt, %246, %247 : vector<16x8xf32>
    %cst_99 = arith.constant 0.000000e+00 : f32
    %249 = vector.broadcast %cst_99 : f32 to vector<16x8xf32>
    %250 = arith.minimumf %246, %249 : vector<16x8xf32>
    %251 = math.exp %250 : vector<16x8xf32>
    %cst_100 = arith.constant 1.000000e+00 : f32
    %252 = vector.broadcast %cst_100 : f32 to vector<16x8xf32>
    %253 = arith.subf %251, %252 : vector<16x8xf32>
    %254 = arith.select %248, %246, %253 : vector<16x8xi1>, vector<16x8xf32>
    %c0_101 = arith.constant 0 : index
    %c0_102 = arith.constant 0 : index
    %255 = vector.load %arg18[%c0_101, %c0_102] : memref<16x8xf32, #tpu.memory_space<vmem>>, vector<16x8xf32>
    tpu.vector_store %arg18[%c0_101, %c0_102], %254 {strides = array<i32>} : memref<16x8xf32, #tpu.memory_space<vmem>>, vector<16x8xf32>,
    return
  }
  func.func @transform_0(%arg0: i32, %arg1: memref<1xi32, #tpu.memory_space<smem>>) -> (i32, i32) {
    %c0_i32 = arith.constant 0 : i32
    %c0_i32_0 = arith.constant 0 : i32
    return %arg0, %c0_i32 : i32, i32
  }
  func.func @transform_1(%arg0: i32, %arg1: memref<1xi32, #tpu.memory_space<smem>>) -> (i32, i32) {
    %c0_i32 = arith.constant 0 : i32
    %c0_i32_0 = arith.constant 0 : i32
    return %arg0, %c0_i32 : i32, i32
  }
  func.func @transform_2(%arg0: i32, %arg1: memref<1xi32, #tpu.memory_space<smem>>) -> (i32, i32) {
    %c0_i32 = arith.constant 0 : i32
    %c0_i32_0 = arith.constant 0 : i32
    %c0_i32_1 = arith.constant 0 : i32
    return %c0_i32, %c0_i32_0 : i32, i32
  }
  func.func @transform_3(%arg0: i32, %arg1: memref<1xi32, #tpu.memory_space<smem>>) -> (i32, i32) {
    %c0_i32 = arith.constant 0 : i32
    %c0_i32_0 = arith.constant 0 : i32
    %c0_i32_1 = arith.constant 0 : i32
    return %c0_i32, %c0_i32_0 : i32, i32
  }
  func.func @transform_4(%arg0: i32, %arg1: memref<1xi32, #tpu.memory_space<smem>>) -> (i32, i32) {
    %c0_i32 = arith.constant 0 : i32
    %c0_i32_0 = arith.constant 0 : i32
    %c0_i32_1 = arith.constant 0 : i32
    return %c0_i32, %c0_i32_0 : i32, i32
  }
  func.func @transform_5(%arg0: i32, %arg1: memref<1xi32, #tpu.memory_space<smem>>) -> (i32, i32) {
    %c0_i32 = arith.constant 0 : i32
    %c0_i32_0 = arith.constant 0 : i32
    return %arg0, %c0_i32 : i32, i32
  }
  func.func @transform_6(%arg0: i32, %arg1: memref<1xi32, #tpu.memory_space<smem>>) -> (i32, i32) {
    %c0_i32 = arith.constant 0 : i32
    %c0_i32_0 = arith.constant 0 : i32
    %c0_i32_1 = arith.constant 0 : i32
    return %c0_i32, %c0_i32_0 : i32, i32
  }
  func.func @transform_7(%arg0: i32, %arg1: memref<1xi32, #tpu.memory_space<smem>>) -> (i32, i32) {
    %c0_i32 = arith.constant 0 : i32
    %c0_i32_0 = arith.constant 0 : i32
    %c0_i32_1 = arith.constant 0 : i32
    return %c0_i32, %c0_i32_0 : i32, i32
  }
  func.func @transform_8(%arg0: i32, %arg1: memref<1xi32, #tpu.memory_space<smem>>) -> (i32, i32) {
    %c0_i32 = arith.constant 0 : i32
    %c0_i32_0 = arith.constant 0 : i32
    %c0_i32_1 = arith.constant 0 : i32
    return %c0_i32, %c0_i32_0 : i32, i32
  }
  func.func @transform_9(%arg0: i32, %arg1: memref<1xi32, #tpu.memory_space<smem>>) -> (i32, i32) {
    %c0_i32 = arith.constant 0 : i32
    %c0_i32_0 = arith.constant 0 : i32
    %c0_i32_1 = arith.constant 0 : i32
    return %c0_i32, %c0_i32_0 : i32, i32
  }
  func.func @transform_10(%arg0: i32, %arg1: memref<1xi32, #tpu.memory_space<smem>>) -> (i32, i32) {
    %c0_i32 = arith.constant 0 : i32
    %c0_i32_0 = arith.constant 0 : i32
    %c0_i32_1 = arith.constant 0 : i32
    return %c0_i32, %c0_i32_0 : i32, i32
  }
  func.func @transform_11(%arg0: i32, %arg1: memref<1xi32, #tpu.memory_space<smem>>) -> (i32, i32) {
    %c0_i32 = arith.constant 0 : i32
    %c0_i32_0 = arith.constant 0 : i32
    %c0_i32_1 = arith.constant 0 : i32
    return %c0_i32, %c0_i32_0 : i32, i32
  }
  func.func @transform_12(%arg0: i32, %arg1: memref<1xi32, #tpu.memory_space<smem>>) -> (i32, i32) {
    %c0_i32 = arith.constant 0 : i32
    %c0_i32_0 = arith.constant 0 : i32
    %c0_i32_1 = arith.constant 0 : i32
    return %c0_i32, %c0_i32_0 : i32, i32
  }
  func.func @transform_13(%arg0: i32, %arg1: memref<1xi32, #tpu.memory_space<smem>>) -> (i32, i32) {
    %c0_i32 = arith.constant 0 : i32
    %c0_i32_0 = arith.constant 0 : i32
    %c0_i32_1 = arith.constant 0 : i32
    return %c0_i32, %c0_i32_0 : i32, i32
  }
  func.func @transform_14(%arg0: i32, %arg1: memref<1xi32, #tpu.memory_space<smem>>) -> (i32, i32) {
    %c0_i32 = arith.constant 0 : i32
    %c0_i32_0 = arith.constant 0 : i32
    %c0_i32_1 = arith.constant 0 : i32
    return %c0_i32, %c0_i32_0 : i32, i32
  }
  func.func @transform_15(%arg0: i32, %arg1: memref<1xi32, #tpu.memory_space<smem>>) -> (i32, i32) {
    %c0_i32 = arith.constant 0 : i32
    %c0_i32_0 = arith.constant 0 : i32
    %c0_i32_1 = arith.constant 0 : i32
    return %c0_i32, %c0_i32_0 : i32, i32
  }
  func.func @transform_16(%arg0: i32, %arg1: memref<1xi32, #tpu.memory_space<smem>>) -> (i32, i32) {
    %c0_i32 = arith.constant 0 : i32
    %c0_i32_0 = arith.constant 0 : i32
    return %arg0, %c0_i32 : i32, i32
  }
}

</mosaic_0001>

<bundles_post_ra>
// kernel: gravnet_model_forward.17
= control target key start
LH: loop header
LB: loop body
LE: loop exit
PB: predicated region body
PF: predicated region fallthrough
CT: control target
= control target key end

     0   :  { %s633_s21 = smov 0   ;;  %s677_s0 = inlined_call_operand.vmem [shape: f32[32,16], index: 0, kind: input, shape index: {}]   ;;  %s678_s1 = inlined_call_operand.vmem [shape: f32[16,8], index: 1, kind: input, shape index: {}]   ;;  %s679_s2 = inlined_call_operand.vmem [shape: f32[1,8], index: 2, kind: input, shape index: {}]   ;;  %s680_s3 = inlined_call_operand.vmem [shape: f32[16,16], index: 3, kind: input, shape index: {}]   ;;  %s681_s4 = inlined_call_operand.vmem [shape: f32[1,16], index: 4, kind: input, shape index: {}]   ;;  %s682_s5 = inlined_call_operand.vmem [shape: f32[32,8], index: 5, kind: output, shape index: {0}]   ;;  %s683_s6 = inlined_call_operand.vmem [shape: f32[32,16], index: 6, kind: output, shape index: {1}]  }
   0x1 LB: > { %s541_s22 = sadd.s32 4294967295, %s596_s21   ;;  %p545_p0 = scmp.ge.s32.totalorder %s596_s21, 1  ;;  %s596_s21 = sphi %s633_s21, %s17_s21  }
   0x2   : > { %p216_p1 = scmp.lt.s32.totalorder %s596_s21, 3 }
   0x4   : > { %p217_p2 = pnand %p545_p0, %p216_p1 }
   0x5   : > { %s546_s29 = sshll.u32 (!%p217_p2), %s541_s22, 1 }
   0x6   : > { %220 = sbr.rel (%p217_p2) target bundleno = 216 (0xd8), region = 40  ;;  %p252_p3 = scmp.lt.s32.totalorder (!%p217_p2), %s546_s29, 3 }
   0xb   : > { %v272_v0 = vld [vmem:[%s678_s1 + $0x8] sm:$0xff]  ;;  %v271_v2 = vld [vmem:[%s678_s1] sm:$0xff]  ;;  %s685_s29 = smov (!%p252_p3, %s546_s29), 3  ;;  %vm280_vm0 = vcmask 130048   ;;  %vm362_vm1 = vcmask 64512  }
   0xc   : > { %v366_v1 = vld [vmem:[%s680_s3 + $0x8] sm:$0xff]  ;;  %568 = vmatprep.subr.mxu0 %v272_v0  ;;  %v365_v3 = vld [vmem:[%s680_s3] sm:$0xff]  ;;  %s547_s8 = sshll.u32 %s685_s29, 3 }
   0xd   : > { %575 = vmatprep.subr.mxu1 %v366_v1  ;;  %569 = vmatpush3.msra.mxu0 %v272_v0  ;;  %s255_s11 = scalar_lea.vmem %s677_s0, %s547_s8  ;;  %v552_v8 = vld [vmem:[%s679_s2] ss:$0 sm:$0xff]  ;;  %s261_s18 = scalar_lea.vmem %s682_s5, %s547_s8 }
   0xe   : > { %576 = vmatpush3.msra.mxu1 %v366_v1  ;;  %570 = vmatprep.subr.mxu0 %v271_v2  ;;  %v269_v4 = vld [vmem:[%s255_s11] sm:$0xff]  ;;  %v270_v5 = vld [vmem:[%s255_s11 + $0x8] sm:$0xff]  ;;  %s267_s22 = scalar_lea.vmem %s683_s6, %s547_s8 }
   0xf   : > { %577 = vmatprep.subr.mxu1 %v365_v3  ;;  %571 = vmatpush3.msra.mxu0 %v271_v2  ;;  %v555_v9 = vld [vmem:[%s681_s4] ss:$0 sm:$0xff] }
  0x10   : > { %578 = vmatpush3.msra.mxu1 %v365_v3  ;;  %572 = vmatprep.mubr.msk.f32.mxu0 %vm280_vm0, %v269_v4 }
  0x11   : > { %579 = vmatprep.mubr.msk.f32.mxu1 %vm280_vm0, %v269_v4  ;;  %573 = vmatmul.mubr.msk.f32.vlgmr.msra.gmra.mxu0 %vm280_vm0, %v270_v5 }
  0x12   : > { %580 = vmatmul.mubr.msk.f32.vlgmr.msra.gmra.mxu1 %vm280_vm0, %v270_v5 }
  0xd1   : > { %v574_v6 = vpop.f32.mrf.mxu0 }
  0xd2   : > { %v581_v7 = vpop.f32.mrf.mxu1  ;;  %v359_v14 = vadd.f32 %v574_v6, %v552_v8 }
  0xd3   : > { %v353_v10 = vpop.f32.mrf.mxu0  ;;  %v446_v15 = vadd.f32 %v581_v7, %v555_v9 }
  0xd4   : > { %v440_v11 = vpop.f32.mrf.mxu1  ;;  %v354_v12 = vadd.f32 %v552_v8, %v353_v10  ;;  %364 = vst.msk [vmem:[%s261_s18 + $0x8] sm:$0xff] %vm362_vm1, %v359_v14 }
  0xd5   : > { %v441_v13 = vadd.f32 %v555_v9, %v440_v11  ;;  %450 = vst.msk [vmem:[%s267_s22 + $0x8] sm:$0xff] %vm280_vm0, %v446_v15 }
  0xd6   : > { %363 = vst.msk [vmem:[%s261_s18] sm:$0xff] %vm362_vm1, %v354_v12 }
  0xd7   : > { %449 = vst.msk [vmem:[%s267_s22] sm:$0xff] %vm280_vm0, %v441_v13 }
  0xd8 PF: > { %s17_s21 = sadd.s32 1, %s596_s21  }
  0xd9   : > { %p14_p4 = scmp.ge.s32.totalorder %s17_s21, 4  }
  0xdb   :  { %16 = sbr.rel (!%p14_p4) target bundleno = 1 (0x1), region = 82 }

// kernel: gravnet_model_forward.21
= control target key start
LH: loop header
LB: loop body
LE: loop exit
PB: predicated region body
PF: predicated region fallthrough
CT: control target
= control target key end

     0   :  { %s625_s21 = smov 0   ;;  %s663_s0 = inlined_call_operand.vmem [shape: f32[32,8], index: 0, kind: input, shape index: {}]   ;;  %s664_s1 = inlined_call_operand.vmem [shape: f32[8,8], index: 1, kind: input, shape index: {}]   ;;  %s665_s2 = inlined_call_operand.vmem [shape: f32[1,8], index: 2, kind: input, shape index: {}]   ;;  %s666_s3 = inlined_call_operand.vmem [shape: f32[8,16], index: 3, kind: input, shape index: {}]   ;;  %s667_s4 = inlined_call_operand.vmem [shape: f32[1,16], index: 4, kind: input, shape index: {}]   ;;  %s668_s5 = inlined_call_operand.vmem [shape: f32[32,8], index: 5, kind: output, shape index: {0}]   ;;  %s669_s6 = inlined_call_operand.vmem [shape: f32[32,16], index: 6, kind: output, shape index: {1}]  }
   0x1 LB: > { %s539_s22 = sadd.s32 4294967295, %s588_s21   ;;  %p543_p0 = scmp.ge.s32.totalorder %s588_s21, 1  ;;  %s588_s21 = sphi %s625_s21, %s17_s21  }
   0x2   : > { %p216_p1 = scmp.lt.s32.totalorder %s588_s21, 3 }
   0x4   : > { %p217_p2 = pnand %p543_p0, %p216_p1 }
   0x5   : > { %s544_s27 = sshll.u32 (!%p217_p2), %s539_s22, 1 }
   0x6   : > { %220 = sbr.rel (%p217_p2) target bundleno = 215 (0xd7), region = 40  ;;  %p252_p3 = scmp.lt.s32.totalorder (!%p217_p2), %s544_s27, 3 }
   0xb   : > { %v271_v0 = vld [vmem:[%s664_s1] sm:$0xff]  ;;  %s671_s27 = smov (!%p252_p3, %s544_s27), 3  ;;  %vm279_vm0 = vcmask 64512   ;;  %vm446_vm1 = vcmask 130048  }
   0xc   : > { %v363_v1 = vld [vmem:[%s666_s3] sm:$0xff]  ;;  %564 = vmatprep.subr.mxu0 %v271_v0  ;;  %s545_s28 = sshll.u32 %s671_s27, 3 }
   0xd   : > { %569 = vmatprep.subr.mxu1 %v363_v1  ;;  %565 = vmatpush3.msra.mxu0 %v271_v0  ;;  %s255_s7 = scalar_lea.vmem %s663_s0, %s545_s28  ;;  %v550_v6 = vld [vmem:[%s665_s2] ss:$0 sm:$0xff]  ;;  %s261_s14 = scalar_lea.vmem %s668_s5, %s545_s28 }
   0xe   : > { %570 = vmatpush3.msra.mxu1 %v363_v1  ;;  %v269_v2 = vld [vmem:[%s255_s7] sm:$0xff]  ;;  %v270_v3 = vld [vmem:[%s255_s7 + $0x8] sm:$0xff]  ;;  %s267_s17 = scalar_lea.vmem %s669_s6, %s545_s28 }
   0xf   : > { %566 = vmatprep.mubr.msk.f32.mxu0 %vm279_vm0, %v269_v2  ;;  %571 = vmatprep.mubr.msk.f32.mxu1 %vm279_vm0, %v269_v2  ;;  %v553_v7 = vld [vmem:[%s667_s4] ss:$0 sm:$0xff] }
  0x10   : > { %567 = vmatmul.mubr.msk.f32.vlgmr.msra.gmra.mxu0 %vm279_vm0, %v270_v3  ;;  %572 = vmatmul.mubr.msk.f32.vlgmr.msra.gmra.mxu1 %vm279_vm0, %v270_v3 }
  0xd0   : > { %v568_v4 = vpop.f32.mrf.mxu0  ;;  %v573_v5 = vpop.f32.mrf.mxu1 }
  0xd1   : > { %v358_v12 = vadd.f32 %v568_v4, %v550_v6  ;;  %v443_v13 = vadd.f32 %v573_v5, %v553_v7 }
  0xd2   : > { %v352_v8 = vpop.f32.mrf.mxu0  ;;  %v437_v9 = vpop.f32.mrf.mxu1 }
  0xd3   : > { %v353_v10 = vadd.f32 %v550_v6, %v352_v8  ;;  %v438_v11 = vadd.f32 %v553_v7, %v437_v9  ;;  %362 = vst.msk [vmem:[%s261_s14 + $0x8] sm:$0xff] %vm279_vm0, %v358_v12 }
  0xd4   : > { %448 = vst.msk [vmem:[%s267_s17 + $0x8] sm:$0xff] %vm446_vm1, %v443_v13 }
  0xd5   : > { %361 = vst.msk [vmem:[%s261_s14] sm:$0xff] %vm279_vm0, %v353_v10 }
  0xd6   : > { %447 = vst.msk [vmem:[%s267_s17] sm:$0xff] %vm446_vm1, %v438_v11 }
  0xd7 PF: > { %s17_s21 = sadd.s32 1, %s588_s21  }
  0xd8   : > { %p14_p4 = scmp.ge.s32.totalorder %s17_s21, 4  }
  0xda   :  { %16 = sbr.rel (!%p14_p4) target bundleno = 1 (0x1), region = 82 }

// kernel: gravnet_model_forward.19
= control target key start
LH: loop header
LB: loop body
LE: loop exit
PB: predicated region body
PF: predicated region fallthrough
CT: control target
= control target key end

     0   :  { %s442_s9 = smov 0   ;;  %s557_s0 = inlined_call_operand.vmem [shape: f32[32,8], index: 0, kind: input, shape index: {}]   ;;  %s558_s1 = inlined_call_operand.vmem [shape: s32[32,1], index: 1, kind: input, shape index: {}]   ;;  %s559_s2 = inlined_call_operand.vmem [shape: f32[4,8,8], index: 2, kind: output, shape index: {}]  }
   0x1 LB: > { %s365_s10 = sadd.s32 4294967295, %s420_s9   ;;  %p368_p0 = scmp.ge.s32.totalorder %s420_s9, 1  ;;  %s420_s9 = sphi %s442_s9, %s12_s9  }
   0x2   : > { %p119_p1 = scmp.lt.s32.totalorder %s420_s9, 3 }
   0x4   : > { %p120_p2 = pnand %p368_p0, %p119_p1 }
   0x5   : > { %s369_s11 = sshll.u32 (!%p120_p2), %s365_s10, 1  ;;  %p373_p4 = scmp.ne.s32.totalorder (!%p120_p2), %s365_s10, 0 }
   0x6   : > { %123 = sbr.rel (%p120_p2) target bundleno = 185 (0xb9), region = 28  ;;  %p142_p3 = scmp.lt.s32.totalorder (!%p120_p2), %s369_s11, 3 }
   0xb   : > { %s561_s11 = smov (!%p142_p3, %s369_s11), 3  ;;  %156 = sbr.rel (%p373_p4) target bundleno = 19 (0x13), region = 32 }
   0xc   : > { %s370_s12 = sshll.u32 %s561_s11, 3 }
   0xd   : > { %s453_s15 = scalar_lea.vmem %s557_s0, %s370_s12  ;;  %s151_s18 = scalar_lea.vmem %s558_s1, %s370_s12 }
  0x10   : > { %vm157_vm0 = vcmask 64512   ;;  %v422_v0 = vmov 0.0   ;;  %v423_v1 = vmov 1e+30   ;;  %v424_v2 = vmov -1e+30  }
  0x11   : > { %158 = vst.msk [vmem:[%s559_s2] sm:$0xff] %vm157_vm0, %v422_v0  ;;  %376 = vst.msk [vmem:[%s559_s2 + $0x18] sm:$0xff] %vm157_vm0, %v422_v0 }
  0x12   : > { %374 = vst.msk [vmem:[%s559_s2 + $0x8] sm:$0xff] %vm157_vm0, %v423_v1  ;;  %375 = vst.msk [vmem:[%s559_s2 + $0x10] sm:$0xff] %vm157_vm0, %v424_v2 }
  0x13 PF: > { %v168_v3 = vld [vmem:[%s151_s18 + $0x8] sm:$0xff]  ;;  %v167_v4 = vld [vmem:[%s151_s18] sm:$0xff]  ;;  %v425_v5 = vmov 0   ;;  %v426_v7 = vmov 0.0   ;;  %vm189_vm6 = vcmask 64512   ;;  %v169_v19 = vlaneseq }
  0x14   : > { %408 = vset.pattern.permute.xlu1 %v425_v5  ;;  %vm172_vm1 = vcmp.eq.s32.totalorder %v168_v3, 0  ;;  %vm242_vm2 = vcmp.eq.s32.totalorder %v168_v3, 1  ;;  %402 = vset.pattern.permute.xlu0 %v425_v5  ;;  %vm171_vm3 = vcmp.eq.s32.totalorder %v167_v4, 0  ;;  %vm241_vm4 = vcmp.eq.s32.totalorder %v167_v4, 1  ;;  %v473_v18 = vld [vmem:[%s453_s15 + $0x8] sm:$0xff]  ;;  %v476_v21 = vld [vmem:[%s453_s15] sm:$0xff] }
  0x15   : > { %v174_v6 = vsel %vm172_vm1, 1, %v425_v5  ;;  %v380_v8 = vsel %vm242_vm2, 1.0, %v426_v7  ;;  %v377_v9 = vsel %vm171_vm3, 1.0, %v426_v7  ;;  %v378_v10 = vsel %vm172_vm1, 1.0, %v426_v7 }
  0x16   : > { %203 = vperm.xlu1 %408, %v174_v6   ;;  %v403_v11 = vpack.i.bf16 %v378_v10, %v377_v9  ;;  %v379_v12 = vsel %vm241_vm4, 1.0, %v426_v7  ;;  %v173_v14 = vsel %vm171_vm3, 1, %v425_v5  ;;  %v244_v15 = vsel %vm242_vm2, 1, %v425_v5 }
  0x17   : > { %v409_v13 = vpack.i.bf16 %v380_v8, %v379_v12  ;;  %v243_v16 = vsel %vm241_vm4, 1, %v425_v5  ;;  %v484_v33 = vshrl.u32 %v169_v19, 7 }
  0x18   : > { %404 = vperm.xlu0 %402, %v403_v11  }
  0x19   : > { %vm236_vm9 = vcmp.eq.s32.totalorder %v484_v33, 0  ;;  %vm305_vm11 = vcmp.eq.s32.totalorder %v484_v33, 1 }
  0x1a   : > { %410 = vperm.xlu1 %408, %v409_v13  }
  0x1c   : > { %200 = vperm.xlu0 %402, %v173_v14  }
  0x1e   : > { %272 = vperm.xlu1 %408, %v244_v15  }
  0x20   : > { %269 = vperm.xlu0 %402, %v243_v16  }
  0x91   : > { %v204_v17 = vpop.permute.xlu1 %203 }
  0x92   : > { %vm206_vm5 = vcmp.eq.s32.totalorder %v204_v17, 1 }
  0x93   : > { %v405_v20 = vpop.permute.xlu0 %404  ;;  %v208_v22 = vsel %vm206_vm5, %v473_v18, 1e+30  ;;  %v219_v23 = vsel %vm206_vm5, %v473_v18, -1e+30 }
  0x94   : > { %v407_v24 = vunpack.i.h.bf16 %v405_v20  ;;  %v406_v25 = vunpack.i.l.bf16 %v405_v20  ;;  %v210_v31 = vsel %vm189_vm6, %v208_v22, inf  ;;  %v221_v32 = vsel %vm189_vm6, %v219_v23, -inf  ;;  %v385_v22 = vld [vmem:[%s559_s2 + $0x18] sm:$0xff] }
  0x95   : > { %v411_v26 = vpop.permute.xlu1 %410 }
  0x96   : > { %v187_v27 = vmul.f32 %v406_v25, %v476_v21  ;;  %v188_v28 = vmul.f32 %v407_v24, %v473_v18  ;;  %v229_v29 = vadd.f32 %v407_v24, %v406_v25  ;;  %v413_v30 = vunpack.i.h.bf16 %v411_v26 }
  0x97   : > { %v412_v34 = vunpack.i.l.bf16 %v411_v26  ;;  %v201_v35 = vpop.permute.xlu0 %200 }
  0x98   : > { %v190_v36 = vsel %vm189_vm6, %v187_v27, 0.0  ;;  %v191_v37 = vsel %vm189_vm6, %v188_v28, 0.0  ;;  %v230_v38 = vrot.slane %v229_v29, 4  ;;  %v258_v39 = vmul.f32 %v413_v30, %v473_v18 }
  0x99   : > { %v192_v40 = vadd.f32 %v191_v37, %v190_v36  ;;  %v257_v41 = vmul.f32 %v412_v34, %v476_v21  ;;  %v298_v42 = vadd.f32 %v413_v30, %v412_v34  ;;  %vm205_vm7 = vcmp.eq.s32.totalorder %v201_v35, 1  ;;  %v273_v51 = vpop.permute.xlu1 %272  ;;  %v310_v34 = vld [vmem:[%s559_s2] sm:$0xff] }
  0x9a   : > { %v231_v43 = vadd.f32 %v230_v38, %v229_v29  ;;  %v260_v44 = vsel %vm189_vm6, %v258_v39, 0.0  ;;  %v207_v45 = vsel %vm205_vm7, %v476_v21, 1e+30  ;;  %v218_v46 = vsel %vm205_vm7, %v476_v21, -1e+30 }
  0x9b   : > { %v193_v47 = vrot.slane %v192_v40, 4  ;;  %v259_v48 = vsel %vm189_vm6, %v257_v41, 0.0  ;;  %v299_v49 = vrot.slane %v298_v42, 4  ;;  %v209_v50 = vsel %vm189_vm6, %v207_v45, inf  ;;  %v270_v1 = vpop.permute.xlu0 %269 }
  0x9c   : > { %v232_v52 = vrot.slane %v231_v43, 2  ;;  %v261_v53 = vadd.f32 %v260_v44, %v259_v48  ;;  %v211_v54 = vmin.f32 %v209_v50, %v210_v31  ;;  %v220_v55 = vsel %vm189_vm6, %v218_v46, -inf }
  0x9d   : > { %v194_v56 = vadd.f32 %v193_v47, %v192_v40  ;;  %v300_v57 = vadd.f32 %v299_v49, %v298_v42  ;;  %v222_v58 = vmax.f32 %v220_v55, %v221_v32  ;;  %vm275_vm8 = vcmp.eq.s32.totalorder %v273_v51, 1  ;;  %v381_v51 = vld [vmem:[%s559_s2 + $0x8] sm:$0xff] }
  0x9e   : > { %v233_v59 = vadd.f32 %v232_v52, %v231_v43  ;;  %v262_v60 = vrot.slane %v261_v53, 4  ;;  %v212_v61 = vrot.slane %v211_v54, 4  ;;  %v277_v8 = vsel %vm275_vm8, %v473_v18, 1e+30 }
  0x9f   : > { %v195_v62 = vrot.slane %v194_v56, 2  ;;  %v301_v63 = vrot.slane %v300_v57, 2  ;;  %v223_v0 = vrot.slane %v222_v58, 4  ;;  %vm274_vm10 = vcmp.eq.s32.totalorder %v270_v1, 1 }
  0xa0   : > { %v234_v2 = vrot.slane %v233_v59, 1  ;;  %v263_v3 = vadd.f32 %v262_v60, %v261_v53  ;;  %v213_v4 = vmin.f32 %v211_v54, %v212_v61  ;;  %v276_v14 = vsel %vm274_vm10, %v476_v21, 1e+30 }
  0xa1   : > { %v196_v5 = vadd.f32 %v195_v62, %v194_v56  ;;  %v302_v6 = vadd.f32 %v301_v63, %v300_v57  ;;  %v224_v7 = vmax.f32 %v222_v58, %v223_v0  ;;  %v279_v17 = vsel %vm189_vm6, %v277_v8, inf }
  0xa2   : > { %v235_v9 = vadd.f32 %v234_v2, %v233_v59  ;;  %v264_v10 = vrot.slane %v263_v3, 2  ;;  %v214_v11 = vrot.slane %v213_v4, 2  ;;  %v278_v19 = vsel %vm189_vm6, %v276_v14, inf  ;;  %v383_v59 = vld [vmem:[%s559_s2 + $0x10] sm:$0xff] }
  0xa3   : > { %v197_v12 = vrot.slane %v196_v5, 1  ;;  %v303_v13 = vrot.slane %v302_v6, 1  ;;  %v288_v24 = vsel %vm275_vm8, %v473_v18, -1e+30  ;;  %v280_v25 = vmin.f32 %v278_v19, %v279_v17 }
  0xa4   : > { %v240_v15 = vsel %vm236_vm9, %v235_v9, 0.0  ;;  %v265_v16 = vadd.f32 %v264_v10, %v263_v3  ;;  %v215_v27 = vmin.f32 %v213_v4, %v214_v11  ;;  %v225_v28 = vrot.slane %v224_v7, 2 }
  0xa5   : > { %v198_v20 = vadd.f32 %v197_v12, %v196_v5  ;;  %v304_v23 = vadd.f32 %v303_v13, %v302_v6  ;;  %v287_v29 = vsel %vm274_vm10, %v476_v21, -1e+30  ;;  %v281_v32 = vrot.slane %v280_v25, 4 }
  0xa6   : > { %v266_v26 = vrot.slane %v265_v16, 1  ;;  %v290_v36 = vsel %vm189_vm6, %v288_v24, -inf  ;;  %v289_v37 = vsel %vm189_vm6, %v287_v29, -inf  ;;  %v216_v40 = vrot.slane %v215_v27, 1 }
  0xa7   : > { %v237_v30 = vsel %vm236_vm9, %v198_v20, 0.0  ;;  %v309_v31 = vsel %vm305_vm11, %v304_v23, %v240_v15  ;;  %v282_v38 = vmin.f32 %v280_v25, %v281_v32  ;;  %v291_v39 = vmax.f32 %v289_v37, %v290_v36 }
  0xa8   : > { %v267_v35 = vadd.f32 %v266_v26, %v265_v16  ;;  %v323_v18 = vadd.f32 %v385_v22, %v309_v31  ;;  %v226_v41 = vmax.f32 %v224_v7, %v225_v28  ;;  %v217_v47 = vmin.f32 %v215_v27, %v216_v40 }
  0xa9   : > { %v283_v43 = vrot.slane %v282_v38, 2  ;;  %v292_v44 = vrot.slane %v291_v39, 4 }
  0xaa   : > { %v306_v21 = vsel %vm305_vm11, %v267_v35, %v237_v30  ;;  %386 = vst.msk [vmem:[%s559_s2 + $0x18] sm:$0xff] %vm189_vm6, %v323_v18  ;;  %v227_v48 = vrot.slane %v226_v41, 1  ;;  %v238_v55 = vsel %vm236_vm9, %v217_v47, 1e+30 }
  0xab   : > { %v311_v42 = vadd.f32 %v310_v34, %v306_v21  ;;  %v284_v45 = vmin.f32 %v282_v38, %v283_v43  ;;  %v293_v46 = vmax.f32 %v291_v39, %v292_v44 }
  0xac   : > { %v228_v54 = vmax.f32 %v226_v41, %v227_v48 }
  0xad   : > { %312 = vst.msk [vmem:[%s559_s2] sm:$0xff] %vm189_vm6, %v311_v42  ;;  %v285_v49 = vrot.slane %v284_v45, 1  ;;  %v294_v50 = vrot.slane %v293_v46, 2 }
  0xae   : > { %v239_v61 = vsel %vm236_vm9, %v228_v54, -1e+30 }
  0xaf   : > { %v286_v52 = vmin.f32 %v284_v45, %v285_v49  ;;  %v295_v53 = vmax.f32 %v293_v46, %v294_v50 }
  0xb1   : > { %v296_v56 = vrot.slane %v295_v53, 1  ;;  %v307_v57 = vsel %vm305_vm11, %v286_v52, %v238_v55 }
  0xb2   : > { %v315_v58 = vmin.f32 %v381_v51, %v307_v57 }
  0xb3   : > { %v297_v60 = vmax.f32 %v295_v53, %v296_v56 }
  0xb4   : > { %382 = vst.msk [vmem:[%s559_s2 + $0x8] sm:$0xff] %vm189_vm6, %v315_v58 }
  0xb5   : > { %v308_v62 = vsel %vm305_vm11, %v297_v60, %v239_v61 }
  0xb6   : > { %v319_v63 = vmax.f32 %v383_v59, %v308_v62 }
  0xb8   : > { %384 = vst.msk [vmem:[%s559_s2 + $0x10] sm:$0xff] %vm189_vm6, %v319_v63 }
  0xb9 PF: > { %s12_s9 = sadd.s32 1, %s420_s9  }
  0xba   : > { %p9_p5 = scmp.ge.s32.totalorder %s12_s9, 4  }
  0xbc   :  { %11 = sbr.rel (!%p9_p5) target bundleno = 1 (0x1), region = 67 }

// kernel: gravnet_model_forward.20
= control target key start
LH: loop header
LB: loop body
LE: loop exit
PB: predicated region body
PF: predicated region fallthrough
CT: control target
= control target key end

     0   :  { %s1087_s18 = smov 0   ;;  %s1155_s0 = inlined_call_operand.vmem [shape: f32[32,8], index: 0, kind: input, shape index: {}]   ;;  %s1156_s1 = inlined_call_operand.vmem [shape: s32[32,1], index: 1, kind: input, shape index: {}]   ;;  %s1157_s2 = inlined_call_operand.vmem [shape: f32[4,8,8], index: 2, kind: input, shape index: {}]   ;;  %s1158_s3 = inlined_call_operand.vmem [shape: f32[4,8,8], index: 3, kind: input, shape index: {}]   ;;  %s1159_s4 = inlined_call_operand.vmem [shape: f32[1,8], index: 4, kind: input, shape index: {}]   ;;  %s1160_s5 = inlined_call_operand.vmem [shape: f32[32,8], index: 5, kind: output, shape index: {}]  }
   0x1 LB: > { %s936_s19 = sadd.s32 4294967295, %s1053_s18   ;;  %p940_p0 = scmp.ge.s32.totalorder %s1053_s18, 1  ;;  %s1053_s18 = sphi %s1087_s18, %s15_s18  }
   0x2   : > { %p199_p1 = scmp.lt.s32.totalorder %s1053_s18, 3 }
   0x4   : > { %p200_p2 = pnand %p940_p0, %p199_p1 }
   0x5   : > { %s941_s20 = sshll.u32 (!%p200_p2), %s936_s19, 1 }
   0x6   : > { %203 = sbr.rel (%p200_p2) target bundleno = 568 (0x238), region = 40  ;;  %p233_p3 = scmp.lt.s32.totalorder (!%p200_p2), %s941_s20, 3 }
   0xb   : > { %v949_v0 = vld [vmem:[%s1157_s2 + $0x18] sm:$0xff]  ;;  %v1055_v1 = vmov 0   ;;  %s1162_s20 = smov (!%p233_p3, %s941_s20), 3  ;;  %v952_v4 = vld [vmem:[%s1157_s2 + $0x8] sm:$0xff]  ;;  %v271_v6 = vld [vmem:[%s1157_s2] sm:$0xff]  ;;  %v254_v11 = vlaneseq  ;;  %vm274_vm0 = vcmask 64512  }
   0xc   : > { %1040 = vset.pattern.permute.xlu0 %v1055_v1  ;;  %v270_v2 = vmax.f32 %v949_v0, 1.0  ;;  %s1098_s23 = sshll.u32 %s1162_s20, 3  ;;  %1000 = vmatprep.subr.mxu1 %v952_v4  ;;  %v958_v7 = vld [vmem:[%s1158_s3 + $0x8] sm:$0xff]  ;;  %v955_v10 = vld [vmem:[%s1157_s2 + $0x10] sm:$0xff]  ;;  %v1056_v14 = vmov 0.0   ;;  %v510_v18 = vld [vmem:[%s1158_s3] sm:$0xff] }
   0xd   : > { %s242_s26 = scalar_lea.vmem %s1156_s1, %s1098_s23  ;;  %1001 = vmatpush3.msra.mxu1 %v952_v4  ;;  %v255_v12 = vand.u32 127, %v254_v11  ;;  %v963_v19 = vld [vmem:[%s1158_s3 + $0x10] sm:$0xff]  ;;  %v966_v20 = vld [vmem:[%s1158_s3 + $0x18] sm:$0xff]  ;;  %s236_s19 = scalar_lea.vmem %s1155_s0, %s1098_s23  ;;  %v969_v38 = vld [vmem:[%s1159_s4] ss:$0 sm:$0xff] }
   0xe   : > { %1041 = vrcp.f32 %v270_v2  ;;  %v252_v3 = vld [vmem:[%s242_s26] sm:$0xff]  ;;  %v253_v5 = vld [vmem:[%s242_s26 + $0x8] sm:$0xff]  ;;  %1010 = vmatprep.subr.mxu1 %v958_v7  ;;  %s248_s25 = scalar_lea.vmem %s1160_s5, %s1098_s23 }
   0xf   : > { %257 = vperm.xlu0 %1040, %v252_v3   ;;  %v250_v25 = vld [vmem:[%s236_s19] sm:$0xff]  ;;  %v251_v27 = vld [vmem:[%s236_s19 + $0x8] sm:$0xff] }
  0x13   : > { %260 = vperm.xlu0 %1040, %v253_v5  }
  0x1b   : > { %v1042_v8 = vpop.eup %1041 }
  0x1c   : > { %v273_v9 = vmul.f32 %v1042_v8, %v271_v6 }
  0x1e   : > { %995 = vmatprep.subr.mxu0 %v273_v9 }
  0x1f   : > { %996 = vmatpush3.msra.mxu0 %v273_v9 }
  0x20   : > { %1005 = vmatprep.subr.mxu0 %v955_v10 }
  0x8a   : > { %v258_v13 = vpop.permute.xlu0 %257 }
  0x8b   : > { %vm262_vm1 = vcmp.eq.s32.totalorder %v258_v13, %v255_v12 }
  0x8c   : > { %v947_v15 = vsel %vm262_vm1, 1.0, %v1056_v14 }
  0x8d   : > { %997 = vmatprep.mubr.msk.f32.mxu0 %vm274_vm0, %v947_v15  ;;  %1002 = vmatprep.mubr.msk.f32.mxu1 %vm274_vm0, %v947_v15 }
  0x8e   : > { %v261_v16 = vpop.permute.xlu0 %260 }
  0x8f   : > { %vm263_vm2 = vcmp.eq.s32.totalorder %v261_v16, %v255_v12 }
  0x90   : > { %v948_v17 = vsel %vm263_vm2, 1.0, %v1056_v14 }
  0x91   : > { %998 = vmatmul.mubr.msk.f32.vlgmr.msra.gmra.mxu0 %vm274_vm0, %v948_v17  ;;  %1003 = vmatmul.mubr.msk.f32.vlgmr.msra.gmra.mxu1 %vm274_vm0, %v948_v17 }
  0x92   : > { %1006 = vmatpush3.msra.mxu0 %v955_v10  ;;  %1007 = vmatprep.mubr.msk.f32.mxu0 %vm274_vm0, %v947_v15 }
  0x93   : > { %1011 = vmatpush3.msra.mxu1 %v958_v7  ;;  %1015 = vmatprep.subr.mxu0 %v510_v18 }
  0x94   : > { %1020 = vmatprep.subr.mxu1 %v963_v19 }
  0x95   : > { %1008 = vmatmul.mubr.msk.f32.vlgmr.msra.gmra.mxu0 %vm274_vm0, %v948_v17 }
  0x96   : > { %1016 = vmatpush3.msra.mxu0 %v510_v18 }
  0x97   : > { %1025 = vmatprep.subr.mxu0 %v966_v20 }
 0x151   : > { %v999_v21 = vpop.f32.mrf.mxu0  ;;  %v1004_v22 = vpop.f32.mrf.mxu1 }
 0x153   : > { %v347_v23 = vpop.f32.mrf.mxu0  ;;  %v424_v24 = vpop.f32.mrf.mxu1 }
 0x154   : > { %1012 = vmatprep.mubr.msk.f32.mxu1 %vm274_vm0, %v424_v24  ;;  %1017 = vmatprep.mubr.msk.f32.mxu0 %vm274_vm0, %v347_v23 }
 0x155   : > { %v1009_v26 = vpop.f32.mrf.mxu0  ;;  %1013 = vmatmul.mubr.msk.f32.vlgmr.msra.gmra.mxu1 %vm274_vm0, %v1004_v22  ;;  %1018 = vmatmul.mubr.msk.f32.vlgmr.msra.gmra.mxu0 %vm274_vm0, %v999_v21 }
 0x156   : > { %1021 = vmatpush3.msra.mxu1 %v963_v19  ;;  %1026 = vmatpush3.msra.mxu0 %v966_v20 }
 0x157   : > { %v501_v28 = vpop.f32.mrf.mxu0  ;;  %1027 = vmatprep.mubr.msk.f32.mxu0 %vm274_vm0, %v250_v25 }
 0x158   : > { %1022 = vmatprep.mubr.msk.f32.mxu1 %vm274_vm0, %v501_v28 }
 0x159   : > { %1023 = vmatmul.mubr.msk.f32.vlgmr.msra.gmra.mxu1 %vm274_vm0, %v1009_v26  ;;  %1028 = vmatmul.mubr.msk.f32.vlgmr.msra.gmra.mxu0 %vm274_vm0, %v251_v27 }
 0x215   : > { %v1014_v29 = vpop.f32.mrf.mxu1  ;;  %v1019_v30 = vpop.f32.mrf.mxu0 }
 0x216   : > { %v672_v33 = vadd.f32 %v1019_v30, %v1014_v29 }
 0x217   : > { %v585_v31 = vpop.f32.mrf.mxu1  ;;  %v666_v32 = vpop.f32.mrf.mxu0 }
 0x218   : > { %v667_v36 = vadd.f32 %v666_v32, %v585_v31 }
 0x219   : > { %v1024_v34 = vpop.f32.mrf.mxu1  ;;  %v1029_v35 = vpop.f32.mrf.mxu0 }
 0x21a   : > { %v759_v37 = vadd.f32 %v1024_v34, %v672_v33 }
 0x21b   : > { %v749_v39 = vpop.f32.mrf.mxu1  ;;  %v834_v42 = vpop.f32.mrf.mxu0 }
 0x21c   : > { %v844_v40 = vadd.f32 %v1029_v35, %v759_v37  ;;  %v758_v41 = vadd.f32 %v749_v39, %v667_v36 }
 0x21e   : > { %v853_v43 = vadd.f32 %v969_v38, %v844_v40  ;;  %v843_v44 = vadd.f32 %v834_v42, %v758_v41 }
 0x220   : > { %v857_v45 = vmin.f32 %v853_v43, 0.0  ;;  %v852_v46 = vadd.f32 %v969_v38, %v843_v44  ;;  %vm855_vm4 = vcmp.gt.f32.partialorder %v853_v43, 0.0 }
 0x222   : > { %v860_v47 = vmul.f32 1.442695, %v857_v45  ;;  %v856_v48 = vmin.f32 %v852_v46, 0.0  ;;  %vm854_vm3 = vcmp.gt.f32.partialorder %v852_v46, 0.0 }
 0x224   : > { %1043 = vpow2.f32 %v860_v47  ;;  %v858_v49 = vmul.f32 1.442695, %v856_v48 }
 0x226   : > { %1045 = vpow2.f32 %v858_v49 }
 0x231   : > { %v1044_v50 = vpop.eup %1043 }
 0x232   : > { %v971_v52 = vadd.f32 -1.0, %v1044_v50 }
 0x233   : > { %v1046_v51 = vpop.eup %1045 }
 0x234   : > { %v970_v53 = vadd.f32 -1.0, %v1046_v51  ;;  %v865_v55 = vsel %vm855_vm4, %v853_v43, %v971_v52 }
 0x235   : > { %867 = vst.msk [vmem:[%s248_s25 + $0x8] sm:$0xff] %vm274_vm0, %v865_v55 }
 0x236   : > { %v864_v54 = vsel %vm854_vm3, %v852_v46, %v970_v53 }
 0x237   : > { %866 = vst.msk [vmem:[%s248_s25] sm:$0xff] %vm274_vm0, %v864_v54 }
 0x238 PF: > { %s15_s18 = sadd.s32 1, %s1053_s18  }
 0x239   : > { %p12_p4 = scmp.ge.s32.totalorder %s15_s18, 4  }
 0x23b   :  { %14 = sbr.rel (!%p12_p4) target bundleno = 1 (0x1), region = 79 }

// kernel: gravnet_model_forward.18
= control target key start
LH: loop header
LB: loop body
LE: loop exit
PB: predicated region body
PF: predicated region fallthrough
CT: control target
= control target key end

     0   :  { %s2097_s24 = smov 0   ;;  %s2434_s0 = inlined_call_operand.<no memory space> [shape: s32[1], index: 0, kind: input, shape index: {}]   ;;  %s2435_s1 = inlined_call_operand.vmem [shape: f32[32,16], index: 1, kind: input, shape index: {}]   ;;  %s2436_s2 = inlined_call_operand.vmem [shape: f32[32,8], index: 2, kind: input, shape index: {}]   ;;  %s2437_s3 = inlined_call_operand.vmem [shape: f32[8,128], index: 3, kind: input, shape index: {}]   ;;  %s2438_s4 = inlined_call_operand.vmem [shape: bf16[128,16], index: 4, kind: input, shape index: {}]   ;;  %s2439_s5 = inlined_call_operand.vmem [shape: f32[16,128], index: 5, kind: input, shape index: {}]   ;;  %s2440_s6 = inlined_call_operand.vmem [shape: s32[32,1], index: 6, kind: input, shape index: {}]   ;;  %s2441_s7 = inlined_call_operand.vmem [shape: s32[1,128], index: 7, kind: input, shape index: {}]   ;;  %s2442_s8 = inlined_call_operand.vmem [shape: f32[16,32], index: 8, kind: input, shape index: {}]   ;;  %s2443_s9 = inlined_call_operand.vmem [shape: f32[16,32], index: 9, kind: input, shape index: {}]   ;;  %s2444_s10 = inlined_call_operand.vmem [shape: f32[16,32], index: 10, kind: input, shape index: {}]   ;;  %s2445_s11 = inlined_call_operand.vmem [shape: f32[1,32], index: 11, kind: input, shape index: {}]   ;;  %s2446_s12 = inlined_call_operand.vmem [shape: f32[32,8], index: 12, kind: input, shape index: {}]   ;;  %s2447_s13 = inlined_call_operand.vmem [shape: f32[8,8], index: 13, kind: input, shape index: {}]   ;;  %s2448_s14 = inlined_call_operand.vmem [shape: f32[1,8], index: 14, kind: input, shape index: {}]   ;;  %s2449_s15 = inlined_call_operand.vmem [shape: f32[8,8], index: 15, kind: input, shape index: {}]   ;;  %s2450_s16 = inlined_call_operand.vmem [shape: f32[1,8], index: 16, kind: input, shape index: {}]   ;;  %s2451_s17 = inlined_call_operand.vmem [shape: f32[32,8], index: 17, kind: output, shape index: {}]  }
   0x1   :  { %2452 = sst [smem:[#allocation5_spill]] %s2435_s1 }
   0x2 LB: > { %s1742_s25 = sadd.s32 4294967295, %s1988_s24   ;;  %p1746_p0 = scmp.ge.s32.totalorder %s1988_s24, 1  ;;  %s1988_s24 = sphi %s2097_s24, %s28_s24  }
   0x3   : > { %p487_p1 = scmp.lt.s32.totalorder %s1988_s24, 3 }
   0x5   : > { %p488_p2 = pnand %p1746_p0, %p487_p1 }
   0x6   : > { %s1747_s28 = sshll.u32 (!%p488_p2), %s1742_s25, 1  ;;  %s2453_s18 = sld [smem:[#allocation5_spill]] (!%p488_p2) }
   0x7   : > { %491 = sbr.rel (%p488_p2) target bundleno = 1370 (0x55a), region = 84  ;;  %p548_p3 = scmp.lt.s32.totalorder (!%p488_p2), %s1747_s28, 3 }
   0x8   : > { %s2146_s0 = smov (!%p488_p2), 0  }
   0xc   : > { %v574_v0 = vld [vmem:[%s2437_s3] sm:$0xff]  ;;  %v2002_v1 = vmov 0   ;;  %s2457_s28 = smov (!%p548_p3, %s1747_s28), 3  ;;  %vm580_vm0 = vcmask 64512   ;;  %v711_v12 = vlaneseq  ;;  %v1990_v41 = vmov 0.0  }
   0xd   : > { %1840 = vmatprep.subr.mxu0 %v574_v0  ;;  %1944 = vset.pattern.permute.xlu1 %v2002_v1  ;;  %s1748_s29 = sshll.u32 %s2457_s28, 3  ;;  %v587_v15 = vmul.f32 %v574_v0, %v574_v0  ;;  %v1757_v25 = vld [vmem:[%s2441_s7] ss:$0 sm:$0xff]  ;;  %v1994_v42 = vmov 0.0  }
   0xe   : > { %1841 = vmatpush3.msra.mxu0 %v574_v0  ;;  %1945 = vset.pattern.permute.xlu0 %v2002_v1  ;;  %s2111_s19 = scalar_lea.vmem %s2453_s18, %s1748_s29  ;;  %s557_s21 = scalar_lea.vmem %s2436_s2, %s1748_s29  ;;  %v2138_v13 = vand.u32 127, %v711_v12 }
   0xf   : > { %s2119_s25 = scalar_lea.vmem %s2451_s17, %s1748_s29  ;;  %v2121_v2 = vld [vmem:[%s557_s21] sm:$0xff]  ;;  %v2123_v3 = vld [vmem:[%s557_s21 + $0x8] sm:$0xff]  ;;  %s563_s28 = scalar_lea.vmem %s2440_s6, %s1748_s29  ;;  %v588_v16 = vrot.slane %v587_v15, 4 }
  0x10   : > { %v578_v4 = vmul.f32 %v2121_v2, %v2121_v2  ;;  %1842 = vmatprep.mubr.msk.f32.mxu0 %vm580_vm0, %v2121_v2  ;;  %v579_v5 = vmul.f32 %v2123_v3, %v2123_v3  ;;  %v575_v6 = vld [vmem:[%s563_s28] sm:$0xff]  ;;  %v576_v8 = vld [vmem:[%s563_s28 + $0x8] sm:$0xff]  ;;  %v2141_v14 = vcvt.s32.f32 %v2138_v13 }
  0x11   : > { %1843 = vmatmul.mubr.msk.f32.vlgmr.msra.gmra.mxu0 %vm580_vm0, %v2123_v3  ;;  %684 = vperm.xlu1 %1944, %v575_v6   ;;  %vm696_vm1 = vcmp.ge.s32.totalorder %v576_v8, 0  ;;  %vm695_vm2 = vcmp.ge.s32.totalorder %v575_v6, 0  ;;  %v589_v17 = vadd.f32 %v588_v16, %v587_v15 }
  0x12   : > { %v581_v7 = vsel %vm580_vm0, %v578_v4, 0.0  ;;  %v584_v9 = vsel %vm580_vm0, %v579_v5, 0.0  ;;  %v698_v10 = vsel %vm696_vm1, 1, %v2002_v1  ;;  %v697_v11 = vsel %vm695_vm2, 1, %v2002_v1 }
  0x13   : > { %582 = vadd.xlane.f32.xlu0 %v581_v7  ;;  %v590_v18 = vrot.slane %v589_v17, 2 }
  0x15   : > { %687 = vperm.xlu1 %1944, %v576_v8   ;;  %v591_v21 = vadd.f32 %v590_v18, %v589_v17 }
  0x17   : > { %585 = vadd.xlane.f32.xlu0 %v584_v9  ;;  %v592_v23 = vrot.slane %v591_v21, 1 }
  0x19   : > { %703 = vperm.xlu1 %1944, %v698_v10   ;;  %v593_v26 = vadd.f32 %v592_v23, %v591_v21 }
  0x2d   : > { %700 = vperm.xlu0 %1945, %v697_v11  }
  0x8c   : > { %v685_v19 = vpop.permute.xlu1 %684 }
  0x8d   : > { %vm693_vm5 = vcmp.eq.s32.totalorder %v685_v19, %v1757_v25 }
  0x90   : > { %v688_v22 = vpop.permute.xlu1 %687 }
  0x91   : > { %vm694_vm3 = vcmp.eq.s32.totalorder %v688_v22, %v1757_v25 }
  0x94   : > { %v704_v27 = vpop.permute.xlu1 %703 }
  0x95   : > { %vm706_vm4 = vcmp.eq.s32.totalorder %v704_v27, 1 }
  0x96   : > { %vm708_vm7 = vmand %vm694_vm3, %vm706_vm4 }
  0x9c   : > { %v583_v20 = vpop.xlane.xlu0 %582 }
  0x9d   : > { %v675_v33 = vadd.f32 %v593_v26, %v583_v20 }
  0xa0   : > { %v586_v24 = vpop.xlane.xlu0 %585 }
  0xa1   : > { %v676_v29 = vadd.f32 %v593_v26, %v586_v24 }
  0xa8   : > { %v701_v31 = vpop.permute.xlu0 %700 }
  0xa9   : > { %vm705_vm6 = vcmp.eq.s32.totalorder %v701_v31, 1 }
  0xaa   : > { %vm707_vm8 = vmand %vm693_vm5, %vm705_vm6 }
  0xd1   : > { %v1844_v28 = vpop.f32.mrf.mxu0 }
  0xd2   : > { %v678_v30 = vmul.f32 2.0, %v1844_v28 }
  0xd3   : > { %v666_v32 = vpop.f32.mrf.mxu0 }
  0xd4   : > { %v680_v34 = vsub.f32 %v676_v29, %v678_v30  ;;  %v677_v35 = vmul.f32 2.0, %v666_v32 }
  0xd6   : > { %v682_v36 = vmax.f32 %v680_v34, 0.0  ;;  %v679_v37 = vsub.f32 %v675_v33, %v677_v35 }
  0xd8   : > { %v710_v38 = vsel %vm708_vm7, %v682_v36, 1e+30  ;;  %v681_v39 = vmax.f32 %v679_v37, 0.0 }
  0xd9   : > { %715 = vst [vmem:[#allocation2 + $0x8] sm:$0xff] %v710_v38 }
  0xda   : > { %v709_v40 = vsel %vm707_vm8, %v681_v39, 1e+30 }
  0xdb   : > { %714 = vst [vmem:[#allocation2] sm:$0xff] %v709_v40 }
  0xdc LB: >> { %v2003_v47 = vmov 0.0   ;;  %s721_s0 = sadd.s32 1, %s2000_s0   ;;  %s2000_s0 = sphi %s2146_s0, %s721_s0   ;;  %v1996_v42 = vphi %v1994_v42, %v1995_v42   ;;  %v1992_v41 = vphi %v1990_v41, %v1991_v41  }
  0xdd   : >> { %p718_p4 = scmp.ge.s32.totalorder %s721_s0, 16  }
  0xde   : > { %v1946_v58 = vld [vmem:[%s2438_s4 + $0x38] sm:$0xff] (%p718_p4)   ;;  %v2004_v59 = vmov (%p718_p4), 0.0   ;;  %v1947_v60 = vld [vmem:[%s2438_s4 + $0x30] sm:$0xff] (%p718_p4)   ;;  %v760_v61 = vmul.f32 (%p718_p4), -10.0, %v709_v40  ;;  %vm2005_vm2 = vmmov (%p718_p4), 0   ;;  %v761_v62 = vmul.f32 (%p718_p4), -10.0, %v710_v38 }
  0xdf   : > { %1845 = vmatprep.subr.bf16.mxu1 (%p718_p4), %v2004_v59  ;;  %1861 = vmatprep.mubr.msk.bf16.mxu1 (%p718_p4), %vm2005_vm2, %v2004_v59  ;;  %v1948_v63 = vld [vmem:[%s2438_s4 + $0x28] sm:$0xff] (%p718_p4)   ;;  %v1949_v4 = vld [vmem:[%s2438_s4 + $0x20] sm:$0xff] (%p718_p4)   ;;  %v1950_v5 = vld [vmem:[%s2438_s4 + $0x18] sm:$0xff] (%p718_p4)   ;;  %vm901_vm8 = vcmp.eq.s32.totalorder (%p718_p4), %v2138_v13, 0  ;;  %vm1108_vm2 = vcmask (%p718_p4), 130048  }
  0xe0   : >> { %v725_v44 = vld [vmem:[#allocation2 + $0x8] sm:$0xff]  ;;  %1846 = vmatpush3.bf16.msra.mxu1 (%p718_p4), %v1946_v58  ;;  %v762_v0 = vmul.f32 (%p718_p4), 1.442695, %v760_v61  ;;  %v764_v1 = vmul.f32 (%p718_p4), 1.442695, %v761_v62  ;;  %v1952_v16 = vld [vmem:[%s2438_s4 + $0x8] sm:$0xff] (%p718_p4)  }
  0xe1   : > { %1847 = vmatprep.subr.bf16.mxu1 (%p718_p4), %v2004_v59  ;;  %v1951_v7 = vld [vmem:[%s2438_s4 + $0x10] sm:$0xff] (%p718_p4)   ;;  %v1771_v9 = vld [vmem:[%s2439_s5] ss:$0 sm:$0xff] (%p718_p4)  ;;  %v1772_v10 = vld [vmem:[%s2439_s5 + $0x1] ss:$0 sm:$0xff] (%p718_p4) }
  0xe2   : >> { %v724_v43 = vld [vmem:[#allocation2] sm:$0xff]  ;;  %1954 = vpow2.f32 (%p718_p4), %v762_v0  ;;  %v1773_v20 = vld [vmem:[%s2439_s5 + $0x2] ss:$0 sm:$0xff] (%p718_p4)  ;;  %v1774_v30 = vld [vmem:[%s2439_s5 + $0x3] ss:$0 sm:$0xff] (%p718_p4) }
  0xe3   : >> { %726 = vmin.xlane.f32.xlu0 %v724_v43  ;;  %1956 = vpow2.f32 (%p718_p4), %v764_v1  ;;  %v1953_v26 = vld [vmem:[%s2438_s4] sm:$0xff] (%p718_p4)   ;;  %v1780_v1 = vld [vmem:[%s2439_s5 + $0x9] ss:$0 sm:$0xff] (%p718_p4) }
  0xe4   : > { %1848 = vmatpush3.bf16.msra.mxu1 (%p718_p4), %v1947_v60  ;;  %v1775_v38 = vld [vmem:[%s2439_s5 + $0x4] ss:$0 sm:$0xff] (%p718_p4)  ;;  %v1779_v60 = vld [vmem:[%s2439_s5 + $0x8] ss:$0 sm:$0xff] (%p718_p4) }
  0xe5   : > { %1849 = vmatprep.subr.bf16.mxu1 (%p718_p4), %v2004_v59 }
  0xe7   : >> { %728 = vmin.xlane.f32.xlu0 %v725_v44 }
  0xe8   : > { %1850 = vmatpush3.bf16.msra.mxu1 (%p718_p4), %v1948_v63 }
  0xe9   : > { %1851 = vmatprep.subr.bf16.mxu1 (%p718_p4), %v2004_v59 }
  0xec   : > { %1852 = vmatpush3.bf16.msra.mxu1 (%p718_p4), %v1949_v4 }
  0xed   : > { %1853 = vmatprep.subr.bf16.mxu1 (%p718_p4), %v2004_v59 }
  0xef   : > { %v1955_v11 = vpop.eup (%p718_p4), %1954 }
  0xf0   : > { %1854 = vmatpush3.bf16.msra.mxu1 (%p718_p4), %v1950_v5  ;;  %v1957_v19 = vpop.eup (%p718_p4), %1956 }
  0xf1   : > { %1855 = vmatprep.subr.bf16.mxu1 (%p718_p4), %v2004_v59  ;;  %v1769_v33 = vpack.c.bf16 (%p718_p4), %v1957_v19, %v1955_v11 }
  0xf4   : > { %1856 = vmatpush3.bf16.msra.mxu1 (%p718_p4), %v1951_v7 }
  0xf5   : > { %1857 = vmatprep.subr.bf16.mxu1 (%p718_p4), %v2004_v59 }
  0xf8   : > { %1858 = vmatpush3.bf16.msra.mxu1 (%p718_p4), %v1952_v16  ;;  %v1782_v16 = vld [vmem:[%s2439_s5 + $0xb] ss:$0 sm:$0xff] (%p718_p4) }
  0xf9   : > { %1859 = vmatprep.subr.bf16.mxu1 (%p718_p4), %v2004_v59 }
  0xfc   : > { %1860 = vmatpush3.bf16.msra.mxu1 (%p718_p4), %v1953_v26 }
 0x16c   : >> { %v727_v45 = vpop.xlane.xlu0 %726 }
 0x16d   : >> { %vm730_vm9 = vcmp.lt.f32.partialorder %v727_v45, 5e+29  ;;  %vm732_vm10 = vcmp.le.f32.partialorder %v724_v43, %v727_v45 }
 0x16e   : >> { %v734_v46 = vsel %vm732_vm10, %v2141_v14, 128.0  ;;  %v1758_v48 = vsel %vm730_vm9, 1.0, %v2003_v47  ;;  %vm937_vm10 = vcmp.eq.s32.totalorder (%p718_p4), %v2138_v13, 2 }
 0x16f   : >> { %736 = vmin.xlane.f32.xlu1 %v734_v46  ;;  %v2153_v42 = vadd.f32 %v1996_v42, %v1758_v48   ;;  %v1777_v48 = vld [vmem:[%s2439_s5 + $0x6] ss:$0 sm:$0xff] (%p718_p4) }
 0x170   : >> { %v729_v50 = vpop.xlane.xlu0 %728 }
 0x171   : >> { %v2454_v49 = vmov %v2153_v42  ;;  %vm731_vm11 = vcmp.lt.f32.partialorder %v729_v50, 5e+29  ;;  %vm733_vm12 = vcmp.le.f32.partialorder %v725_v44, %v729_v50 }
 0x172   : >> { %v1759_v51 = vsel %vm731_vm11, 1.0, %v2003_v47  ;;  %v735_v52 = vsel %vm733_vm12, %v2141_v14, 128.0  ;;  %v1995_v42 = vmov %v2454_v49   ;;  %vm774_vm6 = vcmp.gt.f32.partialorder (%p718_p4), %v2454_v49, 0.0 }
 0x173   : >> { %v2156_v41 = vadd.f32 %v1992_v41, %v1759_v51   ;;  %738 = vmin.xlane.f32.xlu1 %v735_v52  ;;  %vm973_vm12 = vcmp.eq.s32.totalorder (%p718_p4), %v2138_v13, 4 }
 0x175   : >> { %v2455_v53 = vmov %v2156_v41 }
 0x176   : >> { %v1991_v41 = vmov %v2455_v53   ;;  %vm775_vm7 = vcmp.gt.f32.partialorder (%p718_p4), %v2455_v53, 0.0 }
 0x1f8   : >> { %v737_v54 = vpop.xlane.xlu1 %736 }
 0x1f9   : >> { %vm740_vm13 = vcmp.eq.f32.partialorder %v2141_v14, %v737_v54 }
 0x1fa   : >> { %vm746_vm14 = vmand %vm740_vm13, %vm730_vm9  ;;  %vm919_vm9 = vcmp.eq.s32.totalorder (%p718_p4), %v2138_v13, 1  ;;  %vm991_vm13 = vcmp.eq.s32.totalorder (%p718_p4), %v2138_v13, 5 }
 0x1fb   : >> { %v748_v55 = vsel %vm746_vm14, 2e+30, %v724_v43  ;;  %v1776_v43 = vld [vmem:[%s2439_s5 + $0x5] ss:$0 sm:$0xff] (%p718_p4)  ;;  %vm1009_vm14 = vcmp.eq.s32.totalorder (%p718_p4), %v2138_v13, 6 }
 0x1fc   : >> { %750 = vst [vmem:[#allocation2] sm:$0xff] %v748_v55  ;;  %v739_v56 = vpop.xlane.xlu1 %738  ;;  %720 = sbr.rel (!%p718_p4) target bundleno = 220 (0xdc), region = 127  ;;  %v1778_v55 = vld [vmem:[%s2439_s5 + $0x7] ss:$0 sm:$0xff] (%p718_p4) }
 0x1fd   : >> { %vm741_vm15 = vcmp.eq.f32.partialorder %v2141_v14, %v739_v56  ;;  %v2006_v14 = vmov (%p718_p4), -1e+30  }
 0x1fe   : >> { %vm747_vm1 = vmand %vm741_vm15, %vm731_vm11  ;;  %vm955_vm11 = vcmp.eq.s32.totalorder (%p718_p4), %v2138_v13, 3  ;;  %vm1027_vm15 = vcmp.eq.s32.totalorder (%p718_p4), %v2138_v13, 7 }
 0x1ff   : >> { %v749_v57 = vsel %vm747_vm1, 2e+30, %v725_v44  ;;  %vm1045_vm1 = vcmp.eq.s32.totalorder (%p718_p4), %v2138_v13, 8 }
 0x200   : >> { %751 = vst [vmem:[#allocation2 + $0x8] sm:$0xff] %v749_v57 }
 0x203   : > { %v756_v6 = vld [vmem:[#allocation2] sm:$0xff] }
 0x204   : > { %vm758_vm3 = vcmp.gt.f32.partialorder %v756_v6, 1.5e+30 }
 0x205   : > { %v2191_v12 = vsel %vm758_vm3, %v1955_v11, 0.0  ;;  %v2194_v15 = vsel %vm758_vm3, 0.0, %v2006_v14 }
 0x206   : > { %v891_v17 = vmul.f32 %v1771_v9, %v2191_v12  ;;  %v909_v18 = vmul.f32 %v1772_v10, %v2191_v12  ;;  %v927_v28 = vmul.f32 %v1773_v20, %v2191_v12  ;;  %v945_v34 = vmul.f32 %v1774_v30, %v2191_v12 }
 0x207   : > { %v757_v8 = vld [vmem:[#allocation2 + $0x8] sm:$0xff]  ;;  %v963_v39 = vmul.f32 %v1775_v38, %v2191_v12  ;;  %v981_v44 = vmul.f32 %v1776_v43, %v2191_v12  ;;  %v999_v50 = vmul.f32 %v1777_v48, %v2191_v12  ;;  %v1017_v56 = vmul.f32 %v1778_v55, %v2191_v12 }
 0x208   : > { %vm759_vm4 = vcmp.gt.f32.partialorder %v757_v8, 1.5e+30  ;;  %v893_v21 = vadd.f32 %v891_v17, %v2194_v15  ;;  %v911_v22 = vadd.f32 %v909_v18, %v2194_v15  ;;  %v929_v35 = vadd.f32 %v927_v28, %v2194_v15  ;;  %v1781_v8 = vld [vmem:[%s2439_s5 + $0xa] ss:$0 sm:$0xff] }
 0x209   : > { %v2207_v23 = vsel %vm759_vm4, %v1957_v19, 0.0  ;;  %v2210_v24 = vsel %vm759_vm4, 0.0, %v2006_v14  ;;  %vm1768_vm5 = vmpackc.low %vm759_vm4, %vm758_vm3  ;;  %v947_v40 = vadd.f32 %v945_v34, %v2194_v15  ;;  %v965_v45 = vadd.f32 %v963_v39, %v2194_v15 }
 0x20a   : > { %v892_v25 = vmul.f32 %v1771_v9, %v2207_v23  ;;  %v910_v27 = vmul.f32 %v1772_v10, %v2207_v23  ;;  %895 = vmax.xlane.f32.xlu0 %v893_v21  ;;  %913 = vmax.xlane.f32.xlu1 %v911_v22  ;;  %v928_v29 = vmul.f32 %v1773_v20, %v2207_v23  ;;  %vm1063_vm3 = vcmp.eq.s32.totalorder %v2138_v13, 9 }
 0x20b   : > { %v946_v37 = vmul.f32 %v1774_v30, %v2207_v23  ;;  %1862 = vmatmul.mubr.msk.bf16.vlgmr.msra.gmra.mxu1 %vm1768_vm5, %v1769_v33  ;;  %v964_v42 = vmul.f32 %v1775_v38, %v2207_v23  ;;  %v982_v47 = vmul.f32 %v1776_v43, %v2207_v23  ;;  %v983_v51 = vadd.f32 %v981_v44, %v2194_v15 }
 0x20c   : > { %v894_v31 = vadd.f32 %v892_v25, %v2210_v24  ;;  %v912_v32 = vadd.f32 %v910_v27, %v2210_v24  ;;  %v930_v36 = vadd.f32 %v928_v29, %v2210_v24  ;;  %v1000_v54 = vmul.f32 %v1777_v48, %v2207_v23  ;;  %v1106_v25 = vld [vmem:[%s2443_s9] sm:$0xff] }
 0x20d   : > { %v948_v41 = vadd.f32 %v946_v37, %v2210_v24  ;;  %v966_v46 = vadd.f32 %v964_v42, %v2210_v24  ;;  %v984_v52 = vadd.f32 %v982_v47, %v2210_v24  ;;  %v1001_v57 = vadd.f32 %v999_v50, %v2194_v15 }
 0x20e   : > { %897 = vmax.xlane.f32.xlu0 %v894_v31  ;;  %915 = vmax.xlane.f32.xlu1 %v912_v32  ;;  %v1002_v58 = vadd.f32 %v1000_v54, %v2210_v24  ;;  %v1018_v59 = vmul.f32 %v1778_v55, %v2207_v23  ;;  %v1019_v61 = vadd.f32 %v1017_v56, %v2194_v15  ;;  %v768_v47 = vmax.f32 %v2454_v49, 1.0 }
 0x20f   : > { %v1035_v63 = vmul.f32 %v1779_v60, %v2191_v12  ;;  %v1036_v0 = vmul.f32 %v1779_v60, %v2207_v23  ;;  %v1053_v4 = vmul.f32 %v1780_v1, %v2191_v12  ;;  %v1054_v7 = vmul.f32 %v1780_v1, %v2207_v23 }
 0x210   : > { %v1020_v62 = vadd.f32 %v1018_v59, %v2210_v24  ;;  %v1071_v9 = vmul.f32 %v1781_v8, %v2191_v12  ;;  %v1072_v14 = vmul.f32 %v1781_v8, %v2207_v23  ;;  %v1089_v17 = vmul.f32 %v1782_v16, %v2191_v12  ;;  %v1107_v12 = vld [vmem:[%s2443_s9 + $0x8] sm:$0xff] }
 0x211   : > { %v1037_v5 = vadd.f32 %v1035_v63, %v2194_v15  ;;  %v1038_v6 = vadd.f32 %v1036_v0, %v2210_v24  ;;  %v1055_v10 = vadd.f32 %v1053_v4, %v2194_v15  ;;  %v1056_v11 = vadd.f32 %v1054_v7, %v2210_v24  ;;  %1865 = vmatprep.subr.mxu0 %v1107_v12 }
 0x212   : > { %931 = vmax.xlane.f32.xlu0 %v929_v35  ;;  %933 = vmax.xlane.f32.xlu1 %v930_v36  ;;  %v1073_v18 = vadd.f32 %v1071_v9, %v2194_v15  ;;  %v1074_v19 = vadd.f32 %v1072_v14, %v2210_v24  ;;  %v1090_v20 = vmul.f32 %v1782_v16, %v2207_v23  ;;  %v2297_v23 = vld [vmem:[%s2442_s8 + $0x8] sm:$0xff]  ;;  %1958 = vrcp.f32 %v768_v47 }
 0x213   : > { %v1091_v21 = vadd.f32 %v1089_v17, %v2194_v15  ;;  %1866 = vmatpush3.msra.mxu0 %v1107_v12  ;;  %v769_v55 = vmax.f32 %v2455_v53, 1.0  ;;  %vm1081_vm4 = vcmp.eq.s32.totalorder %v2138_v13, 10  ;;  %vm1099_vm5 = vcmp.eq.s32.totalorder %v2138_v13, 11  ;;  %v1103_v47 = vld [vmem:[%s2111_s19 + $0x8] sm:$0xff]  ;;  %v1369_v53 = vld [vmem:[%s2447_s13] sm:$0xff]  ;;  %v1368_v13 = vld [vmem:[%s2446_s12 + $0x18] sm:$0xff] }
 0x214   : > { %v1092_v22 = vadd.f32 %v1090_v20, %v2210_v24  ;;  %1867 = vmatprep.subr.mxu0 %v1106_v25 }
 0x215   : > { %1868 = vmatpush3.msra.mxu0 %v1106_v25  ;;  %1960 = vrcp.f32 %v769_v55 }
 0x216   : > { %949 = vmax.xlane.f32.xlu0 %v947_v40  ;;  %951 = vmax.xlane.f32.xlu1 %v948_v41 }
 0x217   : > { %1872 = vmatprep.subr.mxu0 %v2297_v23 }
 0x21a   : > { %967 = vmax.xlane.f32.xlu0 %v965_v45  ;;  %969 = vmax.xlane.f32.xlu1 %v966_v46 }
 0x21e   : > { %985 = vmax.xlane.f32.xlu0 %v983_v51  ;;  %987 = vmax.xlane.f32.xlu1 %v984_v52 }
 0x21f   : > { %v1959_v17 = vpop.eup %1958 }
 0x222   : > { %1003 = vmax.xlane.f32.xlu0 %v1001_v57  ;;  %1005 = vmax.xlane.f32.xlu1 %v1002_v58 }
 0x226   : > { %1021 = vmax.xlane.f32.xlu0 %v1019_v61  ;;  %1023 = vmax.xlane.f32.xlu1 %v1020_v62 }
 0x22a   : > { %1039 = vmax.xlane.f32.xlu0 %v1037_v5  ;;  %1041 = vmax.xlane.f32.xlu1 %v1038_v6 }
 0x22e   : > { %1057 = vmax.xlane.f32.xlu0 %v1055_v10  ;;  %1059 = vmax.xlane.f32.xlu1 %v1056_v11 }
 0x232   : > { %1075 = vmax.xlane.f32.xlu0 %v1073_v18  ;;  %1077 = vmax.xlane.f32.xlu1 %v1074_v19 }
 0x236   : > { %1093 = vmax.xlane.f32.xlu0 %v1091_v21  ;;  %1095 = vmax.xlane.f32.xlu1 %v1092_v22 }
 0x293   : > { %v896_v15 = vpop.xlane.xlu0 %895  ;;  %v914_v24 = vpop.xlane.xlu1 %913 }
 0x294   : > { %v899_v36 = vsel %vm774_vm6, %v896_v15, 0.0  ;;  %v917_v40 = vsel %vm774_vm6, %v914_v24, 0.0 }
 0x295   : > { %v902_v39 = vsel %vm901_vm8, %v899_v36, 0.0 }
 0x296   : > { %v920_v44 = vsel %vm919_vm9, %v917_v40, %v902_v39  ;;  %v1104_v40 = vld [vmem:[%s2442_s8] sm:$0xff] }
 0x297   : > { %v898_v26 = vpop.xlane.xlu0 %897  ;;  %v916_v27 = vpop.xlane.xlu1 %915 }
 0x298   : > { %v900_v38 = vsel %vm775_vm7, %v898_v26, 0.0  ;;  %v918_v43 = vsel %vm775_vm7, %v916_v27, 0.0  ;;  %v1961_v26 = vpop.eup %1960 }
 0x299   : > { %v903_v42 = vsel %vm901_vm8, %v900_v38, 0.0  ;;  %v1102_v38 = vld [vmem:[%s2111_s19] sm:$0xff] }
 0x29a   : > { %v921_v48 = vsel %vm919_vm9, %v918_v43, %v903_v42 }
 0x29b   : > { %v932_v28 = vpop.xlane.xlu0 %931  ;;  %v934_v29 = vpop.xlane.xlu1 %933 }
 0x29c   : > { %v935_v45 = vsel %vm774_vm6, %v932_v28, 0.0  ;;  %v936_v50 = vsel %vm775_vm7, %v934_v29, 0.0 }
 0x29d   : > { %v938_v51 = vsel %vm937_vm10, %v935_v45, %v920_v44  ;;  %v939_v56 = vsel %vm937_vm10, %v936_v50, %v921_v48  ;;  %v1271_v48 = vld [vmem:[%s2444_s10] sm:$0xff] }
 0x29f   : > { %v950_v30 = vpop.xlane.xlu0 %949  ;;  %v952_v31 = vpop.xlane.xlu1 %951 }
 0x2a0   : > { %v953_v52 = vsel %vm774_vm6, %v950_v30, 0.0  ;;  %v954_v57 = vsel %vm775_vm7, %v952_v31, 0.0 }
 0x2a1   : > { %v956_v58 = vsel %vm955_vm11, %v953_v52, %v938_v51  ;;  %v957_v61 = vsel %vm955_vm11, %v954_v57, %v939_v56  ;;  %v1367_v52 = vld [vmem:[%s2446_s12 + $0x10] sm:$0xff] }
 0x2a3   : > { %v968_v32 = vpop.xlane.xlu0 %967  ;;  %v970_v33 = vpop.xlane.xlu1 %969 }
 0x2a4   : > { %v971_v59 = vsel %vm774_vm6, %v968_v32, 0.0  ;;  %v972_v62 = vsel %vm775_vm7, %v970_v33, 0.0 }
 0x2a5   : > { %v974_v63 = vsel %vm973_vm12, %v971_v59, %v956_v58  ;;  %v975_v4 = vsel %vm973_vm12, %v972_v62, %v957_v61 }
 0x2a7   : > { %v986_v34 = vpop.xlane.xlu0 %985  ;;  %v988_v35 = vpop.xlane.xlu1 %987 }
 0x2a8   : > { %v989_v0 = vsel %vm774_vm6, %v986_v34, 0.0  ;;  %v990_v5 = vsel %vm775_vm7, %v988_v35, 0.0 }
 0x2a9   : > { %v992_v6 = vsel %vm991_vm13, %v989_v0, %v974_v63  ;;  %v993_v9 = vsel %vm991_vm13, %v990_v5, %v975_v4  ;;  %v1789_v63 = vld [vmem:[%s2445_s11] ss:$0 sm:$0xff] }
 0x2aa   : > { %v1548_v5 = vld [vmem:[%s2449_s15] sm:$0xff] }
 0x2ab   : > { %v1004_v37 = vpop.xlane.xlu0 %1003  ;;  %v1006_v41 = vpop.xlane.xlu1 %1005 }
 0x2ac   : > { %v1007_v7 = vsel %vm774_vm6, %v1004_v37, 0.0  ;;  %v1008_v10 = vsel %vm775_vm7, %v1006_v41, 0.0 }
 0x2ad   : > { %v1010_v11 = vsel %vm1009_vm14, %v1007_v7, %v992_v6  ;;  %v1011_v18 = vsel %vm1009_vm14, %v1008_v10, %v993_v9  ;;  %v1794_v9 = vld [vmem:[%s2448_s14] ss:$0 sm:$0xff] }
 0x2af   : > { %v1022_v46 = vpop.xlane.xlu0 %1021  ;;  %v1024_v54 = vpop.xlane.xlu1 %1023 }
 0x2b0   : > { %v1025_v14 = vsel %vm774_vm6, %v1022_v46, 0.0  ;;  %v1026_v19 = vsel %vm775_vm7, %v1024_v54, 0.0  ;;  %v1272_v46 = vld [vmem:[%s2444_s10 + $0x8] sm:$0xff] }
 0x2b1   : > { %v1028_v20 = vsel %vm1027_vm15, %v1025_v14, %v1010_v11  ;;  %v1029_v25 = vsel %vm1027_vm15, %v1026_v19, %v1011_v18 }
 0x2b3   : > { %v1040_v60 = vpop.xlane.xlu0 %1039  ;;  %v1042_v1 = vpop.xlane.xlu1 %1041 }
 0x2b4   : > { %v1043_v21 = vsel %vm774_vm6, %v1040_v60, 0.0  ;;  %v1044_v15 = vsel %vm775_vm7, %v1042_v1, 0.0 }
 0x2b5   : > { %v1046_v27 = vsel %vm1045_vm1, %v1043_v21, %v1028_v20  ;;  %v1047_v31 = vsel %vm1045_vm1, %v1044_v15, %v1029_v25 }
 0x2b7   : > { %v1058_v8 = vpop.xlane.xlu0 %1057  ;;  %v1060_v16 = vpop.xlane.xlu1 %1059 }
 0x2b8   : > { %v1061_v28 = vsel %vm774_vm6, %v1058_v8, 0.0  ;;  %v1062_v34 = vsel %vm775_vm7, %v1060_v16, 0.0 }
 0x2b9   : > { %v1064_v33 = vsel %vm1063_vm3, %v1061_v28, %v1046_v27  ;;  %v1065_v41 = vsel %vm1063_vm3, %v1062_v34, %v1047_v31  ;;  %v1797_v27 = vld [vmem:[%s2450_s16] ss:$0 sm:$0xff] }
 0x2bb   : > { %v1076_v22 = vpop.xlane.xlu0 %1075  ;;  %v1078_v29 = vpop.xlane.xlu1 %1077 }
 0x2bc   : > { %v1079_v35 = vsel %vm774_vm6, %v1076_v22, 0.0  ;;  %v1080_v43 = vsel %vm775_vm7, %v1078_v29, 0.0 }
 0x2bd   : > { %v1082_v42 = vsel %vm1081_vm4, %v1079_v35, %v1064_v33  ;;  %v1083_v49 = vsel %vm1081_vm4, %v1080_v43, %v1065_v41 }
 0x2bf   : > { %v1094_v36 = vpop.xlane.xlu0 %1093  ;;  %v1096_v45 = vpop.xlane.xlu1 %1095 }
 0x2c0   : > { %v1097_v44 = vsel %vm774_vm6, %v1094_v36, 0.0  ;;  %vm1445_vm6 = vcmask 261120  }
 0x2c1   : > { %v1100_v50 = vsel %vm1099_vm5, %v1097_v44, %v1082_v42 }
 0x2cb   : > { %v875_v12 = vpop.f32.mrf.mxu1 }
 0x2cc   : > { %v882_v24 = vmul.f32 %v1959_v17, %v875_v12 }
 0x2cd   : > { %v1863_v30 = vpop.f32.mrf.mxu1 }
 0x2ce   : > { %1869 = vmatprep.mubr.msk.f32.mxu0 %vm1108_vm2, %v882_v24 }
 0x2cf   : > { %v878_v32 = vpop.f32.mrf.mxu1 }
 0x2d0   : > { %v883_v37 = vmul.f32 %v1961_v26, %v878_v32 }
 0x2d1   : > { %v1864_v39 = vpop.f32.mrf.mxu1 }
 0x2d2   : > { %1870 = vmatmul.mubr.msk.f32.vlgmr.msra.gmra.mxu0 %vm1108_vm2, %v883_v37 }
 0x2d3   : > { %1873 = vmatpush3.msra.mxu0 %v2297_v23  ;;  %1876 = vmatprep.mubr.msk.f32.mxu0 %vm1108_vm2, %v1102_v38  ;;  %v1098_v23 = vsel %vm775_vm7, %v1096_v45, 0.0 }
 0x2d4   : > { %1874 = vmatprep.subr.mxu0 %v1104_v40  ;;  %v1101_v51 = vsel %vm1099_vm5, %v1098_v23, %v1083_v49 }
 0x2d5   : > { %1875 = vmatpush3.msra.mxu0 %v1104_v40 }
 0x2d6   : > { %1879 = vmatprep.subr.mxu0 %v1272_v46  ;;  %1877 = vmatmul.mubr.msk.f32.vlgmr.msra.gmra.mxu0 %vm1108_vm2, %v1103_v47 }
 0x2d7   : > { %1880 = vmatpush3.msra.mxu0 %v1272_v46  ;;  %1883 = vmatprep.mubr.msk.f32.mxu0 %vm1108_vm2, %v1100_v50 }
 0x2d8   : > { %1881 = vmatprep.subr.mxu0 %v1271_v48 }
 0x2d9   : > { %1882 = vmatpush3.msra.mxu0 %v1271_v48 }
 0x2da   : > { %1884 = vmatmul.mubr.msk.f32.vlgmr.msra.gmra.mxu0 %vm1108_vm2, %v1101_v51  ;;  %1886 = vmatprep.subr.mxu0 %v1369_v53 }
 0x2db   : > { %1888 = vmatprep.mubr.msk.f32.mxu0 %vm580_vm0, %v2121_v2  ;;  %1887 = vmatpush3.msra.mxu0 %v1369_v53  ;;  %v1366_v2 = vld [vmem:[%s2446_s12 + $0x8] sm:$0xff] }
 0x2dc   : > { %1891 = vmatprep.subr.mxu0 %v1368_v13 }
 0x2de   : > { %1889 = vmatmul.mubr.msk.f32.vlgmr.msra.gmra.mxu0 %vm580_vm0, %v2123_v3  ;;  %v1365_v3 = vld [vmem:[%s2446_s12] sm:$0xff] }
 0x2df   : > { %1892 = vmatpush3.msra.mxu0 %v1368_v13 }
 0x2e0   : > { %1893 = vmatprep.subr.mxu0 %v1367_v52 }
 0x2e1   : > { %1894 = vmatpush3.msra.mxu0 %v1367_v52 }
 0x2e2   : > { %1895 = vmatprep.subr.mxu0 %v1366_v2 }
 0x2e3   : > { %1896 = vmatpush3.msra.mxu0 %v1366_v2 }
 0x2e4   : > { %1897 = vmatprep.subr.mxu0 %v1365_v3 }
 0x2e5   : > { %1898 = vmatpush3.msra.mxu0 %v1365_v3 }
 0x2e6   : > { %1902 = vmatprep.subr.mxu0 %v1548_v5 }
 0x392   : > { %v1871_v54 = vpop.f32.mrf.mxu0 }
 0x394   : > { %v1181_v55 = vpop.f32.mrf.mxu0 }
 0x396   : > { %v1878_v56 = vpop.f32.mrf.mxu0 }
 0x397   : > { %v1268_v58 = vadd.f32 %v1878_v56, %v1871_v54 }
 0x398   : > { %v1262_v57 = vpop.f32.mrf.mxu0 }
 0x399   : > { %v1263_v60 = vadd.f32 %v1262_v57, %v1181_v55 }
 0x39a   : > { %v1885_v59 = vpop.f32.mrf.mxu0 }
 0x39b   : > { %v1355_v61 = vadd.f32 %v1885_v59, %v1268_v58 }
 0x39c   : > { %v1345_v62 = vpop.f32.mrf.mxu0 }
 0x39d   : > { %v1354_v0 = vadd.f32 %v1345_v62, %v1263_v60  ;;  %v1364_v4 = vadd.f32 %v1789_v63, %v1355_v61 }
 0x39e   : > { %v1890_v6 = vpop.f32.mrf.mxu0 }
 0x39f   : > { %v1363_v1 = vadd.f32 %v1789_v63, %v1354_v0 }
 0x3a0   : > { %v1436_v7 = vpop.f32.mrf.mxu0 }
 0x3a1   : > { %1899 = vmatprep.mubr.msk.f32.mxu0 %vm1445_vm6, %v1363_v1 }
 0x3a2   : > { %1900 = vmatmul.mubr.msk.f32.vlgmr.msra.gmra.mxu0 %vm1445_vm6, %v1364_v4 }
 0x3a3   : > { %1903 = vmatpush3.msra.mxu0 %v1548_v5 }
 0x462   : > { %v1901_v8 = vpop.f32.mrf.mxu0 }
 0x463   : > { %v1524_v10 = vadd.f32 %v1901_v8, %v1890_v6 }
 0x464   : > { %v1518_v11 = vpop.f32.mrf.mxu0 }
 0x465   : > { %v1535_v14 = vadd.f32 %v1794_v9, %v1524_v10  ;;  %v1519_v16 = vadd.f32 %v1518_v11, %v1436_v7 }
 0x467   : > { %v1539_v17 = vmin.f32 %v1535_v14, 0.0  ;;  %v1534_v18 = vadd.f32 %v1794_v9, %v1519_v16  ;;  %vm1537_vm8 = vcmp.gt.f32.partialorder %v1535_v14, 0.0 }
 0x469   : > { %v1542_v19 = vmul.f32 1.442695, %v1539_v17  ;;  %v1538_v20 = vmin.f32 %v1534_v18, 0.0  ;;  %vm1536_vm7 = vcmp.gt.f32.partialorder %v1534_v18, 0.0 }
 0x46b   : > { %1962 = vpow2.f32 %v1542_v19  ;;  %v1540_v21 = vmul.f32 1.442695, %v1538_v20 }
 0x46d   : > { %1964 = vpow2.f32 %v1540_v21 }
 0x478   : > { %v1963_v22 = vpop.eup %1962 }
 0x479   : > { %v1796_v25 = vadd.f32 -1.0, %v1963_v22 }
 0x47a   : > { %v1965_v12 = vpop.eup %1964 }
 0x47b   : > { %v1795_v15 = vadd.f32 -1.0, %v1965_v12  ;;  %v1547_v26 = vsel %vm1537_vm8, %v1535_v14, %v1796_v25 }
 0x47d   : > { %v1546_v24 = vsel %vm1536_vm7, %v1534_v18, %v1795_v15 }
 0x47e   : > { %1904 = vmatprep.mubr.msk.f32.mxu0 %vm580_vm0, %v1546_v24 }
 0x47f   : > { %1905 = vmatmul.mubr.msk.f32.vlgmr.msra.gmra.mxu0 %vm580_vm0, %v1547_v26 }
 0x53f   : > { %v1906_v28 = vpop.f32.mrf.mxu0 }
 0x540   : > { %v1634_v29 = vadd.f32 %v1906_v28, %v1797_v27 }
 0x541   : > { %v1628_v30 = vpop.f32.mrf.mxu0 }
 0x542   : > { %v1640_v31 = vmin.f32 %v1634_v29, 0.0  ;;  %v1629_v32 = vadd.f32 %v1797_v27, %v1628_v30  ;;  %vm1638_vm10 = vcmp.gt.f32.partialorder %v1634_v29, 0.0 }
 0x544   : > { %v1643_v33 = vmul.f32 1.442695, %v1640_v31  ;;  %v1639_v34 = vmin.f32 %v1629_v32, 0.0  ;;  %vm1637_vm9 = vcmp.gt.f32.partialorder %v1629_v32, 0.0 }
 0x546   : > { %1966 = vpow2.f32 %v1643_v33  ;;  %v1641_v35 = vmul.f32 1.442695, %v1639_v34 }
 0x548   : > { %1968 = vpow2.f32 %v1641_v35 }
 0x553   : > { %v1967_v36 = vpop.eup %1966 }
 0x554   : > { %v1801_v38 = vadd.f32 -1.0, %v1967_v36 }
 0x555   : > { %v1969_v37 = vpop.eup %1968 }
 0x556   : > { %v1800_v39 = vadd.f32 -1.0, %v1969_v37  ;;  %v1648_v41 = vsel %vm1638_vm10, %v1634_v29, %v1801_v38 }
 0x557   : > { %1650 = vst.msk [vmem:[%s2119_s25 + $0x8] sm:$0xff] %vm580_vm0, %v1648_v41 }
 0x558   : > { %v1647_v40 = vsel %vm1637_vm9, %v1629_v32, %v1800_v39 }
 0x559   : > { %1649 = vst.msk [vmem:[%s2119_s25] sm:$0xff] %vm580_vm0, %v1647_v40 }
 0x55a PF: > { %s28_s24 = sadd.s32 1, %s1988_s24  }
 0x55b   : > { %p25_p5 = scmp.ge.s32.totalorder %s28_s24, 4  }
 0x55d   :  { %27 = sbr.rel (!%p25_p5) target bundleno = 2 (0x2), region = 138 }

// kernel: gravnet_model_forward.22
= control target key start
LH: loop header
LB: loop body
LE: loop exit
PB: predicated region body
PF: predicated region fallthrough
CT: control target
= control target key end

     0   :  { %s2130_s27 = smov 0   ;;  %s2470_s0 = inlined_call_operand.<no memory space> [shape: s32[1], index: 0, kind: input, shape index: {}]   ;;  %s2471_s1 = inlined_call_operand.vmem [shape: f32[32,8], index: 1, kind: input, shape index: {}]   ;;  %s2472_s2 = inlined_call_operand.vmem [shape: f32[32,8], index: 2, kind: input, shape index: {}]   ;;  %s2473_s3 = inlined_call_operand.vmem [shape: f32[8,128], index: 3, kind: input, shape index: {}]   ;;  %s2474_s4 = inlined_call_operand.vmem [shape: bf16[128,16], index: 4, kind: input, shape index: {}]   ;;  %s2475_s5 = inlined_call_operand.vmem [shape: f32[16,128], index: 5, kind: input, shape index: {}]   ;;  %s2476_s6 = inlined_call_operand.vmem [shape: s32[32,1], index: 6, kind: input, shape index: {}]   ;;  %s2477_s7 = inlined_call_operand.vmem [shape: s32[1,128], index: 7, kind: input, shape index: {}]   ;;  %s2478_s8 = inlined_call_operand.vmem [shape: f32[8,32], index: 8, kind: input, shape index: {}]   ;;  %s2479_s9 = inlined_call_operand.vmem [shape: f32[16,32], index: 9, kind: input, shape index: {}]   ;;  %s2480_s10 = inlined_call_operand.vmem [shape: f32[16,32], index: 10, kind: input, shape index: {}]   ;;  %s2481_s11 = inlined_call_operand.vmem [shape: f32[1,32], index: 11, kind: input, shape index: {}]   ;;  %s2482_s12 = inlined_call_operand.vmem [shape: f32[32,8], index: 12, kind: input, shape index: {}]   ;;  %s2483_s13 = inlined_call_operand.vmem [shape: f32[8,8], index: 13, kind: input, shape index: {}]   ;;  %s2484_s14 = inlined_call_operand.vmem [shape: f32[1,8], index: 14, kind: input, shape index: {}]   ;;  %s2485_s15 = inlined_call_operand.vmem [shape: f32[8,8], index: 15, kind: input, shape index: {}]   ;;  %s2486_s16 = inlined_call_operand.vmem [shape: f32[1,8], index: 16, kind: input, shape index: {}]   ;;  %s2487_s17 = inlined_call_operand.vmem [shape: f32[32,8], index: 17, kind: output, shape index: {}]  }
   0x1   :  { %2488 = sst [smem:[#allocation5_spill]] %s2470_s0 }
   0x2   :  { %2489 = sst [smem:[#allocation6_spill]] %s2471_s1 }
   0x3   :  { %s2490_s26 = sld [smem:[#allocation5_spill]] }
   0x9   :  { %22 = sst [smem:[#allocation4]] %s2490_s26 }
   0xa LB: > { %s1742_s28 = sadd.s32 4294967295, %s2010_s27   ;;  %p1746_p0 = scmp.ge.s32.totalorder %s2010_s27, 1  ;;  %s2010_s27 = sphi %s2130_s27, %s28_s27  }
   0xb   : > { %p487_p1 = scmp.lt.s32.totalorder %s2010_s27, 3 }
   0xd   : > { %p488_p2 = pnand %p1746_p0, %p487_p1 }
   0xe   : > { %s1747_s30 = sshll.u32 (!%p488_p2), %s1742_s28, 1  ;;  %s2491_s20 = sld [smem:[#allocation6_spill]] (!%p488_p2) }
   0xf   : > { %491 = sbr.rel (%p488_p2) target bundleno = 1401 (0x579), region = 84  ;;  %p548_p3 = scmp.lt.s32.totalorder (!%p488_p2), %s1747_s30, 3 }
  0x14   : > { %v574_v0 = vld [vmem:[%s2473_s3] sm:$0xff]  ;;  %v2032_v1 = vmov 0   ;;  %s2493_s30 = smov (!%p548_p3, %s1747_s30), 3  ;;  %vm580_vm0 = vcmask 64512   ;;  %v711_v12 = vlaneseq  ;;  %v2024_v41 = vmov 0.0  }
  0x15   : > { %1840 = vmatprep.subr.mxu0 %v574_v0  ;;  %1958 = vset.pattern.permute.xlu1 %v2032_v1  ;;  %s1748_s18 = sshll.u32 %s2493_s30, 3  ;;  %v587_v15 = vmul.f32 %v574_v0, %v574_v0  ;;  %v1757_v25 = vld [vmem:[%s2477_s7] ss:$0 sm:$0xff]  ;;  %v2028_v42 = vmov 0.0  }
  0x16   : > { %1841 = vmatpush3.msra.mxu0 %v574_v0  ;;  %1959 = vset.pattern.permute.xlu0 %v2032_v1  ;;  %s2144_s21 = scalar_lea.vmem %s2491_s20, %s1748_s18  ;;  %s557_s24 = scalar_lea.vmem %s2472_s2, %s1748_s18  ;;  %v2171_v13 = vand.u32 127, %v711_v12 }
  0x17   : > { %s2152_s28 = scalar_lea.vmem %s2487_s17, %s1748_s18  ;;  %v2154_v2 = vld [vmem:[%s557_s24] sm:$0xff]  ;;  %v2156_v3 = vld [vmem:[%s557_s24 + $0x8] sm:$0xff]  ;;  %s563_s30 = scalar_lea.vmem %s2476_s6, %s1748_s18  ;;  %v588_v16 = vrot.slane %v587_v15, 4 }
  0x18   : > { %v578_v4 = vmul.f32 %v2154_v2, %v2154_v2  ;;  %1842 = vmatprep.mubr.msk.f32.mxu0 %vm580_vm0, %v2154_v2  ;;  %v579_v5 = vmul.f32 %v2156_v3, %v2156_v3  ;;  %v575_v6 = vld [vmem:[%s563_s30] sm:$0xff]  ;;  %v576_v8 = vld [vmem:[%s563_s30 + $0x8] sm:$0xff]  ;;  %v2174_v14 = vcvt.s32.f32 %v2171_v13  ;;  %s2176_s18 = sld [smem:[#allocation4]] }
  0x19   : > { %1843 = vmatmul.mubr.msk.f32.vlgmr.msra.gmra.mxu0 %vm580_vm0, %v2156_v3  ;;  %684 = vperm.xlu1 %1958, %v575_v6   ;;  %vm696_vm1 = vcmp.ge.s32.totalorder %v576_v8, 0  ;;  %vm695_vm2 = vcmp.ge.s32.totalorder %v575_v6, 0  ;;  %v589_v17 = vadd.f32 %v588_v16, %v587_v15 }
  0x1a   : > { %v581_v7 = vsel %vm580_vm0, %v578_v4, 0.0  ;;  %v584_v9 = vsel %vm580_vm0, %v579_v5, 0.0  ;;  %v698_v10 = vsel %vm696_vm1, 1, %v2032_v1  ;;  %v697_v11 = vsel %vm695_vm2, 1, %v2032_v1 }
  0x1b   : > { %582 = vadd.xlane.f32.xlu0 %v581_v7  ;;  %v590_v18 = vrot.slane %v589_v17, 2 }
  0x1d   : > { %687 = vperm.xlu1 %1958, %v576_v8   ;;  %v591_v21 = vadd.f32 %v590_v18, %v589_v17 }
  0x1e   : > { %p1758_p4 = scmp.le.s32.totalorder %s2176_s18, 0 }
  0x1f   : > { %585 = vadd.xlane.f32.xlu0 %v584_v9  ;;  %v592_v23 = vrot.slane %v591_v21, 1  ;;  %s2185_s20 = smov (!%p1758_p4), 0  }
  0x21   : > { %703 = vperm.xlu1 %1958, %v698_v10   ;;  %v593_v26 = vadd.f32 %v592_v23, %v591_v21 }
  0x35   : > { %700 = vperm.xlu0 %1959, %v697_v11  }
  0x94   : > { %v685_v19 = vpop.permute.xlu1 %684 }
  0x95   : > { %vm693_vm5 = vcmp.eq.s32.totalorder %v685_v19, %v1757_v25 }
  0x98   : > { %v688_v22 = vpop.permute.xlu1 %687 }
  0x99   : > { %vm694_vm3 = vcmp.eq.s32.totalorder %v688_v22, %v1757_v25 }
  0x9c   : > { %v704_v27 = vpop.permute.xlu1 %703 }
  0x9d   : > { %vm706_vm4 = vcmp.eq.s32.totalorder %v704_v27, 1 }
  0x9e   : > { %vm708_vm7 = vmand %vm694_vm3, %vm706_vm4 }
  0xa4   : > { %v583_v20 = vpop.xlane.xlu0 %582 }
  0xa5   : > { %v675_v33 = vadd.f32 %v593_v26, %v583_v20 }
  0xa8   : > { %v586_v24 = vpop.xlane.xlu0 %585 }
  0xa9   : > { %v676_v29 = vadd.f32 %v593_v26, %v586_v24 }
  0xb0   : > { %v701_v31 = vpop.permute.xlu0 %700 }
  0xb1   : > { %vm705_vm6 = vcmp.eq.s32.totalorder %v701_v31, 1 }
  0xb2   : > { %vm707_vm8 = vmand %vm693_vm5, %vm705_vm6 }
  0xd9   : > { %v1844_v28 = vpop.f32.mrf.mxu0 }
  0xda   : > { %v678_v30 = vmul.f32 2.0, %v1844_v28 }
  0xdb   : > { %v666_v32 = vpop.f32.mrf.mxu0 }
  0xdc   : > { %v680_v34 = vsub.f32 %v676_v29, %v678_v30  ;;  %v677_v35 = vmul.f32 2.0, %v666_v32 }
  0xde   : > { %v682_v36 = vmax.f32 %v680_v34, 0.0  ;;  %v679_v37 = vsub.f32 %v675_v33, %v677_v35 }
  0xdf   : > { %1703 = sbr.rel (%p1758_p4) target bundleno = 521 (0x209), region = 121 }
  0xe0   : > { %v2181_v38 = vsel %vm708_vm7, %v682_v36, 1e+30  ;;  %v681_v39 = vmax.f32 %v679_v37, 0.0 }
  0xe1   : > { %715 = vst [vmem:[#allocation2 + $0x8] sm:$0xff] %v2181_v38 }
  0xe2   : > { %v709_v40 = vsel %vm707_vm8, %v681_v39, 1e+30 }
  0xe3   : > { %714 = vst [vmem:[#allocation2] sm:$0xff] %v709_v40 }
  0xe4   : > { %v2012_v43 = vmov 0.0   ;;  %v2016_v44 = vmov 0.0  }
  0xe5 LB: >> { %v2033_v49 = vmov 0.0   ;;  %s720_s20 = sadd.s32 1, %s2022_s20   ;;  %s2022_s20 = sphi %s2185_s20, %s720_s20   ;;  %v2018_v44 = vphi %v2016_v44, %v2017_v44   ;;  %v2014_v43 = vphi %v2012_v43, %v2013_v43  }
  0xe6   : >> { %p719_p5 = scmp.ge.s32.totalorder %s720_s20, %s2176_s18 }
  0xe8   : >> { %v726_v46 = vld [vmem:[#allocation2 + $0x8] sm:$0xff] }
  0xea   : >> { %v725_v45 = vld [vmem:[#allocation2] sm:$0xff] }
  0xeb   : >> { %727 = vmin.xlane.f32.xlu0 %v725_v45 }
  0xef   : >> { %729 = vmin.xlane.f32.xlu0 %v726_v46 }
 0x174   : >> { %v728_v47 = vpop.xlane.xlu0 %727 }
 0x175   : >> { %vm731_vm9 = vcmp.lt.f32.partialorder %v728_v47, 5e+29  ;;  %vm733_vm10 = vcmp.le.f32.partialorder %v725_v45, %v728_v47 }
 0x176   : >> { %v735_v48 = vsel %vm733_vm10, %v2174_v14, 128.0  ;;  %v1759_v50 = vsel %vm731_vm9, 1.0, %v2033_v49 }
 0x177   : >> { %737 = vmin.xlane.f32.xlu1 %v735_v48  ;;  %v755_v51 = vadd.f32 %v2018_v44, %v1759_v50  }
 0x178   : >> { %v730_v52 = vpop.xlane.xlu0 %729 }
 0x179   : >> { %vm732_vm11 = vcmp.lt.f32.partialorder %v730_v52, 5e+29  ;;  %vm734_vm12 = vcmp.le.f32.partialorder %v726_v46, %v730_v52  ;;  %v2017_v44 = vmov %v755_v51   ;;  %v2029_v42 = vmov (%p719_p5), %v755_v51  }
 0x17a   : >> { %v1760_v53 = vsel %vm732_vm11, 1.0, %v2033_v49  ;;  %v736_v54 = vsel %vm734_vm12, %v2174_v14, 128.0 }
 0x17b   : >> { %v756_v55 = vadd.f32 %v2014_v43, %v1760_v53   ;;  %739 = vmin.xlane.f32.xlu1 %v736_v54 }
 0x17d   : >> { %v2013_v43 = vmov %v756_v55   ;;  %v2025_v41 = vmov (%p719_p5), %v756_v55  }
 0x200   : >> { %v738_v56 = vpop.xlane.xlu1 %737 }
 0x201   : >> { %vm741_vm13 = vcmp.eq.f32.partialorder %v2174_v14, %v738_v56 }
 0x202   : >> { %vm747_vm14 = vmand %vm741_vm13, %vm731_vm9 }
 0x203   : >> { %v749_v57 = vsel %vm747_vm14, 2e+30, %v725_v45 }
 0x204   : >> { %751 = vst [vmem:[#allocation2] sm:$0xff] %v749_v57  ;;  %v740_v58 = vpop.xlane.xlu1 %739  ;;  %722 = sbr.rel (!%p719_p5) target bundleno = 229 (0xe5), region = 127 }
 0x205   : >> { %vm742_vm15 = vcmp.eq.f32.partialorder %v2174_v14, %v740_v58 }
 0x206   : >> { %vm748_vm1 = vmand %vm742_vm15, %vm732_vm11 }
 0x207   : >> { %v750_v59 = vsel %vm748_vm1, 2e+30, %v726_v46 }
 0x208   : >> { %752 = vst [vmem:[#allocation2 + $0x8] sm:$0xff] %v750_v59 }
 0x209 PF: > { %v1960_v60 = vld [vmem:[%s2474_s4 + $0x38] sm:$0xff]   ;;  %v2034_v61 = vmov 0.0   ;;  %v1961_v62 = vld [vmem:[%s2474_s4 + $0x30] sm:$0xff]   ;;  %v761_v63 = vmul.f32 -10.0, %v709_v40  ;;  %vm2035_vm2 = vmmov 0   ;;  %v762_v0 = vmul.f32 -10.0, %v2181_v38  ;;  %v2030_v42 = vphi %v2028_v42, %v2029_v42   ;;  %v2026_v41 = vphi %v2024_v41, %v2025_v41  }
 0x20a   : > { %1845 = vmatprep.subr.bf16.mxu1 %v2034_v61  ;;  %1861 = vmatprep.mubr.msk.bf16.mxu1 %vm2035_vm2, %v2034_v61  ;;  %v1962_v1 = vld [vmem:[%s2474_s4 + $0x28] sm:$0xff]   ;;  %v1963_v6 = vld [vmem:[%s2474_s4 + $0x20] sm:$0xff]   ;;  %v1964_v7 = vld [vmem:[%s2474_s4 + $0x18] sm:$0xff]   ;;  %v2036_v16 = vmov -1e+30   ;;  %vm775_vm6 = vcmp.gt.f32.partialorder %v2030_v42, 0.0 }
 0x20b   : > { %1846 = vmatpush3.bf16.msra.mxu1 %v1960_v60  ;;  %v763_v4 = vmul.f32 1.442695, %v761_v63  ;;  %v765_v5 = vmul.f32 1.442695, %v762_v0  ;;  %v1965_v9 = vld [vmem:[%s2474_s4 + $0x10] sm:$0xff]   ;;  %v1966_v18 = vld [vmem:[%s2474_s4 + $0x8] sm:$0xff]  }
 0x20c   : > { %1847 = vmatprep.subr.bf16.mxu1 %v2034_v61  ;;  %v1772_v11 = vld [vmem:[%s2475_s5] ss:$0 sm:$0xff]  ;;  %v1773_v12 = vld [vmem:[%s2475_s5 + $0x1] ss:$0 sm:$0xff]  ;;  %v1774_v22 = vld [vmem:[%s2475_s5 + $0x2] ss:$0 sm:$0xff] }
 0x20d   : > { %1968 = vpow2.f32 %v763_v4  ;;  %v1967_v28 = vld [vmem:[%s2474_s4] sm:$0xff]   ;;  %vm776_vm7 = vcmp.gt.f32.partialorder %v2026_v41, 0.0  ;;  %vm902_vm8 = vcmp.eq.s32.totalorder %v2171_v13, 0  ;;  %vm920_vm9 = vcmp.eq.s32.totalorder %v2171_v13, 1 }
 0x20e   : > { %1970 = vpow2.f32 %v765_v5  ;;  %v1775_v32 = vld [vmem:[%s2475_s5 + $0x3] ss:$0 sm:$0xff]  ;;  %v1776_v40 = vld [vmem:[%s2475_s5 + $0x4] ss:$0 sm:$0xff]  ;;  %v1777_v47 = vld [vmem:[%s2475_s5 + $0x5] ss:$0 sm:$0xff] }
 0x20f   : > { %1848 = vmatpush3.bf16.msra.mxu1 %v1961_v62  ;;  %v757_v8 = vld [vmem:[#allocation2] sm:$0xff]  ;;  %v758_v10 = vld [vmem:[#allocation2 + $0x8] sm:$0xff]  ;;  %v1778_v52 = vld [vmem:[%s2475_s5 + $0x6] ss:$0 sm:$0xff]  ;;  %vm938_vm10 = vcmp.eq.s32.totalorder %v2171_v13, 2  ;;  %vm956_vm11 = vcmp.eq.s32.totalorder %v2171_v13, 3 }
 0x210   : > { %1849 = vmatprep.subr.bf16.mxu1 %v2034_v61  ;;  %vm759_vm3 = vcmp.gt.f32.partialorder %v757_v8, 1.5e+30  ;;  %vm760_vm4 = vcmp.gt.f32.partialorder %v758_v10, 1.5e+30  ;;  %v1779_v57 = vld [vmem:[%s2475_s5 + $0x7] ss:$0 sm:$0xff] }
 0x211   : > { %v2233_v17 = vsel %vm759_vm3, 0.0, %v2036_v16  ;;  %v2249_v26 = vsel %vm760_vm4, 0.0, %v2036_v16  ;;  %vm1769_vm5 = vmpackc.low %vm760_vm4, %vm759_vm3  ;;  %v1780_v62 = vld [vmem:[%s2475_s5 + $0x8] ss:$0 sm:$0xff]  ;;  %v1781_v5 = vld [vmem:[%s2475_s5 + $0x9] ss:$0 sm:$0xff] }
 0x212   : > { %v1782_v10 = vld [vmem:[%s2475_s5 + $0xa] ss:$0 sm:$0xff]  ;;  %vm974_vm12 = vcmp.eq.s32.totalorder %v2171_v13, 4  ;;  %vm992_vm13 = vcmp.eq.s32.totalorder %v2171_v13, 5  ;;  %vm1010_vm14 = vcmp.eq.s32.totalorder %v2171_v13, 6  ;;  %vm1028_vm15 = vcmp.eq.s32.totalorder %v2171_v13, 7 }
 0x213   : > { %1850 = vmatpush3.bf16.msra.mxu1 %v1962_v1  ;;  %vm1046_vm1 = vcmp.eq.s32.totalorder %v2171_v13, 8  ;;  %vm1108_vm2 = vcmask 130048  }
 0x214   : > { %1851 = vmatprep.subr.bf16.mxu1 %v2034_v61 }
 0x217   : > { %1852 = vmatpush3.bf16.msra.mxu1 %v1963_v6 }
 0x218   : > { %1853 = vmatprep.subr.bf16.mxu1 %v2034_v61 }
 0x21a   : > { %v1969_v14 = vpop.eup %1968 }
 0x21b   : > { %1854 = vmatpush3.bf16.msra.mxu1 %v1964_v7  ;;  %v2230_v15 = vsel %vm759_vm3, %v1969_v14, 0.0  ;;  %v1971_v21 = vpop.eup %1970  ;;  %vm1064_vm3 = vcmp.eq.s32.totalorder %v2171_v13, 9 }
 0x21c   : > { %1855 = vmatprep.subr.bf16.mxu1 %v2034_v61  ;;  %v892_v19 = vmul.f32 %v1772_v11, %v2230_v15  ;;  %v910_v20 = vmul.f32 %v1773_v12, %v2230_v15  ;;  %v2246_v25 = vsel %vm760_vm4, %v1971_v21, 0.0  ;;  %v928_v30 = vmul.f32 %v1774_v22, %v2230_v15 }
 0x21d   : > { %v893_v27 = vmul.f32 %v1772_v11, %v2246_v25  ;;  %v911_v29 = vmul.f32 %v1773_v12, %v2246_v25  ;;  %v929_v31 = vmul.f32 %v1774_v22, %v2246_v25  ;;  %v1770_v35 = vpack.c.bf16 %v1971_v21, %v1969_v14 }
 0x21e   : > { %v894_v23 = vadd.f32 %v892_v19, %v2233_v17  ;;  %v912_v24 = vadd.f32 %v910_v20, %v2233_v17  ;;  %v946_v36 = vmul.f32 %v1775_v32, %v2230_v15  ;;  %v930_v37 = vadd.f32 %v928_v30, %v2233_v17 }
 0x21f   : > { %1856 = vmatpush3.bf16.msra.mxu1 %v1965_v9  ;;  %v895_v33 = vadd.f32 %v893_v27, %v2249_v26  ;;  %v913_v34 = vadd.f32 %v911_v29, %v2249_v26  ;;  %v931_v38 = vadd.f32 %v929_v31, %v2249_v26  ;;  %v947_v39 = vmul.f32 %v1775_v32, %v2246_v25  ;;  %v1106_v27 = vld [vmem:[%s2479_s9] sm:$0xff] }
 0x220   : > { %1857 = vmatprep.subr.bf16.mxu1 %v2034_v61  ;;  %896 = vmax.xlane.f32.xlu0 %v894_v23  ;;  %v964_v43 = vmul.f32 %v1776_v40, %v2230_v15  ;;  %v948_v44 = vadd.f32 %v946_v36, %v2233_v17  ;;  %v965_v46 = vmul.f32 %v1776_v40, %v2246_v25  ;;  %vm1082_vm4 = vcmp.eq.s32.totalorder %v2171_v13, 10 }
 0x221   : > { %914 = vmax.xlane.f32.xlu1 %v912_v24  ;;  %v949_v45 = vadd.f32 %v947_v39, %v2249_v26  ;;  %v982_v48 = vmul.f32 %v1777_v47, %v2230_v15  ;;  %v983_v51 = vmul.f32 %v1777_v47, %v2246_v25  ;;  %v1000_v53 = vmul.f32 %v1778_v52, %v2230_v15 }
 0x222   : > { %v966_v49 = vadd.f32 %v964_v43, %v2233_v17  ;;  %v967_v50 = vadd.f32 %v965_v46, %v2249_v26  ;;  %v1001_v56 = vmul.f32 %v1778_v52, %v2246_v25  ;;  %v1018_v58 = vmul.f32 %v1779_v57, %v2230_v15 }
 0x223   : > { %1858 = vmatpush3.bf16.msra.mxu1 %v1966_v18  ;;  %v984_v54 = vadd.f32 %v982_v48, %v2233_v17  ;;  %v985_v55 = vadd.f32 %v983_v51, %v2249_v26  ;;  %v1002_v59 = vadd.f32 %v1000_v53, %v2233_v17  ;;  %v1036_v1 = vmul.f32 %v1780_v62, %v2230_v15  ;;  %v1783_v18 = vld [vmem:[%s2475_s5 + $0xb] ss:$0 sm:$0xff] }
 0x224   : > { %1859 = vmatprep.subr.bf16.mxu1 %v2034_v61  ;;  %898 = vmax.xlane.f32.xlu0 %v895_v33  ;;  %v1003_v60 = vadd.f32 %v1001_v56, %v2249_v26  ;;  %v1019_v61 = vmul.f32 %v1779_v57, %v2246_v25  ;;  %v1020_v63 = vadd.f32 %v1018_v58, %v2233_v17  ;;  %v769_v51 = vmax.f32 %v2030_v42, 1.0 }
 0x225   : > { %916 = vmax.xlane.f32.xlu1 %v913_v34  ;;  %v1037_v4 = vmul.f32 %v1780_v62, %v2246_v25  ;;  %v1054_v6 = vmul.f32 %v1781_v5, %v2230_v15  ;;  %v1038_v7 = vadd.f32 %v1036_v1, %v2233_v17  ;;  %v1055_v9 = vmul.f32 %v1781_v5, %v2246_v25 }
 0x226   : > { %v1021_v0 = vadd.f32 %v1019_v61, %v2249_v26  ;;  %v1072_v11 = vmul.f32 %v1782_v10, %v2230_v15  ;;  %v1073_v16 = vmul.f32 %v1782_v10, %v2246_v25  ;;  %v1090_v19 = vmul.f32 %v1783_v18, %v2230_v15  ;;  %v1107_v15 = vld [vmem:[%s2479_s9 + $0x8] sm:$0xff] }
 0x227   : > { %1860 = vmatpush3.bf16.msra.mxu1 %v1967_v28  ;;  %v1039_v8 = vadd.f32 %v1037_v4, %v2249_v26  ;;  %v1056_v12 = vadd.f32 %v1054_v6, %v2233_v17  ;;  %v1057_v14 = vadd.f32 %v1055_v9, %v2249_v26  ;;  %v1091_v22 = vmul.f32 %v1783_v18, %v2246_v25  ;;  %v2336_v25 = vld [vmem:[%s2478_s8] sm:$0xff] }
 0x228   : > { %932 = vmax.xlane.f32.xlu0 %v930_v37  ;;  %v1074_v20 = vadd.f32 %v1072_v11, %v2233_v17  ;;  %v1075_v21 = vadd.f32 %v1073_v16, %v2249_v26  ;;  %v1092_v23 = vadd.f32 %v1090_v19, %v2233_v17  ;;  %1865 = vmatprep.subr.mxu0 %v1107_v15  ;;  %1972 = vrcp.f32 %v769_v51  ;;  %v1271_v51 = vld [vmem:[%s2480_s10] sm:$0xff] }
 0x229   : > { %934 = vmax.xlane.f32.xlu1 %v931_v38  ;;  %v1093_v24 = vadd.f32 %v1091_v22, %v2249_v26  ;;  %1866 = vmatpush3.msra.mxu0 %v1107_v15  ;;  %v770_v57 = vmax.f32 %v2026_v41, 1.0  ;;  %v1369_v41 = vld [vmem:[%s2483_s13] sm:$0xff] }
 0x22a   : > { %1862 = vmatmul.mubr.msk.bf16.vlgmr.msra.gmra.mxu1 %vm1769_vm5, %v1770_v35  ;;  %1867 = vmatprep.subr.mxu0 %v1106_v27  ;;  %vm1100_vm5 = vcmp.eq.s32.totalorder %v2171_v13, 11  ;;  %v1368_v13 = vld [vmem:[%s2482_s12 + $0x18] sm:$0xff] }
 0x22b   : > { %1868 = vmatpush3.msra.mxu0 %v1106_v27  ;;  %1974 = vrcp.f32 %v770_v57 }
 0x22c   : > { %950 = vmax.xlane.f32.xlu0 %v948_v44  ;;  %1872 = vmatprep.subr.mxu0 %v2336_v25 }
 0x22d   : > { %952 = vmax.xlane.f32.xlu1 %v949_v45 }
 0x230   : > { %968 = vmax.xlane.f32.xlu0 %v966_v49 }
 0x231   : > { %970 = vmax.xlane.f32.xlu1 %v967_v50 }
 0x234   : > { %986 = vmax.xlane.f32.xlu0 %v984_v54 }
 0x235   : > { %988 = vmax.xlane.f32.xlu1 %v985_v55  ;;  %v1973_v19 = vpop.eup %1972 }
 0x238   : > { %1004 = vmax.xlane.f32.xlu0 %v1002_v59 }
 0x239   : > { %1006 = vmax.xlane.f32.xlu1 %v1003_v60 }
 0x23c   : > { %1022 = vmax.xlane.f32.xlu0 %v1020_v63 }
 0x23d   : > { %1024 = vmax.xlane.f32.xlu1 %v1021_v0 }
 0x240   : > { %1040 = vmax.xlane.f32.xlu0 %v1038_v7 }
 0x241   : > { %1042 = vmax.xlane.f32.xlu1 %v1039_v8 }
 0x244   : > { %1058 = vmax.xlane.f32.xlu0 %v1056_v12 }
 0x245   : > { %1060 = vmax.xlane.f32.xlu1 %v1057_v14 }
 0x248   : > { %1076 = vmax.xlane.f32.xlu0 %v1074_v20 }
 0x249   : > { %1078 = vmax.xlane.f32.xlu1 %v1075_v21 }
 0x24c   : > { %1094 = vmax.xlane.f32.xlu0 %v1092_v23 }
 0x24d   : > { %1096 = vmax.xlane.f32.xlu1 %v1093_v24 }
 0x2a9   : > { %v897_v17 = vpop.xlane.xlu0 %896 }
 0x2aa   : > { %v915_v26 = vpop.xlane.xlu1 %914  ;;  %v900_v38 = vsel %vm775_vm6, %v897_v17, 0.0 }
 0x2ab   : > { %v903_v43 = vsel %vm902_vm8, %v900_v38, 0.0  ;;  %v918_v44 = vsel %vm775_vm6, %v915_v26, 0.0 }
 0x2ac   : > { %v921_v48 = vsel %vm920_vm9, %v918_v44, %v903_v43  ;;  %v1272_v44 = vld [vmem:[%s2480_s10 + $0x8] sm:$0xff] }
 0x2ad   : > { %v899_v28 = vpop.xlane.xlu0 %898 }
 0x2ae   : > { %v917_v29 = vpop.xlane.xlu1 %916  ;;  %v901_v40 = vsel %vm776_vm7, %v899_v28, 0.0  ;;  %v1975_v28 = vpop.eup %1974 }
 0x2af   : > { %v904_v46 = vsel %vm902_vm8, %v901_v40, 0.0  ;;  %v919_v47 = vsel %vm776_vm7, %v917_v29, 0.0  ;;  %v1103_v40 = vld [vmem:[%s2144_s21] sm:$0xff] }
 0x2b0   : > { %v922_v52 = vsel %vm920_vm9, %v919_v47, %v904_v46 }
 0x2b1   : > { %v933_v30 = vpop.xlane.xlu0 %932 }
 0x2b2   : > { %v935_v31 = vpop.xlane.xlu1 %934  ;;  %v936_v49 = vsel %vm775_vm6, %v933_v30, 0.0 }
 0x2b3   : > { %v937_v53 = vsel %vm776_vm7, %v935_v31, 0.0  ;;  %v939_v54 = vsel %vm938_vm10, %v936_v49, %v921_v48 }
 0x2b4   : > { %v940_v58 = vsel %vm938_vm10, %v937_v53, %v922_v52 }
 0x2b5   : > { %v951_v32 = vpop.xlane.xlu0 %950 }
 0x2b6   : > { %v953_v33 = vpop.xlane.xlu1 %952  ;;  %v954_v55 = vsel %vm775_vm6, %v951_v32, 0.0 }
 0x2b7   : > { %v955_v59 = vsel %vm776_vm7, %v953_v33, 0.0  ;;  %v957_v60 = vsel %vm956_vm11, %v954_v55, %v939_v54  ;;  %v1367_v54 = vld [vmem:[%s2482_s12 + $0x10] sm:$0xff] }
 0x2b8   : > { %v958_v63 = vsel %vm956_vm11, %v955_v59, %v940_v58 }
 0x2b9   : > { %v969_v34 = vpop.xlane.xlu0 %968 }
 0x2ba   : > { %v971_v35 = vpop.xlane.xlu1 %970  ;;  %v972_v61 = vsel %vm775_vm6, %v969_v34, 0.0 }
 0x2bb   : > { %v973_v0 = vsel %vm776_vm7, %v971_v35, 0.0  ;;  %v975_v1 = vsel %vm974_vm12, %v972_v61, %v957_v60 }
 0x2bc   : > { %v976_v6 = vsel %vm974_vm12, %v973_v0, %v958_v63  ;;  %v1790_v0 = vld [vmem:[%s2481_s11] ss:$0 sm:$0xff] }
 0x2bd   : > { %v987_v36 = vpop.xlane.xlu0 %986 }
 0x2be   : > { %v989_v37 = vpop.xlane.xlu1 %988  ;;  %v990_v4 = vsel %vm775_vm6, %v987_v36, 0.0 }
 0x2bf   : > { %v991_v7 = vsel %vm776_vm7, %v989_v37, 0.0  ;;  %v993_v8 = vsel %vm992_vm13, %v990_v4, %v975_v1 }
 0x2c0   : > { %v994_v11 = vsel %vm992_vm13, %v991_v7, %v976_v6  ;;  %v1548_v6 = vld [vmem:[%s2485_s15] sm:$0xff] }
 0x2c1   : > { %v1005_v39 = vpop.xlane.xlu0 %1004 }
 0x2c2   : > { %v1007_v45 = vpop.xlane.xlu1 %1006  ;;  %v1008_v9 = vsel %vm775_vm6, %v1005_v39, 0.0 }
 0x2c3   : > { %v1009_v12 = vsel %vm776_vm7, %v1007_v45, 0.0  ;;  %v1011_v14 = vsel %vm1010_vm14, %v1008_v9, %v993_v8 }
 0x2c4   : > { %v1012_v20 = vsel %vm1010_vm14, %v1009_v12, %v994_v11 }
 0x2c5   : > { %v1023_v50 = vpop.xlane.xlu0 %1022 }
 0x2c6   : > { %v1025_v56 = vpop.xlane.xlu1 %1024  ;;  %v1026_v16 = vsel %vm775_vm6, %v1023_v50, 0.0  ;;  %v1104_v50 = vld [vmem:[%s2144_s21 + $0x8] sm:$0xff] }
 0x2c7   : > { %v1027_v21 = vsel %vm776_vm7, %v1025_v56, 0.0  ;;  %v1029_v22 = vsel %vm1028_vm15, %v1026_v16, %v1011_v14 }
 0x2c8   : > { %v1030_v27 = vsel %vm1028_vm15, %v1027_v21, %v1012_v20 }
 0x2c9   : > { %v1041_v62 = vpop.xlane.xlu0 %1040 }
 0x2ca   : > { %v1043_v5 = vpop.xlane.xlu1 %1042  ;;  %v1044_v23 = vsel %vm775_vm6, %v1041_v62, 0.0 }
 0x2cb   : > { %v1045_v17 = vsel %vm776_vm7, %v1043_v5, 0.0  ;;  %v1047_v29 = vsel %vm1046_vm1, %v1044_v23, %v1029_v22 }
 0x2cc   : > { %v1048_v33 = vsel %vm1046_vm1, %v1045_v17, %v1030_v27 }
 0x2cd   : > { %v1059_v10 = vpop.xlane.xlu0 %1058 }
 0x2ce   : > { %v1061_v18 = vpop.xlane.xlu1 %1060  ;;  %v1062_v30 = vsel %vm775_vm6, %v1059_v10, 0.0  ;;  %v1795_v10 = vld [vmem:[%s2484_s14] ss:$0 sm:$0xff] }
 0x2cf   : > { %v1065_v35 = vsel %vm1064_vm3, %v1062_v30, %v1047_v29  ;;  %v1063_v36 = vsel %vm776_vm7, %v1061_v18, 0.0 }
 0x2d0   : > { %v1066_v45 = vsel %vm1064_vm3, %v1063_v36, %v1048_v33 }
 0x2d1   : > { %v1077_v24 = vpop.xlane.xlu0 %1076 }
 0x2d2   : > { %v1079_v31 = vpop.xlane.xlu1 %1078  ;;  %v1080_v37 = vsel %vm775_vm6, %v1077_v24, 0.0 }
 0x2d3   : > { %v1083_v46 = vsel %vm1082_vm4, %v1080_v37, %v1065_v35  ;;  %v1081_v47 = vsel %vm776_vm7, %v1079_v31, 0.0 }
 0x2d4   : > { %v1084_v52 = vsel %vm1082_vm4, %v1081_v47, %v1066_v45 }
 0x2d5   : > { %v1095_v38 = vpop.xlane.xlu0 %1094 }
 0x2d6   : > { %v1098_v48 = vsel %vm775_vm6, %v1095_v38, 0.0  ;;  %v1097_v49 = vpop.xlane.xlu1 %1096  ;;  %vm1445_vm6 = vcmask 261120  }
 0x2d7   : > { %v1101_v53 = vsel %vm1100_vm5, %v1098_v48, %v1083_v46  ;;  %v1099_v42 = vsel %vm776_vm7, %v1097_v49, 0.0 }
 0x2ea   : > { %v876_v15 = vpop.f32.mrf.mxu1 }
 0x2eb   : > { %v883_v26 = vmul.f32 %v1973_v19, %v876_v15 }
 0x2ec   : > { %v1863_v32 = vpop.f32.mrf.mxu1 }
 0x2ed   : > { %1869 = vmatprep.mubr.msk.f32.mxu0 %vm1108_vm2, %v883_v26 }
 0x2ee   : > { %v879_v34 = vpop.f32.mrf.mxu1 }
 0x2ef   : > { %v884_v39 = vmul.f32 %v1975_v28, %v879_v34  ;;  %v1798_v28 = vld [vmem:[%s2486_s16] ss:$0 sm:$0xff] }
 0x2f0   : > { %v1864_v43 = vpop.f32.mrf.mxu1 }
 0x2f1   : > { %1870 = vmatmul.mubr.msk.f32.vlgmr.msra.gmra.mxu0 %vm1108_vm2, %v884_v39 }
 0x2f2   : > { %1873 = vmatpush3.msra.mxu0 %v2336_v25  ;;  %1874 = vmatprep.mubr.msk.f32.mxu0 %vm580_vm0, %v1103_v40  ;;  %v1102_v25 = vsel %vm1100_vm5, %v1099_v42, %v1084_v52 }
 0x2f3   : > { %1877 = vmatprep.subr.mxu0 %v1272_v44 }
 0x2f5   : > { %1875 = vmatmul.mubr.msk.f32.vlgmr.msra.gmra.mxu0 %vm580_vm0, %v1104_v50 }
 0x2f6   : > { %1878 = vmatpush3.msra.mxu0 %v1272_v44  ;;  %1881 = vmatprep.mubr.msk.f32.mxu0 %vm1108_vm2, %v1101_v53 }
 0x2f7   : > { %1879 = vmatprep.subr.mxu0 %v1271_v51 }
 0x2f8   : > { %1880 = vmatpush3.msra.mxu0 %v1271_v51 }
 0x2f9   : > { %1882 = vmatmul.mubr.msk.f32.vlgmr.msra.gmra.mxu0 %vm1108_vm2, %v1102_v25  ;;  %1884 = vmatprep.subr.mxu0 %v1369_v41 }
 0x2fa   : > { %1886 = vmatprep.mubr.msk.f32.mxu0 %vm580_vm0, %v2154_v2  ;;  %1885 = vmatpush3.msra.mxu0 %v1369_v41  ;;  %v1366_v2 = vld [vmem:[%s2482_s12 + $0x8] sm:$0xff] }
 0x2fb   : > { %1889 = vmatprep.subr.mxu0 %v1368_v13 }
 0x2fd   : > { %1887 = vmatmul.mubr.msk.f32.vlgmr.msra.gmra.mxu0 %vm580_vm0, %v2156_v3  ;;  %v1365_v3 = vld [vmem:[%s2482_s12] sm:$0xff] }
 0x2fe   : > { %1890 = vmatpush3.msra.mxu0 %v1368_v13 }
 0x2ff   : > { %1891 = vmatprep.subr.mxu0 %v1367_v54 }
 0x300   : > { %1892 = vmatpush3.msra.mxu0 %v1367_v54 }
 0x301   : > { %1893 = vmatprep.subr.mxu0 %v1366_v2 }
 0x302   : > { %1894 = vmatpush3.msra.mxu0 %v1366_v2 }
 0x303   : > { %1895 = vmatprep.subr.mxu0 %v1365_v3 }
 0x304   : > { %1896 = vmatpush3.msra.mxu0 %v1365_v3 }
 0x305   : > { %1900 = vmatprep.subr.mxu0 %v1548_v6 }
 0x3b1   : > { %v1871_v55 = vpop.f32.mrf.mxu0 }
 0x3b3   : > { %v1181_v56 = vpop.f32.mrf.mxu0 }
 0x3b5   : > { %v1876_v57 = vpop.f32.mrf.mxu0 }
 0x3b6   : > { %v1268_v59 = vadd.f32 %v1876_v57, %v1871_v55 }
 0x3b7   : > { %v1262_v58 = vpop.f32.mrf.mxu0 }
 0x3b8   : > { %v1263_v61 = vadd.f32 %v1262_v58, %v1181_v56 }
 0x3b9   : > { %v1883_v60 = vpop.f32.mrf.mxu0 }
 0x3ba   : > { %v1355_v62 = vadd.f32 %v1883_v60, %v1268_v59 }
 0x3bb   : > { %v1345_v63 = vpop.f32.mrf.mxu0 }
 0x3bc   : > { %v1354_v1 = vadd.f32 %v1345_v63, %v1263_v61  ;;  %v1364_v5 = vadd.f32 %v1790_v0, %v1355_v62 }
 0x3bd   : > { %v1888_v7 = vpop.f32.mrf.mxu0 }
 0x3be   : > { %v1363_v4 = vadd.f32 %v1790_v0, %v1354_v1 }
 0x3bf   : > { %v1436_v8 = vpop.f32.mrf.mxu0 }
 0x3c0   : > { %1897 = vmatprep.mubr.msk.f32.mxu0 %vm1445_vm6, %v1363_v4 }
 0x3c1   : > { %1898 = vmatmul.mubr.msk.f32.vlgmr.msra.gmra.mxu0 %vm1445_vm6, %v1364_v5 }
 0x3c2   : > { %1901 = vmatpush3.msra.mxu0 %v1548_v6 }
 0x481   : > { %v1899_v9 = vpop.f32.mrf.mxu0 }
 0x482   : > { %v1524_v11 = vadd.f32 %v1899_v9, %v1888_v7 }
 0x483   : > { %v1518_v12 = vpop.f32.mrf.mxu0 }
 0x484   : > { %v1535_v14 = vadd.f32 %v1795_v10, %v1524_v11  ;;  %v1519_v16 = vadd.f32 %v1518_v12, %v1436_v8 }
 0x486   : > { %v1539_v18 = vmin.f32 %v1535_v14, 0.0  ;;  %v1534_v19 = vadd.f32 %v1795_v10, %v1519_v16  ;;  %vm1537_vm8 = vcmp.gt.f32.partialorder %v1535_v14, 0.0 }
 0x488   : > { %v1542_v20 = vmul.f32 1.442695, %v1539_v18  ;;  %v1538_v21 = vmin.f32 %v1534_v19, 0.0  ;;  %vm1536_vm7 = vcmp.gt.f32.partialorder %v1534_v19, 0.0 }
 0x48a   : > { %1976 = vpow2.f32 %v1542_v20  ;;  %v1540_v22 = vmul.f32 1.442695, %v1538_v21 }
 0x48c   : > { %1978 = vpow2.f32 %v1540_v22 }
 0x497   : > { %v1977_v23 = vpop.eup %1976 }
 0x498   : > { %v1797_v15 = vadd.f32 -1.0, %v1977_v23 }
 0x499   : > { %v1979_v24 = vpop.eup %1978 }
 0x49a   : > { %v1796_v27 = vadd.f32 -1.0, %v1979_v24  ;;  %v1547_v26 = vsel %vm1537_vm8, %v1535_v14, %v1797_v15 }
 0x49c   : > { %v1546_v17 = vsel %vm1536_vm7, %v1534_v19, %v1796_v27 }
 0x49d   : > { %1902 = vmatprep.mubr.msk.f32.mxu0 %vm580_vm0, %v1546_v17 }
 0x49e   : > { %1903 = vmatmul.mubr.msk.f32.vlgmr.msra.gmra.mxu0 %vm580_vm0, %v1547_v26 }
 0x55e   : > { %v1904_v29 = vpop.f32.mrf.mxu0 }
 0x55f   : > { %v1634_v30 = vadd.f32 %v1904_v29, %v1798_v28 }
 0x560   : > { %v1628_v31 = vpop.f32.mrf.mxu0 }
 0x561   : > { %v1640_v32 = vmin.f32 %v1634_v30, 0.0  ;;  %v1629_v33 = vadd.f32 %v1798_v28, %v1628_v31  ;;  %vm1638_vm10 = vcmp.gt.f32.partialorder %v1634_v30, 0.0 }
 0x563   : > { %v1643_v34 = vmul.f32 1.442695, %v1640_v32  ;;  %v1639_v35 = vmin.f32 %v1629_v33, 0.0  ;;  %vm1637_vm9 = vcmp.gt.f32.partialorder %v1629_v33, 0.0 }
 0x565   : > { %1980 = vpow2.f32 %v1643_v34  ;;  %v1641_v36 = vmul.f32 1.442695, %v1639_v35 }
 0x567   : > { %1982 = vpow2.f32 %v1641_v36 }
 0x572   : > { %v1981_v37 = vpop.eup %1980 }
 0x573   : > { %v1802_v39 = vadd.f32 -1.0, %v1981_v37 }
 0x574   : > { %v1983_v38 = vpop.eup %1982 }
 0x575   : > { %v1801_v40 = vadd.f32 -1.0, %v1983_v38  ;;  %v1648_v44 = vsel %vm1638_vm10, %v1634_v30, %v1802_v39 }
 0x576   : > { %1650 = vst.msk [vmem:[%s2152_s28 + $0x8] sm:$0xff] %vm580_vm0, %v1648_v44 }
 0x577   : > { %v1647_v43 = vsel %vm1637_vm9, %v1629_v33, %v1801_v40 }
 0x578   : > { %1649 = vst.msk [vmem:[%s2152_s28] sm:$0xff] %vm580_vm0, %v1647_v43 }
 0x579 PF: > { %s28_s27 = sadd.s32 1, %s2010_s27  }
 0x57a   : > { %p25_p6 = scmp.ge.s32.totalorder %s28_s27, 4  }
 0x57c   :  { %27 = sbr.rel (!%p25_p6) target bundleno = 10 (0xa), region = 138 }

// kernel: gravnet_model_forward.33
= control target key start
LH: loop header
LB: loop body
LE: loop exit
PB: predicated region body
PF: predicated region fallthrough
CT: control target
= control target key end

     0   :  { %s2230_s27 = smov 0   ;;  %s2643_s0 = inlined_call_operand.vmem [shape: f32[32,8], index: 0, kind: input, shape index: {}]   ;;  %s2644_s1 = inlined_call_operand.vmem [shape: f32[32,8], index: 1, kind: input, shape index: {}]   ;;  %s2645_s2 = inlined_call_operand.vmem [shape: f32[32,8], index: 2, kind: input, shape index: {}]   ;;  %s2646_s3 = inlined_call_operand.vmem [shape: f32[32,8], index: 3, kind: input, shape index: {}]   ;;  %s2647_s4 = inlined_call_operand.vmem [shape: f32[4,8,128], index: 4, kind: input, shape index: {}]   ;;  %s2648_s5 = inlined_call_operand.vmem [shape: f32[1,128], index: 5, kind: input, shape index: {}]   ;;  %s2649_s6 = inlined_call_operand.vmem [shape: f32[7,128,128], index: 6, kind: input, shape index: {}]   ;;  %s2650_s7 = inlined_call_operand.vmem [shape: f32[7,1,128], index: 7, kind: input, shape index: {}]   ;;  %s2651_s8 = inlined_call_operand.vmem [shape: f32[32,128], index: 8, kind: output, shape index: {}]  }
   0x1 LB: > { %s1592_s28 = sadd.s32 4294967295, %s2183_s27   ;;  %p1596_p0 = scmp.ge.s32.totalorder %s2183_s27, 1  ;;  %s2183_s27 = sphi %s2230_s27, %s18_s27  }
   0x2   : > { %p296_p1 = scmp.lt.s32.totalorder %s2183_s27, 3 }
   0x4   : > { %p297_p2 = pnand %p1596_p0, %p296_p1 }
   0x5   : > { %s1597_s9 = sshll.u32 (!%p297_p2), %s1592_s28, 1 }
   0x6   : > { %300 = sbr.rel (%p297_p2) target bundleno = 1740 (0x6cc), region = 52  ;;  %p346_p3 = scmp.lt.s32.totalorder (!%p297_p2), %s1597_s9, 3 }
   0xb   : > { %v1607_v0 = vld [vmem:[%s2647_s4 + $0x8] sm:$0xff]  ;;  %v377_v1 = vld [vmem:[%s2647_s4] sm:$0xff]  ;;  %s2653_s9 = smov (!%p346_p3, %s1597_s9), 3  ;;  %vm382_vm0 = vcmask 64512   ;;  %v1612_v5 = vld [vmem:[%s2647_s4 + $0x10] sm:$0xff] }
   0xc   : > { %1880 = vmatprep.subr.mxu1 %v1607_v0  ;;  %s2244_s12 = sshll.u32 %s2653_s9, 3  ;;  %v1615_v8 = vld [vmem:[%s2647_s4 + $0x18] sm:$0xff]  ;;  %v754_v13 = vld [vmem:[%s2649_s6 + $0x70] sm:$0xff]  ;;  %v753_v14 = vld [vmem:[%s2649_s6 + $0x68] sm:$0xff] }
   0xd   : > { %1881 = vmatpush3.msra.mxu1 %v1607_v0  ;;  %s355_s15 = scalar_lea.vmem %s2644_s1, %s2244_s12  ;;  %s349_s18 = scalar_lea.vmem %s2643_s0, %s2244_s12  ;;  %v755_v12 = vld [vmem:[%s2649_s6 + $0x78] sm:$0xff]  ;;  %v752_v15 = vld [vmem:[%s2649_s6 + $0x60] sm:$0xff]  ;;  %v750_v17 = vld [vmem:[%s2649_s6 + $0x50] sm:$0xff] }
   0xe   : > { %1885 = vmatprep.subr.mxu1 %v377_v1  ;;  %v378_v2 = vld [vmem:[%s355_s15] sm:$0xff]  ;;  %v379_v3 = vld [vmem:[%s355_s15 + $0x8] sm:$0xff]  ;;  %s361_s23 = scalar_lea.vmem %s2645_s2, %s2244_s12  ;;  %s367_s29 = scalar_lea.vmem %s2646_s3, %s2244_s12  ;;  %1900 = vmatprep.subr.mxu0 %v755_v12  ;;  %v751_v16 = vld [vmem:[%s2649_s6 + $0x58] sm:$0xff] }
   0xf   : > { %v375_v4 = vld [vmem:[%s349_s18] sm:$0xff]  ;;  %1882 = vmatprep.mubr.msk.f32.mxu1 %vm382_vm0, %v378_v2  ;;  %v376_v6 = vld [vmem:[%s349_s18 + $0x8] sm:$0xff]  ;;  %1901 = vmatpush3.msra.mxu0 %v755_v12  ;;  %v747_v20 = vld [vmem:[%s2649_s6 + $0x38] sm:$0xff]  ;;  %s373_s10 = scalar_lea.vmem %s2651_s8, %s2244_s12 }
  0x10   : > { %1883 = vmatmul.mubr.msk.f32.vlgmr.msra.gmra.mxu1 %vm382_vm0, %v379_v3  ;;  %v545_v7 = vld [vmem:[%s361_s23] sm:$0xff]  ;;  %v546_v9 = vld [vmem:[%s361_s23 + $0x8] sm:$0xff]  ;;  %1902 = vmatprep.subr.mxu0 %v754_v13  ;;  %v746_v21 = vld [vmem:[%s2649_s6 + $0x30] sm:$0xff] }
  0x11   : > { %1886 = vmatpush3.msra.mxu1 %v377_v1  ;;  %1887 = vmatprep.mubr.msk.f32.mxu1 %vm382_vm0, %v375_v4  ;;  %v632_v10 = vld [vmem:[%s367_s29] sm:$0xff]  ;;  %v633_v11 = vld [vmem:[%s367_s29 + $0x8] sm:$0xff]  ;;  %v743_v24 = vld [vmem:[%s2649_s6 + $0x18] sm:$0xff] }
  0x12   : > { %1890 = vmatprep.subr.mxu1 %v1612_v5  ;;  %1903 = vmatpush3.msra.mxu0 %v754_v13  ;;  %v749_v18 = vld [vmem:[%s2649_s6 + $0x48] sm:$0xff]  ;;  %v748_v19 = vld [vmem:[%s2649_s6 + $0x40] sm:$0xff]  ;;  %v742_v25 = vld [vmem:[%s2649_s6 + $0x10] sm:$0xff] }
  0x13   : > { %1904 = vmatprep.subr.mxu0 %v753_v14  ;;  %v745_v22 = vld [vmem:[%s2649_s6 + $0x28] sm:$0xff]  ;;  %v744_v23 = vld [vmem:[%s2649_s6 + $0x20] sm:$0xff]  ;;  %v1639_v28 = vld [vmem:[%s2649_s6 + $0xf8] sm:$0xff] }
  0x14   : > { %1888 = vmatmul.mubr.msk.f32.vlgmr.msra.gmra.mxu1 %vm382_vm0, %v376_v6  ;;  %1905 = vmatpush3.msra.mxu0 %v753_v14  ;;  %v741_v26 = vld [vmem:[%s2649_s6 + $0x8] sm:$0xff]  ;;  %v740_v27 = vld [vmem:[%s2649_s6] sm:$0xff]  ;;  %v1638_v29 = vld [vmem:[%s2649_s6 + $0xf0] sm:$0xff] }
  0x15   : > { %1891 = vmatpush3.msra.mxu1 %v1612_v5  ;;  %1892 = vmatprep.mubr.msk.f32.mxu1 %vm382_vm0, %v545_v7  ;;  %v1637_v30 = vld [vmem:[%s2649_s6 + $0xe8] sm:$0xff]  ;;  %v1618_v41 = vld [vmem:[%s2648_s5] ss:$0 sm:$0xff]  ;;  %v1635_v59 = vld [vmem:[%s2649_s6 + $0xd8] sm:$0xff] }
  0x16   : > { %1895 = vmatprep.subr.mxu1 %v1615_v8  ;;  %1906 = vmatprep.subr.mxu0 %v752_v15  ;;  %v1636_v58 = vld [vmem:[%s2649_s6 + $0xe0] sm:$0xff]  ;;  %v1634_v60 = vld [vmem:[%s2649_s6 + $0xd0] sm:$0xff]  ;;  %v1633_v61 = vld [vmem:[%s2649_s6 + $0xc8] sm:$0xff] }
  0x17   : > { %1907 = vmatpush3.msra.mxu0 %v752_v15  ;;  %v1632_v62 = vld [vmem:[%s2649_s6 + $0xc0] sm:$0xff]  ;;  %v1631_v63 = vld [vmem:[%s2649_s6 + $0xb8] sm:$0xff]  ;;  %v1630_v0 = vld [vmem:[%s2649_s6 + $0xb0] sm:$0xff] }
  0x18   : > { %1893 = vmatmul.mubr.msk.f32.vlgmr.msra.gmra.mxu1 %vm382_vm0, %v546_v9  ;;  %1908 = vmatprep.subr.mxu0 %v751_v16  ;;  %v1629_v1 = vld [vmem:[%s2649_s6 + $0xa8] sm:$0xff]  ;;  %v1628_v2 = vld [vmem:[%s2649_s6 + $0xa0] sm:$0xff]  ;;  %v1627_v3 = vld [vmem:[%s2649_s6 + $0x98] sm:$0xff] }
  0x19   : > { %1896 = vmatpush3.msra.mxu1 %v1615_v8  ;;  %1897 = vmatprep.mubr.msk.f32.mxu1 %vm382_vm0, %v632_v10  ;;  %v1626_v4 = vld [vmem:[%s2649_s6 + $0x90] sm:$0xff]  ;;  %v1625_v5 = vld [vmem:[%s2649_s6 + $0x88] sm:$0xff]  ;;  %v1624_v6 = vld [vmem:[%s2649_s6 + $0x80] sm:$0xff] }
  0x1a   : > { %1909 = vmatpush3.msra.mxu0 %v751_v16  ;;  %1935 = vmatprep.subr.mxu1 %v1639_v28  ;;  %v1659_v7 = vld [vmem:[%s2649_s6 + $0x178] sm:$0xff]  ;;  %v1658_v8 = vld [vmem:[%s2649_s6 + $0x170] sm:$0xff]  ;;  %v1657_v9 = vld [vmem:[%s2649_s6 + $0x168] sm:$0xff] }
  0x1b   : > { %1910 = vmatprep.subr.mxu0 %v750_v17  ;;  %v1621_v10 = vld [vmem:[%s2650_s7] ss:$0 sm:$0xff] }
  0x1c   : > { %1898 = vmatmul.mubr.msk.f32.vlgmr.msra.gmra.mxu1 %vm382_vm0, %v633_v11  ;;  %1911 = vmatpush3.msra.mxu0 %v750_v17 }
  0x1d   : > { %1912 = vmatprep.subr.mxu0 %v749_v18  ;;  %1936 = vmatpush3.msra.mxu1 %v1639_v28  ;;  %v1653_v28 = vld [vmem:[%s2649_s6 + $0x148] sm:$0xff] }
  0x1e   : > { %1913 = vmatpush3.msra.mxu0 %v749_v18  ;;  %1937 = vmatprep.subr.mxu1 %v1638_v29 }
  0x1f   : > { %1914 = vmatprep.subr.mxu0 %v748_v19  ;;  %1938 = vmatpush3.msra.mxu1 %v1638_v29  ;;  %v1652_v29 = vld [vmem:[%s2649_s6 + $0x140] sm:$0xff] }
  0x20   : > { %1915 = vmatpush3.msra.mxu0 %v748_v19  ;;  %1939 = vmatprep.subr.mxu1 %v1637_v30 }
  0x21   : > { %1916 = vmatprep.subr.mxu0 %v747_v20  ;;  %1940 = vmatpush3.msra.mxu1 %v1637_v30  ;;  %v1651_v30 = vld [vmem:[%s2649_s6 + $0x138] sm:$0xff] }
  0x22   : > { %1917 = vmatpush3.msra.mxu0 %v747_v20  ;;  %1941 = vmatprep.subr.mxu1 %v1636_v58 }
  0x23   : > { %1918 = vmatprep.subr.mxu0 %v746_v21  ;;  %1942 = vmatpush3.msra.mxu1 %v1636_v58  ;;  %v1674_v58 = vld [vmem:[%s2649_s6 + $0x1d0] sm:$0xff] }
  0x24   : > { %1919 = vmatpush3.msra.mxu0 %v746_v21  ;;  %1943 = vmatprep.subr.mxu1 %v1635_v59 }
  0x25   : > { %1920 = vmatprep.subr.mxu0 %v745_v22  ;;  %1944 = vmatpush3.msra.mxu1 %v1635_v59  ;;  %v1673_v59 = vld [vmem:[%s2649_s6 + $0x1c8] sm:$0xff] }
  0x26   : > { %1921 = vmatpush3.msra.mxu0 %v745_v22  ;;  %1945 = vmatprep.subr.mxu1 %v1634_v60 }
  0x27   : > { %1922 = vmatprep.subr.mxu0 %v744_v23  ;;  %1946 = vmatpush3.msra.mxu1 %v1634_v60  ;;  %v1672_v60 = vld [vmem:[%s2649_s6 + $0x1c0] sm:$0xff] }
  0x28   : > { %1923 = vmatpush3.msra.mxu0 %v744_v23  ;;  %1947 = vmatprep.subr.mxu1 %v1633_v61 }
  0x29   : > { %1924 = vmatprep.subr.mxu0 %v743_v24  ;;  %1948 = vmatpush3.msra.mxu1 %v1633_v61  ;;  %v1671_v61 = vld [vmem:[%s2649_s6 + $0x1b8] sm:$0xff] }
  0x2a   : > { %1925 = vmatpush3.msra.mxu0 %v743_v24  ;;  %1949 = vmatprep.subr.mxu1 %v1632_v62 }
  0x2b   : > { %1926 = vmatprep.subr.mxu0 %v742_v25  ;;  %1950 = vmatpush3.msra.mxu1 %v1632_v62  ;;  %v1670_v62 = vld [vmem:[%s2649_s6 + $0x1b0] sm:$0xff] }
  0x2c   : > { %1927 = vmatpush3.msra.mxu0 %v742_v25  ;;  %1951 = vmatprep.subr.mxu1 %v1631_v63  ;;  %v1656_v25 = vld [vmem:[%s2649_s6 + $0x160] sm:$0xff] }
  0x2d   : > { %1928 = vmatprep.subr.mxu0 %v741_v26  ;;  %1952 = vmatpush3.msra.mxu1 %v1631_v63  ;;  %v1669_v63 = vld [vmem:[%s2649_s6 + $0x1a8] sm:$0xff] }
  0x2e   : > { %1929 = vmatpush3.msra.mxu0 %v741_v26  ;;  %1953 = vmatprep.subr.mxu1 %v1630_v0  ;;  %v1655_v26 = vld [vmem:[%s2649_s6 + $0x158] sm:$0xff] }
  0x2f   : > { %1930 = vmatprep.subr.mxu0 %v740_v27  ;;  %1954 = vmatpush3.msra.mxu1 %v1630_v0  ;;  %v1668_v0 = vld [vmem:[%s2649_s6 + $0x1a0] sm:$0xff] }
  0x30   : > { %1931 = vmatpush3.msra.mxu0 %v740_v27  ;;  %1955 = vmatprep.subr.mxu1 %v1629_v1  ;;  %v1654_v27 = vld [vmem:[%s2649_s6 + $0x150] sm:$0xff] }
  0x31   : > { %1956 = vmatpush3.msra.mxu1 %v1629_v1  ;;  %1970 = vmatprep.subr.mxu0 %v1659_v7  ;;  %v1667_v1 = vld [vmem:[%s2649_s6 + $0x198] sm:$0xff] }
  0x32   : > { %1957 = vmatprep.subr.mxu1 %v1628_v2 }
  0x33   : > { %1958 = vmatpush3.msra.mxu1 %v1628_v2  ;;  %v1666_v2 = vld [vmem:[%s2649_s6 + $0x190] sm:$0xff] }
  0x34   : > { %1959 = vmatprep.subr.mxu1 %v1627_v3 }
  0x35   : > { %1960 = vmatpush3.msra.mxu1 %v1627_v3  ;;  %v1665_v3 = vld [vmem:[%s2649_s6 + $0x188] sm:$0xff] }
  0x36   : > { %1961 = vmatprep.subr.mxu1 %v1626_v4 }
  0x37   : > { %1962 = vmatpush3.msra.mxu1 %v1626_v4  ;;  %v1664_v4 = vld [vmem:[%s2649_s6 + $0x180] sm:$0xff] }
  0x38   : > { %1963 = vmatprep.subr.mxu1 %v1625_v5 }
  0x39   : > { %1964 = vmatpush3.msra.mxu1 %v1625_v5  ;;  %v1699_v5 = vld [vmem:[%s2649_s6 + $0x278] sm:$0xff] }
  0x3a   : > { %1965 = vmatprep.subr.mxu1 %v1624_v6 }
  0x3b   : > { %1966 = vmatpush3.msra.mxu1 %v1624_v6  ;;  %v1698_v6 = vld [vmem:[%s2649_s6 + $0x270] sm:$0xff] }
  0xd0   : > { %v1884_v31 = vpop.f32.mrf.mxu1 }
  0xd2   : > { %v455_v32 = vpop.f32.mrf.mxu1 }
  0xd4   : > { %v1889_v33 = vpop.f32.mrf.mxu1 }
  0xd5   : > { %v542_v36 = vadd.f32 %v1889_v33, %v1884_v31  ;;  %v1650_v31 = vld [vmem:[%s2649_s6 + $0x130] sm:$0xff]  ;;  %v1648_v33 = vld [vmem:[%s2649_s6 + $0x120] sm:$0xff] }
  0xd6   : > { %v536_v34 = vpop.f32.mrf.mxu1 }
  0xd7   : > { %v537_v38 = vadd.f32 %v536_v34, %v455_v32  ;;  %v1649_v32 = vld [vmem:[%s2649_s6 + $0x128] sm:$0xff]  ;;  %v1647_v34 = vld [vmem:[%s2649_s6 + $0x118] sm:$0xff] }
  0xd8   : > { %v1894_v35 = vpop.f32.mrf.mxu1 }
  0xd9   : > { %v631_v39 = vadd.f32 %v1894_v35, %v542_v36  ;;  %v1646_v35 = vld [vmem:[%s2649_s6 + $0x110] sm:$0xff]  ;;  %v1645_v36 = vld [vmem:[%s2649_s6 + $0x108] sm:$0xff] }
  0xda   : > { %v621_v37 = vpop.f32.mrf.mxu1 }
  0xdb   : > { %v630_v42 = vadd.f32 %v621_v37, %v537_v38  ;;  %v1644_v37 = vld [vmem:[%s2649_s6 + $0x100] sm:$0xff]  ;;  %v1679_v38 = vld [vmem:[%s2649_s6 + $0x1f8] sm:$0xff] }
  0xdc   : > { %v1899_v40 = vpop.f32.mrf.mxu1  ;;  %2005 = vmatprep.subr.mxu1 %v1679_v38 }
  0xdd   : > { %v718_v43 = vadd.f32 %v1899_v40, %v631_v39  ;;  %v1678_v39 = vld [vmem:[%s2649_s6 + $0x1f0] sm:$0xff]  ;;  %v1677_v40 = vld [vmem:[%s2649_s6 + $0x1e8] sm:$0xff] }
  0xde   : > { %v708_v44 = vpop.f32.mrf.mxu1 }
  0xdf   : > { %v727_v45 = vadd.f32 %v1618_v41, %v718_v43  ;;  %v717_v46 = vadd.f32 %v708_v44, %v630_v42 }
  0xe1   : > { %v731_v47 = vmin.f32 %v727_v45, 0.0  ;;  %v726_v48 = vadd.f32 %v1618_v41, %v717_v46  ;;  %vm729_vm2 = vcmp.gt.f32.partialorder %v727_v45, 0.0  ;;  %v1641_v41 = vld [vmem:[%s2650_s7 + $0x1] ss:$0 sm:$0xff] }
  0xe3   : > { %v734_v49 = vmul.f32 1.442695, %v731_v47  ;;  %v730_v50 = vmin.f32 %v726_v48, 0.0  ;;  %vm728_vm1 = vcmp.gt.f32.partialorder %v726_v48, 0.0 }
  0xe5   : > { %2153 = vpow2.f32 %v734_v49  ;;  %v732_v51 = vmul.f32 1.442695, %v730_v50 }
  0xe7   : > { %2155 = vpow2.f32 %v732_v51 }
  0xf2   : > { %v2154_v52 = vpop.eup %2153 }
  0xf3   : > { %v1620_v54 = vadd.f32 -1.0, %v2154_v52 }
  0xf4   : > { %v2156_v53 = vpop.eup %2155 }
  0xf5   : > { %v1619_v55 = vadd.f32 -1.0, %v2156_v53  ;;  %v739_v57 = vsel %vm729_vm2, %v727_v45, %v1620_v54 }
  0xf7   : > { %v738_v56 = vsel %vm728_vm1, %v726_v48, %v1619_v55 }
  0xf8   : > { %1932 = vmatprep.mubr.f32.mxu0 %v738_v56  ;;  %v1676_v56 = vld [vmem:[%s2649_s6 + $0x1e0] sm:$0xff] }
  0xf9   : > { %1933 = vmatmul.mubr.f32.vlgmr.msra.gmra.mxu0 %v739_v57  ;;  %v1675_v57 = vld [vmem:[%s2649_s6 + $0x1d8] sm:$0xff] }
  0xfa   : > { %1971 = vmatpush3.msra.mxu0 %v1659_v7  ;;  %v1697_v7 = vld [vmem:[%s2649_s6 + $0x268] sm:$0xff] }
  0xfb   : > { %1972 = vmatprep.subr.mxu0 %v1658_v8 }
  0xfc   : > { %1973 = vmatpush3.msra.mxu0 %v1658_v8  ;;  %v1661_v8 = vld [vmem:[%s2650_s7 + $0x2] ss:$0 sm:$0xff] }
  0xfd   : > { %1974 = vmatprep.subr.mxu0 %v1657_v9 }
  0xfe   : > { %1975 = vmatpush3.msra.mxu0 %v1657_v9 }
  0xff   : > { %1976 = vmatprep.subr.mxu0 %v1656_v25 }
 0x100   : > { %1977 = vmatpush3.msra.mxu0 %v1656_v25  ;;  %v1694_v25 = vld [vmem:[%s2649_s6 + $0x250] sm:$0xff] }
 0x101   : > { %1978 = vmatprep.subr.mxu0 %v1655_v26 }
 0x102   : > { %1979 = vmatpush3.msra.mxu0 %v1655_v26  ;;  %v1693_v26 = vld [vmem:[%s2649_s6 + $0x248] sm:$0xff] }
 0x103   : > { %1980 = vmatprep.subr.mxu0 %v1654_v27 }
 0x104   : > { %1981 = vmatpush3.msra.mxu0 %v1654_v27  ;;  %v1692_v27 = vld [vmem:[%s2649_s6 + $0x240] sm:$0xff] }
 0x105   : > { %1982 = vmatprep.subr.mxu0 %v1653_v28 }
 0x106   : > { %1983 = vmatpush3.msra.mxu0 %v1653_v28  ;;  %v1691_v28 = vld [vmem:[%s2649_s6 + $0x238] sm:$0xff] }
 0x107   : > { %1984 = vmatprep.subr.mxu0 %v1652_v29 }
 0x108   : > { %1985 = vmatpush3.msra.mxu0 %v1652_v29  ;;  %v1690_v29 = vld [vmem:[%s2649_s6 + $0x230] sm:$0xff] }
 0x109   : > { %1986 = vmatprep.subr.mxu0 %v1651_v30 }
 0x10a   : > { %1987 = vmatpush3.msra.mxu0 %v1651_v30  ;;  %v1689_v30 = vld [vmem:[%s2649_s6 + $0x228] sm:$0xff] }
 0x10b   : > { %1988 = vmatprep.subr.mxu0 %v1650_v31 }
 0x10c   : > { %1989 = vmatpush3.msra.mxu0 %v1650_v31  ;;  %v1688_v31 = vld [vmem:[%s2649_s6 + $0x220] sm:$0xff] }
 0x10d   : > { %1990 = vmatprep.subr.mxu0 %v1649_v32 }
 0x10e   : > { %1991 = vmatpush3.msra.mxu0 %v1649_v32  ;;  %v1687_v32 = vld [vmem:[%s2649_s6 + $0x218] sm:$0xff] }
 0x10f   : > { %1992 = vmatprep.subr.mxu0 %v1648_v33 }
 0x110   : > { %1993 = vmatpush3.msra.mxu0 %v1648_v33  ;;  %v1686_v33 = vld [vmem:[%s2649_s6 + $0x210] sm:$0xff] }
 0x111   : > { %1994 = vmatprep.subr.mxu0 %v1647_v34 }
 0x112   : > { %1995 = vmatpush3.msra.mxu0 %v1647_v34  ;;  %v1685_v34 = vld [vmem:[%s2649_s6 + $0x208] sm:$0xff] }
 0x113   : > { %1996 = vmatprep.subr.mxu0 %v1646_v35 }
 0x114   : > { %1997 = vmatpush3.msra.mxu0 %v1646_v35  ;;  %v1684_v35 = vld [vmem:[%s2649_s6 + $0x200] sm:$0xff] }
 0x115   : > { %1998 = vmatprep.subr.mxu0 %v1645_v36 }
 0x116   : > { %1999 = vmatpush3.msra.mxu0 %v1645_v36  ;;  %v1719_v36 = vld [vmem:[%s2649_s6 + $0x2f8] sm:$0xff] }
 0x117   : > { %2000 = vmatprep.subr.mxu0 %v1644_v37 }
 0x118   : > { %2001 = vmatpush3.msra.mxu0 %v1644_v37  ;;  %v1718_v37 = vld [vmem:[%s2649_s6 + $0x2f0] sm:$0xff] }
 0x119   : > { %2040 = vmatprep.subr.mxu0 %v1699_v5 }
 0x1b9   : > { %v1934_v11 = vpop.f32.mrf.mxu0 }
 0x1ba   : > { %v835_v12 = vadd.f32 %v1934_v11, %v1621_v10 }
 0x1bb   : > { %v829_v13 = vpop.f32.mrf.mxu0 }
 0x1bc   : > { %v841_v14 = vmin.f32 %v835_v12, 0.0  ;;  %v830_v15 = vadd.f32 %v1621_v10, %v829_v13  ;;  %vm839_vm4 = vcmp.gt.f32.partialorder %v835_v12, 0.0 }
 0x1be   : > { %v844_v16 = vmul.f32 1.442695, %v841_v14  ;;  %v840_v17 = vmin.f32 %v830_v15, 0.0  ;;  %vm838_vm3 = vcmp.gt.f32.partialorder %v830_v15, 0.0 }
 0x1c0   : > { %2157 = vpow2.f32 %v844_v16  ;;  %v842_v18 = vmul.f32 1.442695, %v840_v17 }
 0x1c2   : > { %2159 = vpow2.f32 %v842_v18 }
 0x1cd   : > { %v2158_v19 = vpop.eup %2157 }
 0x1ce   : > { %v1623_v21 = vadd.f32 -1.0, %v2158_v19 }
 0x1cf   : > { %v2160_v20 = vpop.eup %2159 }
 0x1d0   : > { %v1622_v22 = vadd.f32 -1.0, %v2160_v20  ;;  %v849_v24 = vsel %vm839_vm4, %v835_v12, %v1623_v21 }
 0x1d2   : > { %v848_v23 = vsel %vm838_vm3, %v830_v15, %v1622_v22 }
 0x1d3   : > { %1967 = vmatprep.mubr.f32.mxu1 %v848_v23  ;;  %v1696_v23 = vld [vmem:[%s2649_s6 + $0x260] sm:$0xff] }
 0x1d4   : > { %1968 = vmatmul.mubr.f32.vlgmr.msra.gmra.mxu1 %v849_v24  ;;  %v1695_v24 = vld [vmem:[%s2649_s6 + $0x258] sm:$0xff] }
 0x1d5   : > { %2006 = vmatpush3.msra.mxu1 %v1679_v38  ;;  %v1717_v38 = vld [vmem:[%s2649_s6 + $0x2e8] sm:$0xff] }
 0x1d6   : > { %2007 = vmatprep.subr.mxu1 %v1678_v39 }
 0x1d7   : > { %2008 = vmatpush3.msra.mxu1 %v1678_v39  ;;  %v1681_v39 = vld [vmem:[%s2650_s7 + $0x3] ss:$0 sm:$0xff] }
 0x1d8   : > { %2009 = vmatprep.subr.mxu1 %v1677_v40 }
 0x1d9   : > { %2010 = vmatpush3.msra.mxu1 %v1677_v40 }
 0x1da   : > { %2011 = vmatprep.subr.mxu1 %v1676_v56 }
 0x1db   : > { %2012 = vmatpush3.msra.mxu1 %v1676_v56  ;;  %v1714_v56 = vld [vmem:[%s2649_s6 + $0x2d0] sm:$0xff] }
 0x1dc   : > { %2013 = vmatprep.subr.mxu1 %v1675_v57 }
 0x1dd   : > { %2014 = vmatpush3.msra.mxu1 %v1675_v57  ;;  %v1713_v57 = vld [vmem:[%s2649_s6 + $0x2c8] sm:$0xff] }
 0x1de   : > { %2015 = vmatprep.subr.mxu1 %v1674_v58 }
 0x1df   : > { %2016 = vmatpush3.msra.mxu1 %v1674_v58  ;;  %v1712_v58 = vld [vmem:[%s2649_s6 + $0x2c0] sm:$0xff] }
 0x1e0   : > { %2017 = vmatprep.subr.mxu1 %v1673_v59 }
 0x1e1   : > { %2018 = vmatpush3.msra.mxu1 %v1673_v59  ;;  %v1711_v59 = vld [vmem:[%s2649_s6 + $0x2b8] sm:$0xff] }
 0x1e2   : > { %2019 = vmatprep.subr.mxu1 %v1672_v60 }
 0x1e3   : > { %2020 = vmatpush3.msra.mxu1 %v1672_v60  ;;  %v1710_v60 = vld [vmem:[%s2649_s6 + $0x2b0] sm:$0xff] }
 0x1e4   : > { %2021 = vmatprep.subr.mxu1 %v1671_v61 }
 0x1e5   : > { %2022 = vmatpush3.msra.mxu1 %v1671_v61  ;;  %v1709_v61 = vld [vmem:[%s2649_s6 + $0x2a8] sm:$0xff] }
 0x1e6   : > { %2023 = vmatprep.subr.mxu1 %v1670_v62 }
 0x1e7   : > { %2024 = vmatpush3.msra.mxu1 %v1670_v62  ;;  %v1708_v62 = vld [vmem:[%s2649_s6 + $0x2a0] sm:$0xff] }
 0x1e8   : > { %2025 = vmatprep.subr.mxu1 %v1669_v63 }
 0x1e9   : > { %2026 = vmatpush3.msra.mxu1 %v1669_v63  ;;  %v1707_v63 = vld [vmem:[%s2649_s6 + $0x298] sm:$0xff] }
 0x1ea   : > { %2027 = vmatprep.subr.mxu1 %v1668_v0 }
 0x1eb   : > { %2028 = vmatpush3.msra.mxu1 %v1668_v0  ;;  %v1706_v0 = vld [vmem:[%s2649_s6 + $0x290] sm:$0xff] }
 0x1ec   : > { %2029 = vmatprep.subr.mxu1 %v1667_v1 }
 0x1ed   : > { %2030 = vmatpush3.msra.mxu1 %v1667_v1  ;;  %v1705_v1 = vld [vmem:[%s2649_s6 + $0x288] sm:$0xff] }
 0x1ee   : > { %2031 = vmatprep.subr.mxu1 %v1666_v2 }
 0x1ef   : > { %2032 = vmatpush3.msra.mxu1 %v1666_v2  ;;  %v1704_v2 = vld [vmem:[%s2649_s6 + $0x280] sm:$0xff] }
 0x1f0   : > { %2033 = vmatprep.subr.mxu1 %v1665_v3 }
 0x1f1   : > { %2034 = vmatpush3.msra.mxu1 %v1665_v3  ;;  %v1737_v3 = vld [vmem:[%s2649_s6 + $0x378] sm:$0xff] }
 0x1f2   : > { %2035 = vmatprep.subr.mxu1 %v1664_v4 }
 0x1f3   : > { %2036 = vmatpush3.msra.mxu1 %v1664_v4  ;;  %v1736_v4 = vld [vmem:[%s2649_s6 + $0x370] sm:$0xff] }
 0x1f4   : > { %2075 = vmatprep.subr.mxu1 %v1719_v36 }
 0x294   : > { %v1969_v42 = vpop.f32.mrf.mxu1 }
 0x295   : > { %v947_v43 = vadd.f32 %v1969_v42, %v1641_v41 }
 0x296   : > { %v941_v44 = vpop.f32.mrf.mxu1 }
 0x297   : > { %v953_v45 = vmin.f32 %v947_v43, 0.0  ;;  %v942_v46 = vadd.f32 %v1641_v41, %v941_v44  ;;  %vm951_vm6 = vcmp.gt.f32.partialorder %v947_v43, 0.0 }
 0x299   : > { %v956_v47 = vmul.f32 1.442695, %v953_v45  ;;  %v952_v48 = vmin.f32 %v942_v46, 0.0  ;;  %vm950_vm5 = vcmp.gt.f32.partialorder %v942_v46, 0.0 }
 0x29b   : > { %2161 = vpow2.f32 %v956_v47  ;;  %v954_v49 = vmul.f32 1.442695, %v952_v48 }
 0x29d   : > { %2163 = vpow2.f32 %v954_v49 }
 0x2a8   : > { %v2162_v50 = vpop.eup %2161 }
 0x2a9   : > { %v1643_v52 = vadd.f32 -1.0, %v2162_v50 }
 0x2aa   : > { %v2164_v51 = vpop.eup %2163 }
 0x2ab   : > { %v1642_v53 = vadd.f32 -1.0, %v2164_v51  ;;  %v961_v55 = vsel %vm951_vm6, %v947_v43, %v1643_v52 }
 0x2ad   : > { %v960_v54 = vsel %vm950_vm5, %v942_v46, %v1642_v53 }
 0x2ae   : > { %2002 = vmatprep.mubr.f32.mxu0 %v960_v54  ;;  %v1716_v54 = vld [vmem:[%s2649_s6 + $0x2e0] sm:$0xff] }
 0x2af   : > { %2003 = vmatmul.mubr.f32.vlgmr.msra.gmra.mxu0 %v961_v55  ;;  %v1715_v55 = vld [vmem:[%s2649_s6 + $0x2d8] sm:$0xff] }
 0x2b0   : > { %2041 = vmatpush3.msra.mxu0 %v1699_v5  ;;  %v1735_v5 = vld [vmem:[%s2649_s6 + $0x368] sm:$0xff] }
 0x2b1   : > { %2042 = vmatprep.subr.mxu0 %v1698_v6 }
 0x2b2   : > { %2043 = vmatpush3.msra.mxu0 %v1698_v6  ;;  %v1734_v6 = vld [vmem:[%s2649_s6 + $0x360] sm:$0xff] }
 0x2b3   : > { %2044 = vmatprep.subr.mxu0 %v1697_v7 }
 0x2b4   : > { %2045 = vmatpush3.msra.mxu0 %v1697_v7  ;;  %v1733_v7 = vld [vmem:[%s2649_s6 + $0x358] sm:$0xff] }
 0x2b5   : > { %2046 = vmatprep.subr.mxu0 %v1696_v23 }
 0x2b6   : > { %2047 = vmatpush3.msra.mxu0 %v1696_v23 }
 0x2b7   : > { %2048 = vmatprep.subr.mxu0 %v1695_v24 }
 0x2b8   : > { %2049 = vmatpush3.msra.mxu0 %v1695_v24 }
 0x2b9   : > { %2050 = vmatprep.subr.mxu0 %v1694_v25 }
 0x2ba   : > { %2051 = vmatpush3.msra.mxu0 %v1694_v25 }
 0x2bb   : > { %2052 = vmatprep.subr.mxu0 %v1693_v26 }
 0x2bc   : > { %2053 = vmatpush3.msra.mxu0 %v1693_v26 }
 0x2bd   : > { %2054 = vmatprep.subr.mxu0 %v1692_v27 }
 0x2be   : > { %2055 = vmatpush3.msra.mxu0 %v1692_v27 }
 0x2bf   : > { %2056 = vmatprep.subr.mxu0 %v1691_v28 }
 0x2c0   : > { %2057 = vmatpush3.msra.mxu0 %v1691_v28 }
 0x2c1   : > { %2058 = vmatprep.subr.mxu0 %v1690_v29 }
 0x2c2   : > { %2059 = vmatpush3.msra.mxu0 %v1690_v29 }
 0x2c3   : > { %2060 = vmatprep.subr.mxu0 %v1689_v30 }
 0x2c4   : > { %2061 = vmatpush3.msra.mxu0 %v1689_v30 }
 0x2c5   : > { %2062 = vmatprep.subr.mxu0 %v1688_v31 }
 0x2c6   : > { %2063 = vmatpush3.msra.mxu0 %v1688_v31  ;;  %v1724_v31 = vld [vmem:[%s2649_s6 + $0x310] sm:$0xff] }
 0x2c7   : > { %2064 = vmatprep.subr.mxu0 %v1687_v32 }
 0x2c8   : > { %2065 = vmatpush3.msra.mxu0 %v1687_v32  ;;  %v1723_v32 = vld [vmem:[%s2649_s6 + $0x308] sm:$0xff] }
 0x2c9   : > { %2066 = vmatprep.subr.mxu0 %v1686_v33 }
 0x2ca   : > { %2067 = vmatpush3.msra.mxu0 %v1686_v33  ;;  %v1722_v33 = vld [vmem:[%s2649_s6 + $0x300] sm:$0xff] }
 0x2cb   : > { %2068 = vmatprep.subr.mxu0 %v1685_v34 }
 0x2cc   : > { %2069 = vmatpush3.msra.mxu0 %v1685_v34 }
 0x2cd   : > { %2070 = vmatprep.subr.mxu0 %v1684_v35 }
 0x2ce   : > { %2071 = vmatpush3.msra.mxu0 %v1684_v35  ;;  %v1721_v35 = vld [vmem:[%s2650_s7 + $0x5] ss:$0 sm:$0xff] }
 0x2cf   : > { %2110 = vmatprep.subr.mxu0 %v1737_v3 }
 0x36f   : > { %v2004_v9 = vpop.f32.mrf.mxu0 }
 0x370   : > { %v1059_v10 = vadd.f32 %v2004_v9, %v1661_v8  ;;  %v1731_v9 = vld [vmem:[%s2649_s6 + $0x348] sm:$0xff] }
 0x371   : > { %v1053_v11 = vpop.f32.mrf.mxu0 }
 0x372   : > { %v1065_v12 = vmin.f32 %v1059_v10, 0.0  ;;  %v1054_v13 = vadd.f32 %v1661_v8, %v1053_v11  ;;  %vm1063_vm8 = vcmp.gt.f32.partialorder %v1059_v10, 0.0  ;;  %v1732_v8 = vld [vmem:[%s2649_s6 + $0x350] sm:$0xff]  ;;  %v1729_v11 = vld [vmem:[%s2649_s6 + $0x338] sm:$0xff] }
 0x374   : > { %v1068_v14 = vmul.f32 1.442695, %v1065_v12  ;;  %v1064_v15 = vmin.f32 %v1054_v13, 0.0  ;;  %vm1062_vm7 = vcmp.gt.f32.partialorder %v1054_v13, 0.0  ;;  %v1728_v12 = vld [vmem:[%s2649_s6 + $0x330] sm:$0xff] }
 0x376   : > { %2165 = vpow2.f32 %v1068_v14  ;;  %v1066_v16 = vmul.f32 1.442695, %v1064_v15  ;;  %v1726_v14 = vld [vmem:[%s2649_s6 + $0x320] sm:$0xff]  ;;  %v1725_v15 = vld [vmem:[%s2649_s6 + $0x318] sm:$0xff] }
 0x378   : > { %2167 = vpow2.f32 %v1066_v16  ;;  %v1701_v16 = vld [vmem:[%s2650_s7 + $0x4] ss:$0 sm:$0xff] }
 0x383   : > { %v2166_v17 = vpop.eup %2165 }
 0x384   : > { %v1663_v19 = vadd.f32 -1.0, %v2166_v17 }
 0x385   : > { %v2168_v18 = vpop.eup %2167 }
 0x386   : > { %v1662_v20 = vadd.f32 -1.0, %v2168_v18  ;;  %v1073_v22 = vsel %vm1063_vm8, %v1059_v10, %v1663_v19  ;;  %v1730_v10 = vld [vmem:[%s2649_s6 + $0x340] sm:$0xff] }
 0x388   : > { %v1072_v21 = vsel %vm1062_vm7, %v1054_v13, %v1662_v20  ;;  %v1727_v13 = vld [vmem:[%s2649_s6 + $0x328] sm:$0xff] }
 0x389   : > { %2037 = vmatprep.mubr.f32.mxu1 %v1072_v21 }
 0x38a   : > { %2038 = vmatmul.mubr.f32.vlgmr.msra.gmra.mxu1 %v1073_v22 }
 0x38b   : > { %2076 = vmatpush3.msra.mxu1 %v1719_v36 }
 0x38c   : > { %2077 = vmatprep.subr.mxu1 %v1718_v37 }
 0x38d   : > { %2078 = vmatpush3.msra.mxu1 %v1718_v37 }
 0x38e   : > { %2079 = vmatprep.subr.mxu1 %v1717_v38 }
 0x38f   : > { %2080 = vmatpush3.msra.mxu1 %v1717_v38 }
 0x390   : > { %2081 = vmatprep.subr.mxu1 %v1716_v54 }
 0x391   : > { %2082 = vmatpush3.msra.mxu1 %v1716_v54 }
 0x392   : > { %2083 = vmatprep.subr.mxu1 %v1715_v55 }
 0x393   : > { %2084 = vmatpush3.msra.mxu1 %v1715_v55 }
 0x394   : > { %2085 = vmatprep.subr.mxu1 %v1714_v56 }
 0x395   : > { %2086 = vmatpush3.msra.mxu1 %v1714_v56 }
 0x396   : > { %2087 = vmatprep.subr.mxu1 %v1713_v57 }
 0x397   : > { %2088 = vmatpush3.msra.mxu1 %v1713_v57 }
 0x398   : > { %2089 = vmatprep.subr.mxu1 %v1712_v58 }
 0x399   : > { %2090 = vmatpush3.msra.mxu1 %v1712_v58 }
 0x39a   : > { %2091 = vmatprep.subr.mxu1 %v1711_v59 }
 0x39b   : > { %2092 = vmatpush3.msra.mxu1 %v1711_v59 }
 0x39c   : > { %2093 = vmatprep.subr.mxu1 %v1710_v60 }
 0x39d   : > { %2094 = vmatpush3.msra.mxu1 %v1710_v60 }
 0x39e   : > { %2095 = vmatprep.subr.mxu1 %v1709_v61 }
 0x39f   : > { %2096 = vmatpush3.msra.mxu1 %v1709_v61 }
 0x3a0   : > { %2097 = vmatprep.subr.mxu1 %v1708_v62 }
 0x3a1   : > { %2098 = vmatpush3.msra.mxu1 %v1708_v62 }
 0x3a2   : > { %2099 = vmatprep.subr.mxu1 %v1707_v63 }
 0x3a3   : > { %2100 = vmatpush3.msra.mxu1 %v1707_v63 }
 0x3a4   : > { %2101 = vmatprep.subr.mxu1 %v1706_v0 }
 0x3a5   : > { %2102 = vmatpush3.msra.mxu1 %v1706_v0 }
 0x3a6   : > { %2103 = vmatprep.subr.mxu1 %v1705_v1 }
 0x3a7   : > { %2104 = vmatpush3.msra.mxu1 %v1705_v1 }
 0x3a8   : > { %2105 = vmatprep.subr.mxu1 %v1704_v2 }
 0x3a9   : > { %2106 = vmatpush3.msra.mxu1 %v1704_v2 }
 0x44a   : > { %v2039_v40 = vpop.f32.mrf.mxu1 }
 0x44b   : > { %v1171_v41 = vadd.f32 %v2039_v40, %v1681_v39  ;;  %v1739_v40 = vld [vmem:[%s2650_s7 + $0x6] ss:$0 sm:$0xff] }
 0x44c   : > { %v1165_v42 = vpop.f32.mrf.mxu1 }
 0x44d   : > { %v1177_v43 = vmin.f32 %v1171_v41, 0.0  ;;  %v1166_v44 = vadd.f32 %v1681_v39, %v1165_v42  ;;  %vm1175_vm10 = vcmp.gt.f32.partialorder %v1171_v41, 0.0 }
 0x44f   : > { %v1180_v45 = vmul.f32 1.442695, %v1177_v43  ;;  %v1176_v46 = vmin.f32 %v1166_v44, 0.0  ;;  %vm1174_vm9 = vcmp.gt.f32.partialorder %v1166_v44, 0.0 }
 0x451   : > { %2169 = vpow2.f32 %v1180_v45  ;;  %v1178_v47 = vmul.f32 1.442695, %v1176_v46 }
 0x453   : > { %2171 = vpow2.f32 %v1178_v47 }
 0x45e   : > { %v2170_v48 = vpop.eup %2169 }
 0x45f   : > { %v1683_v50 = vadd.f32 -1.0, %v2170_v48 }
 0x460   : > { %v2172_v49 = vpop.eup %2171 }
 0x461   : > { %v1682_v51 = vadd.f32 -1.0, %v2172_v49  ;;  %v1185_v53 = vsel %vm1175_vm10, %v1171_v41, %v1683_v50 }
 0x463   : > { %v1184_v52 = vsel %vm1174_vm9, %v1166_v44, %v1682_v51 }
 0x464   : > { %2072 = vmatprep.mubr.f32.mxu0 %v1184_v52 }
 0x465   : > { %2073 = vmatmul.mubr.f32.vlgmr.msra.gmra.mxu0 %v1185_v53 }
 0x466   : > { %2111 = vmatpush3.msra.mxu0 %v1737_v3 }
 0x467   : > { %2112 = vmatprep.subr.mxu0 %v1736_v4 }
 0x468   : > { %2113 = vmatpush3.msra.mxu0 %v1736_v4 }
 0x469   : > { %2114 = vmatprep.subr.mxu0 %v1735_v5 }
 0x46a   : > { %2115 = vmatpush3.msra.mxu0 %v1735_v5 }
 0x46b   : > { %2116 = vmatprep.subr.mxu0 %v1734_v6 }
 0x46c   : > { %2117 = vmatpush3.msra.mxu0 %v1734_v6 }
 0x46d   : > { %2118 = vmatprep.subr.mxu0 %v1733_v7 }
 0x46e   : > { %2119 = vmatpush3.msra.mxu0 %v1733_v7 }
 0x46f   : > { %2120 = vmatprep.subr.mxu0 %v1732_v8 }
 0x470   : > { %2121 = vmatpush3.msra.mxu0 %v1732_v8 }
 0x471   : > { %2122 = vmatprep.subr.mxu0 %v1731_v9 }
 0x472   : > { %2123 = vmatpush3.msra.mxu0 %v1731_v9 }
 0x473   : > { %2124 = vmatprep.subr.mxu0 %v1730_v10 }
 0x474   : > { %2125 = vmatpush3.msra.mxu0 %v1730_v10 }
 0x475   : > { %2126 = vmatprep.subr.mxu0 %v1729_v11 }
 0x476   : > { %2127 = vmatpush3.msra.mxu0 %v1729_v11 }
 0x477   : > { %2128 = vmatprep.subr.mxu0 %v1728_v12 }
 0x478   : > { %2129 = vmatpush3.msra.mxu0 %v1728_v12 }
 0x479   : > { %2130 = vmatprep.subr.mxu0 %v1727_v13 }
 0x47a   : > { %2131 = vmatpush3.msra.mxu0 %v1727_v13 }
 0x47b   : > { %2132 = vmatprep.subr.mxu0 %v1726_v14 }
 0x47c   : > { %2133 = vmatpush3.msra.mxu0 %v1726_v14 }
 0x47d   : > { %2134 = vmatprep.subr.mxu0 %v1725_v15 }
 0x47e   : > { %2135 = vmatpush3.msra.mxu0 %v1725_v15 }
 0x47f   : > { %2136 = vmatprep.subr.mxu0 %v1724_v31 }
 0x480   : > { %2137 = vmatpush3.msra.mxu0 %v1724_v31 }
 0x481   : > { %2138 = vmatprep.subr.mxu0 %v1723_v32 }
 0x482   : > { %2139 = vmatpush3.msra.mxu0 %v1723_v32 }
 0x483   : > { %2140 = vmatprep.subr.mxu0 %v1722_v33 }
 0x484   : > { %2141 = vmatpush3.msra.mxu0 %v1722_v33 }
 0x525   : > { %v2074_v17 = vpop.f32.mrf.mxu0 }
 0x526   : > { %v1283_v18 = vadd.f32 %v2074_v17, %v1701_v16 }
 0x527   : > { %v1277_v19 = vpop.f32.mrf.mxu0 }
 0x528   : > { %v1289_v20 = vmin.f32 %v1283_v18, 0.0  ;;  %v1278_v21 = vadd.f32 %v1701_v16, %v1277_v19  ;;  %vm1287_vm12 = vcmp.gt.f32.partialorder %v1283_v18, 0.0 }
 0x52a   : > { %v1292_v22 = vmul.f32 1.442695, %v1289_v20  ;;  %v1288_v23 = vmin.f32 %v1278_v21, 0.0  ;;  %vm1286_vm11 = vcmp.gt.f32.partialorder %v1278_v21, 0.0 }
 0x52c   : > { %2173 = vpow2.f32 %v1292_v22  ;;  %v1290_v24 = vmul.f32 1.442695, %v1288_v23 }
 0x52e   : > { %2175 = vpow2.f32 %v1290_v24 }
 0x539   : > { %v2174_v25 = vpop.eup %2173 }
 0x53a   : > { %v1703_v27 = vadd.f32 -1.0, %v2174_v25 }
 0x53b   : > { %v2176_v26 = vpop.eup %2175 }
 0x53c   : > { %v1702_v28 = vadd.f32 -1.0, %v2176_v26  ;;  %v1297_v30 = vsel %vm1287_vm12, %v1283_v18, %v1703_v27 }
 0x53e   : > { %v1296_v29 = vsel %vm1286_vm11, %v1278_v21, %v1702_v28 }
 0x53f   : > { %2107 = vmatprep.mubr.f32.mxu1 %v1296_v29 }
 0x540   : > { %2108 = vmatmul.mubr.f32.vlgmr.msra.gmra.mxu1 %v1297_v30 }
 0x600   : > { %v2109_v34 = vpop.f32.mrf.mxu1 }
 0x601   : > { %v1395_v38 = vadd.f32 %v2109_v34, %v1721_v35 }
 0x602   : > { %v1389_v36 = vpop.f32.mrf.mxu1 }
 0x603   : > { %v1390_v37 = vadd.f32 %v1721_v35, %v1389_v36 }
 0x605   : > { %2142 = vmatprep.mubr.f32.mxu0 %v1390_v37 }
 0x606   : > { %2143 = vmatmul.mubr.f32.vlgmr.msra.gmra.mxu0 %v1395_v38 }
 0x6c6   : > { %v2144_v39 = vpop.f32.mrf.mxu0 }
 0x6c7   : > { %v1495_v43 = vadd.f32 %v2144_v39, %v1739_v40 }
 0x6c8   : > { %v1489_v41 = vpop.f32.mrf.mxu0 }
 0x6c9   : > { %v1490_v42 = vadd.f32 %v1739_v40, %v1489_v41  ;;  %1499 = vst [vmem:[%s373_s10 + $0x8] sm:$0xff] %v1495_v43 }
 0x6cb   : > { %1498 = vst [vmem:[%s373_s10] sm:$0xff] %v1490_v42 }
 0x6cc PF: > { %s18_s27 = sadd.s32 1, %s2183_s27  }
 0x6cd   : > { %p15_p4 = scmp.ge.s32.totalorder %s18_s27, 4  }
 0x6cf   :  { %17 = sbr.rel (!%p15_p4) target bundleno = 1 (0x1), region = 106 }

// kernel: gravnet_model_forward.26
= control target key start
LH: loop header
LB: loop body
LE: loop exit
PB: predicated region body
PF: predicated region fallthrough
CT: control target
= control target key end

     0   :  { %s2093_s24 = smov 0   ;;  %s2427_s0 = inlined_call_operand.<no memory space> [shape: s32[1], index: 0, kind: input, shape index: {}]   ;;  %s2428_s1 = inlined_call_operand.vmem [shape: f32[32,8], index: 1, kind: input, shape index: {}]   ;;  %s2429_s2 = inlined_call_operand.vmem [shape: f32[32,8], index: 2, kind: input, shape index: {}]   ;;  %s2430_s3 = inlined_call_operand.vmem [shape: f32[8,128], index: 3, kind: input, shape index: {}]   ;;  %s2431_s4 = inlined_call_operand.vmem [shape: bf16[128,16], index: 4, kind: input, shape index: {}]   ;;  %s2432_s5 = inlined_call_operand.vmem [shape: f32[16,128], index: 5, kind: input, shape index: {}]   ;;  %s2433_s6 = inlined_call_operand.vmem [shape: s32[32,1], index: 6, kind: input, shape index: {}]   ;;  %s2434_s7 = inlined_call_operand.vmem [shape: s32[1,128], index: 7, kind: input, shape index: {}]   ;;  %s2435_s8 = inlined_call_operand.vmem [shape: f32[8,32], index: 8, kind: input, shape index: {}]   ;;  %s2436_s9 = inlined_call_operand.vmem [shape: f32[16,32], index: 9, kind: input, shape index: {}]   ;;  %s2437_s10 = inlined_call_operand.vmem [shape: f32[16,32], index: 10, kind: input, shape index: {}]   ;;  %s2438_s11 = inlined_call_operand.vmem [shape: f32[1,32], index: 11, kind: input, shape index: {}]   ;;  %s2439_s12 = inlined_call_operand.vmem [shape: f32[32,8], index: 12, kind: input, shape index: {}]   ;;  %s2440_s13 = inlined_call_operand.vmem [shape: f32[8,8], index: 13, kind: input, shape index: {}]   ;;  %s2441_s14 = inlined_call_operand.vmem [shape: f32[1,8], index: 14, kind: input, shape index: {}]   ;;  %s2442_s15 = inlined_call_operand.vmem [shape: f32[8,8], index: 15, kind: input, shape index: {}]   ;;  %s2443_s16 = inlined_call_operand.vmem [shape: f32[1,8], index: 16, kind: input, shape index: {}]   ;;  %s2444_s17 = inlined_call_operand.vmem [shape: f32[32,8], index: 17, kind: output, shape index: {}]  }
   0x1   :  { %2445 = sst [smem:[#allocation5_spill]] %s2428_s1 }
   0x2 LB: > { %s1741_s25 = sadd.s32 4294967295, %s1984_s24   ;;  %p1745_p0 = scmp.ge.s32.totalorder %s1984_s24, 1  ;;  %s1984_s24 = sphi %s2093_s24, %s28_s24  }
   0x3   : > { %p487_p1 = scmp.lt.s32.totalorder %s1984_s24, 3 }
   0x5   : > { %p488_p2 = pnand %p1745_p0, %p487_p1 }
   0x6   : > { %s1746_s28 = sshll.u32 (!%p488_p2), %s1741_s25, 1  ;;  %s2446_s18 = sld [smem:[#allocation5_spill]] (!%p488_p2) }
   0x7   : > { %491 = sbr.rel (%p488_p2) target bundleno = 1370 (0x55a), region = 84  ;;  %p548_p3 = scmp.lt.s32.totalorder (!%p488_p2), %s1746_s28, 3 }
   0x8   : > { %s2142_s0 = smov (!%p488_p2), 0  }
   0xc   : > { %v574_v0 = vld [vmem:[%s2430_s3] sm:$0xff]  ;;  %v1998_v1 = vmov 0   ;;  %s2450_s28 = smov (!%p548_p3, %s1746_s28), 3  ;;  %vm580_vm0 = vcmask 64512   ;;  %v711_v12 = vlaneseq  ;;  %v1986_v41 = vmov 0.0  }
   0xd   : > { %1838 = vmatprep.subr.mxu0 %v574_v0  ;;  %1940 = vset.pattern.permute.xlu1 %v1998_v1  ;;  %s1747_s29 = sshll.u32 %s2450_s28, 3  ;;  %v587_v15 = vmul.f32 %v574_v0, %v574_v0  ;;  %v1756_v25 = vld [vmem:[%s2434_s7] ss:$0 sm:$0xff]  ;;  %v1990_v42 = vmov 0.0  }
   0xe   : > { %1839 = vmatpush3.msra.mxu0 %v574_v0  ;;  %1941 = vset.pattern.permute.xlu0 %v1998_v1  ;;  %s2107_s19 = scalar_lea.vmem %s2446_s18, %s1747_s29  ;;  %s557_s21 = scalar_lea.vmem %s2429_s2, %s1747_s29  ;;  %v2134_v13 = vand.u32 127, %v711_v12 }
   0xf   : > { %s2115_s25 = scalar_lea.vmem %s2444_s17, %s1747_s29  ;;  %v2117_v2 = vld [vmem:[%s557_s21] sm:$0xff]  ;;  %v2119_v3 = vld [vmem:[%s557_s21 + $0x8] sm:$0xff]  ;;  %s563_s28 = scalar_lea.vmem %s2433_s6, %s1747_s29  ;;  %v588_v16 = vrot.slane %v587_v15, 4 }
  0x10   : > { %v578_v4 = vmul.f32 %v2117_v2, %v2117_v2  ;;  %1840 = vmatprep.mubr.msk.f32.mxu0 %vm580_vm0, %v2117_v2  ;;  %v579_v5 = vmul.f32 %v2119_v3, %v2119_v3  ;;  %v575_v6 = vld [vmem:[%s563_s28] sm:$0xff]  ;;  %v576_v8 = vld [vmem:[%s563_s28 + $0x8] sm:$0xff]  ;;  %v2137_v14 = vcvt.s32.f32 %v2134_v13 }
  0x11   : > { %1841 = vmatmul.mubr.msk.f32.vlgmr.msra.gmra.mxu0 %vm580_vm0, %v2119_v3  ;;  %684 = vperm.xlu1 %1940, %v575_v6   ;;  %vm696_vm1 = vcmp.ge.s32.totalorder %v576_v8, 0  ;;  %vm695_vm2 = vcmp.ge.s32.totalorder %v575_v6, 0  ;;  %v589_v17 = vadd.f32 %v588_v16, %v587_v15 }
  0x12   : > { %v581_v7 = vsel %vm580_vm0, %v578_v4, 0.0  ;;  %v584_v9 = vsel %vm580_vm0, %v579_v5, 0.0  ;;  %v698_v10 = vsel %vm696_vm1, 1, %v1998_v1  ;;  %v697_v11 = vsel %vm695_vm2, 1, %v1998_v1 }
  0x13   : > { %582 = vadd.xlane.f32.xlu0 %v581_v7  ;;  %v590_v18 = vrot.slane %v589_v17, 2 }
  0x15   : > { %687 = vperm.xlu1 %1940, %v576_v8   ;;  %v591_v21 = vadd.f32 %v590_v18, %v589_v17 }
  0x17   : > { %585 = vadd.xlane.f32.xlu0 %v584_v9  ;;  %v592_v23 = vrot.slane %v591_v21, 1 }
  0x19   : > { %703 = vperm.xlu1 %1940, %v698_v10   ;;  %v593_v26 = vadd.f32 %v592_v23, %v591_v21 }
  0x2d   : > { %700 = vperm.xlu0 %1941, %v697_v11  }
  0x8c   : > { %v685_v19 = vpop.permute.xlu1 %684 }
  0x8d   : > { %vm693_vm5 = vcmp.eq.s32.totalorder %v685_v19, %v1756_v25 }
  0x90   : > { %v688_v22 = vpop.permute.xlu1 %687 }
  0x91   : > { %vm694_vm3 = vcmp.eq.s32.totalorder %v688_v22, %v1756_v25 }
  0x94   : > { %v704_v27 = vpop.permute.xlu1 %703 }
  0x95   : > { %vm706_vm4 = vcmp.eq.s32.totalorder %v704_v27, 1 }
  0x96   : > { %vm708_vm7 = vmand %vm694_vm3, %vm706_vm4 }
  0x9c   : > { %v583_v20 = vpop.xlane.xlu0 %582 }
  0x9d   : > { %v675_v33 = vadd.f32 %v593_v26, %v583_v20 }
  0xa0   : > { %v586_v24 = vpop.xlane.xlu0 %585 }
  0xa1   : > { %v676_v29 = vadd.f32 %v593_v26, %v586_v24 }
  0xa8   : > { %v701_v31 = vpop.permute.xlu0 %700 }
  0xa9   : > { %vm705_vm6 = vcmp.eq.s32.totalorder %v701_v31, 1 }
  0xaa   : > { %vm707_vm8 = vmand %vm693_vm5, %vm705_vm6 }
  0xd1   : > { %v1842_v28 = vpop.f32.mrf.mxu0 }
  0xd2   : > { %v678_v30 = vmul.f32 2.0, %v1842_v28 }
  0xd3   : > { %v666_v32 = vpop.f32.mrf.mxu0 }
  0xd4   : > { %v680_v34 = vsub.f32 %v676_v29, %v678_v30  ;;  %v677_v35 = vmul.f32 2.0, %v666_v32 }
  0xd6   : > { %v682_v36 = vmax.f32 %v680_v34, 0.0  ;;  %v679_v37 = vsub.f32 %v675_v33, %v677_v35 }
  0xd8   : > { %v710_v38 = vsel %vm708_vm7, %v682_v36, 1e+30  ;;  %v681_v39 = vmax.f32 %v679_v37, 0.0 }
  0xd9   : > { %715 = vst [vmem:[#allocation2 + $0x8] sm:$0xff] %v710_v38 }
  0xda   : > { %v709_v40 = vsel %vm707_vm8, %v681_v39, 1e+30 }
  0xdb   : > { %714 = vst [vmem:[#allocation2] sm:$0xff] %v709_v40 }
  0xdc LB: >> { %v1999_v47 = vmov 0.0   ;;  %s721_s0 = sadd.s32 1, %s1996_s0   ;;  %s1996_s0 = sphi %s2142_s0, %s721_s0   ;;  %v1992_v42 = vphi %v1990_v42, %v1991_v42   ;;  %v1988_v41 = vphi %v1986_v41, %v1987_v41  }
  0xdd   : >> { %p718_p4 = scmp.ge.s32.totalorder %s721_s0, 16  }
  0xde   : > { %v1942_v58 = vld [vmem:[%s2431_s4 + $0x38] sm:$0xff] (%p718_p4)   ;;  %v2000_v59 = vmov (%p718_p4), 0.0   ;;  %v1943_v60 = vld [vmem:[%s2431_s4 + $0x30] sm:$0xff] (%p718_p4)   ;;  %v760_v61 = vmul.f32 (%p718_p4), -10.0, %v709_v40  ;;  %vm2001_vm2 = vmmov (%p718_p4), 0   ;;  %v761_v62 = vmul.f32 (%p718_p4), -10.0, %v710_v38 }
  0xdf   : > { %1843 = vmatprep.subr.bf16.mxu1 (%p718_p4), %v2000_v59  ;;  %1859 = vmatprep.mubr.msk.bf16.mxu1 (%p718_p4), %vm2001_vm2, %v2000_v59  ;;  %v1944_v63 = vld [vmem:[%s2431_s4 + $0x28] sm:$0xff] (%p718_p4)   ;;  %v1945_v4 = vld [vmem:[%s2431_s4 + $0x20] sm:$0xff] (%p718_p4)   ;;  %v1946_v5 = vld [vmem:[%s2431_s4 + $0x18] sm:$0xff] (%p718_p4)   ;;  %vm901_vm8 = vcmp.eq.s32.totalorder (%p718_p4), %v2134_v13, 0  ;;  %vm1107_vm2 = vcmask (%p718_p4), 130048  }
  0xe0   : >> { %v725_v44 = vld [vmem:[#allocation2 + $0x8] sm:$0xff]  ;;  %1844 = vmatpush3.bf16.msra.mxu1 (%p718_p4), %v1942_v58  ;;  %v762_v0 = vmul.f32 (%p718_p4), 1.442695, %v760_v61  ;;  %v764_v1 = vmul.f32 (%p718_p4), 1.442695, %v761_v62  ;;  %v1948_v16 = vld [vmem:[%s2431_s4 + $0x8] sm:$0xff] (%p718_p4)  }
  0xe1   : > { %1845 = vmatprep.subr.bf16.mxu1 (%p718_p4), %v2000_v59  ;;  %v1947_v7 = vld [vmem:[%s2431_s4 + $0x10] sm:$0xff] (%p718_p4)   ;;  %v1770_v9 = vld [vmem:[%s2432_s5] ss:$0 sm:$0xff] (%p718_p4)  ;;  %v1771_v10 = vld [vmem:[%s2432_s5 + $0x1] ss:$0 sm:$0xff] (%p718_p4) }
  0xe2   : >> { %v724_v43 = vld [vmem:[#allocation2] sm:$0xff]  ;;  %1950 = vpow2.f32 (%p718_p4), %v762_v0  ;;  %v1772_v20 = vld [vmem:[%s2432_s5 + $0x2] ss:$0 sm:$0xff] (%p718_p4)  ;;  %v1773_v30 = vld [vmem:[%s2432_s5 + $0x3] ss:$0 sm:$0xff] (%p718_p4) }
  0xe3   : >> { %726 = vmin.xlane.f32.xlu0 %v724_v43  ;;  %1952 = vpow2.f32 (%p718_p4), %v764_v1  ;;  %v1949_v26 = vld [vmem:[%s2431_s4] sm:$0xff] (%p718_p4)   ;;  %v1779_v1 = vld [vmem:[%s2432_s5 + $0x9] ss:$0 sm:$0xff] (%p718_p4) }
  0xe4   : > { %1846 = vmatpush3.bf16.msra.mxu1 (%p718_p4), %v1943_v60  ;;  %v1774_v38 = vld [vmem:[%s2432_s5 + $0x4] ss:$0 sm:$0xff] (%p718_p4)  ;;  %v1778_v60 = vld [vmem:[%s2432_s5 + $0x8] ss:$0 sm:$0xff] (%p718_p4) }
  0xe5   : > { %1847 = vmatprep.subr.bf16.mxu1 (%p718_p4), %v2000_v59 }
  0xe7   : >> { %728 = vmin.xlane.f32.xlu0 %v725_v44 }
  0xe8   : > { %1848 = vmatpush3.bf16.msra.mxu1 (%p718_p4), %v1944_v63 }
  0xe9   : > { %1849 = vmatprep.subr.bf16.mxu1 (%p718_p4), %v2000_v59 }
  0xec   : > { %1850 = vmatpush3.bf16.msra.mxu1 (%p718_p4), %v1945_v4 }
  0xed   : > { %1851 = vmatprep.subr.bf16.mxu1 (%p718_p4), %v2000_v59 }
  0xef   : > { %v1951_v11 = vpop.eup (%p718_p4), %1950 }
  0xf0   : > { %1852 = vmatpush3.bf16.msra.mxu1 (%p718_p4), %v1946_v5  ;;  %v1953_v19 = vpop.eup (%p718_p4), %1952 }
  0xf1   : > { %1853 = vmatprep.subr.bf16.mxu1 (%p718_p4), %v2000_v59  ;;  %v1768_v33 = vpack.c.bf16 (%p718_p4), %v1953_v19, %v1951_v11 }
  0xf4   : > { %1854 = vmatpush3.bf16.msra.mxu1 (%p718_p4), %v1947_v7 }
  0xf5   : > { %1855 = vmatprep.subr.bf16.mxu1 (%p718_p4), %v2000_v59 }
  0xf8   : > { %1856 = vmatpush3.bf16.msra.mxu1 (%p718_p4), %v1948_v16  ;;  %v1781_v16 = vld [vmem:[%s2432_s5 + $0xb] ss:$0 sm:$0xff] (%p718_p4) }
  0xf9   : > { %1857 = vmatprep.subr.bf16.mxu1 (%p718_p4), %v2000_v59 }
  0xfc   : > { %1858 = vmatpush3.bf16.msra.mxu1 (%p718_p4), %v1949_v26 }
 0x16c   : >> { %v727_v45 = vpop.xlane.xlu0 %726 }
 0x16d   : >> { %vm730_vm9 = vcmp.lt.f32.partialorder %v727_v45, 5e+29  ;;  %vm732_vm10 = vcmp.le.f32.partialorder %v724_v43, %v727_v45 }
 0x16e   : >> { %v734_v46 = vsel %vm732_vm10, %v2137_v14, 128.0  ;;  %v1757_v48 = vsel %vm730_vm9, 1.0, %v1999_v47  ;;  %vm937_vm10 = vcmp.eq.s32.totalorder (%p718_p4), %v2134_v13, 2 }
 0x16f   : >> { %736 = vmin.xlane.f32.xlu1 %v734_v46  ;;  %v2149_v42 = vadd.f32 %v1992_v42, %v1757_v48   ;;  %v1776_v48 = vld [vmem:[%s2432_s5 + $0x6] ss:$0 sm:$0xff] (%p718_p4) }
 0x170   : >> { %v729_v50 = vpop.xlane.xlu0 %728 }
 0x171   : >> { %v2447_v49 = vmov %v2149_v42  ;;  %vm731_vm11 = vcmp.lt.f32.partialorder %v729_v50, 5e+29  ;;  %vm733_vm12 = vcmp.le.f32.partialorder %v725_v44, %v729_v50 }
 0x172   : >> { %v1758_v51 = vsel %vm731_vm11, 1.0, %v1999_v47  ;;  %v735_v52 = vsel %vm733_vm12, %v2137_v14, 128.0  ;;  %v1991_v42 = vmov %v2447_v49   ;;  %vm774_vm6 = vcmp.gt.f32.partialorder (%p718_p4), %v2447_v49, 0.0 }
 0x173   : >> { %v2152_v41 = vadd.f32 %v1988_v41, %v1758_v51   ;;  %738 = vmin.xlane.f32.xlu1 %v735_v52  ;;  %vm973_vm12 = vcmp.eq.s32.totalorder (%p718_p4), %v2134_v13, 4 }
 0x175   : >> { %v2448_v53 = vmov %v2152_v41 }
 0x176   : >> { %v1987_v41 = vmov %v2448_v53   ;;  %vm775_vm7 = vcmp.gt.f32.partialorder (%p718_p4), %v2448_v53, 0.0 }
 0x1f8   : >> { %v737_v54 = vpop.xlane.xlu1 %736 }
 0x1f9   : >> { %vm740_vm13 = vcmp.eq.f32.partialorder %v2137_v14, %v737_v54 }
 0x1fa   : >> { %vm746_vm14 = vmand %vm740_vm13, %vm730_vm9  ;;  %vm919_vm9 = vcmp.eq.s32.totalorder (%p718_p4), %v2134_v13, 1  ;;  %vm991_vm13 = vcmp.eq.s32.totalorder (%p718_p4), %v2134_v13, 5 }
 0x1fb   : >> { %v748_v55 = vsel %vm746_vm14, 2e+30, %v724_v43  ;;  %v1775_v43 = vld [vmem:[%s2432_s5 + $0x5] ss:$0 sm:$0xff] (%p718_p4)  ;;  %vm1009_vm14 = vcmp.eq.s32.totalorder (%p718_p4), %v2134_v13, 6 }
 0x1fc   : >> { %750 = vst [vmem:[#allocation2] sm:$0xff] %v748_v55  ;;  %v739_v56 = vpop.xlane.xlu1 %738  ;;  %720 = sbr.rel (!%p718_p4) target bundleno = 220 (0xdc), region = 127  ;;  %v1777_v55 = vld [vmem:[%s2432_s5 + $0x7] ss:$0 sm:$0xff] (%p718_p4) }
 0x1fd   : >> { %vm741_vm15 = vcmp.eq.f32.partialorder %v2137_v14, %v739_v56  ;;  %v2002_v14 = vmov (%p718_p4), -1e+30  }
 0x1fe   : >> { %vm747_vm1 = vmand %vm741_vm15, %vm731_vm11  ;;  %vm955_vm11 = vcmp.eq.s32.totalorder (%p718_p4), %v2134_v13, 3  ;;  %vm1027_vm15 = vcmp.eq.s32.totalorder (%p718_p4), %v2134_v13, 7 }
 0x1ff   : >> { %v749_v57 = vsel %vm747_vm1, 2e+30, %v725_v44  ;;  %vm1045_vm1 = vcmp.eq.s32.totalorder (%p718_p4), %v2134_v13, 8 }
 0x200   : >> { %751 = vst [vmem:[#allocation2 + $0x8] sm:$0xff] %v749_v57 }
 0x203   : > { %v756_v6 = vld [vmem:[#allocation2] sm:$0xff] }
 0x204   : > { %vm758_vm3 = vcmp.gt.f32.partialorder %v756_v6, 1.5e+30 }
 0x205   : > { %v2187_v12 = vsel %vm758_vm3, %v1951_v11, 0.0  ;;  %v2190_v15 = vsel %vm758_vm3, 0.0, %v2002_v14 }
 0x206   : > { %v891_v17 = vmul.f32 %v1770_v9, %v2187_v12  ;;  %v909_v18 = vmul.f32 %v1771_v10, %v2187_v12  ;;  %v927_v28 = vmul.f32 %v1772_v20, %v2187_v12  ;;  %v945_v34 = vmul.f32 %v1773_v30, %v2187_v12 }
 0x207   : > { %v757_v8 = vld [vmem:[#allocation2 + $0x8] sm:$0xff]  ;;  %v963_v39 = vmul.f32 %v1774_v38, %v2187_v12  ;;  %v981_v44 = vmul.f32 %v1775_v43, %v2187_v12  ;;  %v999_v50 = vmul.f32 %v1776_v48, %v2187_v12  ;;  %v1017_v56 = vmul.f32 %v1777_v55, %v2187_v12 }
 0x208   : > { %vm759_vm4 = vcmp.gt.f32.partialorder %v757_v8, 1.5e+30  ;;  %v893_v21 = vadd.f32 %v891_v17, %v2190_v15  ;;  %v911_v22 = vadd.f32 %v909_v18, %v2190_v15  ;;  %v929_v35 = vadd.f32 %v927_v28, %v2190_v15  ;;  %v1780_v8 = vld [vmem:[%s2432_s5 + $0xa] ss:$0 sm:$0xff] }
 0x209   : > { %v2203_v23 = vsel %vm759_vm4, %v1953_v19, 0.0  ;;  %v2206_v24 = vsel %vm759_vm4, 0.0, %v2002_v14  ;;  %vm1767_vm5 = vmpackc.low %vm759_vm4, %vm758_vm3  ;;  %v947_v40 = vadd.f32 %v945_v34, %v2190_v15  ;;  %v965_v45 = vadd.f32 %v963_v39, %v2190_v15 }
 0x20a   : > { %v892_v25 = vmul.f32 %v1770_v9, %v2203_v23  ;;  %v910_v27 = vmul.f32 %v1771_v10, %v2203_v23  ;;  %895 = vmax.xlane.f32.xlu0 %v893_v21  ;;  %913 = vmax.xlane.f32.xlu1 %v911_v22  ;;  %v928_v29 = vmul.f32 %v1772_v20, %v2203_v23  ;;  %vm1063_vm3 = vcmp.eq.s32.totalorder %v2134_v13, 9 }
 0x20b   : > { %v946_v37 = vmul.f32 %v1773_v30, %v2203_v23  ;;  %1860 = vmatmul.mubr.msk.bf16.vlgmr.msra.gmra.mxu1 %vm1767_vm5, %v1768_v33  ;;  %v964_v42 = vmul.f32 %v1774_v38, %v2203_v23  ;;  %v982_v47 = vmul.f32 %v1775_v43, %v2203_v23  ;;  %v983_v51 = vadd.f32 %v981_v44, %v2190_v15 }
 0x20c   : > { %v894_v31 = vadd.f32 %v892_v25, %v2206_v24  ;;  %v912_v32 = vadd.f32 %v910_v27, %v2206_v24  ;;  %v930_v36 = vadd.f32 %v928_v29, %v2206_v24  ;;  %v1000_v54 = vmul.f32 %v1776_v48, %v2203_v23  ;;  %v1105_v25 = vld [vmem:[%s2436_s9] sm:$0xff] }
 0x20d   : > { %v948_v41 = vadd.f32 %v946_v37, %v2206_v24  ;;  %v966_v46 = vadd.f32 %v964_v42, %v2206_v24  ;;  %v984_v52 = vadd.f32 %v982_v47, %v2206_v24  ;;  %v1001_v57 = vadd.f32 %v999_v50, %v2190_v15 }
 0x20e   : > { %897 = vmax.xlane.f32.xlu0 %v894_v31  ;;  %915 = vmax.xlane.f32.xlu1 %v912_v32  ;;  %v1002_v58 = vadd.f32 %v1000_v54, %v2206_v24  ;;  %v1018_v59 = vmul.f32 %v1777_v55, %v2203_v23  ;;  %v1019_v61 = vadd.f32 %v1017_v56, %v2190_v15  ;;  %v768_v47 = vmax.f32 %v2447_v49, 1.0 }
 0x20f   : > { %v1035_v63 = vmul.f32 %v1778_v60, %v2187_v12  ;;  %v1036_v0 = vmul.f32 %v1778_v60, %v2203_v23  ;;  %v1053_v4 = vmul.f32 %v1779_v1, %v2187_v12  ;;  %v1054_v7 = vmul.f32 %v1779_v1, %v2203_v23 }
 0x210   : > { %v1020_v62 = vadd.f32 %v1018_v59, %v2206_v24  ;;  %v1071_v9 = vmul.f32 %v1780_v8, %v2187_v12  ;;  %v1072_v14 = vmul.f32 %v1780_v8, %v2203_v23  ;;  %v1089_v17 = vmul.f32 %v1781_v16, %v2187_v12  ;;  %v1106_v12 = vld [vmem:[%s2436_s9 + $0x8] sm:$0xff] }
 0x211   : > { %v1037_v5 = vadd.f32 %v1035_v63, %v2190_v15  ;;  %v1038_v6 = vadd.f32 %v1036_v0, %v2206_v24  ;;  %v1055_v10 = vadd.f32 %v1053_v4, %v2190_v15  ;;  %v1056_v11 = vadd.f32 %v1054_v7, %v2206_v24  ;;  %1863 = vmatprep.subr.mxu0 %v1106_v12 }
 0x212   : > { %931 = vmax.xlane.f32.xlu0 %v929_v35  ;;  %933 = vmax.xlane.f32.xlu1 %v930_v36  ;;  %v1073_v18 = vadd.f32 %v1071_v9, %v2190_v15  ;;  %v1074_v19 = vadd.f32 %v1072_v14, %v2206_v24  ;;  %v1090_v20 = vmul.f32 %v1781_v16, %v2203_v23  ;;  %v2293_v23 = vld [vmem:[%s2435_s8] sm:$0xff]  ;;  %1954 = vrcp.f32 %v768_v47 }
 0x213   : > { %v1091_v21 = vadd.f32 %v1089_v17, %v2190_v15  ;;  %1864 = vmatpush3.msra.mxu0 %v1106_v12  ;;  %v769_v55 = vmax.f32 %v2448_v53, 1.0  ;;  %vm1081_vm4 = vcmp.eq.s32.totalorder %v2134_v13, 10  ;;  %vm1099_vm5 = vcmp.eq.s32.totalorder %v2134_v13, 11  ;;  %v1270_v47 = vld [vmem:[%s2437_s10] sm:$0xff]  ;;  %v1367_v13 = vld [vmem:[%s2439_s12 + $0x18] sm:$0xff] }
 0x214   : > { %v1092_v22 = vadd.f32 %v1090_v20, %v2206_v24  ;;  %1865 = vmatprep.subr.mxu0 %v1105_v25  ;;  %v1368_v53 = vld [vmem:[%s2440_s13] sm:$0xff] }
 0x215   : > { %1866 = vmatpush3.msra.mxu0 %v1105_v25  ;;  %1956 = vrcp.f32 %v769_v55 }
 0x216   : > { %949 = vmax.xlane.f32.xlu0 %v947_v40  ;;  %951 = vmax.xlane.f32.xlu1 %v948_v41 }
 0x217   : > { %1870 = vmatprep.subr.mxu0 %v2293_v23 }
 0x21a   : > { %967 = vmax.xlane.f32.xlu0 %v965_v45  ;;  %969 = vmax.xlane.f32.xlu1 %v966_v46 }
 0x21e   : > { %985 = vmax.xlane.f32.xlu0 %v983_v51  ;;  %987 = vmax.xlane.f32.xlu1 %v984_v52 }
 0x21f   : > { %v1955_v17 = vpop.eup %1954 }
 0x222   : > { %1003 = vmax.xlane.f32.xlu0 %v1001_v57  ;;  %1005 = vmax.xlane.f32.xlu1 %v1002_v58 }
 0x226   : > { %1021 = vmax.xlane.f32.xlu0 %v1019_v61  ;;  %1023 = vmax.xlane.f32.xlu1 %v1020_v62 }
 0x22a   : > { %1039 = vmax.xlane.f32.xlu0 %v1037_v5  ;;  %1041 = vmax.xlane.f32.xlu1 %v1038_v6 }
 0x22e   : > { %1057 = vmax.xlane.f32.xlu0 %v1055_v10  ;;  %1059 = vmax.xlane.f32.xlu1 %v1056_v11 }
 0x232   : > { %1075 = vmax.xlane.f32.xlu0 %v1073_v18  ;;  %1077 = vmax.xlane.f32.xlu1 %v1074_v19 }
 0x236   : > { %1093 = vmax.xlane.f32.xlu0 %v1091_v21  ;;  %1095 = vmax.xlane.f32.xlu1 %v1092_v22 }
 0x293   : > { %v896_v15 = vpop.xlane.xlu0 %895  ;;  %v914_v24 = vpop.xlane.xlu1 %913 }
 0x294   : > { %v899_v36 = vsel %vm774_vm6, %v896_v15, 0.0  ;;  %v917_v40 = vsel %vm774_vm6, %v914_v24, 0.0 }
 0x295   : > { %v902_v39 = vsel %vm901_vm8, %v899_v36, 0.0 }
 0x296   : > { %v920_v44 = vsel %vm919_vm9, %v917_v40, %v902_v39  ;;  %v1271_v40 = vld [vmem:[%s2437_s10 + $0x8] sm:$0xff] }
 0x297   : > { %v898_v26 = vpop.xlane.xlu0 %897  ;;  %v916_v27 = vpop.xlane.xlu1 %915 }
 0x298   : > { %v900_v38 = vsel %vm775_vm7, %v898_v26, 0.0  ;;  %v918_v43 = vsel %vm775_vm7, %v916_v27, 0.0  ;;  %v1957_v26 = vpop.eup %1956 }
 0x299   : > { %v903_v42 = vsel %vm901_vm8, %v900_v38, 0.0  ;;  %v1102_v38 = vld [vmem:[%s2107_s19] sm:$0xff] }
 0x29a   : > { %v921_v48 = vsel %vm919_vm9, %v918_v43, %v903_v42 }
 0x29b   : > { %v932_v28 = vpop.xlane.xlu0 %931  ;;  %v934_v29 = vpop.xlane.xlu1 %933 }
 0x29c   : > { %v935_v45 = vsel %vm774_vm6, %v932_v28, 0.0  ;;  %v936_v50 = vsel %vm775_vm7, %v934_v29, 0.0 }
 0x29d   : > { %v938_v51 = vsel %vm937_vm10, %v935_v45, %v920_v44  ;;  %v939_v56 = vsel %vm937_vm10, %v936_v50, %v921_v48 }
 0x29f   : > { %v950_v30 = vpop.xlane.xlu0 %949  ;;  %v952_v31 = vpop.xlane.xlu1 %951 }
 0x2a0   : > { %v953_v52 = vsel %vm774_vm6, %v950_v30, 0.0  ;;  %v954_v57 = vsel %vm775_vm7, %v952_v31, 0.0 }
 0x2a1   : > { %v956_v58 = vsel %vm955_vm11, %v953_v52, %v938_v51  ;;  %v957_v61 = vsel %vm955_vm11, %v954_v57, %v939_v56  ;;  %v1366_v51 = vld [vmem:[%s2439_s12 + $0x10] sm:$0xff] }
 0x2a3   : > { %v968_v32 = vpop.xlane.xlu0 %967  ;;  %v970_v33 = vpop.xlane.xlu1 %969 }
 0x2a4   : > { %v971_v59 = vsel %vm774_vm6, %v968_v32, 0.0  ;;  %v972_v62 = vsel %vm775_vm7, %v970_v33, 0.0 }
 0x2a5   : > { %v974_v63 = vsel %vm973_vm12, %v971_v59, %v956_v58  ;;  %v975_v4 = vsel %vm973_vm12, %v972_v62, %v957_v61  ;;  %v1788_v62 = vld [vmem:[%s2438_s11] ss:$0 sm:$0xff] }
 0x2a7   : > { %v986_v34 = vpop.xlane.xlu0 %985  ;;  %v988_v35 = vpop.xlane.xlu1 %987 }
 0x2a8   : > { %v989_v0 = vsel %vm774_vm6, %v986_v34, 0.0  ;;  %v990_v5 = vsel %vm775_vm7, %v988_v35, 0.0 }
 0x2a9   : > { %v992_v6 = vsel %vm991_vm13, %v989_v0, %v974_v63  ;;  %v993_v9 = vsel %vm991_vm13, %v990_v5, %v975_v4  ;;  %v1547_v4 = vld [vmem:[%s2442_s15] sm:$0xff] }
 0x2ab   : > { %v1004_v37 = vpop.xlane.xlu0 %1003  ;;  %v1006_v41 = vpop.xlane.xlu1 %1005 }
 0x2ac   : > { %v1007_v7 = vsel %vm774_vm6, %v1004_v37, 0.0  ;;  %v1008_v10 = vsel %vm775_vm7, %v1006_v41, 0.0 }
 0x2ad   : > { %v1010_v11 = vsel %vm1009_vm14, %v1007_v7, %v992_v6  ;;  %v1011_v18 = vsel %vm1009_vm14, %v1008_v10, %v993_v9 }
 0x2af   : > { %v1022_v46 = vpop.xlane.xlu0 %1021  ;;  %v1024_v54 = vpop.xlane.xlu1 %1023 }
 0x2b0   : > { %v1025_v14 = vsel %vm774_vm6, %v1022_v46, 0.0  ;;  %v1026_v19 = vsel %vm775_vm7, %v1024_v54, 0.0  ;;  %v1103_v46 = vld [vmem:[%s2107_s19 + $0x8] sm:$0xff] }
 0x2b1   : > { %v1028_v20 = vsel %vm1027_vm15, %v1025_v14, %v1010_v11  ;;  %v1029_v25 = vsel %vm1027_vm15, %v1026_v19, %v1011_v18 }
 0x2b3   : > { %v1040_v60 = vpop.xlane.xlu0 %1039  ;;  %v1042_v1 = vpop.xlane.xlu1 %1041 }
 0x2b4   : > { %v1043_v21 = vsel %vm774_vm6, %v1040_v60, 0.0  ;;  %v1044_v15 = vsel %vm775_vm7, %v1042_v1, 0.0 }
 0x2b5   : > { %v1046_v27 = vsel %vm1045_vm1, %v1043_v21, %v1028_v20  ;;  %v1047_v31 = vsel %vm1045_vm1, %v1044_v15, %v1029_v25 }
 0x2b7   : > { %v1058_v8 = vpop.xlane.xlu0 %1057  ;;  %v1060_v16 = vpop.xlane.xlu1 %1059 }
 0x2b8   : > { %v1061_v28 = vsel %vm774_vm6, %v1058_v8, 0.0  ;;  %v1062_v34 = vsel %vm775_vm7, %v1060_v16, 0.0  ;;  %v1793_v8 = vld [vmem:[%s2441_s14] ss:$0 sm:$0xff] }
 0x2b9   : > { %v1064_v33 = vsel %vm1063_vm3, %v1061_v28, %v1046_v27  ;;  %v1065_v41 = vsel %vm1063_vm3, %v1062_v34, %v1047_v31 }
 0x2bb   : > { %v1076_v22 = vpop.xlane.xlu0 %1075  ;;  %v1078_v29 = vpop.xlane.xlu1 %1077 }
 0x2bc   : > { %v1079_v35 = vsel %vm774_vm6, %v1076_v22, 0.0  ;;  %v1080_v43 = vsel %vm775_vm7, %v1078_v29, 0.0 }
 0x2bd   : > { %v1082_v42 = vsel %vm1081_vm4, %v1079_v35, %v1064_v33  ;;  %v1083_v48 = vsel %vm1081_vm4, %v1080_v43, %v1065_v41 }
 0x2bf   : > { %v1094_v36 = vpop.xlane.xlu0 %1093  ;;  %v1096_v45 = vpop.xlane.xlu1 %1095 }
 0x2c0   : > { %v1097_v44 = vsel %vm774_vm6, %v1094_v36, 0.0  ;;  %v1098_v49 = vsel %vm775_vm7, %v1096_v45, 0.0  ;;  %vm1444_vm6 = vcmask 261120  }
 0x2c1   : > { %v1100_v50 = vsel %vm1099_vm5, %v1097_v44, %v1082_v42 }
 0x2cb   : > { %v875_v12 = vpop.f32.mrf.mxu1 }
 0x2cc   : > { %v882_v24 = vmul.f32 %v1955_v17, %v875_v12 }
 0x2cd   : > { %v1861_v30 = vpop.f32.mrf.mxu1 }
 0x2ce   : > { %1867 = vmatprep.mubr.msk.f32.mxu0 %vm1107_vm2, %v882_v24 }
 0x2cf   : > { %v878_v32 = vpop.f32.mrf.mxu1 }
 0x2d0   : > { %v883_v37 = vmul.f32 %v1957_v26, %v878_v32  ;;  %v1796_v26 = vld [vmem:[%s2443_s16] ss:$0 sm:$0xff] }
 0x2d1   : > { %v1862_v39 = vpop.f32.mrf.mxu1 }
 0x2d2   : > { %1868 = vmatmul.mubr.msk.f32.vlgmr.msra.gmra.mxu0 %vm1107_vm2, %v883_v37 }
 0x2d3   : > { %1871 = vmatpush3.msra.mxu0 %v2293_v23  ;;  %1872 = vmatprep.mubr.msk.f32.mxu0 %vm580_vm0, %v1102_v38  ;;  %v1101_v23 = vsel %vm1099_vm5, %v1098_v49, %v1083_v48 }
 0x2d4   : > { %1875 = vmatprep.subr.mxu0 %v1271_v40 }
 0x2d6   : > { %1873 = vmatmul.mubr.msk.f32.vlgmr.msra.gmra.mxu0 %vm580_vm0, %v1103_v46 }
 0x2d7   : > { %1876 = vmatpush3.msra.mxu0 %v1271_v40  ;;  %1879 = vmatprep.mubr.msk.f32.mxu0 %vm1107_vm2, %v1100_v50 }
 0x2d8   : > { %1877 = vmatprep.subr.mxu0 %v1270_v47 }
 0x2d9   : > { %1878 = vmatpush3.msra.mxu0 %v1270_v47 }
 0x2da   : > { %1880 = vmatmul.mubr.msk.f32.vlgmr.msra.gmra.mxu0 %vm1107_vm2, %v1101_v23  ;;  %1882 = vmatprep.subr.mxu0 %v1368_v53 }
 0x2db   : > { %1884 = vmatprep.mubr.msk.f32.mxu0 %vm580_vm0, %v2117_v2  ;;  %1883 = vmatpush3.msra.mxu0 %v1368_v53  ;;  %v1365_v2 = vld [vmem:[%s2439_s12 + $0x8] sm:$0xff] }
 0x2dc   : > { %1887 = vmatprep.subr.mxu0 %v1367_v13 }
 0x2de   : > { %1885 = vmatmul.mubr.msk.f32.vlgmr.msra.gmra.mxu0 %vm580_vm0, %v2119_v3  ;;  %v1364_v3 = vld [vmem:[%s2439_s12] sm:$0xff] }
 0x2df   : > { %1888 = vmatpush3.msra.mxu0 %v1367_v13 }
 0x2e0   : > { %1889 = vmatprep.subr.mxu0 %v1366_v51 }
 0x2e1   : > { %1890 = vmatpush3.msra.mxu0 %v1366_v51 }
 0x2e2   : > { %1891 = vmatprep.subr.mxu0 %v1365_v2 }
 0x2e3   : > { %1892 = vmatpush3.msra.mxu0 %v1365_v2 }
 0x2e4   : > { %1893 = vmatprep.subr.mxu0 %v1364_v3 }
 0x2e5   : > { %1894 = vmatpush3.msra.mxu0 %v1364_v3 }
 0x2e6   : > { %1898 = vmatprep.subr.mxu0 %v1547_v4 }
 0x392   : > { %v1869_v52 = vpop.f32.mrf.mxu0 }
 0x394   : > { %v1180_v54 = vpop.f32.mrf.mxu0 }
 0x396   : > { %v1874_v55 = vpop.f32.mrf.mxu0 }
 0x397   : > { %v1267_v57 = vadd.f32 %v1874_v55, %v1869_v52 }
 0x398   : > { %v1261_v56 = vpop.f32.mrf.mxu0 }
 0x399   : > { %v1262_v59 = vadd.f32 %v1261_v56, %v1180_v54 }
 0x39a   : > { %v1881_v58 = vpop.f32.mrf.mxu0 }
 0x39b   : > { %v1354_v60 = vadd.f32 %v1881_v58, %v1267_v57 }
 0x39c   : > { %v1344_v61 = vpop.f32.mrf.mxu0 }
 0x39d   : > { %v1353_v63 = vadd.f32 %v1344_v61, %v1262_v59  ;;  %v1363_v1 = vadd.f32 %v1788_v62, %v1354_v60 }
 0x39e   : > { %v1886_v5 = vpop.f32.mrf.mxu0 }
 0x39f   : > { %v1362_v0 = vadd.f32 %v1788_v62, %v1353_v63 }
 0x3a0   : > { %v1435_v6 = vpop.f32.mrf.mxu0 }
 0x3a1   : > { %1895 = vmatprep.mubr.msk.f32.mxu0 %vm1444_vm6, %v1362_v0 }
 0x3a2   : > { %1896 = vmatmul.mubr.msk.f32.vlgmr.msra.gmra.mxu0 %vm1444_vm6, %v1363_v1 }
 0x3a3   : > { %1899 = vmatpush3.msra.mxu0 %v1547_v4 }
 0x462   : > { %v1897_v7 = vpop.f32.mrf.mxu0 }
 0x463   : > { %v1523_v9 = vadd.f32 %v1897_v7, %v1886_v5 }
 0x464   : > { %v1517_v10 = vpop.f32.mrf.mxu0 }
 0x465   : > { %v1534_v11 = vadd.f32 %v1793_v8, %v1523_v9  ;;  %v1518_v14 = vadd.f32 %v1517_v10, %v1435_v6 }
 0x467   : > { %v1538_v16 = vmin.f32 %v1534_v11, 0.0  ;;  %v1533_v17 = vadd.f32 %v1793_v8, %v1518_v14  ;;  %vm1536_vm8 = vcmp.gt.f32.partialorder %v1534_v11, 0.0 }
 0x469   : > { %v1541_v18 = vmul.f32 1.442695, %v1538_v16  ;;  %v1537_v19 = vmin.f32 %v1533_v17, 0.0  ;;  %vm1535_vm7 = vcmp.gt.f32.partialorder %v1533_v17, 0.0 }
 0x46b   : > { %1958 = vpow2.f32 %v1541_v18  ;;  %v1539_v20 = vmul.f32 1.442695, %v1537_v19 }
 0x46d   : > { %1960 = vpow2.f32 %v1539_v20 }
 0x478   : > { %v1959_v21 = vpop.eup %1958 }
 0x479   : > { %v1795_v12 = vadd.f32 -1.0, %v1959_v21 }
 0x47a   : > { %v1961_v22 = vpop.eup %1960 }
 0x47b   : > { %v1794_v25 = vadd.f32 -1.0, %v1961_v22  ;;  %v1546_v24 = vsel %vm1536_vm8, %v1534_v11, %v1795_v12 }
 0x47d   : > { %v1545_v15 = vsel %vm1535_vm7, %v1533_v17, %v1794_v25 }
 0x47e   : > { %1900 = vmatprep.mubr.msk.f32.mxu0 %vm580_vm0, %v1545_v15 }
 0x47f   : > { %1901 = vmatmul.mubr.msk.f32.vlgmr.msra.gmra.mxu0 %vm580_vm0, %v1546_v24 }
 0x53f   : > { %v1902_v27 = vpop.f32.mrf.mxu0 }
 0x540   : > { %v1633_v28 = vadd.f32 %v1902_v27, %v1796_v26 }
 0x541   : > { %v1627_v29 = vpop.f32.mrf.mxu0 }
 0x542   : > { %v1639_v30 = vmin.f32 %v1633_v28, 0.0  ;;  %v1628_v31 = vadd.f32 %v1796_v26, %v1627_v29  ;;  %vm1637_vm10 = vcmp.gt.f32.partialorder %v1633_v28, 0.0 }
 0x544   : > { %v1642_v32 = vmul.f32 1.442695, %v1639_v30  ;;  %v1638_v33 = vmin.f32 %v1628_v31, 0.0  ;;  %vm1636_vm9 = vcmp.gt.f32.partialorder %v1628_v31, 0.0 }
 0x546   : > { %1962 = vpow2.f32 %v1642_v32  ;;  %v1640_v34 = vmul.f32 1.442695, %v1638_v33 }
 0x548   : > { %1964 = vpow2.f32 %v1640_v34 }
 0x553   : > { %v1963_v35 = vpop.eup %1962 }
 0x554   : > { %v1800_v37 = vadd.f32 -1.0, %v1963_v35 }
 0x555   : > { %v1965_v36 = vpop.eup %1964 }
 0x556   : > { %v1799_v38 = vadd.f32 -1.0, %v1965_v36  ;;  %v1647_v40 = vsel %vm1637_vm10, %v1633_v28, %v1800_v37 }
 0x557   : > { %1649 = vst.msk [vmem:[%s2115_s25 + $0x8] sm:$0xff] %vm580_vm0, %v1647_v40 }
 0x558   : > { %v1646_v39 = vsel %vm1636_vm9, %v1628_v31, %v1799_v38 }
 0x559   : > { %1648 = vst.msk [vmem:[%s2115_s25] sm:$0xff] %vm580_vm0, %v1646_v39 }
 0x55a PF: > { %s28_s24 = sadd.s32 1, %s1984_s24  }
 0x55b   : > { %p25_p5 = scmp.ge.s32.totalorder %s28_s24, 4  }
 0x55d   :  { %27 = sbr.rel (!%p25_p5) target bundleno = 2 (0x2), region = 138 }

</bundles_post_ra>
